<compile_context>
chip_gen: v6e
topology: v6e:2x2x1
jax: 0.10.0
libtpu: 0.0.40
codegen_flags: <defaults>
</compile_context>

<pallas_src>
import functools

import jax
import jax.numpy as jnp
from jax.experimental import pallas as pl
from jax.experimental.pallas import tpu as pltpu

LANE = 128
CHUNK = 512            # rows consumed per inner unrolled step (multiple of 32)
ACC_ROWS = 32          # accumulator rows: 4 x (8,128) vregs -> 4-way VALU ILP
TILE_BYTES = 4 << 20   # target HBM bytes per input tile per grid step (~4 MiB)
SMALL_N = 1 << 17      # below this, a fused XLA reduction beats the kernel launch


def _round_up(x: int, m: int) -> int:
    return ((x + m - 1) // m) * m


def _num_tensorcores() -> int:
    """2 on dual-TensorCore generations (v7x); 1 on single-TC v5e/v6e."""
    try:
        kind = jax.devices()[0].device_kind.lower()
    except Exception:
        return 1
    return 2 if "v7" in kind else 1


def _dice_kernel(x_ref, t_ref, o_ref, *, rows, blk_r, ragged):
    """Accumulate per-split partial sums of x*t and x+t into the resident output block.

    o_ref block: (1, 2, ACC_ROWS, LANE) f32.
      o_ref[0, 0] += fold of x*t   (intersection partials, 4 vregs)
      o_ref[0, 1] += fold of x+t   (total partials, 4 vregs)
    """
    j = pl.program_id(1)

    @pl.when(j == 0)
    def _():
        o_ref[...] = jnp.zeros_like(o_ref)

    def consume(masked, valid):
        # Unrolled chunk loop: per-chunk loads straight from the VMEM tile ref, folded
        # immediately into 4-vreg accumulators -> no full-tile f32 temporaries.
        acc_i = jnp.zeros((ACC_ROWS, LANE), jnp.float32)
        acc_t = jnp.zeros((ACC_ROWS, LANE), jnp.float32)
        for c in range(blk_r // CHUNK):
            base = c * CHUNK
            xc = x_ref[pl.ds(base, CHUNK), :].astype(jnp.float32)
            tc = t_ref[pl.ds(base, CHUNK), :].astype(jnp.float32)
            if masked:
                rid = base + jax.lax.broadcasted_iota(jnp.int32, (CHUNK, LANE), 0)
                keep = rid < valid
                xc = jnp.where(keep, xc, 0.0)
                tc = jnp.where(keep, tc, 0.0)
            acc_i = acc_i + (xc * tc).reshape(CHUNK // ACC_ROWS, ACC_ROWS, LANE).sum(axis=0)
            acc_t = acc_t + (xc + tc).reshape(CHUNK // ACC_ROWS, ACC_ROWS, LANE).sum(axis=0)
        o_ref[0, 0] += acc_i
        o_ref[0, 1] += acc_t

    if ragged:
        # Only partial / phantom blocks pay the masking cost; full blocks stay fast.
        blk = pl.program_id(0) * pl.num_programs(1) + j
        valid = rows - blk * blk_r

        @pl.when(valid >= blk_r)
        def _():
            consume(False, valid)

        @pl.when(valid < blk_r)
        def _():
            consume(True, valid)
    else:
        consume(False, rows)


def _partial_sums(x2, t2, rows: int, *, blk_r=None, n_splits=None):
    """Run the Pallas reduction over (rows, 128)-viewed data; return (inter, total)."""
    if blk_r is None:
        # Dtype-aware tile size targeting ~TILE_BYTES of HBM per input per step.
        itemsize = max(jnp.dtype(x2.dtype).itemsize, jnp.dtype(t2.dtype).itemsize)
        cap = max(CHUNK, (TILE_BYTES // (LANE * itemsize)) // CHUNK * CHUNK)
        blk_r = min(cap, _round_up(rows, CHUNK))
    assert blk_r % CHUNK == 0

    num_blocks = pl.cdiv(rows, blk_r)
    if n_splits is None:
        # 2-way split only where it maps onto two TensorCores (v7x); 1 elsewhere.
        n_splits = 2 if (_num_tensorcores() >= 2 and num_blocks >= 2) else 1
    n_splits = max(1, min(n_splits, num_blocks))
    bps = pl.cdiv(num_blocks, n_splits)            # blocks per split
    ragged = (n_splits * bps * blk_r != rows)
    phantom = (n_splits * bps != num_blocks)

    if phantom:
        # Clamp phantom blocks onto the last real block; their (re-read) contents are
        # masked to zero in the kernel since `valid <= 0` for them.
        def row_map(s, j):
            return (jnp.minimum(s * bps + j, num_blocks - 1), 0)
    else:
        def row_map(s, j):
            return (s * bps + j, 0)

    kernel = functools.partial(_dice_kernel, rows=rows, blk_r=blk_r, ragged=ragged)
    partials = pl.pallas_call(
        kernel,
        out_shape=jax.ShapeDtypeStruct((n_splits, 2, ACC_ROWS, LANE), jnp.float32),
        grid_spec=pltpu.PrefetchScalarGridSpec(
            num_scalar_prefetch=0,
            grid=(n_splits, bps),
            in_specs=[
                pl.BlockSpec((blk_r, LANE), row_map),
                pl.BlockSpec((blk_r, LANE), row_map),
            ],
            out_specs=pl.BlockSpec((1, 2, ACC_ROWS, LANE), lambda s, j: (s, 0, 0, 0)),
        ),
        compiler_params=pltpu.CompilerParams(
            dimension_semantics=("parallel", "arbitrary"),
            # 2 inputs x 2 buffers x ~4 MiB = 16 MiB of input buffering: raise v5e's
            # 16 MiB default; 48 MiB stays within v7x's 64 MiB physical VMEM.
            vmem_limit_bytes=48 << 20,
        ),
    )(x2, t2)

    # Tiny final cross-lane reduction of the (n_splits, 2, 32, 128) partials.
    inter = jnp.sum(partials[:, 0])
    total = jnp.sum(partials[:, 1])
    return inter, total


def dice_loss(inputs, targets, smooth: float = 1e-6, reduction: str = "mean"):
    """JAX/Pallas equivalent of DiceLoss.forward (global-sum dice over all elements)."""
    if reduction not in ("none", "mean", "sum"):
        raise ValueError(f"Invalid reduction: {reduction}. Must be 'none', 'mean', or 'sum'.")

    x = inputs.reshape(-1)   # native dtype: no astype / pad copies of the full tensor
    t = targets.reshape(-1)
    n = x.shape[0]

    if n < SMALL_N:
        # Tiny tensors: pallas_call launch + follow-up reductions would dominate;
        # a single fused XLA reduction is strictly faster on all generations.
        xf = x.astype(jnp.float32)
        tf = t.astype(jnp.float32)
        inter = jnp.sum(xf * tf)
        total = jnp.sum(xf) + jnp.sum(tf)
    else:
        rows = n // LANE
        bulk = rows * LANE
        if bulk != n:
            # Rare for segmentation shapes; the bulk slice below costs a copy here.
            # TODO(synk): fold the sub-128 lane tail into the kernel via SMEM-passed n
            # to consume the original buffers when n % 128 != 0.
            xt = x[bulk:].astype(jnp.float32)
            tt = t[bulk:].astype(jnp.float32)
            tail_inter = jnp.sum(xt * tt)
            tail_total = jnp.sum(xt) + jnp.sum(tt)
        else:
            tail_inter = jnp.float32(0.0)
            tail_total = jnp.float32(0.0)
        # When bulk == n (the common case) this slice+reshape is a free bitcast.
        x2 = x[:bulk].reshape(rows, LANE)
        t2 = t[:bulk].reshape(rows, LANE)
        inter, total = _partial_sums(x2, t2, rows)
        inter = inter + tail_inter
        total = total + tail_total

    loss = 1.0 - (2.0 * inter + smooth) / (total + smooth)
    # The module's dice loss is a 0-d scalar, so 'none'/'mean'/'sum' are identical.
    return loss


def _dice_loss_ref(inputs, targets, smooth=1e-6):
    x = inputs.astype(jnp.float32)
    t = targets.astype(jnp.float32)
    intersection = jnp.sum(x * t)
    total = jnp.sum(x) + jnp.sum(t)
    return 1.0 - (2.0 * intersection + smooth) / (total + smooth)


def _check(shape, key, in_dtype=jnp.float32):
    k1, k2 = jax.random.split(key)
    inputs = jax.random.uniform(k1, shape, dtype=jnp.float32).astype(in_dtype)
    targets = (jax.random.uniform(k2, shape) > 0.5).astype(jnp.float32)
    loss = jax.block_until_ready(dice_loss(inputs, targets, smooth=1e-6, reduction="mean"))
    ref = _dice_loss_ref(inputs, targets, smooth=1e-6)
    assert jnp.allclose(loss, ref, rtol=2e-5, atol=1e-6), (shape, loss, ref)
    return loss


if __name__ == "__main__":
    key = jax.random.PRNGKey(0)
    k_main, k_b, k_c, k_d, k_p = jax.random.split(key, 5)

    # Primary (small) case from the module: routed through the fused-XLA fast path.
    _check((2, 4, 16, 16), k_main)
    # Pallas path: single full block, clean unmasked fast path.
    _check((2, 1, 512, 512), k_b)
    # Pallas path: multi-block with a partial last block (pl.when-gated masking).
    _check((1, 1, 8200, 128), k_c)
    # Pallas path: bf16 inputs (dtype-aware tile sizing + in-kernel f32 cast).
    _check((1, 1, 2048, 512), k_d, in_dtype=jnp.bfloat16)

    # Direct test of the 2-way split with a phantom block (clamp + mask), regardless
    # of which TPU generation the sandbox runs on.
    k3, k4 = jax.random.split(k_p)
    rows = 1500
    x2 = jax.random.uniform(k3, (rows, LANE), dtype=jnp.float32)
    t2 = (jax.random.uniform(k4, (rows, LANE)) > 0.5).astype(jnp.float32)
    inter, total = jax.block_until_ready(_partial_sums(x2, t2, rows, blk_r=512, n_splits=2))
    ref_i = jnp.sum(x2 * t2)
    ref_t = jnp.sum(x2) + jnp.sum(t2)
    assert jnp.allclose(inter, ref_i, rtol=2e-5, atol=1e-3), (inter, ref_i)
    assert jnp.allclose(total, ref_t, rtol=2e-5, atol=1e-3), (total, ref_t)

    print("KERNEL_OK")
</pallas_src>

<mosaic_0001>
module attributes {stable_mosaic.version = 11 : i64} {
  func.func @_dice_kernel(%arg0: i32, %arg1: i32, %arg2: memref<4096x128xf32, #tpu.memory_space<vmem>>, %arg3: memref<4096x128xf32, #tpu.memory_space<vmem>>, %arg4: memref<1x2x32x128xf32, #tpu.memory_space<vmem>>) attributes {dimension_semantics = [#tpu.dimension_semantics<parallel>, #tpu.dimension_semantics<arbitrary>], iteration_bounds = array<i64: 1, 1>, scalar_prefetch = 0 : i64, scratch_operands = 0 : i64, tpu.core_type = #tpu.core_type<tc>, window_params = [{transform_indices = @transform_0, window_bounds = array<i64: 4096, 128>}, {transform_indices = @transform_1, window_bounds = array<i64: 4096, 128>}, {transform_indices = @transform_2, window_bounds = array<i64: 1, 2, 32, 128>}]} {
    %c0_i32 = arith.constant 0 : i32
    %0 = arith.cmpi eq, %arg1, %c0_i32 : i32
    %1 = arith.extui %0 : i1 to i32
    %c0_i32_0 = arith.constant 0 : i32
    %2 = arith.cmpi ne, %1, %c0_i32_0 : i32
    scf.if %2 {
      %cst_57 = arith.constant 0.000000e+00 : f32
      %97 = vector.broadcast %cst_57 : f32 to vector<1x2x32x128xf32>
      %c0_58 = arith.constant 0 : index
      %c0_59 = arith.constant 0 : index
      %c0_60 = arith.constant 0 : index
      %c0_61 = arith.constant 0 : index
      %98 = vector.load %arg4[%c0_58, %c0_59, %c0_60, %c0_61] : memref<1x2x32x128xf32, #tpu.memory_space<vmem>>, vector<1x2x32x128xf32>
      tpu.vector_store %arg4[%c0_58, %c0_59, %c0_60, %c0_61], %97 {strides = array<i32>} : memref<1x2x32x128xf32, #tpu.memory_space<vmem>>, vector<1x2x32x128xf32>,
    } else {
    }
    %cst = arith.constant 0.000000e+00 : f32
    %3 = vector.broadcast %cst : f32 to vector<32x128xf32>
    %cst_1 = arith.constant 0.000000e+00 : f32
    %4 = vector.broadcast %cst_1 : f32 to vector<32x128xf32>
    %c0 = arith.constant 0 : index
    %c0_2 = arith.constant 0 : index
    %5 = vector.load %arg2[%c0, %c0_2] : memref<4096x128xf32, #tpu.memory_space<vmem>>, vector<512x128xf32>
    %c0_3 = arith.constant 0 : index
    %c0_4 = arith.constant 0 : index
    %6 = vector.load %arg3[%c0_3, %c0_4] : memref<4096x128xf32, #tpu.memory_space<vmem>>, vector<512x128xf32>
    %7 = arith.mulf %5, %6 : vector<512x128xf32>
    %8 = vector.shape_cast %7 : vector<512x128xf32> to vector<16x32x128xf32>
    %cst_5 = arith.constant dense<0.000000e+00> : vector<32x128xf32>
    %9 = vector.multi_reduction <add>, %8, %cst_5 [0] : vector<16x32x128xf32> to vector<32x128xf32>
    %10 = arith.addf %3, %9 : vector<32x128xf32>
    %11 = arith.addf %5, %6 : vector<512x128xf32>
    %12 = vector.shape_cast %11 : vector<512x128xf32> to vector<16x32x128xf32>
    %cst_6 = arith.constant dense<0.000000e+00> : vector<32x128xf32>
    %13 = vector.multi_reduction <add>, %12, %cst_6 [0] : vector<16x32x128xf32> to vector<32x128xf32>
    %14 = arith.addf %4, %13 : vector<32x128xf32>
    %c512 = arith.constant 512 : index
    %c0_7 = arith.constant 0 : index
    %15 = vector.load %arg2[%c512, %c0_7] : memref<4096x128xf32, #tpu.memory_space<vmem>>, vector<512x128xf32>
    %c512_8 = arith.constant 512 : index
    %c0_9 = arith.constant 0 : index
    %16 = vector.load %arg3[%c512_8, %c0_9] : memref<4096x128xf32, #tpu.memory_space<vmem>>, vector<512x128xf32>
    %17 = arith.mulf %15, %16 : vector<512x128xf32>
    %18 = vector.shape_cast %17 : vector<512x128xf32> to vector<16x32x128xf32>
    %cst_10 = arith.constant dense<0.000000e+00> : vector<32x128xf32>
    %19 = vector.multi_reduction <add>, %18, %cst_10 [0] : vector<16x32x128xf32> to vector<32x128xf32>
    %20 = arith.addf %10, %19 : vector<32x128xf32>
    %21 = arith.addf %15, %16 : vector<512x128xf32>
    %22 = vector.shape_cast %21 : vector<512x128xf32> to vector<16x32x128xf32>
    %cst_11 = arith.constant dense<0.000000e+00> : vector<32x128xf32>
    %23 = vector.multi_reduction <add>, %22, %cst_11 [0] : vector<16x32x128xf32> to vector<32x128xf32>
    %24 = arith.addf %14, %23 : vector<32x128xf32>
    %c1024 = arith.constant 1024 : index
    %c0_12 = arith.constant 0 : index
    %25 = vector.load %arg2[%c1024, %c0_12] : memref<4096x128xf32, #tpu.memory_space<vmem>>, vector<512x128xf32>
    %c1024_13 = arith.constant 1024 : index
    %c0_14 = arith.constant 0 : index
    %26 = vector.load %arg3[%c1024_13, %c0_14] : memref<4096x128xf32, #tpu.memory_space<vmem>>, vector<512x128xf32>
    %27 = arith.mulf %25, %26 : vector<512x128xf32>
    %28 = vector.shape_cast %27 : vector<512x128xf32> to vector<16x32x128xf32>
    %cst_15 = arith.constant dense<0.000000e+00> : vector<32x128xf32>
    %29 = vector.multi_reduction <add>, %28, %cst_15 [0] : vector<16x32x128xf32> to vector<32x128xf32>
    %30 = arith.addf %20, %29 : vector<32x128xf32>
    %31 = arith.addf %25, %26 : vector<512x128xf32>
    %32 = vector.shape_cast %31 : vector<512x128xf32> to vector<16x32x128xf32>
    %cst_16 = arith.constant dense<0.000000e+00> : vector<32x128xf32>
    %33 = vector.multi_reduction <add>, %32, %cst_16 [0] : vector<16x32x128xf32> to vector<32x128xf32>
    %34 = arith.addf %24, %33 : vector<32x128xf32>
    %c1536 = arith.constant 1536 : index
    %c0_17 = arith.constant 0 : index
    %35 = vector.load %arg2[%c1536, %c0_17] : memref<4096x128xf32, #tpu.memory_space<vmem>>, vector<512x128xf32>
    %c1536_18 = arith.constant 1536 : index
    %c0_19 = arith.constant 0 : index
    %36 = vector.load %arg3[%c1536_18, %c0_19] : memref<4096x128xf32, #tpu.memory_space<vmem>>, vector<512x128xf32>
    %37 = arith.mulf %35, %36 : vector<512x128xf32>
    %38 = vector.shape_cast %37 : vector<512x128xf32> to vector<16x32x128xf32>
    %cst_20 = arith.constant dense<0.000000e+00> : vector<32x128xf32>
    %39 = vector.multi_reduction <add>, %38, %cst_20 [0] : vector<16x32x128xf32> to vector<32x128xf32>
    %40 = arith.addf %30, %39 : vector<32x128xf32>
    %41 = arith.addf %35, %36 : vector<512x128xf32>
    %42 = vector.shape_cast %41 : vector<512x128xf32> to vector<16x32x128xf32>
    %cst_21 = arith.constant dense<0.000000e+00> : vector<32x128xf32>
    %43 = vector.multi_reduction <add>, %42, %cst_21 [0] : vector<16x32x128xf32> to vector<32x128xf32>
    %44 = arith.addf %34, %43 : vector<32x128xf32>
    %c2048 = arith.constant 2048 : index
    %c0_22 = arith.constant 0 : index
    %45 = vector.load %arg2[%c2048, %c0_22] : memref<4096x128xf32, #tpu.memory_space<vmem>>, vector<512x128xf32>
    %c2048_23 = arith.constant 2048 : index
    %c0_24 = arith.constant 0 : index
    %46 = vector.load %arg3[%c2048_23, %c0_24] : memref<4096x128xf32, #tpu.memory_space<vmem>>, vector<512x128xf32>
    %47 = arith.mulf %45, %46 : vector<512x128xf32>
    %48 = vector.shape_cast %47 : vector<512x128xf32> to vector<16x32x128xf32>
    %cst_25 = arith.constant dense<0.000000e+00> : vector<32x128xf32>
    %49 = vector.multi_reduction <add>, %48, %cst_25 [0] : vector<16x32x128xf32> to vector<32x128xf32>
    %50 = arith.addf %40, %49 : vector<32x128xf32>
    %51 = arith.addf %45, %46 : vector<512x128xf32>
    %52 = vector.shape_cast %51 : vector<512x128xf32> to vector<16x32x128xf32>
    %cst_26 = arith.constant dense<0.000000e+00> : vector<32x128xf32>
    %53 = vector.multi_reduction <add>, %52, %cst_26 [0] : vector<16x32x128xf32> to vector<32x128xf32>
    %54 = arith.addf %44, %53 : vector<32x128xf32>
    %c2560 = arith.constant 2560 : index
    %c0_27 = arith.constant 0 : index
    %55 = vector.load %arg2[%c2560, %c0_27] : memref<4096x128xf32, #tpu.memory_space<vmem>>, vector<512x128xf32>
    %c2560_28 = arith.constant 2560 : index
    %c0_29 = arith.constant 0 : index
    %56 = vector.load %arg3[%c2560_28, %c0_29] : memref<4096x128xf32, #tpu.memory_space<vmem>>, vector<512x128xf32>
    %57 = arith.mulf %55, %56 : vector<512x128xf32>
    %58 = vector.shape_cast %57 : vector<512x128xf32> to vector<16x32x128xf32>
    %cst_30 = arith.constant dense<0.000000e+00> : vector<32x128xf32>
    %59 = vector.multi_reduction <add>, %58, %cst_30 [0] : vector<16x32x128xf32> to vector<32x128xf32>
    %60 = arith.addf %50, %59 : vector<32x128xf32>
    %61 = arith.addf %55, %56 : vector<512x128xf32>
    %62 = vector.shape_cast %61 : vector<512x128xf32> to vector<16x32x128xf32>
    %cst_31 = arith.constant dense<0.000000e+00> : vector<32x128xf32>
    %63 = vector.multi_reduction <add>, %62, %cst_31 [0] : vector<16x32x128xf32> to vector<32x128xf32>
    %64 = arith.addf %54, %63 : vector<32x128xf32>
    %c3072 = arith.constant 3072 : index
    %c0_32 = arith.constant 0 : index
    %65 = vector.load %arg2[%c3072, %c0_32] : memref<4096x128xf32, #tpu.memory_space<vmem>>, vector<512x128xf32>
    %c3072_33 = arith.constant 3072 : index
    %c0_34 = arith.constant 0 : index
    %66 = vector.load %arg3[%c3072_33, %c0_34] : memref<4096x128xf32, #tpu.memory_space<vmem>>, vector<512x128xf32>
    %67 = arith.mulf %65, %66 : vector<512x128xf32>
    %68 = vector.shape_cast %67 : vector<512x128xf32> to vector<16x32x128xf32>
    %cst_35 = arith.constant dense<0.000000e+00> : vector<32x128xf32>
    %69 = vector.multi_reduction <add>, %68, %cst_35 [0] : vector<16x32x128xf32> to vector<32x128xf32>
    %70 = arith.addf %60, %69 : vector<32x128xf32>
    %71 = arith.addf %65, %66 : vector<512x128xf32>
    %72 = vector.shape_cast %71 : vector<512x128xf32> to vector<16x32x128xf32>
    %cst_36 = arith.constant dense<0.000000e+00> : vector<32x128xf32>
    %73 = vector.multi_reduction <add>, %72, %cst_36 [0] : vector<16x32x128xf32> to vector<32x128xf32>
    %74 = arith.addf %64, %73 : vector<32x128xf32>
    %c3584 = arith.constant 3584 : index
    %c0_37 = arith.constant 0 : index
    %75 = vector.load %arg2[%c3584, %c0_37] : memref<4096x128xf32, #tpu.memory_space<vmem>>, vector<512x128xf32>
    %c3584_38 = arith.constant 3584 : index
    %c0_39 = arith.constant 0 : index
    %76 = vector.load %arg3[%c3584_38, %c0_39] : memref<4096x128xf32, #tpu.memory_space<vmem>>, vector<512x128xf32>
    %77 = arith.mulf %75, %76 : vector<512x128xf32>
    %78 = vector.shape_cast %77 : vector<512x128xf32> to vector<16x32x128xf32>
    %cst_40 = arith.constant dense<0.000000e+00> : vector<32x128xf32>
    %79 = vector.multi_reduction <add>, %78, %cst_40 [0] : vector<16x32x128xf32> to vector<32x128xf32>
    %80 = arith.addf %70, %79 : vector<32x128xf32>
    %81 = arith.addf %75, %76 : vector<512x128xf32>
    %82 = vector.shape_cast %81 : vector<512x128xf32> to vector<16x32x128xf32>
    %cst_41 = arith.constant dense<0.000000e+00> : vector<32x128xf32>
    %83 = vector.multi_reduction <add>, %82, %cst_41 [0] : vector<16x32x128xf32> to vector<32x128xf32>
    %84 = arith.addf %74, %83 : vector<32x128xf32>
    %c0_42 = arith.constant 0 : index
    %c0_43 = arith.constant 0 : index
    %c0_44 = arith.constant 0 : index
    %c0_45 = arith.constant 0 : index
    %85 = vector.load %arg4[%c0_42, %c0_43, %c0_44, %c0_45] : memref<1x2x32x128xf32, #tpu.memory_space<vmem>>, vector<1x1x32x128xf32>
    %86 = vector.shape_cast %85 : vector<1x1x32x128xf32> to vector<32x128xf32>
    %87 = arith.addf %86, %80 : vector<32x128xf32>
    %c0_46 = arith.constant 0 : index
    %c0_47 = arith.constant 0 : index
    %c0_48 = arith.constant 0 : index
    %c0_49 = arith.constant 0 : index
    %88 = vector.load %arg4[%c0_46, %c0_47, %c0_48, %c0_49] : memref<1x2x32x128xf32, #tpu.memory_space<vmem>>, vector<1x1x32x128xf32>
    %89 = vector.shape_cast %88 : vector<1x1x32x128xf32> to vector<32x128xf32>
    %90 = vector.shape_cast %87 : vector<32x128xf32> to vector<1x1x32x128xf32>
    tpu.vector_store %arg4[%c0_46, %c0_47, %c0_48, %c0_49], %90 {strides = array<i32>} : memref<1x2x32x128xf32, #tpu.memory_space<vmem>>, vector<1x1x32x128xf32>,
    %c0_50 = arith.constant 0 : index
    %c1 = arith.constant 1 : index
    %c0_51 = arith.constant 0 : index
    %c0_52 = arith.constant 0 : index
    %91 = vector.load %arg4[%c0_50, %c1, %c0_51, %c0_52] : memref<1x2x32x128xf32, #tpu.memory_space<vmem>>, vector<1x1x32x128xf32>
    %92 = vector.shape_cast %91 : vector<1x1x32x128xf32> to vector<32x128xf32>
    %93 = arith.addf %92, %84 : vector<32x128xf32>
    %c0_53 = arith.constant 0 : index
    %c1_54 = arith.constant 1 : index
    %c0_55 = arith.constant 0 : index
    %c0_56 = arith.constant 0 : index
    %94 = vector.load %arg4[%c0_53, %c1_54, %c0_55, %c0_56] : memref<1x2x32x128xf32, #tpu.memory_space<vmem>>, vector<1x1x32x128xf32>
    %95 = vector.shape_cast %94 : vector<1x1x32x128xf32> to vector<32x128xf32>
    %96 = vector.shape_cast %93 : vector<32x128xf32> to vector<1x1x32x128xf32>
    tpu.vector_store %arg4[%c0_53, %c1_54, %c0_55, %c0_56], %96 {strides = array<i32>} : memref<1x2x32x128xf32, #tpu.memory_space<vmem>>, vector<1x1x32x128xf32>,
    return
  }
  func.func @transform_0(%arg0: i32, %arg1: i32) -> (i32, i32) {
    %c1_i32 = arith.constant 1 : i32
    %0 = arith.muli %arg0, %c1_i32 : i32
    %1 = arith.addi %0, %arg1 : i32
    %c0_i32 = arith.constant 0 : i32
    %c0_i32_0 = arith.constant 0 : i32
    return %1, %c0_i32 : i32, i32
  }
  func.func @transform_1(%arg0: i32, %arg1: i32) -> (i32, i32) {
    %c1_i32 = arith.constant 1 : i32
    %0 = arith.muli %arg0, %c1_i32 : i32
    %1 = arith.addi %0, %arg1 : i32
    %c0_i32 = arith.constant 0 : i32
    %c0_i32_0 = arith.constant 0 : i32
    return %1, %c0_i32 : i32, i32
  }
  func.func @transform_2(%arg0: i32, %arg1: i32) -> (i32, i32, i32, i32) {
    %c0_i32 = arith.constant 0 : i32
    %c0_i32_0 = arith.constant 0 : i32
    %c0_i32_1 = arith.constant 0 : i32
    %c0_i32_2 = arith.constant 0 : i32
    return %arg0, %c0_i32, %c0_i32_0, %c0_i32_1 : i32, i32, i32, i32
  }
}

</mosaic_0001>

<bundles_post_ra>
// kernel: tpu_custom_call.1
= control target key start
LH: loop header
LB: loop body
LE: loop exit
PB: predicated region body
PF: predicated region fallthrough
CT: control target
= control target key end

     0   :  { %7 = vsyncpa [#allocation3], 0  ;;  %s9590_s0 = inlined_call_operand.hbm [shape: f32[4096,128], index: 0, kind: input, shape index: {}]   ;;  %s9591_s1 = inlined_call_operand.hbm [shape: f32[4096,128], index: 1, kind: input, shape index: {}]   ;;  %s9592_s2 = inlined_call_operand.hbm [shape: f32[1,2,32,128], index: 2, kind: output, shape index: {}]  }
   0x1   :  { %8 = vsyncpa [#allocation6], 0 }
   0x2   :  { %9 = vsyncpa [#allocation4], 0  ;;  %s3251_s9 = smov [#allocation2]  }
   0x3   :  { %s19_s10 = sshll.u32 %s3251_s9, 4  ;;  %s20_s10 = int_to_ptr.vmem [resolvable:$true] %s19_s10 }
   0x4   :  { %s3193_s11 = scalar_lea.vmem %s20_s10, 65536  ;;  %p3198_p1 = scmp.lt.s32.totalorder %s20_s10, %s20_s10 }
   0x5   :  { %p3194_p0 = scmp.ne.s32.totalorder %s20_s10, %s3193_s11  ;;  %p3199_p2 = scmp.lt.s32.totalorder %s3193_s11, %s3193_s11 }
   0x7   :  { %p3200_p3 = por %p3199_p2, %p3198_p1 }
   0x9   :  { %p3201_p4 = pnand %p3200_p3, %p3194_p0 }
   0xb   :  { %3204 = shalt.err (!%p3201_p4)
}
   0xc   :  { %s3252_s12 = smov 128   ;;  %s3253_s13 = smov 8  }
   0xd   :  { %25 = dma.hbm_to_vmem [thread:$0]  %s9590_s0, 65536, %s20_s10, [#allocation3], %s3252_s12, %s3252_s12, %s3253_s13  }
   0xe   :  { %s3254_s16 = smov [#allocation5]  }
   0xf   :  { %s35_s17 = sshll.u32 %s3254_s16, 4  ;;  %s36_s17 = int_to_ptr.vmem [resolvable:$true] %s35_s17 }
  0x10   :  { %s3213_s18 = scalar_lea.vmem %s36_s17, 65536  ;;  %p3218_p6 = scmp.lt.s32.totalorder %s36_s17, %s36_s17 }
  0x11   :  { %p3214_p5 = scmp.ne.s32.totalorder %s36_s17, %s3213_s18  ;;  %p3219_p7 = scmp.lt.s32.totalorder %s3213_s18, %s3213_s18 }
  0x13   :  { %p3220_p8 = por %p3219_p7, %p3218_p6 }
  0x15   :  { %p3221_p9 = pnand %p3220_p8, %p3214_p5 }
  0x17   :  { %3224 = shalt.err (!%p3221_p9)
}
  0x18   :  { %41 = dma.hbm_to_vmem [thread:$0]  %s9591_s1, 65536, %s36_s17, [#allocation6], %s3252_s12, %s3252_s12, %s3253_s13  }
  0x19   :  { %3245 = dma.done.wait [#allocation3], 65536  }
  0x1a   :  { %3246 = vsyncadd [#allocation3], 4294901760 }
  0x1b   :  { %3247 = dma.done.wait [#allocation6], 65536  }
  0x1c   :  { %3248 = vsyncadd [#allocation6], 4294901760  ;;  %v3283_v0 = vld [vmem:[#allocation2] sm:$0xff]  ;;  %v3285_v1 = vld [vmem:[#allocation2 + $0x8] sm:$0xff]  ;;  %s3255_s0 = smov [#allocation7]  }
  0x1d   :  { %v3287_v2 = vld [vmem:[#allocation2 + $0x20] sm:$0xff]  ;;  %v3289_v3 = vld [vmem:[#allocation2 + $0x28] sm:$0xff]  ;;  %v3385_v60 = vld [vmem:[#allocation2 + $0x10] sm:$0xff]  ;;  %s3166_s1 = sshll.u32 %s3255_s0, 4  ;;  %s3167_s1 = int_to_ptr.vmem [resolvable:$true] %s3166_s1 }
  0x1e   :  { %v3291_v4 = vld [vmem:[#allocation5] sm:$0xff]  ;;  %v3293_v5 = vld [vmem:[#allocation5 + $0x8] sm:$0xff]  ;;  %v3387_v61 = vld [vmem:[#allocation2 + $0x30] sm:$0xff]  ;;  %s3225_s21 = scalar_lea.vmem %s3167_s1, 1024  ;;  %p3230_p11 = scmp.lt.s32.totalorder %s3167_s1, %s3167_s1 }
  0x1f   :  { %v3295_v6 = vld [vmem:[#allocation2 + $0x40] sm:$0xff]  ;;  %v3297_v7 = vld [vmem:[#allocation2 + $0x48] sm:$0xff]  ;;  %v192_v9 = vmul.f32 %v3291_v4, %v3283_v0  ;;  %v193_v10 = vmul.f32 %v3293_v5, %v3285_v1  ;;  %p3226_p10 = scmp.ne.s32.totalorder %s3167_s1, %s3225_s21  ;;  %p3231_p12 = scmp.lt.s32.totalorder %s3225_s21, %s3225_s21 }
  0x20   :  { %v3299_v8 = vld [vmem:[#allocation5 + $0x20] sm:$0xff]  ;;  %v3307_v12 = vld [vmem:[#allocation2 + $0x68] sm:$0xff] }
  0x21   :  { %v3305_v11 = vld [vmem:[#allocation2 + $0x60] sm:$0xff]  ;;  %10534 = vst [vmem:[#allocation12_spill] sm:$0xff] %v3307_v12  ;;  %v3309_v13 = vld [vmem:[#allocation5 + $0x28] sm:$0xff]  ;;  %v196_v14 = vmul.f32 %v3299_v8, %v3287_v2  ;;  %p3232_p13 = por %p3231_p12, %p3230_p11 }
  0x22   :  { %10533 = vst [vmem:[#allocation11_spill] sm:$0xff] %v3305_v11  ;;  %v3313_v15 = vld [vmem:[#allocation2 + $0x80] sm:$0xff]  ;;  %v3317_v17 = vld [vmem:[#allocation5 + $0x48] sm:$0xff]  ;;  %v197_v18 = vmul.f32 %v3309_v13, %v3289_v3 }
  0x23   :  { %10535 = vst [vmem:[#allocation13_spill] sm:$0xff] %v3313_v15  ;;  %v3315_v16 = vld [vmem:[#allocation5 + $0x40] sm:$0xff]  ;;  %v3321_v19 = vld [vmem:[#allocation2 + $0x88] sm:$0xff]  ;;  %v201_v23 = vmul.f32 %v3317_v17, %v3297_v7  ;;  %v256_v24 = vadd.f32 %v196_v14, %v192_v9  ;;  %v3391_v9 = vld [vmem:[#allocation2 + $0x18] sm:$0xff]  ;;  %p3233_p0 = pnand %p3232_p13, %p3226_p10 }
  0x24   :  { %10536 = vst [vmem:[#allocation14_spill] sm:$0xff] %v3321_v19  ;;  %v3323_v20 = vld [vmem:[#allocation5 + $0x60] sm:$0xff]  ;;  %v3325_v21 = vld [vmem:[#allocation5 + $0x68] sm:$0xff]  ;;  %v200_v22 = vmul.f32 %v3315_v16, %v3295_v6  ;;  %v271_v29 = vadd.f32 %v197_v18, %v193_v10  ;;  %v3393_v10 = vld [vmem:[#allocation2 + $0x38] sm:$0xff] }
  0x25   :  { %10537 = vst [vmem:[#allocation15_spill] sm:$0xff] %v3323_v20  ;;  %10538 = vst [vmem:[#allocation16_spill] sm:$0xff] %v3325_v21  ;;  %v3331_v25 = vld [vmem:[#allocation2 + $0xa0] sm:$0xff]  ;;  %v204_v27 = vmul.f32 %v3323_v20, %v3305_v11  ;;  %v205_v28 = vmul.f32 %v3325_v21, %v3307_v12  ;;  %v3339_v30 = vld [vmem:[#allocation2 + $0xa8] sm:$0xff] }
  0x26   :  { %10539 = vst [vmem:[#allocation17_spill] sm:$0xff] %v3331_v25  ;;  %v3333_v26 = vld [vmem:[#allocation5 + $0x80] sm:$0xff]  ;;  %10541 = vst [vmem:[#allocation19_spill] sm:$0xff] %v3339_v30  ;;  %v3341_v31 = vld [vmem:[#allocation5 + $0x88] sm:$0xff]  ;;  %v257_v33 = vadd.f32 %v256_v24, %v200_v22  ;;  %v272_v38 = vadd.f32 %v271_v29, %v201_v23 }
  0x27   :  { %10540 = vst [vmem:[#allocation18_spill] sm:$0xff] %v3333_v26  ;;  %10542 = vst [vmem:[#allocation20_spill] sm:$0xff] %v3341_v31  ;;  %v208_v32 = vmul.f32 %v3333_v26, %v3313_v15  ;;  %v3345_v34 = vld [vmem:[#allocation2 + $0xc0] sm:$0xff]  ;;  %v3349_v36 = vld [vmem:[#allocation5 + $0xa8] sm:$0xff]  ;;  %v209_v37 = vmul.f32 %v3341_v31, %v3321_v19 }
  0x28   :  { %10543 = vst [vmem:[#allocation21_spill] sm:$0xff] %v3345_v34  ;;  %v3347_v35 = vld [vmem:[#allocation5 + $0xa0] sm:$0xff]  ;;  %10545 = vst [vmem:[#allocation23_spill] sm:$0xff] %v3349_v36  ;;  %v3353_v39 = vld [vmem:[#allocation2 + $0xc8] sm:$0xff]  ;;  %v258_v43 = vadd.f32 %v257_v33, %v204_v27  ;;  %v213_v46 = vmul.f32 %v3349_v36, %v3339_v30  ;;  %v273_v47 = vadd.f32 %v272_v38, %v205_v28 }
  0x29   :  { %10544 = vst [vmem:[#allocation22_spill] sm:$0xff] %v3347_v35  ;;  %10546 = vst [vmem:[#allocation24_spill] sm:$0xff] %v3353_v39  ;;  %v3355_v40 = vld [vmem:[#allocation5 + $0xc0] sm:$0xff]  ;;  %v3357_v41 = vld [vmem:[#allocation5 + $0xc8] sm:$0xff]  ;;  %v212_v42 = vmul.f32 %v3347_v35, %v3331_v25 }
  0x2a   :  { %10547 = vst [vmem:[#allocation25_spill] sm:$0xff] %v3355_v40  ;;  %10548 = vst [vmem:[#allocation26_spill] sm:$0xff] %v3357_v41  ;;  %v3361_v44 = vld [vmem:[#allocation2 + $0xe0] sm:$0xff]  ;;  %v3367_v48 = vld [vmem:[#allocation2 + $0xe8] sm:$0xff]  ;;  %v216_v50 = vmul.f32 %v3355_v40, %v3345_v34  ;;  %v259_v51 = vadd.f32 %v258_v43, %v208_v32  ;;  %v217_v54 = vmul.f32 %v3357_v41, %v3353_v39 }
  0x2b   :  { %10549 = vst [vmem:[#allocation27_spill] sm:$0xff] %v3361_v44  ;;  %v3363_v45 = vld [vmem:[#allocation5 + $0xe0] sm:$0xff]  ;;  %10551 = vst [vmem:[#allocation29_spill] sm:$0xff] %v3367_v48  ;;  %v3369_v49 = vld [vmem:[#allocation5 + $0xe8] sm:$0xff]  ;;  %v274_v55 = vadd.f32 %v273_v47, %v209_v37 }
  0x2c   :  { %10550 = vst [vmem:[#allocation28_spill] sm:$0xff] %v3363_v45  ;;  %10552 = vst [vmem:[#allocation30_spill] sm:$0xff] %v3369_v49  ;;  %v3373_v52 = vld [vmem:[#allocation2 + $0x100] sm:$0xff]  ;;  %v3379_v56 = vld [vmem:[#allocation2 + $0x108] sm:$0xff]  ;;  %v220_v58 = vmul.f32 %v3363_v45, %v3361_v44  ;;  %v260_v59 = vadd.f32 %v259_v51, %v212_v42  ;;  %v221_v62 = vmul.f32 %v3369_v49, %v3367_v48 }
  0x2d   :  { %10553 = vst [vmem:[#allocation31_spill] sm:$0xff] %v3373_v52  ;;  %v3375_v53 = vld [vmem:[#allocation5 + $0x100] sm:$0xff]  ;;  %10555 = vst [vmem:[#allocation33_spill] sm:$0xff] %v3379_v56  ;;  %v3381_v57 = vld [vmem:[#allocation5 + $0x108] sm:$0xff]  ;;  %v275_v63 = vadd.f32 %v274_v55, %v213_v46 }
  0x2e   :  { %10554 = vst [vmem:[#allocation32_spill] sm:$0xff] %v3375_v53  ;;  %10556 = vst [vmem:[#allocation34_spill] sm:$0xff] %v3381_v57  ;;  %v3395_v14 = vld [vmem:[#allocation2 + $0x120] sm:$0xff]  ;;  %v3397_v18 = vld [vmem:[#allocation2 + $0x128] sm:$0xff]  ;;  %v224_v22 = vmul.f32 %v3375_v53, %v3373_v52  ;;  %v261_v23 = vadd.f32 %v260_v59, %v216_v50  ;;  %v225_v29 = vmul.f32 %v3381_v57, %v3379_v56 }
  0x2f   :  { %10557 = vst [vmem:[#allocation35_spill] sm:$0xff] %v3395_v14  ;;  %10558 = vst [vmem:[#allocation36_spill] sm:$0xff] %v3397_v18  ;;  %v3401_v24 = vld [vmem:[#allocation5 + $0x10] sm:$0xff]  ;;  %v3405_v28 = vld [vmem:[#allocation5 + $0x120] sm:$0xff]  ;;  %v276_v32 = vadd.f32 %v275_v63, %v217_v54 }
  0x30   :  { %v3403_v27 = vld [vmem:[#allocation5 + $0x30] sm:$0xff]  ;;  %10559 = vst [vmem:[#allocation37_spill] sm:$0xff] %v3405_v28  ;;  %v3409_v33 = vld [vmem:[#allocation5 + $0x18] sm:$0xff]  ;;  %v3413_v38 = vld [vmem:[#allocation5 + $0x128] sm:$0xff]  ;;  %v262_v42 = vadd.f32 %v261_v23, %v220_v58  ;;  %v194_v54 = vmul.f32 %v3401_v24, %v3385_v60  ;;  %v228_v58 = vmul.f32 %v3405_v28, %v3395_v14 }
  0x31   :  { %v3411_v37 = vld [vmem:[#allocation5 + $0x38] sm:$0xff]  ;;  %10560 = vst [vmem:[#allocation38_spill] sm:$0xff] %v3413_v38  ;;  %v3415_v43 = vld [vmem:[#allocation2 + $0x50] sm:$0xff]  ;;  %v277_v50 = vadd.f32 %v276_v32, %v221_v62  ;;  %v198_v63 = vmul.f32 %v3403_v27, %v3387_v61  ;;  %v3433_v57 = vld [vmem:[#allocation2 + $0x140] sm:$0xff]  ;;  %v195_v32 = vmul.f32 %v3409_v33, %v3391_v9  ;;  %v229_v52 = vmul.f32 %v3413_v38, %v3397_v18 }
  0x32   :  { %v3417_v46 = vld [vmem:[#allocation2 + $0x58] sm:$0xff]  ;;  %v3419_v47 = vld [vmem:[#allocation5 + $0x50] sm:$0xff]  ;;  %v263_v23 = vadd.f32 %v262_v42, %v224_v22  ;;  %10565 = vst [vmem:[#allocation43_spill] sm:$0xff] %v3433_v57  ;;  %v3437_v62 = vld [vmem:[#allocation5 + $0x140] sm:$0xff]  ;;  %v199_v53 = vmul.f32 %v3411_v37, %v3393_v10 }
  0x33   :  { %10561 = vst [vmem:[#allocation39_spill] sm:$0xff] %v3417_v46  ;;  %v3421_v51 = vld [vmem:[#allocation2 + $0x70] sm:$0xff]  ;;  %v3423_v55 = vld [vmem:[#allocation2 + $0x78] sm:$0xff]  ;;  %10567 = vst [vmem:[#allocation45_spill] sm:$0xff] %v3437_v62  ;;  %v278_v49 = vadd.f32 %v277_v50, %v225_v29  ;;  %v202_v42 = vmul.f32 %v3419_v47, %v3415_v43  ;;  %v232_v39 = vmul.f32 %v3437_v62, %v3433_v57 }
  0x34   :  { %10562 = vst [vmem:[#allocation40_spill] sm:$0xff] %v3421_v51  ;;  %10563 = vst [vmem:[#allocation41_spill] sm:$0xff] %v3423_v55  ;;  %v3425_v59 = vld [vmem:[#allocation5 + $0x58] sm:$0xff]  ;;  %v3435_v56 = vld [vmem:[#allocation5 + $0x70] sm:$0xff]  ;;  %v264_v40 = vadd.f32 %v263_v23, %v228_v58  ;;  %v286_v34 = vadd.f32 %v198_v63, %v194_v54  ;;  %v301_v26 = vadd.f32 %v199_v53, %v195_v32 }
  0x35   :  { %10564 = vst [vmem:[#allocation42_spill] sm:$0xff] %v3425_v59  ;;  %10566 = vst [vmem:[#allocation44_spill] sm:$0xff] %v3435_v56  ;;  %v3445_v48 = vld [vmem:[#allocation2 + $0x148] sm:$0xff]  ;;  %v3447_v28 = vld [vmem:[#allocation5 + $0x78] sm:$0xff]  ;;  %v203_v41 = vmul.f32 %v3425_v59, %v3417_v46  ;;  %v206_v18 = vmul.f32 %v3435_v56, %v3421_v51  ;;  %v279_v19 = vadd.f32 %v278_v49, %v229_v52 }
  0x36   :  { %10568 = vst [vmem:[#allocation46_spill] sm:$0xff] %v3445_v48  ;;  %10569 = vst [vmem:[#allocation47_spill] sm:$0xff] %v3447_v28  ;;  %v3449_v22 = vld [vmem:[#allocation5 + $0x148] sm:$0xff]  ;;  %v3453_v14 = vld [vmem:[#allocation2 + $0x90] sm:$0xff]  ;;  %v207_v25 = vmul.f32 %v3447_v28, %v3423_v55  ;;  %v287_v63 = vadd.f32 %v286_v34, %v202_v42 }
  0x37   :  { %10570 = vst [vmem:[#allocation48_spill] sm:$0xff] %v3449_v22  ;;  %10571 = vst [vmem:[#allocation49_spill] sm:$0xff] %v3453_v14  ;;  %v3455_v45 = vld [vmem:[#allocation2 + $0x98] sm:$0xff]  ;;  %v3457_v44 = vld [vmem:[#allocation5 + $0x90] sm:$0xff]  ;;  %v233_v31 = vmul.f32 %v3449_v22, %v3445_v48  ;;  %v302_v22 = vadd.f32 %v301_v26, %v203_v41  ;;  %v265_v48 = vadd.f32 %v264_v40, %v232_v39 }
  0x38   :  { %10572 = vst [vmem:[#allocation50_spill] sm:$0xff] %v3455_v45  ;;  %10573 = vst [vmem:[#allocation51_spill] sm:$0xff] %v3457_v44  ;;  %v3461_v38 = vld [vmem:[#allocation2 + $0xb0] sm:$0xff]  ;;  %v3463_v29 = vld [vmem:[#allocation2 + $0xb8] sm:$0xff]  ;;  %v210_v54 = vmul.f32 %v3457_v44, %v3453_v14  ;;  %v288_v34 = vadd.f32 %v287_v63, %v206_v18 }
  0x39   :  { %10574 = vst [vmem:[#allocation52_spill] sm:$0xff] %v3461_v38  ;;  %10575 = vst [vmem:[#allocation53_spill] sm:$0xff] %v3463_v29  ;;  %v3465_v50 = vld [vmem:[#allocation5 + $0x98] sm:$0xff]  ;;  %v3471_v36 = vld [vmem:[#allocation2 + $0x160] sm:$0xff] }
  0x3a   :  { %10576 = vst [vmem:[#allocation54_spill] sm:$0xff] %v3465_v50  ;;  %10577 = vst [vmem:[#allocation55_spill] sm:$0xff] %v3471_v36  ;;  %v3473_v30 = vld [vmem:[#allocation5 + $0xb0] sm:$0xff]  ;;  %v3475_v35 = vld [vmem:[#allocation5 + $0x160] sm:$0xff]  ;;  %v211_v57 = vmul.f32 %v3465_v50, %v3455_v45  ;;  %v289_v28 = vadd.f32 %v288_v34, %v210_v54  ;;  %v3549_v54 = vadd.f32 %v3293_v5, %v3285_v1 }
  0x3b   :  { %10578 = vst [vmem:[#allocation56_spill] sm:$0xff] %v3473_v30  ;;  %10579 = vst [vmem:[#allocation57_spill] sm:$0xff] %v3475_v35  ;;  %v3481_v15 = vld [vmem:[#allocation2 + $0x168] sm:$0xff]  ;;  %v3483_v56 = vld [vmem:[#allocation5 + $0xb8] sm:$0xff]  ;;  %v214_v53 = vmul.f32 %v3473_v30, %v3461_v38  ;;  %v236_v32 = vmul.f32 %v3475_v35, %v3471_v36  ;;  %v280_v38 = vadd.f32 %v279_v19, %v233_v31 }
  0x3c   :  { %10580 = vst [vmem:[#allocation58_spill] sm:$0xff] %v3481_v15  ;;  %10581 = vst [vmem:[#allocation59_spill] sm:$0xff] %v3483_v56  ;;  %v3485_v58 = vld [vmem:[#allocation5 + $0x168] sm:$0xff]  ;;  %v3489_v23 = vld [vmem:[#allocation2 + $0xd0] sm:$0xff]  ;;  %v215_v41 = vmul.f32 %v3483_v56, %v3463_v29  ;;  %v303_v35 = vadd.f32 %v302_v22, %v207_v25  ;;  %v3567_v1 = vadd.f32 %v3401_v24, %v3385_v60 }
  0x3d   :  { %10582 = vst [vmem:[#allocation60_spill] sm:$0xff] %v3485_v58  ;;  %10583 = vst [vmem:[#allocation61_spill] sm:$0xff] %v3489_v23  ;;  %v3491_v62 = vld [vmem:[#allocation5 + $0xd0] sm:$0xff]  ;;  %v3495_v49 = vld [vmem:[#allocation2 + $0xd8] sm:$0xff]  ;;  %v237_v30 = vmul.f32 %v3485_v58, %v3481_v15  ;;  %v3585_v60 = vadd.f32 %v3409_v33, %v3391_v9 }
  0x3e   :  { %10584 = vst [vmem:[#allocation62_spill] sm:$0xff] %v3491_v62  ;;  %10585 = vst [vmem:[#allocation63_spill] sm:$0xff] %v3495_v49  ;;  %v3497_v52 = vld [vmem:[#allocation5 + $0xd8] sm:$0xff]  ;;  %v3503_v42 = vld [vmem:[#allocation2 + $0xf0] sm:$0xff]  ;;  %v218_v45 = vmul.f32 %v3491_v62, %v3489_v23  ;;  %v304_v15 = vadd.f32 %v303_v35, %v211_v57  ;;  %v3545_v62 = vadd.f32 %v3291_v4, %v3283_v0 }
  0x3f   :  { %10586 = vst [vmem:[#allocation64_spill] sm:$0xff] %v3497_v52  ;;  %10587 = vst [vmem:[#allocation65_spill] sm:$0xff] %v3503_v42  ;;  %v3505_v44 = vld [vmem:[#allocation2 + $0xf8] sm:$0xff]  ;;  %v3507_v14 = vld [vmem:[#allocation2 + $0x110] sm:$0xff]  ;;  %v219_v58 = vmul.f32 %v3497_v52, %v3495_v49  ;;  %v266_v4 = vadd.f32 %v265_v48, %v236_v32  ;;  %v290_v35 = vadd.f32 %v289_v28, %v214_v53 }
  0x40   :  { %10588 = vst [vmem:[#allocation66_spill] sm:$0xff] %v3505_v44  ;;  %10589 = vst [vmem:[#allocation67_spill] sm:$0xff] %v3507_v14  ;;  %v3509_v50 = vld [vmem:[#allocation2 + $0x180] sm:$0xff]  ;;  %v3517_v39 = vld [vmem:[#allocation2 + $0x118] sm:$0xff]  ;;  %v281_v28 = vadd.f32 %v280_v38, %v237_v30  ;;  %v305_v53 = vadd.f32 %v304_v15, %v215_v41 }
  0x41   :  { %10590 = vst [vmem:[#allocation68_spill] sm:$0xff] %v3509_v50  ;;  %v3511_v26 = vld [vmem:[#allocation5 + $0x180] sm:$0xff]  ;;  %10592 = vst [vmem:[#allocation70_spill] sm:$0xff] %v3517_v39  ;;  %v3519_v40 = vld [vmem:[#allocation2 + $0x130] sm:$0xff]  ;;  %v291_v33 = vadd.f32 %v290_v35, %v218_v45 }
  0x42   :  { %10591 = vst [vmem:[#allocation69_spill] sm:$0xff] %v3511_v26  ;;  %10593 = vst [vmem:[#allocation71_spill] sm:$0xff] %v3519_v40  ;;  %v3521_v18 = vld [vmem:[#allocation2 + $0x138] sm:$0xff]  ;;  %v3523_v63 = vld [vmem:[#allocation2 + $0x188] sm:$0xff]  ;;  %v240_v0 = vmul.f32 %v3511_v26, %v3509_v50  ;;  %v306_v35 = vadd.f32 %v305_v53, %v219_v58 }
  0x43   :  { %10594 = vst [vmem:[#allocation72_spill] sm:$0xff] %v3521_v18  ;;  %10595 = vst [vmem:[#allocation73_spill] sm:$0xff] %v3523_v63  ;;  %v3525_v36 = vld [vmem:[#allocation5 + $0x188] sm:$0xff]  ;;  %v3529_v56 = vld [vmem:[#allocation2 + $0x150] sm:$0xff] }
  0x44   :  { %10596 = vst [vmem:[#allocation74_spill] sm:$0xff] %v3525_v36  ;;  %v3531_v29 = vld [vmem:[#allocation2 + $0x158] sm:$0xff]  ;;  %v3533_v19 = vld [vmem:[#allocation2 + $0x1a0] sm:$0xff]  ;;  %v3535_v25 = vld [vmem:[#allocation5 + $0xf0] sm:$0xff]  ;;  %v241_v48 = vmul.f32 %v3525_v36, %v3523_v63  ;;  %v267_v53 = vadd.f32 %v266_v4, %v240_v0 }
  0x45   :  { %10597 = vst [vmem:[#allocation75_spill] sm:$0xff] %v3531_v29  ;;  %10598 = vst [vmem:[#allocation76_spill] sm:$0xff] %v3533_v19  ;;  %v3537_v31 = vld [vmem:[#allocation5 + $0xf8] sm:$0xff]  ;;  %v3539_v22 = vld [vmem:[#allocation5 + $0x110] sm:$0xff]  ;;  %v222_v30 = vmul.f32 %v3535_v25, %v3503_v42 }
  0x46   :  { %10599 = vst [vmem:[#allocation77_spill] sm:$0xff] %v3535_v25  ;;  %10600 = vst [vmem:[#allocation78_spill] sm:$0xff] %v3537_v31  ;;  %v3551_v34 = vld [vmem:[#allocation2 + $0x170] sm:$0xff]  ;;  %v3553_v23 = vld [vmem:[#allocation2 + $0x178] sm:$0xff]  ;;  %v223_v15 = vmul.f32 %v3537_v31, %v3505_v44  ;;  %v226_v9 = vmul.f32 %v3539_v22, %v3507_v14 }
  0x47   :  { %10601 = vst [vmem:[#allocation79_spill] sm:$0xff] %v3539_v22  ;;  %10602 = vst [vmem:[#allocation80_spill] sm:$0xff] %v3545_v62  ;;  %v3555_v55 = vld [vmem:[#allocation2 + $0x1a8] sm:$0xff]  ;;  %v3557_v51 = vld [vmem:[#allocation5 + $0x118] sm:$0xff] }
  0x48   :  { %10603 = vst [vmem:[#allocation81_spill] sm:$0xff] %v3549_v54  ;;  %10604 = vst [vmem:[#allocation82_spill] sm:$0xff] %v3555_v55  ;;  %v3559_v21 = vld [vmem:[#allocation5 + $0x130] sm:$0xff]  ;;  %v3561_v52 = vld [vmem:[#allocation5 + $0x138] sm:$0xff]  ;;  %v227_v25 = vmul.f32 %v3557_v51, %v3517_v39 }
  0x49   :  { %10605 = vst [vmem:[#allocation83_spill] sm:$0xff] %v3557_v51  ;;  %10606 = vst [vmem:[#allocation84_spill] sm:$0xff] %v3559_v21  ;;  %v3569_v5 = vld [vmem:[#allocation2 + $0x190] sm:$0xff]  ;;  %v3571_v57 = vld [vmem:[#allocation2 + $0x198] sm:$0xff]  ;;  %v230_v31 = vmul.f32 %v3559_v21, %v3519_v40  ;;  %v231_v45 = vmul.f32 %v3561_v52, %v3521_v18 }
  0x4a   :  { %10607 = vst [vmem:[#allocation85_spill] sm:$0xff] %v3561_v52  ;;  %10608 = vst [vmem:[#allocation86_spill] sm:$0xff] %v3567_v1  ;;  %v3573_v49 = vld [vmem:[#allocation2 + $0x1b0] sm:$0xff]  ;;  %v3577_v62 = vld [vmem:[#allocation5 + $0x158] sm:$0xff] }
  0x4b   :  { %v3575_v54 = vld [vmem:[#allocation5 + $0x150] sm:$0xff]  ;;  %10610 = vst [vmem:[#allocation88_spill] sm:$0xff] %v3577_v62  ;;  %v3579_v12 = vld [vmem:[#allocation5 + $0x1a0] sm:$0xff]  ;;  %10612 = vst [vmem:[#allocation90_spill] sm:$0xff] %v3585_v60  ;;  %v3639_v21 = vmul.f32 %v3577_v62, %v3531_v29  ;;  %v282_v29 = vadd.f32 %v281_v28, %v241_v48 }
  0x4c   :  { %10609 = vst [vmem:[#allocation87_spill] sm:$0xff] %v3575_v54  ;;  %10611 = vst [vmem:[#allocation89_spill] sm:$0xff] %v3579_v12  ;;  %v3587_v24 = vld [vmem:[#allocation2 + $0x1b8] sm:$0xff]  ;;  %v3589_v32 = vld [vmem:[#allocation2 + $0x1c0] sm:$0xff]  ;;  %v234_v51 = vmul.f32 %v3575_v54, %v3529_v56  ;;  %v244_v58 = vmul.f32 %v3579_v12, %v3533_v19 }
  0x4d   :  { %v3591_v26 = vld [vmem:[#allocation2 + $0x1c8] sm:$0xff]  ;;  %v3593_v50 = vld [vmem:[#allocation5 + $0x170] sm:$0xff]  ;;  %v3595_v1 = vld [vmem:[#allocation5 + $0x178] sm:$0xff] }
  0x4e   :  { %10613 = vst [vmem:[#allocation91_spill] sm:$0xff] %v3593_v50  ;;  %10614 = vst [vmem:[#allocation92_spill] sm:$0xff] %v3595_v1  ;;  %v3597_v20 = vld [vmem:[#allocation5 + $0x1a8] sm:$0xff]  ;;  %v3605_v38 = vld [vmem:[#allocation2 + $0x1d0] sm:$0xff]  ;;  %v3651_v39 = vmul.f32 %v3593_v50, %v3551_v34  ;;  %v3655_v54 = vmul.f32 %v3595_v1, %v3553_v23 }
  0x4f   :  { %10615 = vst [vmem:[#allocation93_spill] sm:$0xff] %v3597_v20  ;;  %v3607_v41 = vld [vmem:[#allocation2 + $0x1d8] sm:$0xff]  ;;  %v3609_v36 = vld [vmem:[#allocation2 + $0x1e0] sm:$0xff]  ;;  %v3611_v63 = vld [vmem:[#allocation5 + $0x190] sm:$0xff]  ;;  %v245_v62 = vmul.f32 %v3597_v20, %v3555_v55  ;;  %v292_v20 = vadd.f32 %v291_v33, %v222_v30  ;;  %v268_v33 = vadd.f32 %v267_v53, %v244_v58  ;;  %v326_v58 = vadd.f32 %v3403_v27, %v3387_v61 }
  0x50   :  { %10616 = vst [vmem:[#allocation94_spill] sm:$0xff] %v3607_v41  ;;  %10617 = vst [vmem:[#allocation95_spill] sm:$0xff] %v3609_v36  ;;  %v3613_v60 = vld [vmem:[#allocation5 + $0x198] sm:$0xff]  ;;  %v3615_v11 = vld [vmem:[#allocation5 + $0x1b0] sm:$0xff]  ;;  %v3667_v19 = vmul.f32 %v3611_v63, %v3569_v5 }
  0x51   :  { %10618 = vst [vmem:[#allocation96_spill] sm:$0xff] %v3611_v63  ;;  %10619 = vst [vmem:[#allocation97_spill] sm:$0xff] %v3613_v60  ;;  %v3623_v22 = vld [vmem:[#allocation2 + $0x1e8] sm:$0xff]  ;;  %v3625_v14 = vld [vmem:[#allocation2 + $0x1f0] sm:$0xff]  ;;  %v3671_v50 = vmul.f32 %v3613_v60, %v3571_v57  ;;  %v3675_v1 = vmul.f32 %v3615_v11, %v3573_v49  ;;  %v307_v63 = vadd.f32 %v306_v35, %v223_v15 }
  0x52   :  { %10620 = vst [vmem:[#allocation98_spill] sm:$0xff] %v3615_v11  ;;  %10621 = vst [vmem:[#allocation99_spill] sm:$0xff] %v3623_v22  ;;  %v3627_v44 = vld [vmem:[#allocation2 + $0x1f8] sm:$0xff]  ;;  %v3631_v59 = vld [vmem:[#allocation5 + $0x1c0] sm:$0xff]  ;;  %v283_v35 = vadd.f32 %v282_v29, %v245_v62  ;;  %v329_v62 = vadd.f32 %v3317_v17, %v3297_v7 }
  0x53   :  { %10622 = vst [vmem:[#allocation100_spill] sm:$0xff] %v3625_v14  ;;  %10623 = vst [vmem:[#allocation101_spill] sm:$0xff] %v3627_v44  ;;  %v3629_v42 = vld [vmem:[#allocation5 + $0x1b8] sm:$0xff]  ;;  %v3633_v46 = vld [vmem:[#allocation5 + $0x1c8] sm:$0xff]  ;;  %v248_v28 = vmul.f32 %v3631_v59, %v3589_v32  ;;  %v308_v53 = vadd.f32 %v307_v63, %v227_v25 }
  0x54   :  { %10624 = vst [vmem:[#allocation102_spill] sm:$0xff] %v3629_v42  ;;  %10625 = vst [vmem:[#allocation103_spill] sm:$0xff] %v3631_v59  ;;  %v3643_v52 = vld [vmem:[#allocation5 + $0x1d0] sm:$0xff]  ;;  %v3645_v18 = vld [vmem:[#allocation5 + $0x1d8] sm:$0xff]  ;;  %v3679_v48 = vmul.f32 %v3629_v42, %v3587_v24  ;;  %v249_v55 = vmul.f32 %v3633_v46, %v3591_v26 }
  0x55   :  { %10626 = vst [vmem:[#allocation104_spill] sm:$0xff] %v3643_v52  ;;  %10627 = vst [vmem:[#allocation105_spill] sm:$0xff] %v3645_v18  ;;  %v3647_v40 = vld [vmem:[#allocation5 + $0x1e0] sm:$0xff]  ;;  %v3659_v12 = vld [vmem:[#allocation5 + $0x1e8] sm:$0xff]  ;;  %v3687_v60 = vmul.f32 %v3643_v52, %v3605_v38  ;;  %v3691_v11 = vmul.f32 %v3645_v18, %v3607_v41  ;;  %v293_v52 = vadd.f32 %v292_v20, %v226_v9 }
  0x56   :  { %10628 = vst [vmem:[#allocation106_spill] sm:$0xff] %v3647_v40  ;;  %10629 = vst [vmem:[#allocation107_spill] sm:$0xff] %v3659_v12  ;;  %v3661_v0 = vld [vmem:[#allocation5 + $0x1f0] sm:$0xff]  ;;  %v3663_v4 = vld [vmem:[#allocation5 + $0x1f8] sm:$0xff]  ;;  %v252_v30 = vmul.f32 %v3647_v40, %v3609_v36  ;;  %v253_v42 = vmul.f32 %v3659_v12, %v3623_v22  ;;  %v324_v18 = vadd.f32 %v3299_v8, %v3287_v2 }
  0x57   :  { %10630 = vst [vmem:[#allocation108_spill] sm:$0xff] %v3661_v0  ;;  %10631 = vst [vmem:[#allocation109_spill] sm:$0xff] %v3663_v4  ;;  %v3699_v59 = vmul.f32 %v3661_v0, %v3625_v14  ;;  %v3703_v15 = vmul.f32 %v3663_v4, %v3627_v44  ;;  %v325_v40 = vadd.f32 %v3309_v13, %v3289_v3  ;;  %v10634_v8 = vld [vmem:[#allocation39_spill] sm:$0xff]  ;;  %v10635_v29 = vld [vmem:[#allocation42_spill] sm:$0xff] }
  0x58   :  { %v327_v0 = vadd.f32 %v3411_v37, %v3393_v10  ;;  %v269_v20 = vadd.f32 %v268_v33, %v248_v28  ;;  %v330_v2 = vadd.f32 %v3419_v47, %v3415_v43  ;;  %v331_v3 = vadd.f32 %v10635_v29, %v10634_v8  ;;  %v10636_v13 = vld [vmem:[#allocation11_spill] sm:$0xff]  ;;  %v10638_v63 = vld [vmem:[#allocation12_spill] sm:$0xff]  ;;  %v10644_v28 = vld [vmem:[#allocation13_spill] sm:$0xff] }
  0x59   :  { %10632 = vst [vmem:[#allocation110_spill] sm:$0xff] %v3699_v59  ;;  %10633 = vst [vmem:[#allocation111_spill] sm:$0xff] %v3703_v15  ;;  %v328_v59 = vadd.f32 %v3315_v16, %v3295_v6  ;;  %v10637_v9 = vld [vmem:[#allocation15_spill] sm:$0xff]  ;;  %v284_v27 = vadd.f32 %v283_v35, %v249_v55  ;;  %v10639_v25 = vld [vmem:[#allocation16_spill] sm:$0xff]  ;;  %v294_v17 = vadd.f32 %v293_v52, %v230_v31 }
  0x5a   :  { %v332_v61 = vadd.f32 %v10637_v9, %v10636_v13  ;;  %v333_v10 = vadd.f32 %v10639_v25, %v10638_v63  ;;  %v10640_v37 = vld [vmem:[#allocation40_spill] sm:$0xff]  ;;  %v10642_v16 = vld [vmem:[#allocation41_spill] sm:$0xff]  ;;  %v10643_v4 = vld [vmem:[#allocation47_spill] sm:$0xff]  ;;  %v309_v55 = vadd.f32 %v308_v53, %v231_v45  ;;  %v3741_v52 = vadd.f32 %v269_v20, %v252_v30 }
  0x5b   :  { %v10641_v15 = vld [vmem:[#allocation44_spill] sm:$0xff]  ;;  %v335_v7 = vadd.f32 %v10643_v4, %v10642_v16  ;;  %v10645_v33 = vld [vmem:[#allocation18_spill] sm:$0xff]  ;;  %v10648_v29 = vld [vmem:[#allocation49_spill] sm:$0xff]  ;;  %v3748_v45 = vadd.f32 %v284_v27, %v253_v42  ;;  %v295_v41 = vadd.f32 %v294_v17, %v234_v51 }
  0x5c   :  { %v334_v6 = vadd.f32 %v10641_v15, %v10640_v37  ;;  %v336_v43 = vadd.f32 %v10645_v33, %v10644_v28  ;;  %v10646_v47 = vld [vmem:[#allocation14_spill] sm:$0xff]  ;;  %v10647_v44 = vld [vmem:[#allocation20_spill] sm:$0xff]  ;;  %v10649_v14 = vld [vmem:[#allocation51_spill] sm:$0xff]  ;;  %10656 = vst [vmem:[#allocation39_spill] sm:$0xff] %v3741_v52 }
  0x5d   :  { %v337_v8 = vadd.f32 %v10647_v44, %v10646_v47  ;;  %v338_v13 = vadd.f32 %v10649_v14, %v10648_v29  ;;  %v10650_v35 = vld [vmem:[#allocation50_spill] sm:$0xff]  ;;  %v10652_v25 = vld [vmem:[#allocation17_spill] sm:$0xff]  ;;  %v10654_v37 = vld [vmem:[#allocation19_spill] sm:$0xff]  ;;  %10662 = vst [vmem:[#allocation42_spill] sm:$0xff] %v3748_v45 }
  0x5e   :  { %v10651_v9 = vld [vmem:[#allocation54_spill] sm:$0xff]  ;;  %v10655_v22 = vld [vmem:[#allocation23_spill] sm:$0xff]  ;;  %v10657_v31 = vld [vmem:[#allocation52_spill] sm:$0xff] }
  0x5f   :  { %v339_v63 = vadd.f32 %v10651_v9, %v10650_v35  ;;  %v10653_v12 = vld [vmem:[#allocation22_spill] sm:$0xff]  ;;  %v341_v4 = vadd.f32 %v10655_v22, %v10654_v37  ;;  %v10658_v16 = vld [vmem:[#allocation56_spill] sm:$0xff]  ;;  %v10659_v33 = vld [vmem:[#allocation53_spill] sm:$0xff] }
  0x60   :  { %v340_v15 = vadd.f32 %v10653_v12, %v10652_v25  ;;  %v342_v28 = vadd.f32 %v10658_v16, %v10657_v31  ;;  %v10660_v44 = vld [vmem:[#allocation59_spill] sm:$0xff]  ;;  %v10661_v36 = vld [vmem:[#allocation80_spill] sm:$0xff]  ;;  %v10663_v53 = vld [vmem:[#allocation81_spill] sm:$0xff] }
  0x61   :  { %v343_v47 = vadd.f32 %v10660_v44, %v10659_v33  ;;  %v384_v14 = vadd.f32 %v324_v18, %v10661_v36  ;;  %v399_v29 = vadd.f32 %v325_v40, %v10663_v53  ;;  %v10664_v35 = vld [vmem:[#allocation86_spill] sm:$0xff]  ;;  %v10666_v22 = vld [vmem:[#allocation21_spill] sm:$0xff]  ;;  %v10668_v37 = vld [vmem:[#allocation24_spill] sm:$0xff]  ;;  %v310_v33 = vadd.f32 %v309_v55, %v3639_v21 }
  0x62   :  { %v414_v9 = vadd.f32 %v326_v58, %v10664_v35  ;;  %v10665_v12 = vld [vmem:[#allocation90_spill] sm:$0xff]  ;;  %v10667_v30 = vld [vmem:[#allocation25_spill] sm:$0xff]  ;;  %v10672_v53 = vld [vmem:[#allocation63_spill] sm:$0xff]  ;;  %v296_v21 = vadd.f32 %v295_v41, %v3651_v39 }
  0x63   :  { %v429_v25 = vadd.f32 %v327_v0, %v10665_v12  ;;  %v344_v20 = vadd.f32 %v10667_v30, %v10666_v22  ;;  %v10669_v52 = vld [vmem:[#allocation26_spill] sm:$0xff]  ;;  %v385_v16 = vadd.f32 %v384_v14, %v328_v59  ;;  %v400_v44 = vadd.f32 %v399_v29, %v329_v62  ;;  %v10670_v18 = vld [vmem:[#allocation61_spill] sm:$0xff]  ;;  %v10673_v58 = vld [vmem:[#allocation64_spill] sm:$0xff] }
  0x64   :  { %v345_v31 = vadd.f32 %v10669_v52, %v10668_v37  ;;  %v415_v36 = vadd.f32 %v414_v9, %v330_v2  ;;  %v10671_v27 = vld [vmem:[#allocation62_spill] sm:$0xff]  ;;  %v347_v35 = vadd.f32 %v10673_v58, %v10672_v53  ;;  %v10674_v0 = vld [vmem:[#allocation27_spill] sm:$0xff]  ;;  %v10675_v51 = vld [vmem:[#allocation28_spill] sm:$0xff]  ;;  %v311_v37 = vadd.f32 %v310_v33, %v3655_v54 }
  0x65   :  { %v430_v42 = vadd.f32 %v429_v25, %v331_v3  ;;  %v346_v40 = vadd.f32 %v10671_v27, %v10670_v18  ;;  %v348_v17 = vadd.f32 %v10675_v51, %v10674_v0  ;;  %v386_v12 = vadd.f32 %v385_v16, %v332_v61  ;;  %v10676_v22 = vld [vmem:[#allocation29_spill] sm:$0xff]  ;;  %v10677_v30 = vld [vmem:[#allocation30_spill] sm:$0xff]  ;;  %v10682_v16 = vld [vmem:[#allocation31_spill] sm:$0xff] }
  0x66   :  { %v349_v45 = vadd.f32 %v10677_v30, %v10676_v22  ;;  %v401_v52 = vadd.f32 %v400_v44, %v333_v10  ;;  %v416_v59 = vadd.f32 %v415_v36, %v334_v6  ;;  %v10678_v62 = vld [vmem:[#allocation65_spill] sm:$0xff]  ;;  %v10680_v55 = vld [vmem:[#allocation66_spill] sm:$0xff]  ;;  %v10683_v53 = vld [vmem:[#allocation32_spill] sm:$0xff]  ;;  %v297_v54 = vadd.f32 %v296_v21, %v3667_v19 }
  0x67   :  { %v431_v14 = vadd.f32 %v430_v42, %v335_v7  ;;  %v10679_v2 = vld [vmem:[#allocation77_spill] sm:$0xff]  ;;  %v10681_v29 = vld [vmem:[#allocation78_spill] sm:$0xff]  ;;  %v387_v25 = vadd.f32 %v386_v12, %v336_v43  ;;  %v352_v58 = vadd.f32 %v10683_v53, %v10682_v16  ;;  %v10686_v44 = vld [vmem:[#allocation67_spill] sm:$0xff] }
  0x68   :  { %v350_v3 = vadd.f32 %v10679_v2, %v10678_v62  ;;  %v351_v9 = vadd.f32 %v10681_v29, %v10680_v55  ;;  %v402_v18 = vadd.f32 %v401_v52, %v337_v8  ;;  %v417_v27 = vadd.f32 %v416_v59, %v338_v13  ;;  %v10684_v10 = vld [vmem:[#allocation33_spill] sm:$0xff]  ;;  %v10685_v6 = vld [vmem:[#allocation34_spill] sm:$0xff]  ;;  %v10687_v39 = vld [vmem:[#allocation79_spill] sm:$0xff] }
  0x69   :  { %v432_v61 = vadd.f32 %v431_v14, %v339_v63  ;;  %v353_v7 = vadd.f32 %v10685_v6, %v10684_v10  ;;  %v354_v41 = vadd.f32 %v10687_v39, %v10686_v44  ;;  %v388_v36 = vadd.f32 %v387_v25, %v340_v15  ;;  %v10688_v42 = vld [vmem:[#allocation70_spill] sm:$0xff]  ;;  %v10689_v0 = vld [vmem:[#allocation83_spill] sm:$0xff]  ;;  %v10691_v13 = vld [vmem:[#allocation37_spill] sm:$0xff] }
  0x6a   :  { %v355_v51 = vadd.f32 %v10689_v0, %v10688_v42  ;;  %v403_v22 = vadd.f32 %v402_v18, %v341_v4  ;;  %v418_v43 = vadd.f32 %v417_v27, %v342_v28  ;;  %v10690_v8 = vld [vmem:[#allocation35_spill] sm:$0xff]  ;;  %v10692_v33 = vld [vmem:[#allocation36_spill] sm:$0xff]  ;;  %v10693_v30 = vld [vmem:[#allocation38_spill] sm:$0xff]  ;;  %v312_v14 = vadd.f32 %v311_v37, %v3671_v50 }
  0x6b   :  { %v433_v12 = vadd.f32 %v432_v61, %v343_v47  ;;  %v3783_v63 = vadd.f32 %v10691_v13, %v10690_v8  ;;  %v3787_v52 = vadd.f32 %v10693_v30, %v10692_v33  ;;  %v389_v59 = vadd.f32 %v388_v36, %v344_v20  ;;  %v10694_v15 = vld [vmem:[#allocation71_spill] sm:$0xff]  ;;  %v10695_v62 = vld [vmem:[#allocation84_spill] sm:$0xff]  ;;  %v10697_v28 = vld [vmem:[#allocation85_spill] sm:$0xff] }
  0x6c   :  { %v3792_v2 = vadd.f32 %v10695_v62, %v10694_v15  ;;  %v10696_v4 = vld [vmem:[#allocation72_spill] sm:$0xff]  ;;  %v10698_v19 = vld [vmem:[#allocation43_spill] sm:$0xff]  ;;  %v10699_v21 = vld [vmem:[#allocation45_spill] sm:$0xff]  ;;  %v404_v27 = vadd.f32 %v403_v22, %v345_v31  ;;  %v419_v20 = vadd.f32 %v418_v43, %v346_v40  ;;  %v298_v31 = vadd.f32 %v297_v54, %v3675_v1 }
  0x6d   :  { %v3796_v47 = vadd.f32 %v10697_v28, %v10696_v4  ;;  %v3800_v55 = vadd.f32 %v10699_v21, %v10698_v19  ;;  %v10700_v29 = vld [vmem:[#allocation46_spill] sm:$0xff]  ;;  %v10701_v25 = vld [vmem:[#allocation48_spill] sm:$0xff]  ;;  %v434_v61 = vadd.f32 %v433_v12, %v347_v35  ;;  %v10702_v50 = vld [vmem:[#allocation87_spill] sm:$0xff]  ;;  %v390_v43 = vadd.f32 %v389_v59, %v348_v17 }
  0x6e   :  { %v3804_v18 = vadd.f32 %v10701_v25, %v10700_v29  ;;  %v3808_v37 = vadd.f32 %v10702_v50, %v3529_v56  ;;  %v10703_v16 = vld [vmem:[#allocation75_spill] sm:$0xff]  ;;  %v10704_v53 = vld [vmem:[#allocation88_spill] sm:$0xff]  ;;  %v10706_v44 = vld [vmem:[#allocation57_spill] sm:$0xff]  ;;  %v313_v12 = vadd.f32 %v312_v14, %v3679_v48  ;;  %v420_v17 = vadd.f32 %v419_v20, %v350_v3 }
  0x6f   :  { %v3812_v10 = vadd.f32 %v10704_v53, %v10703_v16  ;;  %v10705_v6 = vld [vmem:[#allocation55_spill] sm:$0xff]  ;;  %v10707_v36 = vld [vmem:[#allocation58_spill] sm:$0xff]  ;;  %v10708_v42 = vld [vmem:[#allocation60_spill] sm:$0xff]  ;;  %v435_v59 = vadd.f32 %v434_v61, %v351_v9  ;;  %v391_v53 = vadd.f32 %v390_v43, %v352_v58 }
  0x70   :  { %v3816_v39 = vadd.f32 %v10706_v44, %v10705_v6  ;;  %v3820_v0 = vadd.f32 %v10708_v42, %v10707_v36  ;;  %v10709_v40 = vld [vmem:[#allocation91_spill] sm:$0xff]  ;;  %v10710_v56 = vld [vmem:[#allocation92_spill] sm:$0xff]  ;;  %v10712_v13 = vld [vmem:[#allocation69_spill] sm:$0xff] }
  0x71   :  { %v3825_v35 = vadd.f32 %v10709_v40, %v3551_v34  ;;  %v3829_v22 = vadd.f32 %v10710_v56, %v3553_v23  ;;  %v10711_v8 = vld [vmem:[#allocation68_spill] sm:$0xff]  ;;  %v10713_v30 = vld [vmem:[#allocation73_spill] sm:$0xff]  ;;  %v10714_v15 = vld [vmem:[#allocation74_spill] sm:$0xff]  ;;  %v405_v23 = vadd.f32 %v404_v27, %v349_v45  ;;  %v299_v27 = vadd.f32 %v298_v31, %v3687_v60 }
  0x72   :  { %v3834_v33 = vadd.f32 %v10712_v13, %v10711_v8  ;;  %v3838_v62 = vadd.f32 %v10714_v15, %v10713_v30  ;;  %v10715_v1 = vld [vmem:[#allocation96_spill] sm:$0xff]  ;;  %v10717_v34 = vld [vmem:[#allocation97_spill] sm:$0xff]  ;;  %v3848_v48 = vld [vmem:[#allocation2 + $0x200] sm:$0xff]  ;;  %v314_v60 = vadd.f32 %v313_v12, %v3691_v11 }
  0x73   :  { %v3842_v54 = vadd.f32 %v10715_v1, %v3569_v5  ;;  %v3846_v4 = vadd.f32 %v10717_v34, %v3571_v57  ;;  %10719 = vst [vmem:[#allocation12_spill] sm:$0xff] %v3848_v48  ;;  %v10720_v14 = vld [vmem:[#allocation76_spill] sm:$0xff]  ;;  %v10721_v28 = vld [vmem:[#allocation89_spill] sm:$0xff]  ;;  %v10723_v21 = vld [vmem:[#allocation82_spill] sm:$0xff]  ;;  %v421_v1 = vadd.f32 %v420_v17, %v354_v41  ;;  %v436_v34 = vadd.f32 %v435_v59, %v355_v51 }
  0x74   :  { %v3852_v19 = vadd.f32 %v10721_v28, %v10720_v14  ;;  %v10724_v29 = vld [vmem:[#allocation93_spill] sm:$0xff]  ;;  %v10726_v5 = vld [vmem:[#allocation98_spill] sm:$0xff]  ;;  %v3866_v45 = vld [vmem:[#allocation2 + $0x208] sm:$0xff] }
  0x75   :  { %10716 = vst [vmem:[#allocation11_spill] sm:$0xff] %v3842_v54  ;;  %10718 = vst [vmem:[#allocation15_spill] sm:$0xff] %v3846_v4  ;;  %v3856_v25 = vadd.f32 %v10724_v29, %v10723_v21  ;;  %v3860_v50 = vadd.f32 %v10726_v5, %v3573_v49  ;;  %v10728_v57 = vld [vmem:[#allocation102_spill] sm:$0xff]  ;;  %v3868_v3 = vld [vmem:[#allocation2 + $0x210] sm:$0xff]  ;;  %v3879_v49 = vadd.f32 %v3633_v46, %v3591_v26 }
  0x76   :  { %10722 = vst [vmem:[#allocation16_spill] sm:$0xff] %v3852_v19  ;;  %v3864_v16 = vadd.f32 %v10728_v57, %v3587_v24  ;;  %10730 = vst [vmem:[#allocation47_spill] sm:$0xff] %v3866_v45  ;;  %v3870_v9 = vld [vmem:[#allocation2 + $0x218] sm:$0xff]  ;;  %v10733_v20 = vld [vmem:[#allocation103_spill] sm:$0xff] }
  0x77   :  { %10725 = vst [vmem:[#allocation40_spill] sm:$0xff] %v3856_v25  ;;  %10727 = vst [vmem:[#allocation44_spill] sm:$0xff] %v3860_v50  ;;  %v3875_v61 = vadd.f32 %v10733_v20, %v3589_v32  ;;  %v3881_v6 = vld [vmem:[#allocation2 + $0x220] sm:$0xff]  ;;  %v3883_v24 = vld [vmem:[#allocation2 + $0x228] sm:$0xff] }
  0x78   :  { %10729 = vst [vmem:[#allocation41_spill] sm:$0xff] %v3864_v16  ;;  %10731 = vst [vmem:[#allocation13_spill] sm:$0xff] %v3868_v3  ;;  %v3885_v44 = vld [vmem:[#allocation2 + $0x230] sm:$0xff]  ;;  %v3887_v36 = vld [vmem:[#allocation5 + $0x200] sm:$0xff] }
  0x79   :  { %10732 = vst [vmem:[#allocation18_spill] sm:$0xff] %v3870_v9  ;;  %10734 = vst [vmem:[#allocation14_spill] sm:$0xff] %v3875_v61  ;;  %v3889_v42 = vld [vmem:[#allocation5 + $0x208] sm:$0xff]  ;;  %v10743_v40 = vld [vmem:[#allocation94_spill] sm:$0xff] }
  0x7a   :  { %10735 = vst [vmem:[#allocation20_spill] sm:$0xff] %v3879_v49  ;;  %10736 = vst [vmem:[#allocation49_spill] sm:$0xff] %v3881_v6  ;;  %v10741_v32 = vld [vmem:[#allocation104_spill] sm:$0xff]  ;;  %v10744_v46 = vld [vmem:[#allocation105_spill] sm:$0xff] }
  0x7b   :  { %10737 = vst [vmem:[#allocation51_spill] sm:$0xff] %v3883_v24  ;;  %10738 = vst [vmem:[#allocation50_spill] sm:$0xff] %v3885_v44  ;;  %v3894_v31 = vadd.f32 %v10741_v32, %v3605_v38  ;;  %v3898_v26 = vadd.f32 %v10744_v46, %v10743_v40  ;;  %v10746_v58 = vld [vmem:[#allocation95_spill] sm:$0xff]  ;;  %v10747_v56 = vld [vmem:[#allocation106_spill] sm:$0xff]  ;;  %v406_v38 = vadd.f32 %v405_v23, %v353_v7 }
  0x7c   :  { %10739 = vst [vmem:[#allocation54_spill] sm:$0xff] %v3887_v36  ;;  %10740 = vst [vmem:[#allocation17_spill] sm:$0xff] %v3889_v42  ;;  %v3902_v43 = vadd.f32 %v10747_v56, %v10746_v58  ;;  %v3904_v8 = vld [vmem:[#allocation2 + $0x238] sm:$0xff]  ;;  %v3906_v13 = vld [vmem:[#allocation5 + $0x210] sm:$0xff] }
  0x7d   :  { %10742 = vst [vmem:[#allocation22_spill] sm:$0xff] %v3894_v31  ;;  %10745 = vst [vmem:[#allocation19_spill] sm:$0xff] %v3898_v26  ;;  %v3908_v30 = vld [vmem:[#allocation5 + $0x218] sm:$0xff]  ;;  %v10752_v15 = vld [vmem:[#allocation99_spill] sm:$0xff] }
  0x7e   :  { %10748 = vst [vmem:[#allocation23_spill] sm:$0xff] %v3902_v43  ;;  %10749 = vst [vmem:[#allocation52_spill] sm:$0xff] %v3904_v8  ;;  %v10753_v11 = vld [vmem:[#allocation107_spill] sm:$0xff]  ;;  %v3916_v28 = vld [vmem:[#allocation2 + $0x248] sm:$0xff] }
  0x7f   :  { %10750 = vst [vmem:[#allocation56_spill] sm:$0xff] %v3906_v13  ;;  %10751 = vst [vmem:[#allocation53_spill] sm:$0xff] %v3908_v30  ;;  %v3912_v12 = vadd.f32 %v10753_v11, %v10752_v15  ;;  %v3914_v14 = vld [vmem:[#allocation2 + $0x240] sm:$0xff]  ;;  %v3918_v21 = vld [vmem:[#allocation2 + $0x250] sm:$0xff]  ;;  %v3950_v11 = vmul.f32 %v3887_v36, %v3848_v48 }
  0x80   :  { %10755 = vst [vmem:[#allocation80_spill] sm:$0xff] %v3914_v14  ;;  %10756 = vst [vmem:[#allocation81_spill] sm:$0xff] %v3916_v28  ;;  %v3920_v29 = vld [vmem:[#allocation2 + $0x258] sm:$0xff]  ;;  %v3922_v5 = vld [vmem:[#allocation5 + $0x220] sm:$0xff] }
  0x81   :  { %10754 = vst [vmem:[#allocation59_spill] sm:$0xff] %v3912_v12  ;;  %10757 = vst [vmem:[#allocation86_spill] sm:$0xff] %v3918_v21  ;;  %v3924_v57 = vld [vmem:[#allocation5 + $0x228] sm:$0xff]  ;;  %v3926_v20 = vld [vmem:[#allocation5 + $0x230] sm:$0xff]  ;;  %v3995_v49 = vmul.f32 %v3922_v5, %v3881_v6 }
  0x82   :  { %10758 = vst [vmem:[#allocation90_spill] sm:$0xff] %v3920_v29  ;;  %10759 = vst [vmem:[#allocation21_spill] sm:$0xff] %v3922_v5  ;;  %v10762_v32 = vld [vmem:[#allocation100_spill] sm:$0xff]  ;;  %v10765_v7 = vld [vmem:[#allocation101_spill] sm:$0xff] }
  0x83   :  { %10760 = vst [vmem:[#allocation25_spill] sm:$0xff] %v3924_v57  ;;  %10761 = vst [vmem:[#allocation24_spill] sm:$0xff] %v3926_v20  ;;  %v10763_v40 = vld [vmem:[#allocation108_spill] sm:$0xff]  ;;  %v10766_v41 = vld [vmem:[#allocation109_spill] sm:$0xff] }
  0x84   :  { %v3930_v46 = vadd.f32 %v10763_v40, %v10762_v32  ;;  %v3934_v51 = vadd.f32 %v10766_v41, %v10765_v7  ;;  %v3936_v23 = vld [vmem:[#allocation2 + $0x260] sm:$0xff]  ;;  %v3938_v17 = vld [vmem:[#allocation2 + $0x268] sm:$0xff]  ;;  %v3940_v59 = vld [vmem:[#allocation2 + $0x270] sm:$0xff]  ;;  %v3954_v32 = vmul.f32 %v3889_v42, %v3866_v45  ;;  %v392_v41 = vadd.f32 %v391_v53, %v3783_v63 }
  0x85   :  { %10768 = vst [vmem:[#allocation62_spill] sm:$0xff] %v3936_v23  ;;  %10769 = vst [vmem:[#allocation63_spill] sm:$0xff] %v3938_v17  ;;  %v3942_v58 = vld [vmem:[#allocation5 + $0x238] sm:$0xff]  ;;  %v3944_v56 = vld [vmem:[#allocation5 + $0x240] sm:$0xff]  ;;  %v3980_v63 = vmul.f32 %v3908_v30, %v3870_v9  ;;  %v437_v30 = vadd.f32 %v436_v34, %v3796_v47 }
  0x86   :  { %10764 = vst [vmem:[#allocation26_spill] sm:$0xff] %v3930_v46  ;;  %10767 = vst [vmem:[#allocation61_spill] sm:$0xff] %v3934_v51  ;;  %v3946_v15 = vld [vmem:[#allocation5 + $0x248] sm:$0xff]  ;;  %v10774_v40 = vld [vmem:[#allocation110_spill] sm:$0xff]  ;;  %v4040_v61 = vmul.f32 %v3944_v56, %v3914_v14  ;;  %v393_v50 = vadd.f32 %v392_v41, %v3800_v55 }
  0x87   :  { %10770 = vst [vmem:[#allocation64_spill] sm:$0xff] %v3940_v59  ;;  %10771 = vst [vmem:[#allocation27_spill] sm:$0xff] %v3942_v58  ;;  %v3957_v7 = vadd.f32 %v299_v27, %v10774_v40  ;;  %v3960_v51 = vld [vmem:[#allocation2 + $0x278] sm:$0xff]  ;;  %v3962_v46 = vld [vmem:[#allocation2 + $0x280] sm:$0xff]  ;;  %v3976_v27 = vmul.f32 %v3906_v13, %v3868_v3  ;;  %v3999_v13 = vmul.f32 %v3924_v57, %v3883_v24 }
  0x88   :  { %10772 = vst [vmem:[#allocation28_spill] sm:$0xff] %v3944_v56  ;;  %10773 = vst [vmem:[#allocation29_spill] sm:$0xff] %v3946_v15  ;;  %v3964_v12 = vld [vmem:[#allocation2 + $0x288] sm:$0xff]  ;;  %v3966_v43 = vld [vmem:[#allocation2 + $0x290] sm:$0xff] }
  0x89   :  { %10775 = vst [vmem:[#allocation30_spill] sm:$0xff] %v3957_v7  ;;  %10776 = vst [vmem:[#allocation65_spill] sm:$0xff] %v3960_v51  ;;  %v3968_v26 = vld [vmem:[#allocation5 + $0x250] sm:$0xff]  ;;  %v3970_v36 = vld [vmem:[#allocation5 + $0x258] sm:$0xff] }
  0x8a   :  { %10777 = vst [vmem:[#allocation77_spill] sm:$0xff] %v3964_v12  ;;  %10778 = vst [vmem:[#allocation66_spill] sm:$0xff] %v3968_v26  ;;  %v3972_v48 = vld [vmem:[#allocation5 + $0x260] sm:$0xff]  ;;  %v3985_v7 = vld [vmem:[#allocation2 + $0x298] sm:$0xff]  ;;  %v4052_v16 = vmul.f32 %v3970_v36, %v3920_v29 }
  0x8b   :  { %10779 = vst [vmem:[#allocation78_spill] sm:$0xff] %v3970_v36  ;;  %10780 = vst [vmem:[#allocation31_spill] sm:$0xff] %v3972_v48  ;;  %v10781_v53 = vld [vmem:[#allocation111_spill] sm:$0xff]  ;;  %v3987_v42 = vld [vmem:[#allocation5 + $0x268] sm:$0xff]  ;;  %v4071_v36 = vmul.f32 %v3972_v48, %v3936_v23  ;;  %v438_v23 = vadd.f32 %v437_v30, %v3812_v10 }
  0x8c   :  { %v3983_v40 = vadd.f32 %v314_v60, %v10781_v53  ;;  %10783 = vst [vmem:[#allocation33_spill] sm:$0xff] %v3987_v42  ;;  %v3989_v45 = vld [vmem:[#allocation5 + $0x270] sm:$0xff]  ;;  %v3991_v31 = vld [vmem:[#allocation5 + $0x278] sm:$0xff]  ;;  %v4003_v60 = vmul.f32 %v3926_v20, %v3885_v44  ;;  %v407_v53 = vadd.f32 %v406_v38, %v3787_v52  ;;  %v4008_v9 = vld [vmem:[#allocation2 + $0x2a0] sm:$0xff]  ;;  %v4024_v52 = vmul.f32 %v3942_v58, %v3904_v8 }
  0x8d   :  { %10784 = vst [vmem:[#allocation34_spill] sm:$0xff] %v3989_v45  ;;  %10785 = vst [vmem:[#allocation67_spill] sm:$0xff] %v3991_v31  ;;  %v4010_v3 = vld [vmem:[#allocation2 + $0x2a8] sm:$0xff]  ;;  %v4012_v5 = vld [vmem:[#allocation2 + $0x2b0] sm:$0xff]  ;;  %v4044_v58 = vmul.f32 %v3946_v15, %v3916_v28  ;;  %v4048_v8 = vmul.f32 %v3968_v26, %v3918_v21  ;;  %v4075_v55 = vmul.f32 %v3987_v42, %v3938_v17 }
  0x8e   :  { %10782 = vst [vmem:[#allocation32_spill] sm:$0xff] %v3983_v40  ;;  %v422_v40 = vadd.f32 %v421_v1, %v3792_v2  ;;  %10786 = vst [vmem:[#allocation79_spill] sm:$0xff] %v4012_v5  ;;  %v4014_v6 = vld [vmem:[#allocation2 + $0x2b8] sm:$0xff]  ;;  %v4016_v57 = vld [vmem:[#allocation5 + $0x280] sm:$0xff]  ;;  %v4079_v41 = vmul.f32 %v3989_v45, %v3940_v59  ;;  %v4089_v54 = vmul.f32 %v3991_v31, %v3960_v51 }
  0x8f   :  { %10787 = vst [vmem:[#allocation70_spill] sm:$0xff] %v4014_v6  ;;  %10788 = vst [vmem:[#allocation83_spill] sm:$0xff] %v4016_v57  ;;  %v4018_v24 = vld [vmem:[#allocation5 + $0x288] sm:$0xff]  ;;  %v4020_v20 = vld [vmem:[#allocation5 + $0x290] sm:$0xff]  ;;  %v4093_v48 = vmul.f32 %v4016_v57, %v3962_v46  ;;  %v408_v59 = vadd.f32 %v407_v53, %v3804_v18 }
  0x90   :  { %10789 = vst [vmem:[#allocation35_spill] sm:$0xff] %v4018_v24  ;;  %10790 = vst [vmem:[#allocation37_spill] sm:$0xff] %v4020_v20  ;;  %v4026_v2 = vld [vmem:[#allocation2 + $0x2c0] sm:$0xff]  ;;  %v4028_v47 = vld [vmem:[#allocation2 + $0x2c8] sm:$0xff]  ;;  %v4097_v42 = vmul.f32 %v4018_v24, %v3964_v12  ;;  %v4101_v45 = vmul.f32 %v4020_v20, %v3966_v43  ;;  %v423_v17 = vadd.f32 %v422_v40, %v3808_v37 }
  0x91   :  { %10791 = vst [vmem:[#allocation36_spill] sm:$0xff] %v4026_v2  ;;  %10792 = vst [vmem:[#allocation38_spill] sm:$0xff] %v4028_v47  ;;  %v4030_v38 = vld [vmem:[#allocation2 + $0x2d0] sm:$0xff]  ;;  %v4032_v1 = vld [vmem:[#allocation5 + $0x298] sm:$0xff]  ;;  %v394_v40 = vadd.f32 %v393_v50, %v3816_v39 }
  0x92   :  { %10793 = vst [vmem:[#allocation71_spill] sm:$0xff] %v4030_v38  ;;  %10794 = vst [vmem:[#allocation84_spill] sm:$0xff] %v4032_v1  ;;  %v4034_v34 = vld [vmem:[#allocation5 + $0x2a0] sm:$0xff]  ;;  %v4036_v44 = vld [vmem:[#allocation5 + $0x2a8] sm:$0xff]  ;;  %v4114_v24 = vmul.f32 %v4032_v1, %v3985_v7 }
  0x93   :  { %10795 = vst [vmem:[#allocation72_spill] sm:$0xff] %v4034_v34  ;;  %10796 = vst [vmem:[#allocation85_spill] sm:$0xff] %v4036_v44  ;;  %v4055_v25 = vld [vmem:[#allocation2 + $0x2d8] sm:$0xff]  ;;  %v4057_v19 = vld [vmem:[#allocation2 + $0x2e0] sm:$0xff]  ;;  %v4122_v18 = vmul.f32 %v4034_v34, %v4008_v9  ;;  %v4126_v37 = vmul.f32 %v4036_v44, %v4010_v3 }
  0x94   :  { %10797 = vst [vmem:[#allocation43_spill] sm:$0xff] %v4057_v19  ;;  %v4059_v56 = vld [vmem:[#allocation2 + $0x2e8] sm:$0xff]  ;;  %v4061_v14 = vld [vmem:[#allocation2 + $0x2f0] sm:$0xff]  ;;  %v4065_v28 = vld [vmem:[#allocation5 + $0x2b8] sm:$0xff] }
  0x95   :  { %10798 = vst [vmem:[#allocation45_spill] sm:$0xff] %v4059_v56  ;;  %10799 = vst [vmem:[#allocation46_spill] sm:$0xff] %v4061_v14  ;;  %v4063_v15 = vld [vmem:[#allocation5 + $0x2b0] sm:$0xff]  ;;  %v4067_v26 = vld [vmem:[#allocation5 + $0x2c0] sm:$0xff]  ;;  %v4134_v30 = vmul.f32 %v4065_v28, %v4014_v6 }
  0x96   :  { %10800 = vst [vmem:[#allocation48_spill] sm:$0xff] %v4063_v15  ;;  %10801 = vst [vmem:[#allocation87_spill] sm:$0xff] %v4065_v28  ;;  %v4081_v29 = vld [vmem:[#allocation5 + $0x2c8] sm:$0xff]  ;;  %v4083_v21 = vld [vmem:[#allocation5 + $0x2d0] sm:$0xff]  ;;  %v4130_v10 = vmul.f32 %v4063_v15, %v4012_v5  ;;  %v4145_v44 = vmul.f32 %v4067_v26, %v4026_v2  ;;  %v439_v2 = vadd.f32 %v438_v23, %v3829_v22 }
  0x97   :  { %10802 = vst [vmem:[#allocation75_spill] sm:$0xff] %v4067_v26  ;;  %10803 = vst [vmem:[#allocation88_spill] sm:$0xff] %v4081_v29  ;;  %v4085_v4 = vld [vmem:[#allocation5 + $0x2d8] sm:$0xff]  ;;  %v4106_v31 = vld [vmem:[#allocation5 + $0x2e0] sm:$0xff]  ;;  %v4149_v15 = vmul.f32 %v4081_v29, %v4028_v47  ;;  %v4153_v28 = vmul.f32 %v4083_v21, %v4030_v38  ;;  %v409_v38 = vadd.f32 %v408_v59, %v3820_v0 }
  0x98   :  { %10804 = vst [vmem:[#allocation55_spill] sm:$0xff] %v4083_v21  ;;  %10805 = vst [vmem:[#allocation57_spill] sm:$0xff] %v4085_v4  ;;  %v4108_v51 = vld [vmem:[#allocation5 + $0x2e8] sm:$0xff]  ;;  %v4110_v57 = vld [vmem:[#allocation5 + $0x2f0] sm:$0xff]  ;;  %v4163_v5 = vmul.f32 %v4085_v4, %v4055_v25  ;;  %v4167_v26 = vmul.f32 %v4106_v31, %v4057_v19  ;;  %v424_v47 = vadd.f32 %v423_v17, %v3825_v35 }
  0x99   :  { %10806 = vst [vmem:[#allocation58_spill] sm:$0xff] %v4106_v31  ;;  %10807 = vst [vmem:[#allocation60_spill] sm:$0xff] %v4108_v51  ;;  %v4116_v12 = vld [vmem:[#allocation2 + $0x2f8] sm:$0xff]  ;;  %v4137_v53 = vld [vmem:[#allocation2 + $0x300] sm:$0xff]  ;;  %v4171_v29 = vmul.f32 %v4108_v51, %v4059_v56  ;;  %v4175_v21 = vmul.f32 %v4110_v57, %v4061_v14  ;;  %v640_v51 = vadd.f32 %v3995_v49, %v3950_v11 }
  0x9a   :  { %10808 = vst [vmem:[#allocation91_spill] sm:$0xff] %v4110_v57  ;;  %10809 = vst [vmem:[#allocation92_spill] sm:$0xff] %v4116_v12  ;;  %v4118_v20 = vld [vmem:[#allocation5 + $0x2f8] sm:$0xff]  ;;  %v4139_v1 = vld [vmem:[#allocation2 + $0x308] sm:$0xff]  ;;  %v655_v57 = vadd.f32 %v3999_v13, %v3954_v32  ;;  %v670_v0 = vadd.f32 %v4003_v60, %v3976_v27  ;;  %v685_v35 = vadd.f32 %v4024_v52, %v3980_v63 }
  0x9b   :  { %10810 = vst [vmem:[#allocation68_spill] sm:$0xff] %v4118_v20  ;;  %10811 = vst [vmem:[#allocation69_spill] sm:$0xff] %v4137_v53  ;;  %v4141_v34 = vld [vmem:[#allocation2 + $0x310] sm:$0xff]  ;;  %v4155_v6 = vld [vmem:[#allocation5 + $0x300] sm:$0xff]  ;;  %v4182_v4 = vmul.f32 %v4118_v20, %v4116_v12  ;;  %v395_v22 = vadd.f32 %v394_v40, %v3834_v33  ;;  %v641_v63 = vadd.f32 %v640_v51, %v4040_v61 }
  0x9c   :  { %10812 = vst [vmem:[#allocation73_spill] sm:$0xff] %v4139_v1  ;;  %10813 = vst [vmem:[#allocation74_spill] sm:$0xff] %v4141_v34  ;;  %v4157_v39 = vld [vmem:[#allocation5 + $0x308] sm:$0xff]  ;;  %v4159_v50 = vld [vmem:[#allocation5 + $0x310] sm:$0xff]  ;;  %v4205_v49 = vmul.f32 %v4155_v6, %v4137_v53  ;;  %v656_v60 = vadd.f32 %v655_v57, %v4044_v58  ;;  %v671_v52 = vadd.f32 %v670_v0, %v4048_v8 }
  0x9d   :  { %10814 = vst [vmem:[#allocation96_spill] sm:$0xff] %v4155_v6  ;;  %10815 = vst [vmem:[#allocation97_spill] sm:$0xff] %v4157_v39  ;;  %v4184_v31 = vld [vmem:[#allocation2 + $0x318] sm:$0xff]  ;;  %v4197_v23 = vld [vmem:[#allocation2 + $0x320] sm:$0xff]  ;;  %v4209_v13 = vmul.f32 %v4157_v39, %v4139_v1  ;;  %v4213_v11 = vmul.f32 %v4159_v50, %v4141_v34  ;;  %v686_v40 = vadd.f32 %v685_v35, %v4052_v16 }
  0x9e   :  { %10816 = vst [vmem:[#allocation76_spill] sm:$0xff] %v4159_v50  ;;  %10817 = vst [vmem:[#allocation89_spill] sm:$0xff] %v4184_v31  ;;  %v4186_v19 = vld [vmem:[#allocation5 + $0x318] sm:$0xff]  ;;  %v4199_v17 = vld [vmem:[#allocation2 + $0x328] sm:$0xff]  ;;  %v410_v39 = vadd.f32 %v409_v38, %v3838_v62  ;;  %v642_v61 = vadd.f32 %v641_v63, %v4071_v36  ;;  %v657_v8 = vadd.f32 %v656_v60, %v4075_v55 }
  0x9f   :  { %10818 = vst [vmem:[#allocation82_spill] sm:$0xff] %v4186_v19  ;;  %10819 = vst [vmem:[#allocation93_spill] sm:$0xff] %v4197_v23  ;;  %v4201_v59 = vld [vmem:[#allocation2 + $0x330] sm:$0xff]  ;;  %v4215_v32 = vld [vmem:[#allocation5 + $0x320] sm:$0xff]  ;;  %v4230_v53 = vmul.f32 %v4186_v19, %v4184_v31  ;;  %v672_v16 = vadd.f32 %v671_v52, %v4079_v41  ;;  %v687_v62 = vadd.f32 %v686_v40, %v4089_v54 }
  0xa0   :  { %10820 = vst [vmem:[#allocation98_spill] sm:$0xff] %v4199_v17  ;;  %10821 = vst [vmem:[#allocation102_spill] sm:$0xff] %v4201_v59  ;;  %v4217_v33 = vld [vmem:[#allocation5 + $0x328] sm:$0xff]  ;;  %v4219_v27 = vld [vmem:[#allocation5 + $0x330] sm:$0xff]  ;;  %v4249_v38 = vmul.f32 %v4215_v32, %v4197_v23  ;;  %v643_v0 = vadd.f32 %v642_v61, %v4093_v48  ;;  %v658_v35 = vadd.f32 %v657_v8, %v4097_v42 }
  0xa1   :  { %10822 = vst [vmem:[#allocation103_spill] sm:$0xff] %v4215_v32  ;;  %10823 = vst [vmem:[#allocation104_spill] sm:$0xff] %v4217_v33  ;;  %v10825_v1 = vld [vmem:[#allocation11_spill] sm:$0xff]  ;;  %v4232_v20 = vld [vmem:[#allocation2 + $0x338] sm:$0xff]  ;;  %v4253_v36 = vmul.f32 %v4217_v33, %v4199_v17  ;;  %v688_v63 = vadd.f32 %v687_v62, %v4114_v24 }
  0xa2   :  { %10824 = vst [vmem:[#allocation94_spill] sm:$0xff] %v4219_v27  ;;  %v425_v6 = vadd.f32 %v424_v47, %v10825_v1  ;;  %v10826_v50 = vld [vmem:[#allocation15_spill] sm:$0xff]  ;;  %10827 = vst [vmem:[#allocation105_spill] sm:$0xff] %v4232_v20  ;;  %v4234_v12 = vld [vmem:[#allocation5 + $0x338] sm:$0xff]  ;;  %v4257_v1 = vmul.f32 %v4219_v27, %v4201_v59 }
  0xa3   :  { %v440_v34 = vadd.f32 %v439_v2, %v10826_v50  ;;  %10828 = vst [vmem:[#allocation95_spill] sm:$0xff] %v4234_v12  ;;  %v10829_v57 = vld [vmem:[#allocation16_spill] sm:$0xff]  ;;  %v4241_v58 = vld [vmem:[#allocation2 + $0x340] sm:$0xff]  ;;  %v4245_v47 = vld [vmem:[#allocation2 + $0x350] sm:$0xff]  ;;  %v4282_v48 = vmul.f32 %v4234_v12, %v4232_v20 }
  0xa4   :  { %v396_v51 = vadd.f32 %v395_v22, %v10829_v57  ;;  %10830 = vst [vmem:[#allocation106_spill] sm:$0xff] %v4241_v58  ;;  %v4243_v2 = vld [vmem:[#allocation2 + $0x348] sm:$0xff]  ;;  %10832 = vst [vmem:[#allocation107_spill] sm:$0xff] %v4245_v47  ;;  %v4259_v54 = vld [vmem:[#allocation2 + $0x358] sm:$0xff]  ;;  %v673_v22 = vadd.f32 %v672_v16, %v4101_v45 }
  0xa5   :  { %10831 = vst [vmem:[#allocation99_spill] sm:$0xff] %v4243_v2  ;;  %10833 = vst [vmem:[#allocation100_spill] sm:$0xff] %v4259_v54  ;;  %v4261_v55 = vld [vmem:[#allocation5 + $0x340] sm:$0xff]  ;;  %v4263_v41 = vld [vmem:[#allocation5 + $0x348] sm:$0xff] }
  0xa6   :  { %10834 = vst [vmem:[#allocation108_spill] sm:$0xff] %v4261_v55  ;;  %10835 = vst [vmem:[#allocation101_spill] sm:$0xff] %v4263_v41  ;;  %v4265_v50 = vld [vmem:[#allocation5 + $0x350] sm:$0xff]  ;;  %v10837_v60 = vld [vmem:[#allocation40_spill] sm:$0xff]  ;;  %v4305_v12 = vmul.f32 %v4261_v55, %v4241_v58 }
  0xa7   :  { %10836 = vst [vmem:[#allocation109_spill] sm:$0xff] %v4265_v50  ;;  %v411_v52 = vadd.f32 %v410_v39, %v10837_v60  ;;  %v10838_v40 = vld [vmem:[#allocation44_spill] sm:$0xff]  ;;  %v10839_v27 = vld [vmem:[#allocation41_spill] sm:$0xff]  ;;  %v4274_v33 = vld [vmem:[#allocation2 + $0x360] sm:$0xff]  ;;  %v674_v39 = vadd.f32 %v673_v22, %v4130_v10 }
  0xa8   :  { %v426_v57 = vadd.f32 %v425_v6, %v10838_v40  ;;  %v441_v59 = vadd.f32 %v440_v34, %v10839_v27  ;;  %10840 = vst [vmem:[#allocation110_spill] sm:$0xff] %v4274_v33  ;;  %v4276_v17 = vld [vmem:[#allocation2 + $0x368] sm:$0xff]  ;;  %v4278_v32 = vld [vmem:[#allocation2 + $0x370] sm:$0xff]  ;;  %v4284_v42 = vld [vmem:[#allocation2 + $0x378] sm:$0xff]  ;;  %v644_v6 = vadd.f32 %v643_v0, %v4122_v18  ;;  %v659_v34 = vadd.f32 %v658_v35, %v4126_v37 }
  0xa9   :  { %10841 = vst [vmem:[#allocation111_spill] sm:$0xff] %v4276_v17  ;;  %10842 = vst [vmem:[#allocation11_spill] sm:$0xff] %v4278_v32  ;;  %v4286_v45 = vld [vmem:[#allocation5 + $0x358] sm:$0xff]  ;;  %v4288_v24 = vld [vmem:[#allocation5 + $0x360] sm:$0xff]  ;;  %v689_v27 = vadd.f32 %v688_v63, %v4134_v30  ;;  %v4309_v18 = vmul.f32 %v4263_v41, %v4243_v2  ;;  %v4313_v37 = vmul.f32 %v4265_v50, %v4245_v47 }
  0xaa   :  { %10843 = vst [vmem:[#allocation15_spill] sm:$0xff] %v4284_v42  ;;  %10844 = vst [vmem:[#allocation16_spill] sm:$0xff] %v4286_v45  ;;  %v10846_v61 = vld [vmem:[#allocation14_spill] sm:$0xff]  ;;  %v4295_v16 = vld [vmem:[#allocation2 + $0x380] sm:$0xff]  ;;  %v645_v0 = vadd.f32 %v644_v6, %v4145_v44  ;;  %v660_v35 = vadd.f32 %v659_v34, %v4149_v15  ;;  %v675_v22 = vadd.f32 %v674_v39, %v4153_v28 }
  0xab   :  { %10845 = vst [vmem:[#allocation40_spill] sm:$0xff] %v4288_v24  ;;  %v397_v8 = vadd.f32 %v396_v51, %v10846_v61  ;;  %10847 = vst [vmem:[#allocation44_spill] sm:$0xff] %v4295_v16  ;;  %v4297_v62 = vld [vmem:[#allocation5 + $0x368] sm:$0xff]  ;;  %v4299_v60 = vld [vmem:[#allocation5 + $0x370] sm:$0xff]  ;;  %v690_v63 = vadd.f32 %v689_v27, %v4163_v5  ;;  %v4342_v28 = vmul.f32 %v4286_v45, %v4259_v54 }
  0xac   :  { %10848 = vst [vmem:[#allocation41_spill] sm:$0xff] %v4297_v62  ;;  %10849 = vst [vmem:[#allocation14_spill] sm:$0xff] %v4299_v60  ;;  %v4301_v40 = vld [vmem:[#allocation5 + $0x378] sm:$0xff]  ;;  %v4315_v10 = vld [vmem:[#allocation2 + $0x388] sm:$0xff] }
  0xad   :  { %10850 = vst [vmem:[#allocation112_spill] sm:$0xff] %v4301_v40  ;;  %10851 = vst [vmem:[#allocation113_spill] sm:$0xff] %v4315_v10  ;;  %v4317_v30 = vld [vmem:[#allocation2 + $0x390] sm:$0xff]  ;;  %v4319_v51 = vld [vmem:[#allocation2 + $0x398] sm:$0xff]  ;;  %v4364_v6 = vmul.f32 %v4301_v40, %v4284_v42  ;;  %v676_v40 = vadd.f32 %v675_v22, %v4175_v21  ;;  %v691_v42 = vadd.f32 %v690_v63, %v4182_v4 }
  0xae   :  { %10852 = vst [vmem:[#allocation114_spill] sm:$0xff] %v4317_v30  ;;  %10853 = vst [vmem:[#allocation115_spill] sm:$0xff] %v4319_v51  ;;  %v10854_v61 = vld [vmem:[#allocation20_spill] sm:$0xff]  ;;  %v10855_v2 = vld [vmem:[#allocation22_spill] sm:$0xff] }
  0xaf   :  { %v412_v41 = vadd.f32 %v411_v52, %v10854_v61  ;;  %v427_v55 = vadd.f32 %v426_v57, %v10855_v2  ;;  %v10856_v50 = vld [vmem:[#allocation19_spill] sm:$0xff]  ;;  %v4330_v20 = vld [vmem:[#allocation2 + $0x3a8] sm:$0xff]  ;;  %v4332_v23 = vld [vmem:[#allocation2 + $0x3b0] sm:$0xff]  ;;  %v4356_v52 = vmul.f32 %v4297_v62, %v4276_v17  ;;  %v4360_v57 = vmul.f32 %v4299_v60, %v4278_v32  ;;  %10866 = vst [vmem:[#allocation122_spill] sm:$0xff] %v4364_v6 }
  0xb0   :  { %v442_v47 = vadd.f32 %v441_v59, %v10856_v50  ;;  %v4328_v58 = vld [vmem:[#allocation2 + $0x3a0] sm:$0xff]  ;;  %10858 = vst [vmem:[#allocation22_spill] sm:$0xff] %v4330_v20  ;;  %10859 = vst [vmem:[#allocation19_spill] sm:$0xff] %v4332_v23  ;;  %v4336_v44 = vld [vmem:[#allocation5 + $0x388] sm:$0xff]  ;;  %v4352_v50 = vmul.f32 %v4288_v24, %v4274_v33  ;;  %v646_v60 = vadd.f32 %v645_v0, %v4167_v26 }
  0xb1   :  { %10857 = vst [vmem:[#allocation20_spill] sm:$0xff] %v4328_v58  ;;  %v4334_v19 = vld [vmem:[#allocation5 + $0x380] sm:$0xff]  ;;  %10861 = vst [vmem:[#allocation117_spill] sm:$0xff] %v4336_v44  ;;  %v4338_v15 = vld [vmem:[#allocation5 + $0x390] sm:$0xff]  ;;  %v661_v32 = vadd.f32 %v660_v35, %v4171_v29  ;;  %v4405_v4 = vmul.f32 %v4336_v44, %v4315_v10 }
  0xb2   :  { %10860 = vst [vmem:[#allocation116_spill] sm:$0xff] %v4334_v19  ;;  %10862 = vst [vmem:[#allocation118_spill] sm:$0xff] %v4338_v15  ;;  %v4344_v5 = vld [vmem:[#allocation2 + $0x3b8] sm:$0xff]  ;;  %v4348_v59 = vld [vmem:[#allocation5 + $0x3a0] sm:$0xff]  ;;  %v4401_v21 = vmul.f32 %v4334_v19, %v4295_v16  ;;  %v4409_v29 = vmul.f32 %v4338_v15, %v4317_v30 }
  0xb3   :  { %10863 = vst [vmem:[#allocation119_spill] sm:$0xff] %v4344_v5  ;;  %v4346_v2 = vld [vmem:[#allocation5 + $0x398] sm:$0xff]  ;;  %10865 = vst [vmem:[#allocation121_spill] sm:$0xff] %v4348_v59  ;;  %v4366_v34 = vld [vmem:[#allocation2 + $0x3c0] sm:$0xff] }
  0xb4   :  { %10864 = vst [vmem:[#allocation120_spill] sm:$0xff] %v4346_v2  ;;  %10867 = vst [vmem:[#allocation123_spill] sm:$0xff] %v4366_v34  ;;  %v4368_v39 = vld [vmem:[#allocation2 + $0x3c8] sm:$0xff]  ;;  %v4370_v27 = vld [vmem:[#allocation2 + $0x3d0] sm:$0xff]  ;;  %v4428_v44 = vmul.f32 %v4346_v2, %v4319_v51 }
  0xb5   :  { %10868 = vst [vmem:[#allocation124_spill] sm:$0xff] %v4368_v39  ;;  %10869 = vst [vmem:[#allocation125_spill] sm:$0xff] %v4370_v27  ;;  %v4372_v61 = vld [vmem:[#allocation2 + $0x3d8] sm:$0xff]  ;;  %v4374_v24 = vld [vmem:[#allocation5 + $0x3a8] sm:$0xff] }
  0xb6   :  { %10870 = vst [vmem:[#allocation126_spill] sm:$0xff] %v4372_v61  ;;  %10871 = vst [vmem:[#allocation127_spill] sm:$0xff] %v4374_v24  ;;  %v4376_v62 = vld [vmem:[#allocation5 + $0x3b0] sm:$0xff]  ;;  %v4378_v17 = vld [vmem:[#allocation5 + $0x3b8] sm:$0xff] }
  0xb7   :  { %10872 = vst [vmem:[#allocation128_spill] sm:$0xff] %v4376_v62  ;;  %10873 = vst [vmem:[#allocation129_spill] sm:$0xff] %v4378_v17  ;;  %v10874_v33 = vld [vmem:[#allocation23_spill] sm:$0xff]  ;;  %v4389_v31 = vld [vmem:[#allocation2 + $0x3e8] sm:$0xff] }
  0xb8   :  { %v4385_v45 = vadd.f32 %v397_v8, %v10874_v33  ;;  %v4387_v54 = vld [vmem:[#allocation2 + $0x3e0] sm:$0xff]  ;;  %10877 = vst [vmem:[#allocation131_spill] sm:$0xff] %v4389_v31  ;;  %v4391_v14 = vld [vmem:[#allocation2 + $0x3f0] sm:$0xff]  ;;  %v4393_v56 = vld [vmem:[#allocation2 + $0x3f8] sm:$0xff] }
  0xb9   :  { %10876 = vst [vmem:[#allocation130_spill] sm:$0xff] %v4387_v54  ;;  %10878 = vst [vmem:[#allocation132_spill] sm:$0xff] %v4391_v14  ;;  %v4395_v6 = vld [vmem:[#allocation5 + $0x3c0] sm:$0xff]  ;;  %v4397_v26 = vld [vmem:[#allocation5 + $0x3c8] sm:$0xff] }
  0xba   :  { %10875 = vst [vmem:[#allocation23_spill] sm:$0xff] %v4385_v45  ;;  %10879 = vst [vmem:[#allocation133_spill] sm:$0xff] %v4393_v56  ;;  %v10882_v33 = vld [vmem:[#allocation59_spill] sm:$0xff]  ;;  %v10884_v0 = vld [vmem:[#allocation26_spill] sm:$0xff] }
  0xbb   :  { %10880 = vst [vmem:[#allocation134_spill] sm:$0xff] %v4395_v6  ;;  %10881 = vst [vmem:[#allocation135_spill] sm:$0xff] %v4397_v26  ;;  %v4412_v8 = vadd.f32 %v412_v41, %v10882_v33  ;;  %v4415_v35 = vadd.f32 %v427_v55, %v10884_v0  ;;  %v10886_v22 = vld [vmem:[#allocation61_spill] sm:$0xff]  ;;  %v4422_v19 = vld [vmem:[#allocation5 + $0x3d8] sm:$0xff]  ;;  %v4442_v55 = vmul.f32 %v4374_v24, %v4330_v20 }
  0xbc   :  { %v4418_v63 = vadd.f32 %v442_v47, %v10886_v22  ;;  %v4420_v45 = vld [vmem:[#allocation5 + $0x3d0] sm:$0xff]  ;;  %10889 = vst [vmem:[#allocation137_spill] sm:$0xff] %v4422_v19  ;;  %v4424_v16 = vld [vmem:[#allocation5 + $0x3e0] sm:$0xff]  ;;  %v4430_v15 = vld [vmem:[#allocation5 + $0x3e8] sm:$0xff]  ;;  %v4438_v47 = vmul.f32 %v4348_v59, %v4328_v58  ;;  %v4446_v0 = vmul.f32 %v4376_v62, %v4332_v23  ;;  %v4450_v22 = vmul.f32 %v4378_v17, %v4344_v5 }
  0xbd   :  { %10883 = vst [vmem:[#allocation59_spill] sm:$0xff] %v4412_v8  ;;  %10885 = vst [vmem:[#allocation26_spill] sm:$0xff] %v4415_v35  ;;  %v4432_v41 = vld [vmem:[#allocation5 + $0x3f0] sm:$0xff]  ;;  %v4434_v33 = vld [vmem:[#allocation5 + $0x3f8] sm:$0xff]  ;;  %v662_v35 = vadd.f32 %v661_v32, %v4209_v13  ;;  %v677_v8 = vadd.f32 %v676_v40, %v4213_v11  ;;  %v692_v59 = vadd.f32 %v691_v42, %v4230_v53 }
  0xbe   :  { %10887 = vst [vmem:[#allocation61_spill] sm:$0xff] %v4418_v63  ;;  %10888 = vst [vmem:[#allocation136_spill] sm:$0xff] %v4420_v45  ;;  %v647_v63 = vadd.f32 %v646_v60, %v4205_v49  ;;  %v4458_v24 = vmul.f32 %v4395_v6, %v4366_v34  ;;  %v4462_v62 = vmul.f32 %v4397_v26, %v4368_v39  ;;  %v10899_v42 = vld [vmem:[#allocation12_spill] sm:$0xff]  ;;  %v10900_v60 = vld [vmem:[#allocation54_spill] sm:$0xff] }
  0xbf   :  { %10890 = vst [vmem:[#allocation138_spill] sm:$0xff] %v4424_v16  ;;  %10891 = vst [vmem:[#allocation139_spill] sm:$0xff] %v4430_v15  ;;  %v4466_v17 = vmul.f32 %v4420_v45, %v4370_v27  ;;  %v4470_v49 = vmul.f32 %v4422_v19, %v4372_v61  ;;  %v4474_v13 = vmul.f32 %v4424_v16, %v4387_v54  ;;  %v10901_v19 = vld [vmem:[#allocation47_spill] sm:$0xff]  ;;  %v10902_v61 = vld [vmem:[#allocation17_spill] sm:$0xff] }
  0xc0   :  { %10892 = vst [vmem:[#allocation140_spill] sm:$0xff] %v4432_v41  ;;  %10893 = vst [vmem:[#allocation141_spill] sm:$0xff] %v4434_v33  ;;  %v4478_v53 = vmul.f32 %v4430_v15, %v4389_v31  ;;  %v4482_v11 = vmul.f32 %v4432_v41, %v4391_v14  ;;  %v4486_v32 = vmul.f32 %v4434_v33, %v4393_v56  ;;  %v10903_v16 = vld [vmem:[#allocation13_spill] sm:$0xff]  ;;  %v10904_v54 = vld [vmem:[#allocation56_spill] sm:$0xff] }
  0xc1   :  { %10894 = vst [vmem:[#allocation142_spill] sm:$0xff] %v4470_v49  ;;  %10895 = vst [vmem:[#allocation143_spill] sm:$0xff] %v4474_v13  ;;  %v704_v40 = vadd.f32 %v10900_v60, %v10899_v42  ;;  %v705_v45 = vadd.f32 %v10902_v61, %v10901_v19  ;;  %v706_v27 = vadd.f32 %v10904_v54, %v10903_v16  ;;  %v10905_v26 = vld [vmem:[#allocation18_spill] sm:$0xff]  ;;  %v10906_v15 = vld [vmem:[#allocation53_spill] sm:$0xff] }
  0xc2   :  { %10896 = vst [vmem:[#allocation144_spill] sm:$0xff] %v4478_v53  ;;  %10897 = vst [vmem:[#allocation145_spill] sm:$0xff] %v4482_v11  ;;  %v707_v31 = vadd.f32 %v10906_v15, %v10905_v26  ;;  %v648_v39 = vadd.f32 %v647_v63, %v4249_v38  ;;  %v663_v41 = vadd.f32 %v662_v35, %v4253_v36  ;;  %v10907_v56 = vld [vmem:[#allocation49_spill] sm:$0xff]  ;;  %v10909_v60 = vld [vmem:[#allocation51_spill] sm:$0xff] }
  0xc3   :  { %10898 = vst [vmem:[#allocation146_spill] sm:$0xff] %v4486_v32  ;;  %v678_v14 = vadd.f32 %v677_v8, %v4257_v1  ;;  %v693_v33 = vadd.f32 %v692_v59, %v4282_v48  ;;  %v10908_v6 = vld [vmem:[#allocation21_spill] sm:$0xff]  ;;  %v10911_v61 = vld [vmem:[#allocation50_spill] sm:$0xff]  ;;  %v10912_v5 = vld [vmem:[#allocation24_spill] sm:$0xff] }
  0xc4   :  { %v708_v42 = vadd.f32 %v10908_v6, %v10907_v56  ;;  %v10910_v34 = vld [vmem:[#allocation25_spill] sm:$0xff]  ;;  %v710_v54 = vadd.f32 %v10912_v5, %v10911_v61  ;;  %v10913_v16 = vld [vmem:[#allocation52_spill] sm:$0xff]  ;;  %v10914_v23 = vld [vmem:[#allocation27_spill] sm:$0xff] }
  0xc5   :  { %v709_v19 = vadd.f32 %v10910_v34, %v10909_v60  ;;  %v711_v15 = vadd.f32 %v10914_v23, %v10913_v16  ;;  %v10915_v26 = vld [vmem:[#allocation80_spill] sm:$0xff]  ;;  %v10917_v36 = vld [vmem:[#allocation81_spill] sm:$0xff]  ;;  %v10919_v8 = vld [vmem:[#allocation86_spill] sm:$0xff] }
  0xc6   :  { %v10916_v38 = vld [vmem:[#allocation28_spill] sm:$0xff]  ;;  %v10918_v35 = vld [vmem:[#allocation29_spill] sm:$0xff]  ;;  %v10920_v48 = vld [vmem:[#allocation66_spill] sm:$0xff] }
  0xc7   :  { %v712_v63 = vadd.f32 %v10916_v38, %v10915_v26  ;;  %v713_v1 = vadd.f32 %v10918_v35, %v10917_v36  ;;  %v714_v59 = vadd.f32 %v10920_v48, %v10919_v8  ;;  %v10921_v20 = vld [vmem:[#allocation90_spill] sm:$0xff]  ;;  %v10924_v34 = vld [vmem:[#allocation31_spill] sm:$0xff]  ;;  %v10926_v5 = vld [vmem:[#allocation33_spill] sm:$0xff]  ;;  %v649_v36 = vadd.f32 %v648_v39, %v4305_v12 }
  0xc8   :  { %v10922_v56 = vld [vmem:[#allocation78_spill] sm:$0xff]  ;;  %v10925_v32 = vld [vmem:[#allocation63_spill] sm:$0xff]  ;;  %v10927_v11 = vld [vmem:[#allocation64_spill] sm:$0xff]  ;;  %v664_v35 = vadd.f32 %v663_v41, %v4309_v18  ;;  %v679_v8 = vadd.f32 %v678_v14, %v4313_v37 }
  0xc9   :  { %v715_v6 = vadd.f32 %v10922_v56, %v10921_v20  ;;  %v10923_v58 = vld [vmem:[#allocation62_spill] sm:$0xff]  ;;  %v717_v61 = vadd.f32 %v10926_v5, %v10925_v32  ;;  %v10929_v53 = vld [vmem:[#allocation65_spill] sm:$0xff]  ;;  %v10930_v26 = vld [vmem:[#allocation67_spill] sm:$0xff]  ;;  %v694_v20 = vadd.f32 %v693_v33, %v4342_v28 }
  0xca   :  { %v716_v60 = vadd.f32 %v10924_v34, %v10923_v58  ;;  %v10928_v23 = vld [vmem:[#allocation34_spill] sm:$0xff]  ;;  %v719_v38 = vadd.f32 %v10930_v26, %v10929_v53  ;;  %v10931_v48 = vld [vmem:[#allocation83_spill] sm:$0xff]  ;;  %v10932_v56 = vld [vmem:[#allocation77_spill] sm:$0xff] }
  0xcb   :  { %v718_v16 = vadd.f32 %v10928_v23, %v10927_v11  ;;  %v720_v58 = vadd.f32 %v10931_v48, %v3962_v46  ;;  %v10933_v34 = vld [vmem:[#allocation35_spill] sm:$0xff]  ;;  %v10934_v5 = vld [vmem:[#allocation37_spill] sm:$0xff]  ;;  %v10935_v23 = vld [vmem:[#allocation84_spill] sm:$0xff] }
  0xcc   :  { %v721_v32 = vadd.f32 %v10933_v34, %v10932_v56  ;;  %v722_v11 = vadd.f32 %v10934_v5, %v3966_v43  ;;  %v723_v53 = vadd.f32 %v10935_v23, %v3985_v7  ;;  %v10936_v12 = vld [vmem:[#allocation72_spill] sm:$0xff]  ;;  %v10937_v18 = vld [vmem:[#allocation85_spill] sm:$0xff]  ;;  %v10938_v37 = vld [vmem:[#allocation79_spill] sm:$0xff] }
  0xcd   :  { %v724_v39 = vadd.f32 %v10936_v12, %v4008_v9  ;;  %v725_v14 = vadd.f32 %v10937_v18, %v4010_v3  ;;  %v10939_v28 = vld [vmem:[#allocation48_spill] sm:$0xff]  ;;  %v10940_v33 = vld [vmem:[#allocation70_spill] sm:$0xff]  ;;  %v10941_v46 = vld [vmem:[#allocation87_spill] sm:$0xff]  ;;  %v650_v3 = vadd.f32 %v649_v36, %v4352_v50  ;;  %v665_v18 = vadd.f32 %v664_v35, %v4356_v52 }
  0xce   :  { %v726_v41 = vadd.f32 %v10939_v28, %v10938_v37  ;;  %v727_v26 = vadd.f32 %v10941_v46, %v10940_v33  ;;  %v10942_v48 = vld [vmem:[#allocation36_spill] sm:$0xff]  ;;  %v10943_v56 = vld [vmem:[#allocation75_spill] sm:$0xff]  ;;  %v10944_v13 = vld [vmem:[#allocation38_spill] sm:$0xff]  ;;  %v680_v37 = vadd.f32 %v679_v8, %v4360_v57 }
  0xcf   :  { %v728_v34 = vadd.f32 %v10943_v56, %v10942_v48  ;;  %v10945_v43 = vld [vmem:[#allocation88_spill] sm:$0xff]  ;;  %v10946_v2 = vld [vmem:[#allocation71_spill] sm:$0xff]  ;;  %v10948_v9 = vld [vmem:[#allocation57_spill] sm:$0xff] }
  0xd0   :  { %v729_v5 = vadd.f32 %v10945_v43, %v10944_v13  ;;  %v10947_v7 = vld [vmem:[#allocation55_spill] sm:$0xff]  ;;  %v731_v12 = vadd.f32 %v10948_v9, %v4055_v25  ;;  %v10949_v28 = vld [vmem:[#allocation122_spill] sm:$0xff]  ;;  %v10952_v56 = vld [vmem:[#allocation45_spill] sm:$0xff] }
  0xd1   :  { %v730_v23 = vadd.f32 %v10947_v7, %v10946_v2  ;;  %v695_v33 = vadd.f32 %v694_v20, %v10949_v28  ;;  %v10950_v46 = vld [vmem:[#allocation43_spill] sm:$0xff]  ;;  %v10951_v51 = vld [vmem:[#allocation58_spill] sm:$0xff]  ;;  %v10953_v30 = vld [vmem:[#allocation60_spill] sm:$0xff] }
  0xd2   :  { %v732_v48 = vadd.f32 %v10951_v51, %v10950_v46  ;;  %v733_v13 = vadd.f32 %v10953_v30, %v10952_v56  ;;  %v10954_v43 = vld [vmem:[#allocation46_spill] sm:$0xff]  ;;  %v10955_v10 = vld [vmem:[#allocation91_spill] sm:$0xff]  ;;  %v10956_v7 = vld [vmem:[#allocation92_spill] sm:$0xff]  ;;  %v783_v56 = vadd.f32 %v709_v19, %v705_v45 }
  0xd3   :  { %v734_v2 = vadd.f32 %v10955_v10, %v10954_v43  ;;  %v10957_v49 = vld [vmem:[#allocation68_spill] sm:$0xff]  ;;  %v10958_v9 = vld [vmem:[#allocation69_spill] sm:$0xff]  ;;  %v10964_v8 = vld [vmem:[#allocation74_spill] sm:$0xff]  ;;  %v768_v10 = vadd.f32 %v708_v42, %v704_v40  ;;  %v798_v43 = vadd.f32 %v710_v54, %v706_v27 }
  0xd4   :  { %v735_v25 = vadd.f32 %v10957_v49, %v10956_v7  ;;  %v10959_v50 = vld [vmem:[#allocation96_spill] sm:$0xff]  ;;  %v10961_v52 = vld [vmem:[#allocation73_spill] sm:$0xff]  ;;  %v10968_v30 = vld [vmem:[#allocation82_spill] sm:$0xff]  ;;  %v813_v49 = vadd.f32 %v711_v15, %v707_v31  ;;  %v651_v7 = vadd.f32 %v650_v3, %v4401_v21 }
  0xd5   :  { %v4566_v36 = vadd.f32 %v10959_v50, %v10958_v9  ;;  %v10962_v57 = vld [vmem:[#allocation97_spill] sm:$0xff]  ;;  %v10965_v20 = vld [vmem:[#allocation76_spill] sm:$0xff]  ;;  %v666_v9 = vadd.f32 %v665_v18, %v4405_v4  ;;  %v681_v50 = vadd.f32 %v680_v37, %v4409_v29  ;;  %v10971_v40 = vld [vmem:[#allocation98_spill] sm:$0xff] }
  0xd6   :  { %v4570_v35 = vadd.f32 %v10962_v57, %v10961_v52  ;;  %v4574_v51 = vadd.f32 %v10965_v20, %v10964_v8  ;;  %v10967_v28 = vld [vmem:[#allocation89_spill] sm:$0xff]  ;;  %v696_v52 = vadd.f32 %v695_v33, %v4428_v44  ;;  %v769_v57 = vadd.f32 %v768_v10, %v712_v63  ;;  %v10972_v45 = vld [vmem:[#allocation104_spill] sm:$0xff]  ;;  %v10973_v31 = vld [vmem:[#allocation102_spill] sm:$0xff] }
  0xd7   :  { %10960 = vst [vmem:[#allocation12_spill] sm:$0xff] %v4566_v36  ;;  %v4578_v46 = vadd.f32 %v10968_v30, %v10967_v28  ;;  %v799_v8 = vadd.f32 %v798_v43, %v714_v59  ;;  %v814_v20 = vadd.f32 %v813_v49, %v715_v6  ;;  %v10970_v36 = vld [vmem:[#allocation103_spill] sm:$0xff]  ;;  %v4590_v27 = vadd.f32 %v10972_v45, %v10971_v40  ;;  %v10974_v21 = vld [vmem:[#allocation94_spill] sm:$0xff]  ;;  %v10975_v4 = vld [vmem:[#allocation105_spill] sm:$0xff] }
  0xd8   :  { %10963 = vst [vmem:[#allocation54_spill] sm:$0xff] %v4570_v35  ;;  %10966 = vst [vmem:[#allocation47_spill] sm:$0xff] %v4574_v51  ;;  %v784_v35 = vadd.f32 %v783_v56, %v713_v1  ;;  %v10969_v51 = vld [vmem:[#allocation93_spill] sm:$0xff]  ;;  %v4594_v42 = vadd.f32 %v10974_v21, %v10973_v31  ;;  %v10976_v29 = vld [vmem:[#allocation95_spill] sm:$0xff]  ;;  %v770_v44 = vadd.f32 %v769_v57, %v716_v60 }
  0xd9   :  { %v4586_v28 = vadd.f32 %v10970_v36, %v10969_v51  ;;  %v4598_v19 = vadd.f32 %v10976_v29, %v10975_v4  ;;  %v800_v15 = vadd.f32 %v799_v8, %v718_v16  ;;  %v815_v63 = vadd.f32 %v814_v20, %v719_v38  ;;  %v10977_v51 = vld [vmem:[#allocation106_spill] sm:$0xff]  ;;  %v10978_v30 = vld [vmem:[#allocation108_spill] sm:$0xff]  ;;  %v10979_v60 = vld [vmem:[#allocation99_spill] sm:$0xff] }
  0xda   :  { %v785_v54 = vadd.f32 %v784_v35, %v717_v61  ;;  %v652_v1 = vadd.f32 %v651_v7, %v4438_v47  ;;  %v667_v59 = vadd.f32 %v666_v9, %v4442_v55  ;;  %v682_v6 = vadd.f32 %v681_v50, %v4446_v0  ;;  %v10980_v61 = vld [vmem:[#allocation101_spill] sm:$0xff]  ;;  %v10981_v38 = vld [vmem:[#allocation107_spill] sm:$0xff]  ;;  %v10983_v55 = vld [vmem:[#allocation100_spill] sm:$0xff] }
  0xdb   :  { %v697_v3 = vadd.f32 %v696_v52, %v4450_v22  ;;  %v771_v18 = vadd.f32 %v770_v44, %v720_v58  ;;  %v801_v33 = vadd.f32 %v800_v15, %v722_v11  ;;  %v816_v36 = vadd.f32 %v815_v63, %v723_v53  ;;  %v10982_v47 = vld [vmem:[#allocation109_spill] sm:$0xff]  ;;  %v10984_v0 = vld [vmem:[#allocation16_spill] sm:$0xff]  ;;  %v10985_v7 = vld [vmem:[#allocation142_spill] sm:$0xff] }
  0xdc   :  { %v786_v37 = vadd.f32 %v785_v54, %v721_v32  ;;  %v4606_v10 = vadd.f32 %v10978_v30, %v10977_v51  ;;  %v4610_v16 = vadd.f32 %v10980_v61, %v10979_v60  ;;  %v4614_v35 = vadd.f32 %v10982_v47, %v10981_v38  ;;  %v10986_v20 = vld [vmem:[#allocation110_spill] sm:$0xff]  ;;  %v10987_v40 = vld [vmem:[#allocation40_spill] sm:$0xff]  ;;  %v10997_v4 = vld [vmem:[#allocation117_spill] sm:$0xff] }
  0xdd   :  { %v4618_v56 = vadd.f32 %v10984_v0, %v10983_v55  ;;  %v772_v22 = vadd.f32 %v771_v18, %v724_v39  ;;  %v802_v32 = vadd.f32 %v801_v33, %v726_v41  ;;  %v817_v11 = vadd.f32 %v816_v36, %v727_v26  ;;  %v10988_v39 = vld [vmem:[#allocation111_spill] sm:$0xff]  ;;  %v10998_v44 = vld [vmem:[#allocation114_spill] sm:$0xff]  ;;  %v11004_v51 = vld [vmem:[#allocation144_spill] sm:$0xff] }
  0xde   :  { %v787_v58 = vadd.f32 %v786_v37, %v725_v14  ;;  %v653_v53 = vadd.f32 %v652_v1, %v4458_v24  ;;  %v668_v43 = vadd.f32 %v667_v59, %v4462_v62  ;;  %v683_v49 = vadd.f32 %v682_v6, %v4466_v17  ;;  %v10989_v14 = vld [vmem:[#allocation41_spill] sm:$0xff]  ;;  %v10990_v26 = vld [vmem:[#allocation11_spill] sm:$0xff]  ;;  %v10991_v24 = vld [vmem:[#allocation14_spill] sm:$0xff] }
  0xdf   :  { %v698_v9 = vadd.f32 %v697_v3, %v10985_v7  ;;  %v773_v50 = vadd.f32 %v772_v22, %v728_v34  ;;  %v803_v57 = vadd.f32 %v802_v32, %v730_v23  ;;  %v818_v8 = vadd.f32 %v817_v11, %v731_v12  ;;  %v10992_v62 = vld [vmem:[#allocation15_spill] sm:$0xff]  ;;  %v10993_v17 = vld [vmem:[#allocation112_spill] sm:$0xff]  ;;  %v10996_v12 = vld [vmem:[#allocation113_spill] sm:$0xff] }
  0xe0   :  { %v788_v52 = vadd.f32 %v787_v58, %v729_v5  ;;  %v4626_v45 = vadd.f32 %v10987_v40, %v10986_v20  ;;  %v4630_v41 = vadd.f32 %v10989_v14, %v10988_v39  ;;  %v4634_v31 = vadd.f32 %v10991_v24, %v10990_v26  ;;  %v10994_v34 = vld [vmem:[#allocation44_spill] sm:$0xff]  ;;  %v10999_v54 = vld [vmem:[#allocation118_spill] sm:$0xff]  ;;  %v11000_v63 = vld [vmem:[#allocation115_spill] sm:$0xff] }
  0xe1   :  { %v4638_v21 = vadd.f32 %v10993_v17, %v10992_v62  ;;  %v10995_v5 = vld [vmem:[#allocation116_spill] sm:$0xff]  ;;  %v4646_v29 = vadd.f32 %v10997_v4, %v10996_v12  ;;  %v4650_v15 = vadd.f32 %v10999_v54, %v10998_v44  ;;  %v774_v6 = vadd.f32 %v773_v50, %v732_v48  ;;  %v11003_v33 = vld [vmem:[#allocation143_spill] sm:$0xff]  ;;  %v11005_v60 = vld [vmem:[#allocation145_spill] sm:$0xff] }
  0xe2   :  { %v4642_v23 = vadd.f32 %v10995_v5, %v10994_v34  ;;  %v11001_v1 = vld [vmem:[#allocation120_spill] sm:$0xff]  ;;  %v789_v3 = vadd.f32 %v788_v52, %v733_v13  ;;  %v804_v18 = vadd.f32 %v803_v57, %v734_v2  ;;  %v819_v37 = vadd.f32 %v818_v8, %v735_v25  ;;  %v11006_v38 = vld [vmem:[#allocation146_spill] sm:$0xff]  ;;  %v11008_v0 = vld [vmem:[#allocation121_spill] sm:$0xff] }
  0xe3   :  { %v4654_v59 = vadd.f32 %v11001_v1, %v11000_v63  ;;  %v654_v36 = vadd.f32 %v653_v53, %v11003_v33  ;;  %v669_v30 = vadd.f32 %v668_v43, %v11004_v51  ;;  %v684_v61 = vadd.f32 %v683_v49, %v11005_v60  ;;  %v11007_v55 = vld [vmem:[#allocation20_spill] sm:$0xff]  ;;  %v11010_v58 = vld [vmem:[#allocation22_spill] sm:$0xff]  ;;  %v11011_v32 = vld [vmem:[#allocation127_spill] sm:$0xff] }
  0xe4   :  { %v699_v47 = vadd.f32 %v698_v9, %v11006_v38  ;;  %v4662_v22 = vadd.f32 %v11008_v0, %v11007_v55  ;;  %v4666_v11 = vadd.f32 %v11011_v32, %v11010_v58  ;;  %v11013_v48 = vld [vmem:[#allocation19_spill] sm:$0xff]  ;;  %v11014_v13 = vld [vmem:[#allocation128_spill] sm:$0xff]  ;;  %v11017_v53 = vld [vmem:[#allocation129_spill] sm:$0xff]  ;;  %v820_v33 = vadd.f32 %v819_v37, %v4578_v46 }
  0xe5   :  { %11002 = vst [vmem:[#allocation17_spill] sm:$0xff] %v4654_v59  ;;  %v4670_v2 = vadd.f32 %v11014_v13, %v11013_v48  ;;  %v11016_v25 = vld [vmem:[#allocation119_spill] sm:$0xff]  ;;  %v4678_v49 = vld [vmem:[#allocation2 + $0x408] sm:$0xff]  ;;  %v11022_v50 = vld [vmem:[#allocation134_spill] sm:$0xff] }
  0xe6   :  { %11009 = vst [vmem:[#allocation13_spill] sm:$0xff] %v4662_v22  ;;  %11012 = vst [vmem:[#allocation56_spill] sm:$0xff] %v4666_v11  ;;  %v4674_v7 = vadd.f32 %v11017_v53, %v11016_v25  ;;  %v4676_v43 = vld [vmem:[#allocation2 + $0x400] sm:$0xff]  ;;  %v11024_v57 = vld [vmem:[#allocation124_spill] sm:$0xff] }
  0xe7   :  { %11015 = vst [vmem:[#allocation18_spill] sm:$0xff] %v4670_v2  ;;  %11019 = vst [vmem:[#allocation49_spill] sm:$0xff] %v4676_v43  ;;  %v11021_v9 = vld [vmem:[#allocation123_spill] sm:$0xff]  ;;  %v11027_v40 = vld [vmem:[#allocation125_spill] sm:$0xff] }
  0xe8   :  { %11018 = vst [vmem:[#allocation53_spill] sm:$0xff] %v4674_v7  ;;  %11020 = vst [vmem:[#allocation21_spill] sm:$0xff] %v4678_v49  ;;  %v4682_v52 = vadd.f32 %v11022_v50, %v11021_v9  ;;  %v11025_v8 = vld [vmem:[#allocation135_spill] sm:$0xff]  ;;  %v11028_v39 = vld [vmem:[#allocation136_spill] sm:$0xff] }
  0xe9   :  { %v4686_v20 = vadd.f32 %v11025_v8, %v11024_v57  ;;  %v4690_v14 = vadd.f32 %v11028_v39, %v11027_v40  ;;  %v11030_v26 = vld [vmem:[#allocation126_spill] sm:$0xff]  ;;  %v11031_v24 = vld [vmem:[#allocation137_spill] sm:$0xff]  ;;  %v4700_v5 = vld [vmem:[#allocation5 + $0x400] sm:$0xff] }
  0xea   :  { %11023 = vst [vmem:[#allocation51_spill] sm:$0xff] %v4682_v52  ;;  %v4694_v62 = vadd.f32 %v11031_v24, %v11030_v26  ;;  %v4696_v17 = vld [vmem:[#allocation2 + $0x410] sm:$0xff]  ;;  %v4698_v34 = vld [vmem:[#allocation2 + $0x418] sm:$0xff]  ;;  %11035 = vst [vmem:[#allocation80_spill] sm:$0xff] %v4700_v5 }
  0xeb   :  { %11026 = vst [vmem:[#allocation25_spill] sm:$0xff] %v4686_v20  ;;  %11029 = vst [vmem:[#allocation50_spill] sm:$0xff] %v4690_v14  ;;  %v11036_v12 = vld [vmem:[#allocation12_spill] sm:$0xff]  ;;  %v11037_v44 = vld [vmem:[#allocation54_spill] sm:$0xff] }
  0xec   :  { %11032 = vst [vmem:[#allocation24_spill] sm:$0xff] %v4694_v62  ;;  %11033 = vst [vmem:[#allocation52_spill] sm:$0xff] %v4696_v17  ;;  %v775_v4 = vadd.f32 %v774_v6, %v11036_v12  ;;  %v790_v54 = vadd.f32 %v789_v3, %v11037_v44  ;;  %v11038_v63 = vld [vmem:[#allocation47_spill] sm:$0xff]  ;;  %v4708_v60 = vld [vmem:[#allocation2 + $0x428] sm:$0xff] }
  0xed   :  { %11034 = vst [vmem:[#allocation27_spill] sm:$0xff] %v4698_v34  ;;  %v805_v1 = vadd.f32 %v804_v18, %v11038_v63  ;;  %v4706_v51 = vld [vmem:[#allocation2 + $0x420] sm:$0xff]  ;;  %11040 = vst [vmem:[#allocation81_spill] sm:$0xff] %v4708_v60  ;;  %v4710_v38 = vld [vmem:[#allocation2 + $0x430] sm:$0xff] }
  0xee   :  { %11039 = vst [vmem:[#allocation28_spill] sm:$0xff] %v4706_v51  ;;  %11041 = vst [vmem:[#allocation29_spill] sm:$0xff] %v4710_v38  ;;  %v4712_v55 = vld [vmem:[#allocation2 + $0x438] sm:$0xff]  ;;  %v4714_v0 = vld [vmem:[#allocation5 + $0x408] sm:$0xff] }
  0xef   :  { %11042 = vst [vmem:[#allocation86_spill] sm:$0xff] %v4712_v55  ;;  %11043 = vst [vmem:[#allocation66_spill] sm:$0xff] %v4714_v0  ;;  %v4716_v58 = vld [vmem:[#allocation5 + $0x410] sm:$0xff]  ;;  %v4718_v32 = vld [vmem:[#allocation5 + $0x418] sm:$0xff] }
  0xf0   :  { %11044 = vst [vmem:[#allocation90_spill] sm:$0xff] %v4716_v58  ;;  %11045 = vst [vmem:[#allocation78_spill] sm:$0xff] %v4718_v32  ;;  %v11046_v6 = vld [vmem:[#allocation39_spill] sm:$0xff]  ;;  %v11048_v18 = vld [vmem:[#allocation42_spill] sm:$0xff] }
  0xf1   :  { %v4721_v3 = vadd.f32 %v654_v36, %v11046_v6  ;;  %v4724_v48 = vadd.f32 %v669_v30, %v11048_v18  ;;  %v11050_v46 = vld [vmem:[#allocation30_spill] sm:$0xff]  ;;  %v11052_v13 = vld [vmem:[#allocation32_spill] sm:$0xff]  ;;  %v4732_v53 = vld [vmem:[#allocation2 + $0x440] sm:$0xff] }
  0xf2   :  { %v4727_v37 = vadd.f32 %v684_v61, %v11050_v46  ;;  %v4730_v25 = vadd.f32 %v699_v47, %v11052_v13  ;;  %11054 = vst [vmem:[#allocation64_spill] sm:$0xff] %v4732_v53  ;;  %v4734_v9 = vld [vmem:[#allocation2 + $0x448] sm:$0xff]  ;;  %v4736_v50 = vld [vmem:[#allocation2 + $0x450] sm:$0xff]  ;;  %v4738_v57 = vld [vmem:[#allocation2 + $0x458] sm:$0xff] }
  0xf3   :  { %11047 = vst [vmem:[#allocation62_spill] sm:$0xff] %v4721_v3  ;;  %11049 = vst [vmem:[#allocation31_spill] sm:$0xff] %v4724_v48  ;;  %v4740_v8 = vld [vmem:[#allocation5 + $0x420] sm:$0xff]  ;;  %v4742_v36 = vld [vmem:[#allocation5 + $0x428] sm:$0xff]  ;;  %v4788_v48 = vmul.f32 %v4714_v0, %v4678_v49  ;;  %v4792_v3 = vmul.f32 %v4716_v58, %v4696_v17 }
  0xf4   :  { %11051 = vst [vmem:[#allocation63_spill] sm:$0xff] %v4727_v37  ;;  %11053 = vst [vmem:[#allocation33_spill] sm:$0xff] %v4730_v25  ;;  %v4744_v30 = vld [vmem:[#allocation5 + $0x430] sm:$0xff]  ;;  %v11061_v40 = vld [vmem:[#allocation130_spill] sm:$0xff]  ;;  %v4836_v62 = vmul.f32 %v4742_v36, %v4708_v60 }
  0xf5   :  { %11055 = vst [vmem:[#allocation34_spill] sm:$0xff] %v4734_v9  ;;  %11056 = vst [vmem:[#allocation65_spill] sm:$0xff] %v4736_v50  ;;  %v11062_v61 = vld [vmem:[#allocation138_spill] sm:$0xff]  ;;  %v11064_v47 = vld [vmem:[#allocation131_spill] sm:$0xff]  ;;  %v4840_v14 = vmul.f32 %v4744_v30, %v4710_v38 }
  0xf6   :  { %11057 = vst [vmem:[#allocation67_spill] sm:$0xff] %v4738_v57  ;;  %11058 = vst [vmem:[#allocation83_spill] sm:$0xff] %v4740_v8  ;;  %v4748_v39 = vadd.f32 %v11062_v61, %v11061_v40  ;;  %v11065_v26 = vld [vmem:[#allocation139_spill] sm:$0xff]  ;;  %v11067_v12 = vld [vmem:[#allocation132_spill] sm:$0xff] }
  0xf7   :  { %11059 = vst [vmem:[#allocation77_spill] sm:$0xff] %v4742_v36  ;;  %11060 = vst [vmem:[#allocation35_spill] sm:$0xff] %v4744_v30  ;;  %v4752_v24 = vadd.f32 %v11065_v26, %v11064_v47  ;;  %v11068_v44 = vld [vmem:[#allocation140_spill] sm:$0xff]  ;;  %v11070_v6 = vld [vmem:[#allocation133_spill] sm:$0xff] }
  0xf8   :  { %11063 = vst [vmem:[#allocation37_spill] sm:$0xff] %v4748_v39  ;;  %v4756_v63 = vadd.f32 %v11068_v44, %v11067_v12  ;;  %v11071_v18 = vld [vmem:[#allocation141_spill] sm:$0xff]  ;;  %v4762_v13 = vld [vmem:[#allocation2 + $0x460] sm:$0xff]  ;;  %v4764_v25 = vld [vmem:[#allocation2 + $0x468] sm:$0xff]  ;;  %v806_v39 = vadd.f32 %v805_v1, %v4594_v42 }
  0xf9   :  { %11066 = vst [vmem:[#allocation84_spill] sm:$0xff] %v4752_v24  ;;  %v4760_v46 = vadd.f32 %v11071_v18, %v11070_v6  ;;  %11073 = vst [vmem:[#allocation79_spill] sm:$0xff] %v4762_v13  ;;  %v4766_v37 = vld [vmem:[#allocation2 + $0x470] sm:$0xff]  ;;  %v4768_v40 = vld [vmem:[#allocation2 + $0x478] sm:$0xff]  ;;  %v4784_v18 = vmul.f32 %v4700_v5, %v4676_v43  ;;  %v791_v24 = vadd.f32 %v790_v54, %v4590_v27 }
  0xfa   :  { %11069 = vst [vmem:[#allocation72_spill] sm:$0xff] %v4756_v63  ;;  %11074 = vst [vmem:[#allocation48_spill] sm:$0xff] %v4764_v25  ;;  %v4770_v61 = vld [vmem:[#allocation5 + $0x438] sm:$0xff]  ;;  %v4772_v47 = vld [vmem:[#allocation5 + $0x440] sm:$0xff]  ;;  %v776_v63 = vadd.f32 %v775_v4, %v4586_v28  ;;  %v821_v5 = vadd.f32 %v820_v33, %v4598_v19  ;;  %v4832_v33 = vmul.f32 %v4740_v8, %v4706_v51 }
  0xfb   :  { %11072 = vst [vmem:[#allocation85_spill] sm:$0xff] %v4760_v46  ;;  %11075 = vst [vmem:[#allocation70_spill] sm:$0xff] %v4766_v37  ;;  %v4774_v26 = vld [vmem:[#allocation5 + $0x448] sm:$0xff]  ;;  %v4776_v12 = vld [vmem:[#allocation5 + $0x450] sm:$0xff]  ;;  %v4796_v46 = vmul.f32 %v4718_v32, %v4698_v34  ;;  %v4844_v20 = vmul.f32 %v4770_v61, %v4712_v55  ;;  %v4862_v30 = vmul.f32 %v4772_v47, %v4732_v53 }
  0xfc   :  { %11076 = vst [vmem:[#allocation87_spill] sm:$0xff] %v4768_v40  ;;  %11077 = vst [vmem:[#allocation36_spill] sm:$0xff] %v4770_v61  ;;  %v4778_v44 = vld [vmem:[#allocation5 + $0x458] sm:$0xff]  ;;  %v4780_v6 = vld [vmem:[#allocation5 + $0x460] sm:$0xff]  ;;  %v4866_v61 = vmul.f32 %v4774_v26, %v4734_v9  ;;  %v4870_v55 = vmul.f32 %v4776_v12, %v4736_v50  ;;  %v792_v50 = vadd.f32 %v791_v24, %v4610_v16 }
  0xfd   :  { %11078 = vst [vmem:[#allocation75_spill] sm:$0xff] %v4772_v47  ;;  %11079 = vst [vmem:[#allocation38_spill] sm:$0xff] %v4774_v26  ;;  %v4802_v43 = vld [vmem:[#allocation2 + $0x480] sm:$0xff]  ;;  %v4804_v0 = vld [vmem:[#allocation2 + $0x488] sm:$0xff]  ;;  %v4874_v38 = vmul.f32 %v4778_v44, %v4738_v57  ;;  %v4884_v47 = vmul.f32 %v4780_v6, %v4762_v13  ;;  %v777_v57 = vadd.f32 %v776_v63, %v4606_v10 }
  0xfe   :  { %11080 = vst [vmem:[#allocation88_spill] sm:$0xff] %v4776_v12  ;;  %11081 = vst [vmem:[#allocation71_spill] sm:$0xff] %v4778_v44  ;;  %v4806_v49 = vld [vmem:[#allocation2 + $0x490] sm:$0xff]  ;;  %v4808_v58 = vld [vmem:[#allocation2 + $0x498] sm:$0xff]  ;;  %v807_v9 = vadd.f32 %v806_v39, %v4614_v35 }
  0xff   :  { %11082 = vst [vmem:[#allocation55_spill] sm:$0xff] %v4780_v6  ;;  %11083 = vst [vmem:[#allocation57_spill] sm:$0xff] %v4804_v0  ;;  %v4810_v17 = vld [vmem:[#allocation5 + $0x468] sm:$0xff]  ;;  %v4812_v32 = vld [vmem:[#allocation5 + $0x470] sm:$0xff]  ;;  %v822_v6 = vadd.f32 %v821_v5, %v4618_v56 }
 0x100   :  { %11084 = vst [vmem:[#allocation122_spill] sm:$0xff] %v4806_v49  ;;  %11085 = vst [vmem:[#allocation43_spill] sm:$0xff] %v4808_v58  ;;  %v4814_v34 = vld [vmem:[#allocation5 + $0x478] sm:$0xff]  ;;  %v4816_v28 = vld [vmem:[#allocation2 + $0x4a0] sm:$0xff]  ;;  %v4888_v26 = vmul.f32 %v4810_v17, %v4764_v25  ;;  %v4892_v12 = vmul.f32 %v4812_v32, %v4766_v37 }
 0x101   :  { %11086 = vst [vmem:[#allocation58_spill] sm:$0xff] %v4810_v17  ;;  %11087 = vst [vmem:[#allocation45_spill] sm:$0xff] %v4812_v32  ;;  %v4818_v27 = vld [vmem:[#allocation2 + $0x4a8] sm:$0xff]  ;;  %v4820_v42 = vld [vmem:[#allocation2 + $0x4b0] sm:$0xff]  ;;  %v4896_v44 = vmul.f32 %v4814_v34, %v4768_v40 }
 0x102   :  { %11088 = vst [vmem:[#allocation60_spill] sm:$0xff] %v4814_v34  ;;  %11089 = vst [vmem:[#allocation46_spill] sm:$0xff] %v4818_v27  ;;  %v4822_v19 = vld [vmem:[#allocation2 + $0x4b8] sm:$0xff]  ;;  %v4824_v4 = vld [vmem:[#allocation5 + $0x480] sm:$0xff] }
 0x103   :  { %11090 = vst [vmem:[#allocation91_spill] sm:$0xff] %v4820_v42  ;;  %11091 = vst [vmem:[#allocation92_spill] sm:$0xff] %v4822_v19  ;;  %v4826_v54 = vld [vmem:[#allocation5 + $0x488] sm:$0xff]  ;;  %v4828_v1 = vld [vmem:[#allocation5 + $0x490] sm:$0xff]  ;;  %v4930_v24 = vmul.f32 %v4824_v4, %v4802_v43 }
 0x104   :  { %11092 = vst [vmem:[#allocation68_spill] sm:$0xff] %v4824_v4  ;;  %11093 = vst [vmem:[#allocation69_spill] sm:$0xff] %v4826_v54  ;;  %v4846_v52 = vld [vmem:[#allocation2 + $0x4c0] sm:$0xff]  ;;  %v4848_v7 = vld [vmem:[#allocation2 + $0x4c8] sm:$0xff]  ;;  %v4934_v63 = vmul.f32 %v4826_v54, %v4804_v0  ;;  %v4938_v53 = vmul.f32 %v4828_v1, %v4806_v49 }
 0x105   :  { %11094 = vst [vmem:[#allocation96_spill] sm:$0xff] %v4828_v1  ;;  %11095 = vst [vmem:[#allocation73_spill] sm:$0xff] %v4846_v52  ;;  %v4850_v2 = vld [vmem:[#allocation2 + $0x4d0] sm:$0xff]  ;;  %v4852_v8 = vld [vmem:[#allocation2 + $0x4d8] sm:$0xff] }
 0x106   :  { %11096 = vst [vmem:[#allocation97_spill] sm:$0xff] %v4852_v8  ;;  %v4854_v51 = vld [vmem:[#allocation5 + $0x498] sm:$0xff]  ;;  %v4856_v36 = vld [vmem:[#allocation5 + $0x4a0] sm:$0xff]  ;;  %v4858_v60 = vld [vmem:[#allocation5 + $0x4a8] sm:$0xff] }
 0x107   :  { %11097 = vst [vmem:[#allocation74_spill] sm:$0xff] %v4854_v51  ;;  %11098 = vst [vmem:[#allocation76_spill] sm:$0xff] %v4856_v36  ;;  %v4876_v11 = vld [vmem:[#allocation5 + $0x4b0] sm:$0xff]  ;;  %v4878_v22 = vld [vmem:[#allocation5 + $0x4b8] sm:$0xff]  ;;  %v4952_v4 = vmul.f32 %v4856_v36, %v4816_v28  ;;  %v4956_v54 = vmul.f32 %v4858_v60, %v4818_v27  ;;  %v808_v27 = vadd.f32 %v807_v9, %v4634_v31 }
 0x108   :  { %11099 = vst [vmem:[#allocation89_spill] sm:$0xff] %v4858_v60  ;;  %11100 = vst [vmem:[#allocation82_spill] sm:$0xff] %v4876_v11  ;;  %v4880_v59 = vld [vmem:[#allocation5 + $0x4c0] sm:$0xff]  ;;  %v4904_v17 = vld [vmem:[#allocation2 + $0x4e8] sm:$0xff]  ;;  %v4960_v1 = vmul.f32 %v4876_v11, %v4820_v42  ;;  %v793_v42 = vadd.f32 %v792_v50, %v4630_v41 }
 0x109   :  { %11101 = vst [vmem:[#allocation93_spill] sm:$0xff] %v4878_v22  ;;  %11102 = vst [vmem:[#allocation103_spill] sm:$0xff] %v4880_v59  ;;  %v4902_v13 = vld [vmem:[#allocation2 + $0x4e0] sm:$0xff]  ;;  %v4906_v25 = vld [vmem:[#allocation2 + $0x4f0] sm:$0xff]  ;;  %v4974_v36 = vmul.f32 %v4880_v59, %v4846_v52  ;;  %v823_v59 = vadd.f32 %v822_v6, %v4638_v21 }
 0x10a   :  { %11103 = vst [vmem:[#allocation98_spill] sm:$0xff] %v4884_v47  ;;  %11104 = vst [vmem:[#allocation104_spill] sm:$0xff] %v4888_v26  ;;  %v4908_v32 = vld [vmem:[#allocation2 + $0x4f8] sm:$0xff]  ;;  %v4910_v37 = vld [vmem:[#allocation5 + $0x4c8] sm:$0xff] }
 0x10b   :  { %11105 = vst [vmem:[#allocation102_spill] sm:$0xff] %v4892_v12  ;;  %11106 = vst [vmem:[#allocation94_spill] sm:$0xff] %v4896_v44  ;;  %v4912_v34 = vld [vmem:[#allocation5 + $0x4d0] sm:$0xff]  ;;  %v4914_v40 = vld [vmem:[#allocation5 + $0x4d8] sm:$0xff]  ;;  %v4942_v44 = vmul.f32 %v4854_v51, %v4808_v58  ;;  %v4964_v51 = vmul.f32 %v4878_v22, %v4822_v19  ;;  %v4978_v60 = vmul.f32 %v4910_v37, %v4848_v7 }
 0x10c   :  { %11107 = vst [vmem:[#allocation105_spill] sm:$0xff] %v4902_v13  ;;  %11108 = vst [vmem:[#allocation95_spill] sm:$0xff] %v4904_v17  ;;  %v4916_v10 = vld [vmem:[#allocation2 + $0x500] sm:$0xff]  ;;  %v4918_v16 = vld [vmem:[#allocation2 + $0x508] sm:$0xff]  ;;  %v4982_v11 = vmul.f32 %v4912_v34, %v4850_v2  ;;  %v4986_v22 = vmul.f32 %v4914_v40, %v4852_v8  ;;  %v778_v19 = vadd.f32 %v777_v57, %v4626_v45 }
 0x10d   :  { %11109 = vst [vmem:[#allocation106_spill] sm:$0xff] %v4906_v25  ;;  %11110 = vst [vmem:[#allocation108_spill] sm:$0xff] %v4908_v32  ;;  %v4920_v35 = vld [vmem:[#allocation2 + $0x510] sm:$0xff]  ;;  %v4922_v56 = vld [vmem:[#allocation2 + $0x518] sm:$0xff] }
 0x10e   :  { %11111 = vst [vmem:[#allocation99_spill] sm:$0xff] %v4910_v37  ;;  %11112 = vst [vmem:[#allocation101_spill] sm:$0xff] %v4912_v34  ;;  %v4924_v5 = vld [vmem:[#allocation5 + $0x4e0] sm:$0xff]  ;;  %v4926_v39 = vld [vmem:[#allocation5 + $0x4e8] sm:$0xff] }
 0x10f   :  { %11113 = vst [vmem:[#allocation107_spill] sm:$0xff] %v4914_v40  ;;  %11114 = vst [vmem:[#allocation109_spill] sm:$0xff] %v4916_v10  ;;  %v4944_v12 = vld [vmem:[#allocation5 + $0x4f0] sm:$0xff]  ;;  %v4946_v26 = vld [vmem:[#allocation5 + $0x4f8] sm:$0xff]  ;;  %v4998_v34 = vmul.f32 %v4924_v5, %v4902_v13  ;;  %v5002_v40 = vmul.f32 %v4926_v39, %v4904_v17 }
 0x110   :  { %11115 = vst [vmem:[#allocation100_spill] sm:$0xff] %v4918_v16  ;;  %11116 = vst [vmem:[#allocation16_spill] sm:$0xff] %v4920_v35  ;;  %v4948_v47 = vld [vmem:[#allocation5 + $0x500] sm:$0xff]  ;;  %v4966_v58 = vld [vmem:[#allocation5 + $0x508] sm:$0xff]  ;;  %v5006_v45 = vmul.f32 %v4944_v12, %v4906_v25  ;;  %v5010_v41 = vmul.f32 %v4946_v26, %v4908_v32 }
 0x111   :  { %11117 = vst [vmem:[#allocation142_spill] sm:$0xff] %v4922_v56  ;;  %11118 = vst [vmem:[#allocation110_spill] sm:$0xff] %v4924_v5  ;;  %v4968_v49 = vld [vmem:[#allocation5 + $0x510] sm:$0xff]  ;;  %v4970_v0 = vld [vmem:[#allocation5 + $0x518] sm:$0xff]  ;;  %v5020_v50 = vmul.f32 %v4948_v47, %v4916_v10  ;;  %v5024_v57 = vmul.f32 %v4966_v58, %v4918_v16  ;;  %v809_v16 = vadd.f32 %v808_v27, %v4650_v15 }
 0x112   :  { %11119 = vst [vmem:[#allocation40_spill] sm:$0xff] %v4926_v39  ;;  %11120 = vst [vmem:[#allocation111_spill] sm:$0xff] %v4944_v12  ;;  %v4992_v52 = vld [vmem:[#allocation2 + $0x520] sm:$0xff]  ;;  %v4994_v37 = vld [vmem:[#allocation2 + $0x528] sm:$0xff]  ;;  %v5028_v6 = vmul.f32 %v4968_v49, %v4920_v35  ;;  %v1069_v35 = vadd.f32 %v4844_v20, %v4796_v46 }
 0x113   :  { %11121 = vst [vmem:[#allocation41_spill] sm:$0xff] %v4946_v26  ;;  %11122 = vst [vmem:[#allocation11_spill] sm:$0xff] %v4948_v47  ;;  %v5012_v31 = vld [vmem:[#allocation2 + $0x530] sm:$0xff]  ;;  %v5014_v21 = vld [vmem:[#allocation2 + $0x538] sm:$0xff]  ;;  %v5032_v26 = vmul.f32 %v4970_v0, %v4922_v56  ;;  %v1024_v47 = vadd.f32 %v4832_v33, %v4784_v18  ;;  %v794_v56 = vadd.f32 %v793_v42, %v4646_v29 }
 0x114   :  { %11123 = vst [vmem:[#allocation14_spill] sm:$0xff] %v4966_v58  ;;  %11124 = vst [vmem:[#allocation15_spill] sm:$0xff] %v4968_v49  ;;  %v5016_v9 = vld [vmem:[#allocation5 + $0x520] sm:$0xff]  ;;  %v5034_v32 = vld [vmem:[#allocation5 + $0x528] sm:$0xff]  ;;  %v1039_v58 = vadd.f32 %v4836_v62, %v4788_v48  ;;  %v1054_v49 = vadd.f32 %v4840_v14, %v4792_v3  ;;  %v1070_v20 = vadd.f32 %v1069_v35, %v4874_v38 }
 0x115   :  { %11125 = vst [vmem:[#allocation112_spill] sm:$0xff] %v4970_v0  ;;  %11126 = vst [vmem:[#allocation44_spill] sm:$0xff] %v4992_v52  ;;  %v5036_v12 = vld [vmem:[#allocation5 + $0x530] sm:$0xff]  ;;  %v5038_v25 = vld [vmem:[#allocation5 + $0x538] sm:$0xff]  ;;  %v779_v0 = vadd.f32 %v778_v19, %v4642_v23  ;;  %v1025_v62 = vadd.f32 %v1024_v47, %v4862_v30  ;;  %v5068_v15 = vmul.f32 %v5016_v9, %v4992_v52 }
 0x116   :  { %11127 = vst [vmem:[#allocation116_spill] sm:$0xff] %v4994_v37  ;;  %11128 = vst [vmem:[#allocation113_spill] sm:$0xff] %v5012_v31  ;;  %v11134_v10 = vld [vmem:[#allocation17_spill] sm:$0xff]  ;;  %v5052_v17 = vld [vmem:[#allocation2 + $0x540] sm:$0xff]  ;;  %v1040_v48 = vadd.f32 %v1039_v58, %v4866_v61  ;;  %v1055_v14 = vadd.f32 %v1054_v49, %v4870_v55  ;;  %v5076_v58 = vmul.f32 %v5036_v12, %v5012_v31 }
 0x117   :  { %11129 = vst [vmem:[#allocation117_spill] sm:$0xff] %v5014_v21  ;;  %11130 = vst [vmem:[#allocation114_spill] sm:$0xff] %v5016_v9  ;;  %v824_v39 = vadd.f32 %v823_v59, %v11134_v10  ;;  %v5054_v18 = vld [vmem:[#allocation2 + $0x548] sm:$0xff]  ;;  %v5060_v3 = vld [vmem:[#allocation2 + $0x550] sm:$0xff]  ;;  %v5072_v59 = vmul.f32 %v5034_v32, %v4994_v37  ;;  %v5080_v49 = vmul.f32 %v5038_v25, %v5014_v21 }
 0x118   :  { %11131 = vst [vmem:[#allocation118_spill] sm:$0xff] %v5034_v32  ;;  %11132 = vst [vmem:[#allocation115_spill] sm:$0xff] %v5036_v12  ;;  %v5062_v23 = vld [vmem:[#allocation2 + $0x558] sm:$0xff]  ;;  %v5064_v29 = vld [vmem:[#allocation5 + $0x540] sm:$0xff] }
 0x119   :  { %11133 = vst [vmem:[#allocation120_spill] sm:$0xff] %v5038_v25  ;;  %11135 = vst [vmem:[#allocation143_spill] sm:$0xff] %v5052_v17  ;;  %v5082_v38 = vld [vmem:[#allocation5 + $0x548] sm:$0xff]  ;;  %v5084_v55 = vld [vmem:[#allocation5 + $0x550] sm:$0xff] }
 0x11a   :  { %11136 = vst [vmem:[#allocation144_spill] sm:$0xff] %v5054_v18  ;;  %11137 = vst [vmem:[#allocation145_spill] sm:$0xff] %v5060_v3  ;;  %v5086_v30 = vld [vmem:[#allocation5 + $0x558] sm:$0xff]  ;;  %v11144_v47 = vld [vmem:[#allocation104_spill] sm:$0xff] }
 0x11b   :  { %11138 = vst [vmem:[#allocation146_spill] sm:$0xff] %v5062_v23  ;;  %11139 = vst [vmem:[#allocation20_spill] sm:$0xff] %v5064_v29  ;;  %v11143_v46 = vld [vmem:[#allocation98_spill] sm:$0xff]  ;;  %v1041_v27 = vadd.f32 %v1040_v48, %v11144_v47  ;;  %v11147_v35 = vld [vmem:[#allocation13_spill] sm:$0xff] }
 0x11c   :  { %11140 = vst [vmem:[#allocation121_spill] sm:$0xff] %v5082_v38  ;;  %11141 = vst [vmem:[#allocation22_spill] sm:$0xff] %v5084_v55  ;;  %v1026_v61 = vadd.f32 %v1025_v62, %v11143_v46  ;;  %v11145_v42 = vld [vmem:[#allocation102_spill] sm:$0xff]  ;;  %v780_v12 = vadd.f32 %v779_v0, %v11147_v35  ;;  %v11148_v31 = vld [vmem:[#allocation56_spill] sm:$0xff] }
 0x11d   :  { %11142 = vst [vmem:[#allocation127_spill] sm:$0xff] %v5086_v30  ;;  %v1056_v19 = vadd.f32 %v1055_v14, %v11145_v42  ;;  %v11146_v33 = vld [vmem:[#allocation94_spill] sm:$0xff]  ;;  %v795_v32 = vadd.f32 %v794_v56, %v11148_v31  ;;  %v11150_v37 = vld [vmem:[#allocation53_spill] sm:$0xff]  ;;  %v5096_v52 = vld [vmem:[#allocation2 + $0x560] sm:$0xff]  ;;  %v1042_v14 = vadd.f32 %v1041_v27, %v4934_v63  ;;  %v5134_v63 = vmul.f32 %v5086_v30, %v5062_v23 }
 0x11e   :  { %v1071_v10 = vadd.f32 %v1070_v20, %v11146_v33  ;;  %v11149_v25 = vld [vmem:[#allocation18_spill] sm:$0xff]  ;;  %v825_v9 = vadd.f32 %v824_v39, %v11150_v37  ;;  %11151 = vst [vmem:[#allocation19_spill] sm:$0xff] %v5096_v52  ;;  %v5098_v5 = vld [vmem:[#allocation2 + $0x568] sm:$0xff]  ;;  %v5100_v13 = vld [vmem:[#allocation2 + $0x570] sm:$0xff]  ;;  %v1027_v48 = vadd.f32 %v1026_v61, %v4930_v24  ;;  %v5122_v24 = vmul.f32 %v5064_v29, %v5052_v17 }
 0x11f   :  { %v810_v21 = vadd.f32 %v809_v16, %v11149_v25  ;;  %11152 = vst [vmem:[#allocation128_spill] sm:$0xff] %v5098_v5  ;;  %11153 = vst [vmem:[#allocation119_spill] sm:$0xff] %v5100_v13  ;;  %v5102_v62 = vld [vmem:[#allocation2 + $0x578] sm:$0xff]  ;;  %v1057_v0 = vadd.f32 %v1056_v19, %v4938_v53  ;;  %v5108_v31 = vld [vmem:[#allocation2 + $0x580] sm:$0xff]  ;;  %v5126_v53 = vmul.f32 %v5082_v38, %v5054_v18 }
 0x120   :  { %11154 = vst [vmem:[#allocation129_spill] sm:$0xff] %v5102_v62  ;;  %v1072_v56 = vadd.f32 %v1071_v10, %v4942_v44  ;;  %11155 = vst [vmem:[#allocation123_spill] sm:$0xff] %v5108_v31  ;;  %v5110_v25 = vld [vmem:[#allocation2 + $0x588] sm:$0xff]  ;;  %v5112_v37 = vld [vmem:[#allocation2 + $0x590] sm:$0xff]  ;;  %v5130_v44 = vmul.f32 %v5084_v55, %v5060_v3  ;;  %v1028_v27 = vadd.f32 %v1027_v48, %v4952_v4 }
 0x121   :  { %11156 = vst [vmem:[#allocation134_spill] sm:$0xff] %v5110_v25  ;;  %11157 = vst [vmem:[#allocation124_spill] sm:$0xff] %v5112_v37  ;;  %v5114_v16 = vld [vmem:[#allocation2 + $0x598] sm:$0xff]  ;;  %v5116_v39 = vld [vmem:[#allocation5 + $0x560] sm:$0xff]  ;;  %v1043_v42 = vadd.f32 %v1042_v14, %v4956_v54  ;;  %v1058_v19 = vadd.f32 %v1057_v0, %v4960_v1 }
 0x122   :  { %11158 = vst [vmem:[#allocation135_spill] sm:$0xff] %v5114_v16  ;;  %11159 = vst [vmem:[#allocation125_spill] sm:$0xff] %v5116_v39  ;;  %v5118_v20 = vld [vmem:[#allocation5 + $0x568] sm:$0xff]  ;;  %v5136_v46 = vld [vmem:[#allocation5 + $0x570] sm:$0xff]  ;;  %v1073_v33 = vadd.f32 %v1072_v56, %v4964_v51 }
 0x123   :  { %11160 = vst [vmem:[#allocation136_spill] sm:$0xff] %v5118_v20  ;;  %11161 = vst [vmem:[#allocation126_spill] sm:$0xff] %v5136_v46  ;;  %v5138_v61 = vld [vmem:[#allocation5 + $0x578] sm:$0xff]  ;;  %v5140_v47 = vld [vmem:[#allocation5 + $0x580] sm:$0xff] }
 0x124   :  { %11162 = vst [vmem:[#allocation137_spill] sm:$0xff] %v5138_v61  ;;  %11163 = vst [vmem:[#allocation12_spill] sm:$0xff] %v5140_v47  ;;  %v11164_v10 = vld [vmem:[#allocation51_spill] sm:$0xff]  ;;  %v11165_v55 = vld [vmem:[#allocation25_spill] sm:$0xff] }
 0x125   :  { %v781_v35 = vadd.f32 %v780_v12, %v11164_v10  ;;  %v796_v3 = vadd.f32 %v795_v32, %v11165_v55  ;;  %v11166_v30 = vld [vmem:[#allocation50_spill] sm:$0xff]  ;;  %v11167_v38 = vld [vmem:[#allocation24_spill] sm:$0xff]  ;;  %v5152_v17 = vld [vmem:[#allocation5 + $0x590] sm:$0xff]  ;;  %v1029_v32 = vadd.f32 %v1028_v27, %v4974_v36  ;;  %v1044_v12 = vadd.f32 %v1043_v42, %v4978_v60 }
 0x126   :  { %v811_v23 = vadd.f32 %v810_v21, %v11166_v30  ;;  %v826_v18 = vadd.f32 %v825_v9, %v11167_v38  ;;  %v5150_v29 = vld [vmem:[#allocation5 + $0x588] sm:$0xff]  ;;  %11169 = vst [vmem:[#allocation47_spill] sm:$0xff] %v5152_v17  ;;  %v5154_v8 = vld [vmem:[#allocation5 + $0x598] sm:$0xff]  ;;  %v5156_v4 = vld [vmem:[#allocation2 + $0x5a0] sm:$0xff]  ;;  %v1059_v21 = vadd.f32 %v1058_v19, %v4982_v11  ;;  %v1074_v9 = vadd.f32 %v1073_v33, %v4986_v22 }
 0x127   :  { %11168 = vst [vmem:[#allocation54_spill] sm:$0xff] %v5150_v29  ;;  %11170 = vst [vmem:[#allocation39_spill] sm:$0xff] %v5154_v8  ;;  %v5158_v54 = vld [vmem:[#allocation2 + $0x5a8] sm:$0xff]  ;;  %v5160_v1 = vld [vmem:[#allocation2 + $0x5b0] sm:$0xff]  ;;  %v5182_v36 = vmul.f32 %v5116_v39, %v5096_v52  ;;  %v5186_v11 = vmul.f32 %v5118_v20, %v5098_v5  ;;  %v5190_v22 = vmul.f32 %v5136_v46, %v5100_v13 }
 0x128   :  { %11171 = vst [vmem:[#allocation42_spill] sm:$0xff] %v5156_v4  ;;  %11172 = vst [vmem:[#allocation30_spill] sm:$0xff] %v5158_v54  ;;  %v5162_v51 = vld [vmem:[#allocation2 + $0x5b8] sm:$0xff]  ;;  %v5168_v38 = vld [vmem:[#allocation2 + $0x5c0] sm:$0xff]  ;;  %v5194_v60 = vmul.f32 %v5138_v61, %v5102_v62  ;;  %v5204_v19 = vmul.f32 %v5140_v47, %v5108_v31  ;;  %v5208_v33 = vmul.f32 %v5150_v29, %v5110_v25 }
 0x129   :  { %11173 = vst [vmem:[#allocation32_spill] sm:$0xff] %v5160_v1  ;;  %11174 = vst [vmem:[#allocation130_spill] sm:$0xff] %v5162_v51  ;;  %v5170_v55 = vld [vmem:[#allocation2 + $0x5c8] sm:$0xff]  ;;  %v5172_v30 = vld [vmem:[#allocation2 + $0x5d0] sm:$0xff]  ;;  %v5212_v10 = vmul.f32 %v5152_v17, %v5112_v37  ;;  %v5216_v61 = vmul.f32 %v5154_v8, %v5114_v16  ;;  %v1030_v47 = vadd.f32 %v1029_v32, %v4998_v34 }
 0x12a   :  { %11175 = vst [vmem:[#allocation138_spill] sm:$0xff] %v5168_v38  ;;  %11176 = vst [vmem:[#allocation131_spill] sm:$0xff] %v5170_v55  ;;  %v5174_v48 = vld [vmem:[#allocation2 + $0x5d8] sm:$0xff]  ;;  %v5176_v14 = vld [vmem:[#allocation5 + $0x5a0] sm:$0xff]  ;;  %v1045_v31 = vadd.f32 %v1044_v12, %v5002_v40  ;;  %v1060_v29 = vadd.f32 %v1059_v21, %v5006_v45  ;;  %v1075_v25 = vadd.f32 %v1074_v9, %v5010_v41 }
 0x12b   :  { %11177 = vst [vmem:[#allocation139_spill] sm:$0xff] %v5172_v30  ;;  %11178 = vst [vmem:[#allocation132_spill] sm:$0xff] %v5174_v48  ;;  %v5178_v0 = vld [vmem:[#allocation5 + $0x5a8] sm:$0xff]  ;;  %v5196_v56 = vld [vmem:[#allocation5 + $0x5b0] sm:$0xff]  ;;  %v5244_v45 = vmul.f32 %v5176_v14, %v5156_v4  ;;  %v1031_v12 = vadd.f32 %v1030_v47, %v5020_v50 }
 0x12c   :  { %11179 = vst [vmem:[#allocation140_spill] sm:$0xff] %v5176_v14  ;;  %11180 = vst [vmem:[#allocation133_spill] sm:$0xff] %v5178_v0  ;;  %v5198_v27 = vld [vmem:[#allocation5 + $0x5b8] sm:$0xff]  ;;  %v5200_v42 = vld [vmem:[#allocation5 + $0x5c0] sm:$0xff]  ;;  %v1046_v21 = vadd.f32 %v1045_v31, %v5024_v57  ;;  %v1061_v9 = vadd.f32 %v1060_v29, %v5028_v6 }
 0x12d   :  { %11181 = vst [vmem:[#allocation141_spill] sm:$0xff] %v5196_v56  ;;  %11182 = vst [vmem:[#allocation17_spill] sm:$0xff] %v5198_v27  ;;  %v5218_v62 = vld [vmem:[#allocation5 + $0x5c8] sm:$0xff]  ;;  %v5220_v46 = vld [vmem:[#allocation5 + $0x5d0] sm:$0xff]  ;;  %v5256_v41 = vmul.f32 %v5198_v27, %v5162_v51 }
 0x12e   :  { %11183 = vst [vmem:[#allocation98_spill] sm:$0xff] %v5200_v42  ;;  %11184 = vst [vmem:[#allocation104_spill] sm:$0xff] %v5208_v33  ;;  %v5222_v13 = vld [vmem:[#allocation5 + $0x5d8] sm:$0xff]  ;;  %v11190_v17 = vld [vmem:[#allocation37_spill] sm:$0xff] }
 0x12f   :  { %11185 = vst [vmem:[#allocation102_spill] sm:$0xff] %v5212_v10  ;;  %11186 = vst [vmem:[#allocation94_spill] sm:$0xff] %v5216_v61  ;;  %v782_v37 = vadd.f32 %v781_v35, %v11190_v17  ;;  %v11191_v20 = vld [vmem:[#allocation84_spill] sm:$0xff]  ;;  %v11193_v39 = vld [vmem:[#allocation85_spill] sm:$0xff]  ;;  %v5248_v17 = vmul.f32 %v5178_v0, %v5158_v54  ;;  %v5274_v35 = vmul.f32 %v5220_v46, %v5172_v30 }
 0x130   :  { %11187 = vst [vmem:[#allocation13_spill] sm:$0xff] %v5218_v62  ;;  %11188 = vst [vmem:[#allocation56_spill] sm:$0xff] %v5220_v46  ;;  %v797_v5 = vadd.f32 %v796_v3, %v11191_v20  ;;  %v11192_v8 = vld [vmem:[#allocation72_spill] sm:$0xff]  ;;  %v827_v52 = vadd.f32 %v826_v18, %v11193_v39  ;;  %v5232_v61 = vld [vmem:[#allocation2 + $0x5e0] sm:$0xff]  ;;  %v5266_v39 = vmul.f32 %v5200_v42, %v5168_v38 }
 0x131   :  { %11189 = vst [vmem:[#allocation18_spill] sm:$0xff] %v5222_v13  ;;  %v812_v16 = vadd.f32 %v811_v23, %v11192_v8  ;;  %11194 = vst [vmem:[#allocation53_spill] sm:$0xff] %v5232_v61  ;;  %v5234_v10 = vld [vmem:[#allocation2 + $0x5e8] sm:$0xff]  ;;  %v5236_v33 = vld [vmem:[#allocation2 + $0x5f0] sm:$0xff]  ;;  %v5252_v8 = vmul.f32 %v5196_v56, %v5160_v1  ;;  %v5270_v20 = vmul.f32 %v5218_v62, %v5170_v55 }
 0x132   :  { %11195 = vst [vmem:[#allocation51_spill] sm:$0xff] %v5234_v10  ;;  %11196 = vst [vmem:[#allocation25_spill] sm:$0xff] %v5236_v33  ;;  %v5238_v34 = vld [vmem:[#allocation2 + $0x5f8] sm:$0xff]  ;;  %v5240_v40 = vld [vmem:[#allocation5 + $0x5e0] sm:$0xff]  ;;  %v5278_v32 = vmul.f32 %v5222_v13, %v5174_v48  ;;  %v1076_v42 = vadd.f32 %v1075_v25, %v5032_v26 }
 0x133   :  { %11197 = vst [vmem:[#allocation50_spill] sm:$0xff] %v5238_v34  ;;  %11198 = vst [vmem:[#allocation24_spill] sm:$0xff] %v5240_v40  ;;  %v5258_v18 = vld [vmem:[#allocation5 + $0x5e8] sm:$0xff]  ;;  %v5260_v3 = vld [vmem:[#allocation5 + $0x5f0] sm:$0xff]  ;;  %v5298_v50 = vmul.f32 %v5240_v40, %v5232_v61 }
 0x134   :  { %11199 = vst [vmem:[#allocation37_spill] sm:$0xff] %v5258_v18  ;;  %11200 = vst [vmem:[#allocation84_spill] sm:$0xff] %v5260_v3  ;;  %v5262_v23 = vld [vmem:[#allocation5 + $0x5f8] sm:$0xff]  ;;  %v11203_v38 = vld [vmem:[#allocation23_spill] sm:$0xff]  ;;  %v5302_v57 = vmul.f32 %v5258_v18, %v5234_v10  ;;  %v5306_v26 = vmul.f32 %v5260_v3, %v5236_v33 }
 0x135   :  { %11201 = vst [vmem:[#allocation72_spill] sm:$0xff] %v5262_v23  ;;  %11202 = vst [vmem:[#allocation85_spill] sm:$0xff] %v5278_v32  ;;  %v5285_v27 = vadd.f32 %v782_v37, %v11203_v38  ;;  %v11205_v62 = vld [vmem:[#allocation59_spill] sm:$0xff]  ;;  %v11207_v46 = vld [vmem:[#allocation26_spill] sm:$0xff] }
 0x136   :  { %v5288_v55 = vadd.f32 %v797_v5, %v11205_v62  ;;  %v5291_v30 = vadd.f32 %v812_v16, %v11207_v46  ;;  %v11209_v51 = vld [vmem:[#allocation61_spill] sm:$0xff]  ;;  %11211 = vst [vmem:[#allocation147_spill] sm:$0xff] %v5298_v50  ;;  %11212 = vst [vmem:[#allocation148_spill] sm:$0xff] %v5302_v57  ;;  %v5310_v5 = vmul.f32 %v5262_v23, %v5238_v34  ;;  %v11216_v29 = vld [vmem:[#allocation80_spill] sm:$0xff] }
 0x137   :  { %11204 = vst [vmem:[#allocation23_spill] sm:$0xff] %v5285_v27  ;;  %v5294_v13 = vadd.f32 %v827_v52, %v11209_v51  ;;  %11213 = vst [vmem:[#allocation149_spill] sm:$0xff] %v5306_v26  ;;  %v11215_v6 = vld [vmem:[#allocation49_spill] sm:$0xff]  ;;  %v11218_v31 = vld [vmem:[#allocation66_spill] sm:$0xff]  ;;  %v1077_v27 = vadd.f32 %v1076_v42, %v5080_v49 }
 0x138   :  { %11206 = vst [vmem:[#allocation59_spill] sm:$0xff] %v5288_v55  ;;  %11208 = vst [vmem:[#allocation26_spill] sm:$0xff] %v5291_v30  ;;  %v1088_v52 = vadd.f32 %v11216_v29, %v11215_v6  ;;  %v11217_v62 = vld [vmem:[#allocation21_spill] sm:$0xff]  ;;  %v11219_v37 = vld [vmem:[#allocation52_spill] sm:$0xff]  ;;  %v1047_v30 = vadd.f32 %v1046_v21, %v5072_v59  ;;  %v1062_v55 = vadd.f32 %v1061_v9, %v5076_v58 }
 0x139   :  { %11210 = vst [vmem:[#allocation61_spill] sm:$0xff] %v5294_v13  ;;  %11214 = vst [vmem:[#allocation150_spill] sm:$0xff] %v5310_v5  ;;  %v1089_v25 = vadd.f32 %v11218_v31, %v11217_v62  ;;  %v11220_v16 = vld [vmem:[#allocation90_spill] sm:$0xff]  ;;  %v11221_v47 = vld [vmem:[#allocation27_spill] sm:$0xff]  ;;  %v1032_v13 = vadd.f32 %v1031_v12, %v5068_v15 }
 0x13a   :  { %v1090_v46 = vadd.f32 %v11220_v16, %v11219_v37  ;;  %v11222_v51 = vld [vmem:[#allocation78_spill] sm:$0xff]  ;;  %v11223_v23 = vld [vmem:[#allocation28_spill] sm:$0xff]  ;;  %v11224_v34 = vld [vmem:[#allocation83_spill] sm:$0xff] }
 0x13b   :  { %v1091_v38 = vadd.f32 %v11222_v51, %v11221_v47  ;;  %v1092_v6 = vadd.f32 %v11224_v34, %v11223_v23  ;;  %v11225_v29 = vld [vmem:[#allocation81_spill] sm:$0xff]  ;;  %v11228_v33 = vld [vmem:[#allocation35_spill] sm:$0xff]  ;;  %v11229_v16 = vld [vmem:[#allocation86_spill] sm:$0xff] }
 0x13c   :  { %v11226_v3 = vld [vmem:[#allocation77_spill] sm:$0xff]  ;;  %v11230_v18 = vld [vmem:[#allocation36_spill] sm:$0xff]  ;;  %v11232_v15 = vld [vmem:[#allocation75_spill] sm:$0xff] }
 0x13d   :  { %v1093_v62 = vadd.f32 %v11226_v3, %v11225_v29  ;;  %v11227_v31 = vld [vmem:[#allocation29_spill] sm:$0xff]  ;;  %v1095_v47 = vadd.f32 %v11230_v18, %v11229_v16  ;;  %v11231_v51 = vld [vmem:[#allocation64_spill] sm:$0xff]  ;;  %v11233_v59 = vld [vmem:[#allocation34_spill] sm:$0xff] }
 0x13e   :  { %v1094_v37 = vadd.f32 %v11228_v33, %v11227_v31  ;;  %v1096_v12 = vadd.f32 %v11232_v15, %v11231_v51  ;;  %v11234_v21 = vld [vmem:[#allocation38_spill] sm:$0xff]  ;;  %v11235_v9 = vld [vmem:[#allocation65_spill] sm:$0xff]  ;;  %v11236_v49 = vld [vmem:[#allocation88_spill] sm:$0xff] }
 0x13f   :  { %v1097_v58 = vadd.f32 %v11234_v21, %v11233_v59  ;;  %v1098_v42 = vadd.f32 %v11236_v49, %v11235_v9  ;;  %v11237_v10 = vld [vmem:[#allocation67_spill] sm:$0xff]  ;;  %v11241_v61 = vld [vmem:[#allocation48_spill] sm:$0xff]  ;;  %v11242_v33 = vld [vmem:[#allocation58_spill] sm:$0xff]  ;;  %v1033_v59 = vadd.f32 %v1032_v13, %v5122_v24  ;;  %v1048_v21 = vadd.f32 %v1047_v30, %v5126_v53 }
 0x140   :  { %v11238_v34 = vld [vmem:[#allocation71_spill] sm:$0xff]  ;;  %v1101_v31 = vadd.f32 %v11242_v33, %v11241_v61  ;;  %v11243_v48 = vld [vmem:[#allocation70_spill] sm:$0xff]  ;;  %v11244_v18 = vld [vmem:[#allocation45_spill] sm:$0xff]  ;;  %v1063_v9 = vadd.f32 %v1062_v55, %v5130_v44 }
 0x141   :  { %v1099_v23 = vadd.f32 %v11238_v34, %v11237_v10  ;;  %v11239_v40 = vld [vmem:[#allocation79_spill] sm:$0xff]  ;;  %v1102_v16 = vadd.f32 %v11244_v18, %v11243_v48  ;;  %v11246_v51 = vld [vmem:[#allocation60_spill] sm:$0xff]  ;;  %v1078_v10 = vadd.f32 %v1077_v27, %v5134_v63  ;;  %v11248_v34 = vld [vmem:[#allocation57_spill] sm:$0xff] }
 0x142   :  { %v11240_v3 = vld [vmem:[#allocation55_spill] sm:$0xff]  ;;  %v11247_v49 = vld [vmem:[#allocation68_spill] sm:$0xff]  ;;  %v11250_v33 = vld [vmem:[#allocation122_spill] sm:$0xff] }
 0x143   :  { %v1100_v29 = vadd.f32 %v11240_v3, %v11239_v40  ;;  %v11245_v56 = vld [vmem:[#allocation87_spill] sm:$0xff]  ;;  %v1104_v40 = vadd.f32 %v11247_v49, %v4802_v43  ;;  %v11249_v3 = vld [vmem:[#allocation69_spill] sm:$0xff]  ;;  %v11251_v1 = vld [vmem:[#allocation96_spill] sm:$0xff] }
 0x144   :  { %v1103_v15 = vadd.f32 %v11246_v51, %v11245_v56  ;;  %v1105_v61 = vadd.f32 %v11249_v3, %v11248_v34  ;;  %v1106_v48 = vadd.f32 %v11251_v1, %v11250_v33  ;;  %v11252_v18 = vld [vmem:[#allocation43_spill] sm:$0xff]  ;;  %v11253_v0 = vld [vmem:[#allocation74_spill] sm:$0xff]  ;;  %v11254_v13 = vld [vmem:[#allocation76_spill] sm:$0xff] }
 0x145   :  { %v1107_v56 = vadd.f32 %v11253_v0, %v11252_v18  ;;  %v1108_v24 = vadd.f32 %v11254_v13, %v4816_v28  ;;  %v11255_v53 = vld [vmem:[#allocation46_spill] sm:$0xff]  ;;  %v11256_v30 = vld [vmem:[#allocation89_spill] sm:$0xff]  ;;  %v11257_v55 = vld [vmem:[#allocation91_spill] sm:$0xff] }
 0x146   :  { %v1109_v44 = vadd.f32 %v11256_v30, %v11255_v53  ;;  %v11258_v63 = vld [vmem:[#allocation82_spill] sm:$0xff]  ;;  %v11259_v51 = vld [vmem:[#allocation92_spill] sm:$0xff]  ;;  %v11260_v43 = vld [vmem:[#allocation93_spill] sm:$0xff]  ;;  %v1034_v53 = vadd.f32 %v1033_v59, %v5182_v36  ;;  %v1049_v30 = vadd.f32 %v1048_v21, %v5186_v11 }
 0x147   :  { %v1110_v27 = vadd.f32 %v11258_v63, %v11257_v55  ;;  %v1111_v49 = vadd.f32 %v11260_v43, %v11259_v51  ;;  %v11261_v54 = vld [vmem:[#allocation73_spill] sm:$0xff]  ;;  %v11262_v34 = vld [vmem:[#allocation103_spill] sm:$0xff]  ;;  %v1064_v55 = vadd.f32 %v1063_v9, %v5190_v22  ;;  %v1079_v63 = vadd.f32 %v1078_v10, %v5194_v60  ;;  %v11268_v43 = vld [vmem:[#allocation110_spill] sm:$0xff] }
 0x148   :  { %v1112_v3 = vadd.f32 %v11262_v34, %v11261_v54  ;;  %v11263_v1 = vld [vmem:[#allocation99_spill] sm:$0xff]  ;;  %v11264_v0 = vld [vmem:[#allocation101_spill] sm:$0xff]  ;;  %v11270_v4 = vld [vmem:[#allocation40_spill] sm:$0xff] }
 0x149   :  { %v1113_v33 = vadd.f32 %v11263_v1, %v4848_v7  ;;  %v1114_v18 = vadd.f32 %v11264_v0, %v4850_v2  ;;  %v11265_v14 = vld [vmem:[#allocation97_spill] sm:$0xff]  ;;  %v11266_v28 = vld [vmem:[#allocation107_spill] sm:$0xff]  ;;  %v11271_v1 = vld [vmem:[#allocation106_spill] sm:$0xff] }
 0x14a   :  { %v1115_v13 = vadd.f32 %v11266_v28, %v11265_v14  ;;  %v11267_v51 = vld [vmem:[#allocation105_spill] sm:$0xff]  ;;  %v11269_v34 = vld [vmem:[#allocation95_spill] sm:$0xff]  ;;  %v11273_v0 = vld [vmem:[#allocation108_spill] sm:$0xff] }
 0x14b   :  { %v1116_v54 = vadd.f32 %v11268_v43, %v11267_v51  ;;  %v1117_v7 = vadd.f32 %v11270_v4, %v11269_v34  ;;  %v11272_v5 = vld [vmem:[#allocation111_spill] sm:$0xff]  ;;  %v11274_v26 = vld [vmem:[#allocation41_spill] sm:$0xff]  ;;  %v11278_v11 = vld [vmem:[#allocation100_spill] sm:$0xff]  ;;  %v1167_v34 = vadd.f32 %v1093_v62, %v1089_v25 }
 0x14c   :  { %v1118_v2 = vadd.f32 %v11272_v5, %v11271_v1  ;;  %v1119_v14 = vadd.f32 %v11274_v26, %v11273_v0  ;;  %v11275_v28 = vld [vmem:[#allocation109_spill] sm:$0xff]  ;;  %v11276_v36 = vld [vmem:[#allocation11_spill] sm:$0xff]  ;;  %v11279_v22 = vld [vmem:[#allocation14_spill] sm:$0xff]  ;;  %v1152_v5 = vadd.f32 %v1092_v6, %v1088_v52  ;;  %v1182_v1 = vadd.f32 %v1094_v37, %v1090_v46 }
 0x14d   :  { %v5390_v59 = vadd.f32 %v11276_v36, %v11275_v28  ;;  %v5394_v21 = vadd.f32 %v11279_v22, %v11278_v11  ;;  %v11281_v60 = vld [vmem:[#allocation16_spill] sm:$0xff]  ;;  %v11282_v9 = vld [vmem:[#allocation15_spill] sm:$0xff]  ;;  %v11284_v51 = vld [vmem:[#allocation142_spill] sm:$0xff]  ;;  %v1197_v26 = vadd.f32 %v1095_v47, %v1091_v38  ;;  %v1035_v0 = vadd.f32 %v1034_v53, %v5204_v19 }
 0x14e   :  { %v5398_v10 = vadd.f32 %v11282_v9, %v11281_v60  ;;  %v11285_v4 = vld [vmem:[#allocation112_spill] sm:$0xff]  ;;  %v11288_v11 = vld [vmem:[#allocation94_spill] sm:$0xff]  ;;  %v1168_v50 = vadd.f32 %v1167_v34, %v1097_v58  ;;  %v1183_v60 = vadd.f32 %v1182_v1, %v1098_v42  ;;  %v11293_v38 = vld [vmem:[#allocation113_spill] sm:$0xff] }
 0x14f   :  { %11277 = vst [vmem:[#allocation49_spill] sm:$0xff] %v5390_v59  ;;  %11280 = vst [vmem:[#allocation80_spill] sm:$0xff] %v5394_v21  ;;  %v5402_v43 = vadd.f32 %v11285_v4, %v11284_v51  ;;  %v11286_v28 = vld [vmem:[#allocation104_spill] sm:$0xff]  ;;  %v11287_v59 = vld [vmem:[#allocation102_spill] sm:$0xff]  ;;  %v1080_v22 = vadd.f32 %v1079_v63, %v11288_v11  ;;  %v1153_v21 = vadd.f32 %v1152_v5, %v1096_v12 }
 0x150   :  { %11283 = vst [vmem:[#allocation21_spill] sm:$0xff] %v5398_v10  ;;  %v1050_v36 = vadd.f32 %v1049_v30, %v11286_v28  ;;  %v1065_v57 = vadd.f32 %v1064_v55, %v11287_v59  ;;  %v1198_v9 = vadd.f32 %v1197_v26, %v1099_v23  ;;  %v11289_v10 = vld [vmem:[#allocation44_spill] sm:$0xff]  ;;  %v11290_v32 = vld [vmem:[#allocation114_spill] sm:$0xff]  ;;  %v11294_v19 = vld [vmem:[#allocation115_spill] sm:$0xff]  ;;  %v1169_v58 = vadd.f32 %v1168_v50, %v1101_v31 }
 0x151   :  { %v5410_v51 = vadd.f32 %v11290_v32, %v11289_v10  ;;  %v11291_v52 = vld [vmem:[#allocation116_spill] sm:$0xff]  ;;  %v11292_v25 = vld [vmem:[#allocation118_spill] sm:$0xff]  ;;  %v5418_v6 = vadd.f32 %v11294_v19, %v11293_v38  ;;  %v11295_v62 = vld [vmem:[#allocation117_spill] sm:$0xff]  ;;  %v1154_v12 = vadd.f32 %v1153_v21, %v1100_v29  ;;  %v1184_v42 = vadd.f32 %v1183_v60, %v1102_v16 }
 0x152   :  { %v5414_v46 = vadd.f32 %v11292_v25, %v11291_v52  ;;  %v11296_v37 = vld [vmem:[#allocation120_spill] sm:$0xff]  ;;  %v1199_v23 = vadd.f32 %v1198_v9, %v1103_v15  ;;  %v1036_v53 = vadd.f32 %v1035_v0, %v5244_v45  ;;  %v1051_v32 = vadd.f32 %v1050_v36, %v5248_v17  ;;  %v11297_v5 = vld [vmem:[#allocation143_spill] sm:$0xff]  ;;  %v11300_v50 = vld [vmem:[#allocation121_spill] sm:$0xff] }
 0x153   :  { %v5422_v47 = vadd.f32 %v11296_v37, %v11295_v62  ;;  %v1066_v30 = vadd.f32 %v1065_v57, %v5252_v8  ;;  %v1081_v55 = vadd.f32 %v1080_v22, %v5256_v41  ;;  %v1155_v63 = vadd.f32 %v1154_v12, %v1104_v40  ;;  %v11298_v34 = vld [vmem:[#allocation20_spill] sm:$0xff]  ;;  %v11301_v16 = vld [vmem:[#allocation145_spill] sm:$0xff]  ;;  %v11302_v45 = vld [vmem:[#allocation22_spill] sm:$0xff] }
 0x154   :  { %v1170_v59 = vadd.f32 %v1169_v58, %v1105_v61  ;;  %v1185_v10 = vadd.f32 %v1184_v42, %v1106_v48  ;;  %v1200_v4 = vadd.f32 %v1199_v23, %v1107_v56  ;;  %v5430_v1 = vadd.f32 %v11298_v34, %v11297_v5  ;;  %v11299_v29 = vld [vmem:[#allocation144_spill] sm:$0xff]  ;;  %v11303_v17 = vld [vmem:[#allocation146_spill] sm:$0xff]  ;;  %v11304_v8 = vld [vmem:[#allocation127_spill] sm:$0xff] }
 0x155   :  { %v5434_v31 = vadd.f32 %v11300_v50, %v11299_v29  ;;  %v5438_v15 = vadd.f32 %v11302_v45, %v11301_v16  ;;  %v5442_v57 = vadd.f32 %v11304_v8, %v11303_v17  ;;  %v1156_v41 = vadd.f32 %v1155_v63, %v1108_v24  ;;  %v11305_v0 = vld [vmem:[#allocation85_spill] sm:$0xff]  ;;  %v11306_v9 = vld [vmem:[#allocation19_spill] sm:$0xff]  ;;  %v11308_v24 = vld [vmem:[#allocation128_spill] sm:$0xff] }
 0x156   :  { %v1171_v40 = vadd.f32 %v1170_v59, %v1109_v44  ;;  %v1186_v61 = vadd.f32 %v1185_v10, %v1110_v27  ;;  %v1201_v48 = vadd.f32 %v1200_v4, %v1111_v49  ;;  %v1037_v56 = vadd.f32 %v1036_v53, %v5266_v39  ;;  %v11307_v52 = vld [vmem:[#allocation125_spill] sm:$0xff]  ;;  %v11309_v44 = vld [vmem:[#allocation136_spill] sm:$0xff]  ;;  %v11310_v49 = vld [vmem:[#allocation119_spill] sm:$0xff] }
 0x157   :  { %v1052_v21 = vadd.f32 %v1051_v32, %v5270_v20  ;;  %v1067_v26 = vadd.f32 %v1066_v30, %v5274_v35  ;;  %v1082_v28 = vadd.f32 %v1081_v55, %v11305_v0  ;;  %v1157_v36 = vadd.f32 %v1156_v41, %v1112_v3  ;;  %v11311_v39 = vld [vmem:[#allocation126_spill] sm:$0xff]  ;;  %v11312_v20 = vld [vmem:[#allocation129_spill] sm:$0xff]  ;;  %v11314_v3 = vld [vmem:[#allocation123_spill] sm:$0xff] }
 0x158   :  { %v1172_v11 = vadd.f32 %v1171_v40, %v1113_v33  ;;  %v1187_v22 = vadd.f32 %v1186_v61, %v1114_v18  ;;  %v1202_v60 = vadd.f32 %v1201_v48, %v1115_v13  ;;  %v5450_v25 = vadd.f32 %v11307_v52, %v11306_v9  ;;  %v11313_v35 = vld [vmem:[#allocation137_spill] sm:$0xff]  ;;  %v11315_v33 = vld [vmem:[#allocation12_spill] sm:$0xff]  ;;  %v11316_v13 = vld [vmem:[#allocation134_spill] sm:$0xff] }
 0x159   :  { %v5454_v27 = vadd.f32 %v11309_v44, %v11308_v24  ;;  %v5458_v38 = vadd.f32 %v11311_v39, %v11310_v49  ;;  %v5462_v19 = vadd.f32 %v11313_v35, %v11312_v20  ;;  %v5466_v18 = vadd.f32 %v11315_v33, %v11314_v3  ;;  %v11317_v62 = vld [vmem:[#allocation54_spill] sm:$0xff]  ;;  %v11318_v12 = vld [vmem:[#allocation124_spill] sm:$0xff]  ;;  %v11319_v58 = vld [vmem:[#allocation47_spill] sm:$0xff] }
 0x15a   :  { %v5470_v37 = vadd.f32 %v11317_v62, %v11316_v13  ;;  %v5474_v42 = vadd.f32 %v11319_v58, %v11318_v12  ;;  %v11320_v23 = vld [vmem:[#allocation135_spill] sm:$0xff]  ;;  %v1158_v30 = vadd.f32 %v1157_v36, %v1116_v54  ;;  %v1173_v55 = vadd.f32 %v1172_v11, %v1117_v7  ;;  %v11324_v5 = vld [vmem:[#allocation148_spill] sm:$0xff]  ;;  %v11325_v29 = vld [vmem:[#allocation149_spill] sm:$0xff] }
 0x15b   :  { %v11321_v53 = vld [vmem:[#allocation39_spill] sm:$0xff]  ;;  %v1188_v63 = vadd.f32 %v1187_v22, %v1118_v2  ;;  %v1203_v59 = vadd.f32 %v1202_v60, %v1119_v14  ;;  %v1053_v34 = vadd.f32 %v1052_v21, %v11324_v5  ;;  %v1068_v50 = vadd.f32 %v1067_v26, %v11325_v29  ;;  %v11326_v16 = vld [vmem:[#allocation150_spill] sm:$0xff]  ;;  %v11328_v8 = vld [vmem:[#allocation140_spill] sm:$0xff] }
 0x15c   :  { %v5478_v32 = vadd.f32 %v11321_v53, %v11320_v23  ;;  %v11323_v10 = vld [vmem:[#allocation147_spill] sm:$0xff]  ;;  %v1083_v45 = vadd.f32 %v1082_v28, %v11326_v16  ;;  %v11327_v17 = vld [vmem:[#allocation42_spill] sm:$0xff]  ;;  %v11331_v61 = vld [vmem:[#allocation133_spill] sm:$0xff] }
 0x15d   :  { %v1038_v4 = vadd.f32 %v1037_v56, %v11323_v10  ;;  %v5486_v41 = vadd.f32 %v11328_v8, %v11327_v17  ;;  %v11330_v40 = vld [vmem:[#allocation30_spill] sm:$0xff]  ;;  %v11333_v54 = vld [vmem:[#allocation32_spill] sm:$0xff]  ;;  %v11334_v7 = vld [vmem:[#allocation141_spill] sm:$0xff]  ;;  %v1204_v10 = vadd.f32 %v1203_v59, %v5402_v43 }
 0x15e   :  { %11322 = vst [vmem:[#allocation66_spill] sm:$0xff] %v5478_v32  ;;  %v5490_v48 = vadd.f32 %v11331_v61, %v11330_v40  ;;  %v5494_v2 = vadd.f32 %v11334_v7, %v11333_v54  ;;  %v11336_v14 = vld [vmem:[#allocation130_spill] sm:$0xff]  ;;  %v11337_v56 = vld [vmem:[#allocation17_spill] sm:$0xff]  ;;  %v5500_v21 = vld [vmem:[#allocation2 + $0x600] sm:$0xff] }
 0x15f   :  { %11329 = vst [vmem:[#allocation52_spill] sm:$0xff] %v5486_v41  ;;  %v5498_v0 = vadd.f32 %v11337_v56, %v11336_v14  ;;  %11339 = vst [vmem:[#allocation28_spill] sm:$0xff] %v5500_v21  ;;  %v5502_v26 = vld [vmem:[#allocation2 + $0x608] sm:$0xff]  ;;  %v11341_v28 = vld [vmem:[#allocation138_spill] sm:$0xff] }
 0x160   :  { %11332 = vst [vmem:[#allocation90_spill] sm:$0xff] %v5490_v48  ;;  %11335 = vst [vmem:[#allocation27_spill] sm:$0xff] %v5494_v2  ;;  %v11342_v36 = vld [vmem:[#allocation98_spill] sm:$0xff]  ;;  %v11344_v22 = vld [vmem:[#allocation131_spill] sm:$0xff] }
 0x161   :  { %11338 = vst [vmem:[#allocation78_spill] sm:$0xff] %v5498_v0  ;;  %11340 = vst [vmem:[#allocation83_spill] sm:$0xff] %v5502_v26  ;;  %v5506_v11 = vadd.f32 %v11342_v36, %v11341_v28  ;;  %v11345_v60 = vld [vmem:[#allocation13_spill] sm:$0xff]  ;;  %v11347_v52 = vld [vmem:[#allocation139_spill] sm:$0xff] }
 0x162   :  { %v5510_v9 = vadd.f32 %v11345_v60, %v11344_v22  ;;  %v11348_v24 = vld [vmem:[#allocation56_spill] sm:$0xff]  ;;  %v11351_v39 = vld [vmem:[#allocation18_spill] sm:$0xff]  ;;  %v5520_v35 = vld [vmem:[#allocation2 + $0x610] sm:$0xff] }
 0x163   :  { %11343 = vst [vmem:[#allocation81_spill] sm:$0xff] %v5506_v11  ;;  %v5514_v44 = vadd.f32 %v11348_v24, %v11347_v52  ;;  %v11350_v49 = vld [vmem:[#allocation132_spill] sm:$0xff]  ;;  %11353 = vst [vmem:[#allocation86_spill] sm:$0xff] %v5520_v35  ;;  %v5522_v3 = vld [vmem:[#allocation2 + $0x618] sm:$0xff] }
 0x164   :  { %11346 = vst [vmem:[#allocation77_spill] sm:$0xff] %v5510_v9  ;;  %v5518_v20 = vadd.f32 %v11351_v39, %v11350_v49  ;;  %11354 = vst [vmem:[#allocation36_spill] sm:$0xff] %v5522_v3  ;;  %v5524_v33 = vld [vmem:[#allocation5 + $0x600] sm:$0xff]  ;;  %v11356_v13 = vld [vmem:[#allocation49_spill] sm:$0xff] }
 0x165   :  { %11349 = vst [vmem:[#allocation29_spill] sm:$0xff] %v5514_v44  ;;  %11355 = vst [vmem:[#allocation64_spill] sm:$0xff] %v5524_v33  ;;  %v1159_v62 = vadd.f32 %v1158_v30, %v11356_v13  ;;  %v11357_v12 = vld [vmem:[#allocation80_spill] sm:$0xff]  ;;  %v11358_v23 = vld [vmem:[#allocation21_spill] sm:$0xff] }
 0x166   :  { %11352 = vst [vmem:[#allocation35_spill] sm:$0xff] %v5518_v20  ;;  %v1174_v58 = vadd.f32 %v1173_v55, %v11357_v12  ;;  %v1189_v53 = vadd.f32 %v1188_v63, %v11358_v23  ;;  %v5530_v5 = vld [vmem:[#allocation2 + $0x620] sm:$0xff]  ;;  %v5532_v29 = vld [vmem:[#allocation2 + $0x628] sm:$0xff]  ;;  %v5534_v16 = vld [vmem:[#allocation2 + $0x630] sm:$0xff] }
 0x167   :  { %11359 = vst [vmem:[#allocation75_spill] sm:$0xff] %v5530_v5  ;;  %11360 = vst [vmem:[#allocation34_spill] sm:$0xff] %v5532_v29  ;;  %v5536_v17 = vld [vmem:[#allocation2 + $0x638] sm:$0xff]  ;;  %v5538_v8 = vld [vmem:[#allocation5 + $0x608] sm:$0xff] }
 0x168   :  { %11361 = vst [vmem:[#allocation38_spill] sm:$0xff] %v5534_v16  ;;  %11362 = vst [vmem:[#allocation65_spill] sm:$0xff] %v5536_v17  ;;  %v5540_v40 = vld [vmem:[#allocation5 + $0x610] sm:$0xff]  ;;  %v5542_v61 = vld [vmem:[#allocation5 + $0x618] sm:$0xff] }
 0x169   :  { %11363 = vst [vmem:[#allocation88_spill] sm:$0xff] %v5538_v8  ;;  %11364 = vst [vmem:[#allocation67_spill] sm:$0xff] %v5540_v40  ;;  %v11366_v30 = vld [vmem:[#allocation62_spill] sm:$0xff]  ;;  %v11368_v63 = vld [vmem:[#allocation31_spill] sm:$0xff] }
 0x16a   :  { %11365 = vst [vmem:[#allocation71_spill] sm:$0xff] %v5542_v61  ;;  %v5545_v55 = vadd.f32 %v1038_v4, %v11366_v30  ;;  %v5548_v54 = vadd.f32 %v1053_v34, %v11368_v63  ;;  %v11370_v43 = vld [vmem:[#allocation63_spill] sm:$0xff]  ;;  %v11372_v7 = vld [vmem:[#allocation33_spill] sm:$0xff]  ;;  %v5558_v28 = vld [vmem:[#allocation2 + $0x648] sm:$0xff] }
 0x16b   :  { %v5551_v59 = vadd.f32 %v1068_v50, %v11370_v43  ;;  %v5554_v14 = vadd.f32 %v1083_v45, %v11372_v7  ;;  %v5556_v56 = vld [vmem:[#allocation2 + $0x640] sm:$0xff]  ;;  %11375 = vst [vmem:[#allocation45_spill] sm:$0xff] %v5558_v28  ;;  %v5560_v36 = vld [vmem:[#allocation2 + $0x650] sm:$0xff]  ;;  %v5562_v22 = vld [vmem:[#allocation2 + $0x658] sm:$0xff] }
 0x16c   :  { %11367 = vst [vmem:[#allocation79_spill] sm:$0xff] %v5545_v55  ;;  %11369 = vst [vmem:[#allocation55_spill] sm:$0xff] %v5548_v54  ;;  %v5564_v60 = vld [vmem:[#allocation5 + $0x620] sm:$0xff]  ;;  %v5566_v4 = vld [vmem:[#allocation5 + $0x628] sm:$0xff]  ;;  %v5612_v54 = vmul.f32 %v5538_v8, %v5502_v26  ;;  %v5616_v55 = vmul.f32 %v5540_v40, %v5520_v35 }
 0x16d   :  { %11371 = vst [vmem:[#allocation48_spill] sm:$0xff] %v5551_v59  ;;  %11373 = vst [vmem:[#allocation58_spill] sm:$0xff] %v5554_v14  ;;  %v5568_v34 = vld [vmem:[#allocation5 + $0x630] sm:$0xff]  ;;  %v11382_v50 = vld [vmem:[#allocation24_spill] sm:$0xff]  ;;  %v5660_v20 = vmul.f32 %v5566_v4, %v5532_v29 }
 0x16e   :  { %11374 = vst [vmem:[#allocation70_spill] sm:$0xff] %v5556_v56  ;;  %11376 = vst [vmem:[#allocation87_spill] sm:$0xff] %v5560_v36  ;;  %v11381_v52 = vld [vmem:[#allocation53_spill] sm:$0xff]  ;;  %v11384_v45 = vld [vmem:[#allocation51_spill] sm:$0xff]  ;;  %v5664_v44 = vmul.f32 %v5568_v34, %v5534_v16 }
 0x16f   :  { %11377 = vst [vmem:[#allocation60_spill] sm:$0xff] %v5562_v22  ;;  %11378 = vst [vmem:[#allocation68_spill] sm:$0xff] %v5564_v60  ;;  %v5572_v24 = vadd.f32 %v11382_v50, %v11381_v52  ;;  %v11385_v49 = vld [vmem:[#allocation37_spill] sm:$0xff]  ;;  %v11388_v12 = vld [vmem:[#allocation84_spill] sm:$0xff] }
 0x170   :  { %11379 = vst [vmem:[#allocation57_spill] sm:$0xff] %v5566_v4  ;;  %11380 = vst [vmem:[#allocation69_spill] sm:$0xff] %v5568_v34  ;;  %v5576_v39 = vadd.f32 %v11385_v49, %v11384_v45  ;;  %v11387_v13 = vld [vmem:[#allocation25_spill] sm:$0xff]  ;;  %v11390_v30 = vld [vmem:[#allocation50_spill] sm:$0xff] }
 0x171   :  { %11383 = vst [vmem:[#allocation122_spill] sm:$0xff] %v5572_v24  ;;  %v5580_v23 = vadd.f32 %v11388_v12, %v11387_v13  ;;  %v11391_v63 = vld [vmem:[#allocation72_spill] sm:$0xff]  ;;  %v5586_v7 = vld [vmem:[#allocation2 + $0x660] sm:$0xff]  ;;  %v5590_v59 = vld [vmem:[#allocation2 + $0x670] sm:$0xff]  ;;  %v1190_v24 = vadd.f32 %v1189_v53, %v5418_v6 }
 0x172   :  { %11386 = vst [vmem:[#allocation96_spill] sm:$0xff] %v5576_v39  ;;  %v5584_v43 = vadd.f32 %v11391_v63, %v11390_v30  ;;  %11393 = vst [vmem:[#allocation76_spill] sm:$0xff] %v5586_v7  ;;  %v5588_v14 = vld [vmem:[#allocation2 + $0x668] sm:$0xff]  ;;  %v5592_v52 = vld [vmem:[#allocation2 + $0x678] sm:$0xff]  ;;  %v5608_v63 = vmul.f32 %v5524_v33, %v5500_v21  ;;  %v1175_v39 = vadd.f32 %v1174_v58, %v5414_v46 }
 0x173   :  { %11389 = vst [vmem:[#allocation43_spill] sm:$0xff] %v5580_v23  ;;  %11394 = vst [vmem:[#allocation46_spill] sm:$0xff] %v5588_v14  ;;  %v5594_v50 = vld [vmem:[#allocation5 + $0x638] sm:$0xff]  ;;  %v5596_v45 = vld [vmem:[#allocation5 + $0x640] sm:$0xff]  ;;  %v1160_v23 = vadd.f32 %v1159_v62, %v5410_v51  ;;  %v1205_v33 = vadd.f32 %v1204_v10, %v5422_v47  ;;  %v5656_v10 = vmul.f32 %v5564_v60, %v5530_v5 }
 0x174   :  { %11392 = vst [vmem:[#allocation74_spill] sm:$0xff] %v5584_v43  ;;  %11395 = vst [vmem:[#allocation89_spill] sm:$0xff] %v5590_v59  ;;  %v5598_v49 = vld [vmem:[#allocation5 + $0x648] sm:$0xff]  ;;  %v5600_v13 = vld [vmem:[#allocation5 + $0x650] sm:$0xff]  ;;  %v5620_v43 = vmul.f32 %v5542_v61, %v5522_v3  ;;  %v5668_v9 = vmul.f32 %v5594_v50, %v5536_v17  ;;  %v5686_v34 = vmul.f32 %v5596_v45, %v5556_v56 }
 0x175   :  { %11396 = vst [vmem:[#allocation91_spill] sm:$0xff] %v5592_v52  ;;  %11397 = vst [vmem:[#allocation82_spill] sm:$0xff] %v5594_v50  ;;  %v5602_v12 = vld [vmem:[#allocation5 + $0x658] sm:$0xff]  ;;  %v5604_v30 = vld [vmem:[#allocation5 + $0x660] sm:$0xff]  ;;  %v5690_v50 = vmul.f32 %v5598_v49, %v5558_v28  ;;  %v5694_v17 = vmul.f32 %v5600_v13, %v5560_v36  ;;  %v1176_v36 = vadd.f32 %v1175_v39, %v5434_v31 }
 0x176   :  { %11398 = vst [vmem:[#allocation92_spill] sm:$0xff] %v5596_v45  ;;  %11399 = vst [vmem:[#allocation93_spill] sm:$0xff] %v5598_v49  ;;  %v5626_v21 = vld [vmem:[#allocation2 + $0x680] sm:$0xff]  ;;  %v5628_v8 = vld [vmem:[#allocation2 + $0x688] sm:$0xff]  ;;  %v5698_v16 = vmul.f32 %v5602_v12, %v5562_v22  ;;  %v5708_v45 = vmul.f32 %v5604_v30, %v5586_v7  ;;  %v1161_v22 = vadd.f32 %v1160_v23, %v5430_v1 }
 0x177   :  { %11400 = vst [vmem:[#allocation73_spill] sm:$0xff] %v5600_v13  ;;  %11401 = vst [vmem:[#allocation103_spill] sm:$0xff] %v5602_v12  ;;  %v5630_v26 = vld [vmem:[#allocation2 + $0x690] sm:$0xff]  ;;  %v5632_v40 = vld [vmem:[#allocation2 + $0x698] sm:$0xff]  ;;  %v1191_v28 = vadd.f32 %v1190_v24, %v5438_v15 }
 0x178   :  { %11402 = vst [vmem:[#allocation99_spill] sm:$0xff] %v5604_v30  ;;  %11403 = vst [vmem:[#allocation101_spill] sm:$0xff] %v5628_v8  ;;  %v5634_v35 = vld [vmem:[#allocation5 + $0x668] sm:$0xff]  ;;  %v5636_v61 = vld [vmem:[#allocation5 + $0x670] sm:$0xff]  ;;  %v1206_v30 = vadd.f32 %v1205_v33, %v5442_v57 }
 0x179   :  { %11404 = vst [vmem:[#allocation97_spill] sm:$0xff] %v5630_v26  ;;  %11405 = vst [vmem:[#allocation107_spill] sm:$0xff] %v5632_v40  ;;  %v5638_v3 = vld [vmem:[#allocation5 + $0x678] sm:$0xff]  ;;  %v5640_v51 = vld [vmem:[#allocation2 + $0x6a0] sm:$0xff]  ;;  %v5712_v49 = vmul.f32 %v5634_v35, %v5588_v14  ;;  %v5716_v13 = vmul.f32 %v5636_v61, %v5590_v59 }
 0x17a   :  { %11406 = vst [vmem:[#allocation105_spill] sm:$0xff] %v5634_v35  ;;  %11407 = vst [vmem:[#allocation110_spill] sm:$0xff] %v5636_v61  ;;  %v5642_v46 = vld [vmem:[#allocation2 + $0x6a8] sm:$0xff]  ;;  %v5644_v6 = vld [vmem:[#allocation2 + $0x6b0] sm:$0xff]  ;;  %v5720_v12 = vmul.f32 %v5638_v3, %v5592_v52 }
 0x17b   :  { %11408 = vst [vmem:[#allocation95_spill] sm:$0xff] %v5638_v3  ;;  %11409 = vst [vmem:[#allocation40_spill] sm:$0xff] %v5642_v46  ;;  %v5646_v47 = vld [vmem:[#allocation2 + $0x6b8] sm:$0xff]  ;;  %v5648_v62 = vld [vmem:[#allocation5 + $0x680] sm:$0xff] }
 0x17c   :  { %11410 = vst [vmem:[#allocation106_spill] sm:$0xff] %v5644_v6  ;;  %11411 = vst [vmem:[#allocation111_spill] sm:$0xff] %v5646_v47  ;;  %v5650_v58 = vld [vmem:[#allocation5 + $0x688] sm:$0xff]  ;;  %v5652_v53 = vld [vmem:[#allocation5 + $0x690] sm:$0xff]  ;;  %v5754_v39 = vmul.f32 %v5648_v62, %v5626_v21 }
 0x17d   :  { %11412 = vst [vmem:[#allocation108_spill] sm:$0xff] %v5648_v62  ;;  %11413 = vst [vmem:[#allocation41_spill] sm:$0xff] %v5650_v58  ;;  %v5670_v11 = vld [vmem:[#allocation2 + $0x6c0] sm:$0xff]  ;;  %v5672_v0 = vld [vmem:[#allocation2 + $0x6c8] sm:$0xff]  ;;  %v5758_v23 = vmul.f32 %v5650_v58, %v5628_v8  ;;  %v5762_v56 = vmul.f32 %v5652_v53, %v5630_v26 }
 0x17e   :  { %11414 = vst [vmem:[#allocation109_spill] sm:$0xff] %v5652_v53  ;;  %11415 = vst [vmem:[#allocation11_spill] sm:$0xff] %v5670_v11  ;;  %v5674_v2 = vld [vmem:[#allocation2 + $0x6d0] sm:$0xff]  ;;  %v5676_v60 = vld [vmem:[#allocation2 + $0x6d8] sm:$0xff] }
 0x17f   :  { %11416 = vst [vmem:[#allocation100_spill] sm:$0xff] %v5676_v60  ;;  %v5678_v5 = vld [vmem:[#allocation5 + $0x698] sm:$0xff]  ;;  %v5680_v4 = vld [vmem:[#allocation5 + $0x6a0] sm:$0xff]  ;;  %v5682_v29 = vld [vmem:[#allocation5 + $0x6a8] sm:$0xff] }
 0x180   :  { %11417 = vst [vmem:[#allocation14_spill] sm:$0xff] %v5678_v5  ;;  %11418 = vst [vmem:[#allocation16_spill] sm:$0xff] %v5680_v4  ;;  %v5700_v48 = vld [vmem:[#allocation5 + $0x6b0] sm:$0xff]  ;;  %v5702_v41 = vld [vmem:[#allocation5 + $0x6b8] sm:$0xff]  ;;  %v5776_v62 = vmul.f32 %v5680_v4, %v5640_v51  ;;  %v5780_v58 = vmul.f32 %v5682_v29, %v5642_v46  ;;  %v1192_v46 = vadd.f32 %v1191_v28, %v5458_v38 }
 0x181   :  { %11419 = vst [vmem:[#allocation15_spill] sm:$0xff] %v5682_v29  ;;  %11420 = vst [vmem:[#allocation142_spill] sm:$0xff] %v5700_v48  ;;  %v5704_v32 = vld [vmem:[#allocation5 + $0x6c0] sm:$0xff]  ;;  %v5728_v35 = vld [vmem:[#allocation2 + $0x6e8] sm:$0xff]  ;;  %v5784_v53 = vmul.f32 %v5700_v48, %v5644_v6  ;;  %v1177_v6 = vadd.f32 %v1176_v36, %v5454_v27 }
 0x182   :  { %11421 = vst [vmem:[#allocation112_spill] sm:$0xff] %v5702_v41  ;;  %11422 = vst [vmem:[#allocation104_spill] sm:$0xff] %v5704_v32  ;;  %v5726_v7 = vld [vmem:[#allocation2 + $0x6e0] sm:$0xff]  ;;  %v5730_v14 = vld [vmem:[#allocation2 + $0x6f0] sm:$0xff]  ;;  %v5798_v4 = vmul.f32 %v5704_v32, %v5670_v11  ;;  %v1207_v32 = vadd.f32 %v1206_v30, %v5462_v19 }
 0x183   :  { %11423 = vst [vmem:[#allocation102_spill] sm:$0xff] %v5708_v45  ;;  %11424 = vst [vmem:[#allocation94_spill] sm:$0xff] %v5712_v49  ;;  %v5732_v61 = vld [vmem:[#allocation2 + $0x6f8] sm:$0xff]  ;;  %v5734_v59 = vld [vmem:[#allocation5 + $0x6c8] sm:$0xff] }
 0x184   :  { %11425 = vst [vmem:[#allocation44_spill] sm:$0xff] %v5716_v13  ;;  %11426 = vst [vmem:[#allocation114_spill] sm:$0xff] %v5720_v12  ;;  %v5736_v3 = vld [vmem:[#allocation5 + $0x6d0] sm:$0xff]  ;;  %v5738_v52 = vld [vmem:[#allocation5 + $0x6d8] sm:$0xff]  ;;  %v5766_v12 = vmul.f32 %v5678_v5, %v5632_v40  ;;  %v5788_v5 = vmul.f32 %v5702_v41, %v5646_v47  ;;  %v5802_v29 = vmul.f32 %v5734_v59, %v5672_v0 }
 0x185   :  { %11427 = vst [vmem:[#allocation116_spill] sm:$0xff] %v5726_v7  ;;  %11428 = vst [vmem:[#allocation118_spill] sm:$0xff] %v5728_v35  ;;  %v5740_v1 = vld [vmem:[#allocation2 + $0x700] sm:$0xff]  ;;  %v5742_v31 = vld [vmem:[#allocation2 + $0x708] sm:$0xff]  ;;  %v5806_v48 = vmul.f32 %v5736_v3, %v5674_v2  ;;  %v5810_v41 = vmul.f32 %v5738_v52, %v5676_v60  ;;  %v1162_v47 = vadd.f32 %v1161_v22, %v5450_v25 }
 0x186   :  { %11429 = vst [vmem:[#allocation113_spill] sm:$0xff] %v5730_v14  ;;  %11430 = vst [vmem:[#allocation115_spill] sm:$0xff] %v5732_v61  ;;  %v5744_v15 = vld [vmem:[#allocation2 + $0x710] sm:$0xff]  ;;  %v5746_v57 = vld [vmem:[#allocation2 + $0x718] sm:$0xff] }
 0x187   :  { %11431 = vst [vmem:[#allocation117_spill] sm:$0xff] %v5734_v59  ;;  %11432 = vst [vmem:[#allocation120_spill] sm:$0xff] %v5736_v3  ;;  %v5748_v33 = vld [vmem:[#allocation5 + $0x6e0] sm:$0xff]  ;;  %v5750_v24 = vld [vmem:[#allocation5 + $0x6e8] sm:$0xff] }
 0x188   :  { %11433 = vst [vmem:[#allocation143_spill] sm:$0xff] %v5738_v52  ;;  %11434 = vst [vmem:[#allocation20_spill] sm:$0xff] %v5740_v1  ;;  %v5768_v13 = vld [vmem:[#allocation5 + $0x6f0] sm:$0xff]  ;;  %v5770_v49 = vld [vmem:[#allocation5 + $0x6f8] sm:$0xff]  ;;  %v5822_v3 = vmul.f32 %v5748_v33, %v5726_v7  ;;  %v5826_v52 = vmul.f32 %v5750_v24, %v5728_v35 }
 0x189   :  { %11435 = vst [vmem:[#allocation144_spill] sm:$0xff] %v5742_v31  ;;  %11436 = vst [vmem:[#allocation121_spill] sm:$0xff] %v5744_v15  ;;  %v5772_v45 = vld [vmem:[#allocation5 + $0x700] sm:$0xff]  ;;  %v5790_v40 = vld [vmem:[#allocation5 + $0x708] sm:$0xff]  ;;  %v5830_v25 = vmul.f32 %v5768_v13, %v5730_v14  ;;  %v5834_v27 = vmul.f32 %v5770_v49, %v5732_v61 }
 0x18a   :  { %11437 = vst [vmem:[#allocation145_spill] sm:$0xff] %v5746_v57  ;;  %11438 = vst [vmem:[#allocation22_spill] sm:$0xff] %v5748_v33  ;;  %v5792_v26 = vld [vmem:[#allocation5 + $0x710] sm:$0xff]  ;;  %v5794_v8 = vld [vmem:[#allocation5 + $0x718] sm:$0xff]  ;;  %v5844_v36 = vmul.f32 %v5772_v45, %v5740_v1  ;;  %v5848_v22 = vmul.f32 %v5790_v40, %v5742_v31  ;;  %v1193_v31 = vadd.f32 %v1192_v46, %v5474_v42 }
 0x18b   :  { %11439 = vst [vmem:[#allocation146_spill] sm:$0xff] %v5750_v24  ;;  %11440 = vst [vmem:[#allocation127_spill] sm:$0xff] %v5768_v13  ;;  %v5816_v11 = vld [vmem:[#allocation2 + $0x720] sm:$0xff]  ;;  %v5818_v59 = vld [vmem:[#allocation2 + $0x728] sm:$0xff]  ;;  %v5852_v30 = vmul.f32 %v5792_v26, %v5744_v15  ;;  %v1453_v15 = vadd.f32 %v5668_v9, %v5620_v43 }
 0x18c   :  { %11441 = vst [vmem:[#allocation85_spill] sm:$0xff] %v5770_v49  ;;  %11442 = vst [vmem:[#allocation19_spill] sm:$0xff] %v5772_v45  ;;  %v5836_v38 = vld [vmem:[#allocation2 + $0x730] sm:$0xff]  ;;  %v5838_v19 = vld [vmem:[#allocation2 + $0x738] sm:$0xff]  ;;  %v5856_v49 = vmul.f32 %v5794_v8, %v5746_v57  ;;  %v1408_v45 = vadd.f32 %v5656_v10, %v5608_v63  ;;  %v1178_v57 = vadd.f32 %v1177_v6, %v5470_v37 }
 0x18d   :  { %11443 = vst [vmem:[#allocation125_spill] sm:$0xff] %v5790_v40  ;;  %11444 = vst [vmem:[#allocation128_spill] sm:$0xff] %v5792_v26  ;;  %v5840_v28 = vld [vmem:[#allocation5 + $0x720] sm:$0xff]  ;;  %v5858_v61 = vld [vmem:[#allocation5 + $0x728] sm:$0xff]  ;;  %v1423_v40 = vadd.f32 %v5660_v20, %v5612_v54  ;;  %v1438_v26 = vadd.f32 %v5664_v44, %v5616_v55  ;;  %v1454_v9 = vadd.f32 %v1453_v15, %v5698_v16 }
 0x18e   :  { %11445 = vst [vmem:[#allocation136_spill] sm:$0xff] %v5794_v8  ;;  %11446 = vst [vmem:[#allocation119_spill] sm:$0xff] %v5816_v11  ;;  %v5860_v13 = vld [vmem:[#allocation5 + $0x730] sm:$0xff]  ;;  %v5862_v14 = vld [vmem:[#allocation5 + $0x738] sm:$0xff]  ;;  %v1163_v8 = vadd.f32 %v1162_v47, %v5466_v18  ;;  %v1409_v20 = vadd.f32 %v1408_v45, %v5686_v34  ;;  %v5892_v42 = vmul.f32 %v5840_v28, %v5816_v11 }
 0x18f   :  { %11447 = vst [vmem:[#allocation126_spill] sm:$0xff] %v5818_v59  ;;  %11448 = vst [vmem:[#allocation129_spill] sm:$0xff] %v5836_v38  ;;  %v11454_v1 = vld [vmem:[#allocation66_spill] sm:$0xff]  ;;  %v5876_v35 = vld [vmem:[#allocation2 + $0x740] sm:$0xff]  ;;  %v1424_v54 = vadd.f32 %v1423_v40, %v5690_v50  ;;  %v1439_v44 = vadd.f32 %v1438_v26, %v5694_v17  ;;  %v5900_v40 = vmul.f32 %v5860_v13, %v5836_v38 }
 0x190   :  { %11449 = vst [vmem:[#allocation137_spill] sm:$0xff] %v5838_v19  ;;  %11450 = vst [vmem:[#allocation123_spill] sm:$0xff] %v5840_v28  ;;  %v1208_v24 = vadd.f32 %v1207_v32, %v11454_v1  ;;  %v5878_v63 = vld [vmem:[#allocation2 + $0x748] sm:$0xff]  ;;  %v5884_v55 = vld [vmem:[#allocation2 + $0x750] sm:$0xff]  ;;  %v5896_v32 = vmul.f32 %v5858_v61, %v5818_v59  ;;  %v5904_v26 = vmul.f32 %v5862_v14, %v5838_v19 }
 0x191   :  { %11451 = vst [vmem:[#allocation12_spill] sm:$0xff] %v5858_v61  ;;  %11452 = vst [vmem:[#allocation134_spill] sm:$0xff] %v5860_v13  ;;  %v5886_v18 = vld [vmem:[#allocation2 + $0x758] sm:$0xff]  ;;  %v5888_v37 = vld [vmem:[#allocation5 + $0x740] sm:$0xff] }
 0x192   :  { %11453 = vst [vmem:[#allocation54_spill] sm:$0xff] %v5862_v14  ;;  %11455 = vst [vmem:[#allocation124_spill] sm:$0xff] %v5876_v35  ;;  %v5906_v16 = vld [vmem:[#allocation5 + $0x748] sm:$0xff]  ;;  %v5908_v17 = vld [vmem:[#allocation5 + $0x750] sm:$0xff] }
 0x193   :  { %11456 = vst [vmem:[#allocation47_spill] sm:$0xff] %v5878_v63  ;;  %11457 = vst [vmem:[#allocation135_spill] sm:$0xff] %v5884_v55  ;;  %v5910_v34 = vld [vmem:[#allocation5 + $0x758] sm:$0xff]  ;;  %v11465_v6 = vld [vmem:[#allocation44_spill] sm:$0xff] }
 0x194   :  { %11458 = vst [vmem:[#allocation39_spill] sm:$0xff] %v5886_v18  ;;  %11459 = vst [vmem:[#allocation147_spill] sm:$0xff] %v5888_v37  ;;  %v11463_v43 = vld [vmem:[#allocation102_spill] sm:$0xff]  ;;  %v1440_v47 = vadd.f32 %v1439_v44, %v11465_v6  ;;  %v11467_v15 = vld [vmem:[#allocation52_spill] sm:$0xff] }
 0x195   :  { %11460 = vst [vmem:[#allocation148_spill] sm:$0xff] %v5906_v16  ;;  %11461 = vst [vmem:[#allocation149_spill] sm:$0xff] %v5908_v17  ;;  %v1410_v50 = vadd.f32 %v1409_v20, %v11463_v43  ;;  %v11464_v45 = vld [vmem:[#allocation94_spill] sm:$0xff]  ;;  %v1164_v13 = vadd.f32 %v1163_v8, %v11467_v15  ;;  %v11469_v14 = vld [vmem:[#allocation27_spill] sm:$0xff] }
 0x196   :  { %11462 = vst [vmem:[#allocation150_spill] sm:$0xff] %v5910_v34  ;;  %v1425_v46 = vadd.f32 %v1424_v54, %v11464_v45  ;;  %v11466_v10 = vld [vmem:[#allocation114_spill] sm:$0xff]  ;;  %v1194_v19 = vadd.f32 %v1193_v31, %v11469_v14  ;;  %v5920_v11 = vld [vmem:[#allocation2 + $0x760] sm:$0xff]  ;;  %v5922_v33 = vld [vmem:[#allocation2 + $0x768] sm:$0xff]  ;;  %v1441_v8 = vadd.f32 %v1440_v47, %v5762_v56  ;;  %v5950_v56 = vmul.f32 %v5906_v16, %v5878_v63 }
 0x197   :  { %v1455_v1 = vadd.f32 %v1454_v9, %v11466_v10  ;;  %v11468_v38 = vld [vmem:[#allocation90_spill] sm:$0xff]  ;;  %11471 = vst [vmem:[#allocation42_spill] sm:$0xff] %v5920_v11  ;;  %11472 = vst [vmem:[#allocation140_spill] sm:$0xff] %v5922_v33  ;;  %v5924_v7 = vld [vmem:[#allocation2 + $0x770] sm:$0xff]  ;;  %v1411_v54 = vadd.f32 %v1410_v50, %v5754_v39  ;;  %v5946_v39 = vmul.f32 %v5888_v37, %v5876_v35 }
 0x198   :  { %v1179_v61 = vadd.f32 %v1178_v57, %v11468_v38  ;;  %v11470_v59 = vld [vmem:[#allocation78_spill] sm:$0xff]  ;;  %11473 = vst [vmem:[#allocation30_spill] sm:$0xff] %v5924_v7  ;;  %v1426_v44 = vadd.f32 %v1425_v46, %v5758_v23  ;;  %v5932_v38 = vld [vmem:[#allocation2 + $0x780] sm:$0xff]  ;;  %v5934_v14 = vld [vmem:[#allocation2 + $0x788] sm:$0xff]  ;;  %v5958_v23 = vmul.f32 %v5910_v34, %v5886_v18  ;;  %v1442_v47 = vadd.f32 %v1441_v8, %v5784_v53 }
 0x199   :  { %v1209_v28 = vadd.f32 %v1208_v24, %v11470_v59  ;;  %v5926_v20 = vld [vmem:[#allocation2 + $0x778] sm:$0xff]  ;;  %v1456_v57 = vadd.f32 %v1455_v1, %v5766_v12  ;;  %11475 = vst [vmem:[#allocation32_spill] sm:$0xff] %v5932_v38  ;;  %11476 = vst [vmem:[#allocation141_spill] sm:$0xff] %v5934_v14  ;;  %v5936_v59 = vld [vmem:[#allocation2 + $0x790] sm:$0xff]  ;;  %v5954_v12 = vmul.f32 %v5908_v17, %v5884_v55 }
 0x19a   :  { %11474 = vst [vmem:[#allocation133_spill] sm:$0xff] %v5926_v20  ;;  %11477 = vst [vmem:[#allocation130_spill] sm:$0xff] %v5936_v59  ;;  %v5938_v31 = vld [vmem:[#allocation2 + $0x798] sm:$0xff]  ;;  %v5940_v24 = vld [vmem:[#allocation5 + $0x760] sm:$0xff]  ;;  %v1412_v46 = vadd.f32 %v1411_v54, %v5776_v62  ;;  %v1427_v6 = vadd.f32 %v1426_v44, %v5780_v58 }
 0x19b   :  { %11478 = vst [vmem:[#allocation17_spill] sm:$0xff] %v5938_v31  ;;  %11479 = vst [vmem:[#allocation138_spill] sm:$0xff] %v5940_v24  ;;  %v5942_v9 = vld [vmem:[#allocation5 + $0x768] sm:$0xff]  ;;  %v5960_v43 = vld [vmem:[#allocation5 + $0x770] sm:$0xff]  ;;  %v1457_v10 = vadd.f32 %v1456_v57, %v5788_v5 }
 0x19c   :  { %11480 = vst [vmem:[#allocation98_spill] sm:$0xff] %v5942_v9  ;;  %11481 = vst [vmem:[#allocation131_spill] sm:$0xff] %v5960_v43  ;;  %v5962_v50 = vld [vmem:[#allocation5 + $0x778] sm:$0xff]  ;;  %v5964_v45 = vld [vmem:[#allocation5 + $0x780] sm:$0xff] }
 0x19d   :  { %11482 = vst [vmem:[#allocation13_spill] sm:$0xff] %v5962_v50  ;;  %11483 = vst [vmem:[#allocation139_spill] sm:$0xff] %v5964_v45  ;;  %v11484_v1 = vld [vmem:[#allocation81_spill] sm:$0xff]  ;;  %v11487_v16 = vld [vmem:[#allocation35_spill] sm:$0xff] }
 0x19e   :  { %v1165_v15 = vadd.f32 %v1164_v13, %v11484_v1  ;;  %v11485_v17 = vld [vmem:[#allocation77_spill] sm:$0xff]  ;;  %v1210_v63 = vadd.f32 %v1209_v28, %v11487_v16  ;;  %v5974_v37 = vld [vmem:[#allocation5 + $0x788] sm:$0xff]  ;;  %v5978_v60 = vld [vmem:[#allocation5 + $0x798] sm:$0xff]  ;;  %v1428_v13 = vadd.f32 %v1427_v6, %v5802_v29  ;;  %v1458_v28 = vadd.f32 %v1457_v10, %v5810_v41 }
 0x19f   :  { %v1180_v55 = vadd.f32 %v1179_v61, %v11485_v17  ;;  %v11486_v34 = vld [vmem:[#allocation29_spill] sm:$0xff]  ;;  %11488 = vst [vmem:[#allocation56_spill] sm:$0xff] %v5974_v37  ;;  %11490 = vst [vmem:[#allocation18_spill] sm:$0xff] %v5978_v60  ;;  %v5980_v62 = vld [vmem:[#allocation2 + $0x7a0] sm:$0xff]  ;;  %v1413_v61 = vadd.f32 %v1412_v46, %v5798_v4  ;;  %v6006_v4 = vmul.f32 %v5940_v24, %v5920_v11 }
 0x1a0   :  { %v1195_v18 = vadd.f32 %v1194_v19, %v11486_v34  ;;  %v5976_v35 = vld [vmem:[#allocation5 + $0x790] sm:$0xff]  ;;  %11491 = vst [vmem:[#allocation49_spill] sm:$0xff] %v5980_v62  ;;  %v5982_v58 = vld [vmem:[#allocation2 + $0x7a8] sm:$0xff]  ;;  %v5986_v5 = vld [vmem:[#allocation2 + $0x7b8] sm:$0xff]  ;;  %v1443_v19 = vadd.f32 %v1442_v47, %v5806_v48  ;;  %v6010_v48 = vmul.f32 %v5942_v9, %v5922_v33  ;;  %v6014_v41 = vmul.f32 %v5960_v43, %v5924_v7 }
 0x1a1   :  { %11489 = vst [vmem:[#allocation132_spill] sm:$0xff] %v5976_v35  ;;  %11492 = vst [vmem:[#allocation80_spill] sm:$0xff] %v5982_v58  ;;  %v5984_v53 = vld [vmem:[#allocation2 + $0x7b0] sm:$0xff]  ;;  %v5992_v16 = vld [vmem:[#allocation2 + $0x7c0] sm:$0xff]  ;;  %v6018_v29 = vmul.f32 %v5962_v50, %v5926_v20  ;;  %v6028_v47 = vmul.f32 %v5964_v45, %v5932_v38  ;;  %v6032_v10 = vmul.f32 %v5974_v37, %v5934_v14 }
 0x1a2   :  { %11493 = vst [vmem:[#allocation21_spill] sm:$0xff] %v5984_v53  ;;  %11494 = vst [vmem:[#allocation62_spill] sm:$0xff] %v5986_v5  ;;  %v5994_v17 = vld [vmem:[#allocation2 + $0x7c8] sm:$0xff]  ;;  %v5996_v34 = vld [vmem:[#allocation2 + $0x7d0] sm:$0xff]  ;;  %v6036_v1 = vmul.f32 %v5976_v35, %v5936_v59  ;;  %v6040_v50 = vmul.f32 %v5978_v60, %v5938_v31  ;;  %v1414_v45 = vadd.f32 %v1413_v61, %v5822_v3 }
 0x1a3   :  { %11495 = vst [vmem:[#allocation31_spill] sm:$0xff] %v5992_v16  ;;  %11496 = vst [vmem:[#allocation63_spill] sm:$0xff] %v5994_v17  ;;  %v5998_v54 = vld [vmem:[#allocation2 + $0x7d8] sm:$0xff]  ;;  %v6000_v44 = vld [vmem:[#allocation5 + $0x7a0] sm:$0xff]  ;;  %v1429_v38 = vadd.f32 %v1428_v13, %v5826_v52  ;;  %v1444_v37 = vadd.f32 %v1443_v19, %v5830_v25  ;;  %v1459_v14 = vadd.f32 %v1458_v28, %v5834_v27 }
 0x1a4   :  { %11497 = vst [vmem:[#allocation33_spill] sm:$0xff] %v5996_v34  ;;  %11498 = vst [vmem:[#allocation53_spill] sm:$0xff] %v5998_v54  ;;  %v6002_v8 = vld [vmem:[#allocation5 + $0x7a8] sm:$0xff]  ;;  %v6020_v57 = vld [vmem:[#allocation5 + $0x7b0] sm:$0xff]  ;;  %v6068_v25 = vmul.f32 %v6000_v44, %v5980_v62  ;;  %v1415_v13 = vadd.f32 %v1414_v45, %v5844_v36 }
 0x1a5   :  { %11499 = vst [vmem:[#allocation24_spill] sm:$0xff] %v6000_v44  ;;  %11500 = vst [vmem:[#allocation51_spill] sm:$0xff] %v6002_v8  ;;  %v6022_v46 = vld [vmem:[#allocation5 + $0x7b8] sm:$0xff]  ;;  %v6024_v6 = vld [vmem:[#allocation5 + $0x7c0] sm:$0xff]  ;;  %v1430_v19 = vadd.f32 %v1429_v38, %v5848_v22  ;;  %v1445_v28 = vadd.f32 %v1444_v37, %v5852_v30 }
 0x1a6   :  { %11501 = vst [vmem:[#allocation37_spill] sm:$0xff] %v6020_v57  ;;  %11502 = vst [vmem:[#allocation25_spill] sm:$0xff] %v6022_v46  ;;  %v6042_v20 = vld [vmem:[#allocation5 + $0x7c8] sm:$0xff]  ;;  %v6044_v43 = vld [vmem:[#allocation5 + $0x7d0] sm:$0xff]  ;;  %v6080_v27 = vmul.f32 %v6022_v46, %v5986_v5 }
 0x1a7   :  { %11503 = vst [vmem:[#allocation84_spill] sm:$0xff] %v6024_v6  ;;  %11504 = vst [vmem:[#allocation50_spill] sm:$0xff] %v6032_v10  ;;  %v6046_v7 = vld [vmem:[#allocation5 + $0x7d8] sm:$0xff]  ;;  %v11511_v9 = vld [vmem:[#allocation96_spill] sm:$0xff] }
 0x1a8   :  { %11505 = vst [vmem:[#allocation72_spill] sm:$0xff] %v6036_v1  ;;  %11506 = vst [vmem:[#allocation66_spill] sm:$0xff] %v6040_v50  ;;  %v11510_v35 = vld [vmem:[#allocation122_spill] sm:$0xff]  ;;  %v1181_v33 = vadd.f32 %v1180_v55, %v11511_v9  ;;  %v11512_v60 = vld [vmem:[#allocation43_spill] sm:$0xff]  ;;  %v6094_v9 = vmul.f32 %v6042_v20, %v5994_v17  ;;  %v6102_v61 = vmul.f32 %v6046_v7, %v5998_v54 }
 0x1a9   :  { %11507 = vst [vmem:[#allocation102_spill] sm:$0xff] %v6042_v20  ;;  %11508 = vst [vmem:[#allocation94_spill] sm:$0xff] %v6044_v43  ;;  %v1166_v59 = vadd.f32 %v1165_v15, %v11510_v35  ;;  %v1196_v31 = vadd.f32 %v1195_v18, %v11512_v60  ;;  %v11513_v24 = vld [vmem:[#allocation74_spill] sm:$0xff]  ;;  %v6056_v50 = vld [vmem:[#allocation2 + $0x7e0] sm:$0xff]  ;;  %v6072_v35 = vmul.f32 %v6002_v8, %v5982_v58 }
 0x1aa   :  { %11509 = vst [vmem:[#allocation44_spill] sm:$0xff] %v6046_v7  ;;  %v1211_v11 = vadd.f32 %v1210_v63, %v11513_v24  ;;  %11514 = vst [vmem:[#allocation114_spill] sm:$0xff] %v6056_v50  ;;  %v6058_v1 = vld [vmem:[#allocation2 + $0x7e8] sm:$0xff]  ;;  %v6060_v10 = vld [vmem:[#allocation2 + $0x7f0] sm:$0xff]  ;;  %v6076_v60 = vmul.f32 %v6020_v57, %v5984_v53  ;;  %v6090_v24 = vmul.f32 %v6024_v6, %v5992_v16 }
 0x1ab   :  { %11515 = vst [vmem:[#allocation52_spill] sm:$0xff] %v6058_v1  ;;  %11516 = vst [vmem:[#allocation90_spill] sm:$0xff] %v6060_v10  ;;  %v6062_v3 = vld [vmem:[#allocation2 + $0x7f8] sm:$0xff]  ;;  %v6064_v52 = vld [vmem:[#allocation5 + $0x7e0] sm:$0xff]  ;;  %v6098_v15 = vmul.f32 %v6044_v43, %v5996_v34  ;;  %v1460_v6 = vadd.f32 %v1459_v14, %v5856_v49 }
 0x1ac   :  { %11517 = vst [vmem:[#allocation27_spill] sm:$0xff] %v6062_v3  ;;  %11518 = vst [vmem:[#allocation78_spill] sm:$0xff] %v6064_v52  ;;  %v6082_v63 = vld [vmem:[#allocation5 + $0x7e8] sm:$0xff]  ;;  %v6084_v55 = vld [vmem:[#allocation5 + $0x7f0] sm:$0xff]  ;;  %v6122_v36 = vmul.f32 %v6064_v52, %v6056_v50 }
 0x1ad   :  { %11519 = vst [vmem:[#allocation81_spill] sm:$0xff] %v6082_v63  ;;  %11520 = vst [vmem:[#allocation77_spill] sm:$0xff] %v6084_v55  ;;  %v6086_v18 = vld [vmem:[#allocation5 + $0x7f8] sm:$0xff]  ;;  %v11523_v16 = vld [vmem:[#allocation23_spill] sm:$0xff]  ;;  %v6126_v22 = vmul.f32 %v6082_v63, %v6058_v1  ;;  %v6130_v49 = vmul.f32 %v6084_v55, %v6060_v10 }
 0x1ae   :  { %11521 = vst [vmem:[#allocation29_spill] sm:$0xff] %v6086_v18  ;;  %11522 = vst [vmem:[#allocation35_spill] sm:$0xff] %v6102_v61  ;;  %v6109_v46 = vadd.f32 %v1166_v59, %v11523_v16  ;;  %v11525_v20 = vld [vmem:[#allocation59_spill] sm:$0xff]  ;;  %v11527_v43 = vld [vmem:[#allocation26_spill] sm:$0xff] }
 0x1af   :  { %v6112_v17 = vadd.f32 %v1181_v33, %v11525_v20  ;;  %v6115_v34 = vadd.f32 %v1196_v31, %v11527_v43  ;;  %v11529_v5 = vld [vmem:[#allocation61_spill] sm:$0xff]  ;;  %11531 = vst [vmem:[#allocation23_spill] sm:$0xff] %v6122_v36  ;;  %11532 = vst [vmem:[#allocation59_spill] sm:$0xff] %v6126_v22  ;;  %v6134_v33 = vmul.f32 %v6086_v18, %v6062_v3  ;;  %v11535_v30 = vld [vmem:[#allocation28_spill] sm:$0xff] }
 0x1b0   :  { %11524 = vst [vmem:[#allocation122_spill] sm:$0xff] %v6109_v46  ;;  %v6118_v7 = vadd.f32 %v1211_v11, %v11529_v5  ;;  %11533 = vst [vmem:[#allocation26_spill] sm:$0xff] %v6130_v49  ;;  %v11536_v37 = vld [vmem:[#allocation64_spill] sm:$0xff]  ;;  %v11537_v20 = vld [vmem:[#allocation83_spill] sm:$0xff]  ;;  %v1461_v46 = vadd.f32 %v1460_v6, %v5904_v26 }
 0x1b1   :  { %11526 = vst [vmem:[#allocation96_spill] sm:$0xff] %v6112_v17  ;;  %11528 = vst [vmem:[#allocation43_spill] sm:$0xff] %v6115_v34  ;;  %v1472_v11 = vadd.f32 %v11536_v37, %v11535_v30  ;;  %v11538_v38 = vld [vmem:[#allocation88_spill] sm:$0xff]  ;;  %v11539_v59 = vld [vmem:[#allocation86_spill] sm:$0xff]  ;;  %v1431_v34 = vadd.f32 %v1430_v19, %v5896_v32  ;;  %v1446_v17 = vadd.f32 %v1445_v28, %v5900_v40 }
 0x1b2   :  { %11530 = vst [vmem:[#allocation74_spill] sm:$0xff] %v6118_v7  ;;  %11534 = vst [vmem:[#allocation61_spill] sm:$0xff] %v6134_v33  ;;  %v1473_v14 = vadd.f32 %v11538_v38, %v11537_v20  ;;  %v11540_v31 = vld [vmem:[#allocation67_spill] sm:$0xff]  ;;  %v11541_v45 = vld [vmem:[#allocation36_spill] sm:$0xff]  ;;  %v1416_v7 = vadd.f32 %v1415_v13, %v5892_v42 }
 0x1b3   :  { %v1474_v43 = vadd.f32 %v11540_v31, %v11539_v59  ;;  %v11542_v5 = vld [vmem:[#allocation71_spill] sm:$0xff]  ;;  %v11544_v3 = vld [vmem:[#allocation68_spill] sm:$0xff]  ;;  %v11545_v37 = vld [vmem:[#allocation34_spill] sm:$0xff] }
 0x1b4   :  { %v1475_v16 = vadd.f32 %v11542_v5, %v11541_v45  ;;  %v11543_v18 = vld [vmem:[#allocation75_spill] sm:$0xff]  ;;  %v11546_v55 = vld [vmem:[#allocation57_spill] sm:$0xff]  ;;  %v11547_v38 = vld [vmem:[#allocation38_spill] sm:$0xff] }
 0x1b5   :  { %v1476_v30 = vadd.f32 %v11544_v3, %v11543_v18  ;;  %v1477_v20 = vadd.f32 %v11546_v55, %v11545_v37  ;;  %v11548_v10 = vld [vmem:[#allocation69_spill] sm:$0xff]  ;;  %v11550_v63 = vld [vmem:[#allocation82_spill] sm:$0xff]  ;;  %v11552_v42 = vld [vmem:[#allocation92_spill] sm:$0xff] }
 0x1b6   :  { %v1478_v59 = vadd.f32 %v11548_v10, %v11547_v38  ;;  %v11549_v31 = vld [vmem:[#allocation65_spill] sm:$0xff]  ;;  %v11551_v5 = vld [vmem:[#allocation70_spill] sm:$0xff]  ;;  %v11555_v28 = vld [vmem:[#allocation87_spill] sm:$0xff] }
 0x1b7   :  { %v1479_v45 = vadd.f32 %v11550_v63, %v11549_v31  ;;  %v1480_v13 = vadd.f32 %v11552_v42, %v11551_v5  ;;  %v11553_v32 = vld [vmem:[#allocation45_spill] sm:$0xff]  ;;  %v11557_v1 = vld [vmem:[#allocation60_spill] sm:$0xff]  ;;  %v11558_v3 = vld [vmem:[#allocation103_spill] sm:$0xff] }
 0x1b8   :  { %v11554_v19 = vld [vmem:[#allocation93_spill] sm:$0xff]  ;;  %v1483_v18 = vadd.f32 %v11558_v3, %v11557_v1  ;;  %v11559_v52 = vld [vmem:[#allocation76_spill] sm:$0xff]  ;;  %v11560_v55 = vld [vmem:[#allocation99_spill] sm:$0xff]  ;;  %v1462_v1 = vadd.f32 %v1461_v46, %v5958_v23 }
 0x1b9   :  { %v1481_v40 = vadd.f32 %v11554_v19, %v11553_v32  ;;  %v11556_v26 = vld [vmem:[#allocation73_spill] sm:$0xff]  ;;  %v1484_v37 = vadd.f32 %v11560_v55, %v11559_v52  ;;  %v11561_v50 = vld [vmem:[#allocation46_spill] sm:$0xff]  ;;  %v11565_v57 = vld [vmem:[#allocation91_spill] sm:$0xff]  ;;  %v1417_v32 = vadd.f32 %v1416_v7, %v5946_v39  ;;  %v1432_v19 = vadd.f32 %v1431_v34, %v5950_v56 }
 0x1ba   :  { %v1482_v6 = vadd.f32 %v11556_v26, %v11555_v28  ;;  %v11562_v10 = vld [vmem:[#allocation105_spill] sm:$0xff]  ;;  %v11564_v63 = vld [vmem:[#allocation110_spill] sm:$0xff]  ;;  %v11566_v5 = vld [vmem:[#allocation95_spill] sm:$0xff]  ;;  %v1447_v28 = vadd.f32 %v1446_v17, %v5954_v12 }
 0x1bb   :  { %v1485_v38 = vadd.f32 %v11562_v10, %v11561_v50  ;;  %v11563_v54 = vld [vmem:[#allocation89_spill] sm:$0xff]  ;;  %v1487_v42 = vadd.f32 %v11566_v5, %v11565_v57  ;;  %v11567_v26 = vld [vmem:[#allocation108_spill] sm:$0xff]  ;;  %v11573_v8 = vld [vmem:[#allocation14_spill] sm:$0xff] }
 0x1bc   :  { %v1486_v31 = vadd.f32 %v11564_v63, %v11563_v54  ;;  %v1488_v52 = vadd.f32 %v11567_v26, %v5626_v21  ;;  %v11568_v3 = vld [vmem:[#allocation101_spill] sm:$0xff]  ;;  %v11572_v63 = vld [vmem:[#allocation107_spill] sm:$0xff]  ;;  %v11574_v7 = vld [vmem:[#allocation16_spill] sm:$0xff] }
 0x1bd   :  { %v11569_v55 = vld [vmem:[#allocation41_spill] sm:$0xff]  ;;  %v1491_v57 = vadd.f32 %v11573_v8, %v11572_v63  ;;  %v1492_v39 = vadd.f32 %v11574_v7, %v5640_v51  ;;  %v11575_v56 = vld [vmem:[#allocation40_spill] sm:$0xff]  ;;  %v11576_v34 = vld [vmem:[#allocation15_spill] sm:$0xff] }
 0x1be   :  { %v1489_v50 = vadd.f32 %v11569_v55, %v11568_v3  ;;  %v11570_v10 = vld [vmem:[#allocation97_spill] sm:$0xff]  ;;  %v1493_v12 = vadd.f32 %v11576_v34, %v11575_v56  ;;  %v11577_v17 = vld [vmem:[#allocation106_spill] sm:$0xff]  ;;  %v11579_v5 = vld [vmem:[#allocation111_spill] sm:$0xff]  ;;  %v1418_v56 = vadd.f32 %v1417_v32, %v6006_v4  ;;  %v1433_v34 = vadd.f32 %v1432_v19, %v6010_v48 }
 0x1bf   :  { %v11571_v53 = vld [vmem:[#allocation109_spill] sm:$0xff]  ;;  %v11578_v23 = vld [vmem:[#allocation142_spill] sm:$0xff]  ;;  %v11580_v21 = vld [vmem:[#allocation112_spill] sm:$0xff] }
 0x1c0   :  { %v1490_v54 = vadd.f32 %v11571_v53, %v11570_v10  ;;  %v1494_v46 = vadd.f32 %v11578_v23, %v11577_v17  ;;  %v1495_v26 = vadd.f32 %v11580_v21, %v11579_v5  ;;  %v11581_v58 = vld [vmem:[#allocation11_spill] sm:$0xff]  ;;  %v11582_v3 = vld [vmem:[#allocation104_spill] sm:$0xff]  ;;  %v11583_v53 = vld [vmem:[#allocation117_spill] sm:$0xff]  ;;  %v1448_v17 = vadd.f32 %v1447_v28, %v6014_v41 }
 0x1c1   :  { %v1496_v55 = vadd.f32 %v11582_v3, %v11581_v58  ;;  %v1497_v10 = vadd.f32 %v11583_v53, %v5672_v0  ;;  %v11584_v8 = vld [vmem:[#allocation120_spill] sm:$0xff]  ;;  %v11586_v51 = vld [vmem:[#allocation143_spill] sm:$0xff]  ;;  %v1463_v23 = vadd.f32 %v1462_v1, %v6018_v29  ;;  %v11588_v21 = vld [vmem:[#allocation22_spill] sm:$0xff] }
 0x1c2   :  { %v1498_v63 = vadd.f32 %v11584_v8, %v5674_v2  ;;  %v11585_v44 = vld [vmem:[#allocation100_spill] sm:$0xff]  ;;  %v11589_v3 = vld [vmem:[#allocation118_spill] sm:$0xff]  ;;  %v11591_v53 = vld [vmem:[#allocation113_spill] sm:$0xff] }
 0x1c3   :  { %v1499_v7 = vadd.f32 %v11586_v51, %v11585_v44  ;;  %v11587_v5 = vld [vmem:[#allocation116_spill] sm:$0xff]  ;;  %v11590_v62 = vld [vmem:[#allocation146_spill] sm:$0xff]  ;;  %v11592_v33 = vld [vmem:[#allocation127_spill] sm:$0xff] }
 0x1c4   :  { %v1500_v58 = vadd.f32 %v11588_v21, %v11587_v5  ;;  %v1501_v0 = vadd.f32 %v11590_v62, %v11589_v3  ;;  %v1502_v2 = vadd.f32 %v11592_v33, %v11591_v53  ;;  %v11593_v8 = vld [vmem:[#allocation115_spill] sm:$0xff]  ;;  %v11594_v49 = vld [vmem:[#allocation85_spill] sm:$0xff]  ;;  %v11595_v51 = vld [vmem:[#allocation20_spill] sm:$0xff]  ;;  %v1536_v33 = vadd.f32 %v1476_v30, %v1472_v11 }
 0x1c5   :  { %v1503_v44 = vadd.f32 %v11594_v49, %v11593_v8  ;;  %v11596_v4 = vld [vmem:[#allocation19_spill] sm:$0xff]  ;;  %v11598_v48 = vld [vmem:[#allocation144_spill] sm:$0xff]  ;;  %v11599_v41 = vld [vmem:[#allocation125_spill] sm:$0xff]  ;;  %v1551_v3 = vadd.f32 %v1477_v20, %v1473_v14  ;;  %v1566_v53 = vadd.f32 %v1478_v59, %v1474_v43  ;;  %v1581_v49 = vadd.f32 %v1479_v45, %v1475_v16 }
 0x1c6   :  { %v6214_v32 = vadd.f32 %v11596_v4, %v11595_v51  ;;  %v6218_v19 = vadd.f32 %v11599_v41, %v11598_v48  ;;  %v11601_v29 = vld [vmem:[#allocation121_spill] sm:$0xff]  ;;  %v11602_v28 = vld [vmem:[#allocation128_spill] sm:$0xff]  ;;  %v1419_v8 = vadd.f32 %v1418_v56, %v6028_v47  ;;  %v11606_v51 = vld [vmem:[#allocation50_spill] sm:$0xff] }
 0x1c7   :  { %v6222_v1 = vadd.f32 %v11602_v28, %v11601_v29  ;;  %v11604_v5 = vld [vmem:[#allocation145_spill] sm:$0xff]  ;;  %v11605_v62 = vld [vmem:[#allocation136_spill] sm:$0xff]  ;;  %v1434_v4 = vadd.f32 %v1433_v34, %v11606_v51  ;;  %v11608_v48 = vld [vmem:[#allocation66_spill] sm:$0xff]  ;;  %v1552_v36 = vadd.f32 %v1551_v3, %v1481_v40  ;;  %v1567_v29 = vadd.f32 %v1566_v53, %v1482_v6 }
 0x1c8   :  { %11597 = vst [vmem:[#allocation28_spill] sm:$0xff] %v6214_v32  ;;  %11600 = vst [vmem:[#allocation64_spill] sm:$0xff] %v6218_v19  ;;  %v6226_v21 = vadd.f32 %v11605_v62, %v11604_v5  ;;  %v11607_v32 = vld [vmem:[#allocation72_spill] sm:$0xff]  ;;  %v1464_v41 = vadd.f32 %v1463_v23, %v11608_v48  ;;  %v1537_v19 = vadd.f32 %v1536_v33, %v1480_v13  ;;  %v11610_v61 = vld [vmem:[#allocation123_spill] sm:$0xff] }
 0x1c9   :  { %11603 = vst [vmem:[#allocation83_spill] sm:$0xff] %v6222_v1  ;;  %v1449_v22 = vadd.f32 %v1448_v17, %v11607_v32  ;;  %v1582_v28 = vadd.f32 %v1581_v49, %v1483_v18  ;;  %v11609_v1 = vld [vmem:[#allocation119_spill] sm:$0xff]  ;;  %v11611_v11 = vld [vmem:[#allocation126_spill] sm:$0xff]  ;;  %v11612_v14 = vld [vmem:[#allocation12_spill] sm:$0xff]  ;;  %v1553_v40 = vadd.f32 %v1552_v36, %v1485_v38  ;;  %v1568_v6 = vadd.f32 %v1567_v29, %v1486_v31 }
 0x1ca   :  { %v6234_v5 = vadd.f32 %v11610_v61, %v11609_v1  ;;  %v6238_v43 = vadd.f32 %v11612_v14, %v11611_v11  ;;  %v11613_v16 = vld [vmem:[#allocation129_spill] sm:$0xff]  ;;  %v11614_v47 = vld [vmem:[#allocation134_spill] sm:$0xff]  ;;  %v1538_v13 = vadd.f32 %v1537_v19, %v1484_v37  ;;  %v1420_v56 = vadd.f32 %v1419_v8, %v6068_v25  ;;  %v11617_v33 = vld [vmem:[#allocation124_spill] sm:$0xff] }
 0x1cb   :  { %v6242_v30 = vadd.f32 %v11614_v47, %v11613_v16  ;;  %v11615_v20 = vld [vmem:[#allocation137_spill] sm:$0xff]  ;;  %v11616_v59 = vld [vmem:[#allocation54_spill] sm:$0xff]  ;;  %v1583_v18 = vadd.f32 %v1582_v28, %v1487_v42  ;;  %v1435_v61 = vadd.f32 %v1434_v4, %v6072_v35  ;;  %v1450_v34 = vadd.f32 %v1449_v22, %v6076_v60  ;;  %v11618_v3 = vld [vmem:[#allocation147_spill] sm:$0xff] }
 0x1cc   :  { %v6246_v45 = vadd.f32 %v11616_v59, %v11615_v20  ;;  %v1465_v17 = vadd.f32 %v1464_v41, %v6080_v27  ;;  %v1539_v23 = vadd.f32 %v1538_v13, %v1488_v52  ;;  %v1554_v32 = vadd.f32 %v1553_v40, %v1489_v50  ;;  %v11619_v37 = vld [vmem:[#allocation47_spill] sm:$0xff]  ;;  %v11620_v36 = vld [vmem:[#allocation148_spill] sm:$0xff]  ;;  %v11622_v25 = vld [vmem:[#allocation149_spill] sm:$0xff] }
 0x1cd   :  { %v1569_v1 = vadd.f32 %v1568_v6, %v1490_v54  ;;  %v1584_v62 = vadd.f32 %v1583_v18, %v1491_v57  ;;  %v6254_v53 = vadd.f32 %v11618_v3, %v11617_v33  ;;  %v6258_v38 = vadd.f32 %v11620_v36, %v11619_v37  ;;  %v11621_v31 = vld [vmem:[#allocation135_spill] sm:$0xff]  ;;  %v11624_v60 = vld [vmem:[#allocation150_spill] sm:$0xff]  ;;  %v11637_v20 = vld [vmem:[#allocation56_spill] sm:$0xff] }
 0x1ce   :  { %v6262_v42 = vadd.f32 %v11622_v25, %v11621_v31  ;;  %v11623_v35 = vld [vmem:[#allocation39_spill] sm:$0xff]  ;;  %v1540_v27 = vadd.f32 %v1539_v23, %v1492_v39  ;;  %v1555_v52 = vadd.f32 %v1554_v32, %v1493_v12  ;;  %v1421_v57 = vadd.f32 %v1420_v56, %v6090_v24  ;;  %v11626_v28 = vld [vmem:[#allocation42_spill] sm:$0xff]  ;;  %v11628_v39 = vld [vmem:[#allocation140_spill] sm:$0xff] }
 0x1cf   :  { %v6266_v22 = vadd.f32 %v11624_v60, %v11623_v35  ;;  %v1570_v50 = vadd.f32 %v1569_v1, %v1494_v46  ;;  %v1585_v54 = vadd.f32 %v1584_v62, %v1495_v26  ;;  %v1436_v19 = vadd.f32 %v1435_v61, %v6094_v9  ;;  %v11625_v8 = vld [vmem:[#allocation35_spill] sm:$0xff]  ;;  %v11627_v11 = vld [vmem:[#allocation138_spill] sm:$0xff]  ;;  %v11632_v9 = vld [vmem:[#allocation133_spill] sm:$0xff] }
 0x1d0   :  { %v1451_v49 = vadd.f32 %v1450_v34, %v6098_v15  ;;  %v1466_v51 = vadd.f32 %v1465_v17, %v11625_v8  ;;  %v1541_v4 = vadd.f32 %v1540_v27, %v1496_v55  ;;  %v1556_v48 = vadd.f32 %v1555_v52, %v1497_v10  ;;  %v11629_v12 = vld [vmem:[#allocation98_spill] sm:$0xff]  ;;  %v11631_v24 = vld [vmem:[#allocation131_spill] sm:$0xff]  ;;  %v11633_v15 = vld [vmem:[#allocation13_spill] sm:$0xff] }
 0x1d1   :  { %v1571_v41 = vadd.f32 %v1570_v50, %v1498_v63  ;;  %v1586_v29 = vadd.f32 %v1585_v54, %v1499_v7  ;;  %v6274_v14 = vadd.f32 %v11627_v11, %v11626_v28  ;;  %v6278_v46 = vadd.f32 %v11629_v12, %v11628_v39  ;;  %v11630_v26 = vld [vmem:[#allocation30_spill] sm:$0xff]  ;;  %v11634_v55 = vld [vmem:[#allocation32_spill] sm:$0xff]  ;;  %v11635_v10 = vld [vmem:[#allocation139_spill] sm:$0xff] }
 0x1d2   :  { %v6282_v16 = vadd.f32 %v11631_v24, %v11630_v26  ;;  %v6286_v47 = vadd.f32 %v11633_v15, %v11632_v9  ;;  %v6290_v63 = vadd.f32 %v11635_v10, %v11634_v55  ;;  %v11636_v7 = vld [vmem:[#allocation141_spill] sm:$0xff]  ;;  %v11638_v13 = vld [vmem:[#allocation130_spill] sm:$0xff]  ;;  %v11639_v40 = vld [vmem:[#allocation132_spill] sm:$0xff]  ;;  %v1542_v34 = vadd.f32 %v1541_v4, %v1500_v58 }
 0x1d3   :  { %v6294_v59 = vadd.f32 %v11637_v20, %v11636_v7  ;;  %v6298_v6 = vadd.f32 %v11639_v40, %v11638_v13  ;;  %v11640_v18 = vld [vmem:[#allocation17_spill] sm:$0xff]  ;;  %v11641_v56 = vld [vmem:[#allocation18_spill] sm:$0xff]  ;;  %v1557_v17 = vadd.f32 %v1556_v48, %v1501_v0  ;;  %v1572_v23 = vadd.f32 %v1571_v41, %v1502_v2  ;;  %v11643_v1 = vld [vmem:[#allocation23_spill] sm:$0xff] }
 0x1d4   :  { %v6302_v61 = vadd.f32 %v11641_v56, %v11640_v18  ;;  %v1587_v32 = vadd.f32 %v1586_v29, %v1503_v44  ;;  %v1422_v62 = vadd.f32 %v1421_v57, %v11643_v1  ;;  %v11644_v33 = vld [vmem:[#allocation59_spill] sm:$0xff]  ;;  %v11645_v37 = vld [vmem:[#allocation26_spill] sm:$0xff]  ;;  %v11646_v31 = vld [vmem:[#allocation61_spill] sm:$0xff] }
 0x1d5   :  { %v1437_v3 = vadd.f32 %v1436_v19, %v11644_v33  ;;  %v1452_v36 = vadd.f32 %v1451_v49, %v11645_v37  ;;  %v1467_v25 = vadd.f32 %v1466_v51, %v11646_v31  ;;  %v11647_v35 = vld [vmem:[#allocation49_spill] sm:$0xff]  ;;  %v11648_v60 = vld [vmem:[#allocation24_spill] sm:$0xff]  ;;  %v11651_v50 = vld [vmem:[#allocation51_spill] sm:$0xff] }
 0x1d6   :  { %11642 = vst [vmem:[#allocation88_spill] sm:$0xff] %v6302_v61  ;;  %v6310_v27 = vadd.f32 %v11648_v60, %v11647_v35  ;;  %v11650_v52 = vld [vmem:[#allocation80_spill] sm:$0xff]  ;;  %v11653_v58 = vld [vmem:[#allocation21_spill] sm:$0xff]  ;;  %v11656_v44 = vld [vmem:[#allocation62_spill] sm:$0xff]  ;;  %v1588_v1 = vadd.f32 %v1587_v32, %v6226_v21 }
 0x1d7   :  { %v6314_v54 = vadd.f32 %v11651_v50, %v11650_v52  ;;  %v11654_v0 = vld [vmem:[#allocation37_spill] sm:$0xff]  ;;  %v6324_v19 = vld [vmem:[#allocation2 + $0x800] sm:$0xff]  ;;  %v6326_v49 = vld [vmem:[#allocation2 + $0x808] sm:$0xff] }
 0x1d8   :  { %11649 = vst [vmem:[#allocation86_spill] sm:$0xff] %v6310_v27  ;;  %v6318_v2 = vadd.f32 %v11654_v0, %v11653_v58  ;;  %v11657_v57 = vld [vmem:[#allocation25_spill] sm:$0xff]  ;;  %11659 = vst [vmem:[#allocation75_spill] sm:$0xff] %v6324_v19  ;;  %v11661_v51 = vld [vmem:[#allocation31_spill] sm:$0xff] }
 0x1d9   :  { %11652 = vst [vmem:[#allocation67_spill] sm:$0xff] %v6314_v54  ;;  %v6322_v8 = vadd.f32 %v11657_v57, %v11656_v44  ;;  %11660 = vst [vmem:[#allocation68_spill] sm:$0xff] %v6326_v49  ;;  %v11662_v4 = vld [vmem:[#allocation84_spill] sm:$0xff]  ;;  %v11664_v41 = vld [vmem:[#allocation63_spill] sm:$0xff] }
 0x1da   :  { %11655 = vst [vmem:[#allocation36_spill] sm:$0xff] %v6318_v2  ;;  %v6330_v48 = vadd.f32 %v11662_v4, %v11661_v51  ;;  %v11665_v29 = vld [vmem:[#allocation102_spill] sm:$0xff]  ;;  %v11667_v11 = vld [vmem:[#allocation33_spill] sm:$0xff]  ;;  %v11671_v24 = vld [vmem:[#allocation44_spill] sm:$0xff] }
 0x1db   :  { %11658 = vst [vmem:[#allocation71_spill] sm:$0xff] %v6322_v8  ;;  %v6334_v28 = vadd.f32 %v11665_v29, %v11664_v41  ;;  %v11668_v39 = vld [vmem:[#allocation94_spill] sm:$0xff]  ;;  %v11670_v26 = vld [vmem:[#allocation53_spill] sm:$0xff]  ;;  %v6348_v10 = vld [vmem:[#allocation5 + $0x800] sm:$0xff] }
 0x1dc   :  { %11663 = vst [vmem:[#allocation34_spill] sm:$0xff] %v6330_v48  ;;  %v6338_v12 = vadd.f32 %v11668_v39, %v11667_v11  ;;  %v6342_v9 = vadd.f32 %v11671_v24, %v11670_v26  ;;  %v6344_v15 = vld [vmem:[#allocation2 + $0x810] sm:$0xff]  ;;  %v6346_v55 = vld [vmem:[#allocation2 + $0x818] sm:$0xff]  ;;  %11675 = vst [vmem:[#allocation70_spill] sm:$0xff] %v6348_v10 }
 0x1dd   :  { %11666 = vst [vmem:[#allocation57_spill] sm:$0xff] %v6334_v28  ;;  %11673 = vst [vmem:[#allocation65_spill] sm:$0xff] %v6344_v15  ;;  %v11676_v7 = vld [vmem:[#allocation28_spill] sm:$0xff]  ;;  %v11678_v18 = vld [vmem:[#allocation83_spill] sm:$0xff] }
 0x1de   :  { %11669 = vst [vmem:[#allocation38_spill] sm:$0xff] %v6338_v12  ;;  %11672 = vst [vmem:[#allocation69_spill] sm:$0xff] %v6342_v9  ;;  %v1543_v20 = vadd.f32 %v1542_v34, %v11676_v7  ;;  %v11677_v13 = vld [vmem:[#allocation64_spill] sm:$0xff]  ;;  %v1573_v56 = vadd.f32 %v1572_v23, %v11678_v18  ;;  %v6354_v33 = vld [vmem:[#allocation2 + $0x820] sm:$0xff] }
 0x1df   :  { %11674 = vst [vmem:[#allocation82_spill] sm:$0xff] %v6346_v55  ;;  %v1558_v40 = vadd.f32 %v1557_v17, %v11677_v13  ;;  %11679 = vst [vmem:[#allocation92_spill] sm:$0xff] %v6354_v33  ;;  %v6356_v37 = vld [vmem:[#allocation2 + $0x828] sm:$0xff]  ;;  %v6358_v31 = vld [vmem:[#allocation2 + $0x830] sm:$0xff] }
 0x1e0   :  { %11680 = vst [vmem:[#allocation45_spill] sm:$0xff] %v6356_v37  ;;  %11681 = vst [vmem:[#allocation93_spill] sm:$0xff] %v6358_v31  ;;  %v6360_v35 = vld [vmem:[#allocation2 + $0x838] sm:$0xff]  ;;  %v6362_v60 = vld [vmem:[#allocation5 + $0x808] sm:$0xff] }
 0x1e1   :  { %11682 = vst [vmem:[#allocation87_spill] sm:$0xff] %v6360_v35  ;;  %11683 = vst [vmem:[#allocation73_spill] sm:$0xff] %v6362_v60  ;;  %v6364_v52 = vld [vmem:[#allocation5 + $0x810] sm:$0xff]  ;;  %v6366_v50 = vld [vmem:[#allocation5 + $0x818] sm:$0xff] }
 0x1e2   :  { %11684 = vst [vmem:[#allocation60_spill] sm:$0xff] %v6364_v52  ;;  %11685 = vst [vmem:[#allocation103_spill] sm:$0xff] %v6366_v50  ;;  %v11686_v34 = vld [vmem:[#allocation79_spill] sm:$0xff]  ;;  %v11690_v21 = vld [vmem:[#allocation48_spill] sm:$0xff] }
 0x1e3   :  { %v6369_v17 = vadd.f32 %v1422_v62, %v11686_v34  ;;  %v11688_v23 = vld [vmem:[#allocation55_spill] sm:$0xff]  ;;  %v6375_v32 = vadd.f32 %v1452_v36, %v11690_v21  ;;  %v11692_v0 = vld [vmem:[#allocation58_spill] sm:$0xff]  ;;  %v6382_v51 = vld [vmem:[#allocation2 + $0x848] sm:$0xff] }
 0x1e4   :  { %v6372_v58 = vadd.f32 %v1437_v3, %v11688_v23  ;;  %v6378_v44 = vadd.f32 %v1467_v25, %v11692_v0  ;;  %v6380_v57 = vld [vmem:[#allocation2 + $0x840] sm:$0xff]  ;;  %11695 = vst [vmem:[#allocation110_spill] sm:$0xff] %v6382_v51  ;;  %v6384_v4 = vld [vmem:[#allocation2 + $0x850] sm:$0xff]  ;;  %v6386_v41 = vld [vmem:[#allocation2 + $0x858] sm:$0xff] }
 0x1e5   :  { %11687 = vst [vmem:[#allocation76_spill] sm:$0xff] %v6369_v17  ;;  %11691 = vst [vmem:[#allocation46_spill] sm:$0xff] %v6375_v32  ;;  %v6388_v29 = vld [vmem:[#allocation5 + $0x820] sm:$0xff]  ;;  %v6390_v62 = vld [vmem:[#allocation5 + $0x828] sm:$0xff]  ;;  %v6440_v17 = vmul.f32 %v6364_v52, %v6344_v15 }
 0x1e6   :  { %11689 = vst [vmem:[#allocation99_spill] sm:$0xff] %v6372_v58  ;;  %11693 = vst [vmem:[#allocation105_spill] sm:$0xff] %v6378_v44  ;;  %v6392_v3 = vld [vmem:[#allocation5 + $0x830] sm:$0xff]  ;;  %v11701_v11 = vld [vmem:[#allocation114_spill] sm:$0xff]  ;;  %v6436_v58 = vmul.f32 %v6362_v60, %v6326_v49  ;;  %v6484_v9 = vmul.f32 %v6390_v62, %v6356_v37 }
 0x1e7   :  { %11694 = vst [vmem:[#allocation89_spill] sm:$0xff] %v6380_v57  ;;  %11696 = vst [vmem:[#allocation91_spill] sm:$0xff] %v6384_v4  ;;  %v11702_v36 = vld [vmem:[#allocation78_spill] sm:$0xff]  ;;  %v11704_v25 = vld [vmem:[#allocation52_spill] sm:$0xff]  ;;  %v6488_v12 = vmul.f32 %v6392_v3, %v6358_v31 }
 0x1e8   :  { %11697 = vst [vmem:[#allocation95_spill] sm:$0xff] %v6386_v41  ;;  %11698 = vst [vmem:[#allocation108_spill] sm:$0xff] %v6388_v29  ;;  %v6396_v39 = vadd.f32 %v11702_v36, %v11701_v11  ;;  %v11705_v26 = vld [vmem:[#allocation81_spill] sm:$0xff]  ;;  %v11707_v7 = vld [vmem:[#allocation90_spill] sm:$0xff] }
 0x1e9   :  { %11699 = vst [vmem:[#allocation101_spill] sm:$0xff] %v6390_v62  ;;  %11700 = vst [vmem:[#allocation41_spill] sm:$0xff] %v6392_v3  ;;  %v6400_v24 = vadd.f32 %v11705_v26, %v11704_v25  ;;  %v11708_v13 = vld [vmem:[#allocation77_spill] sm:$0xff]  ;;  %v11710_v34 = vld [vmem:[#allocation27_spill] sm:$0xff] }
 0x1ea   :  { %11703 = vst [vmem:[#allocation97_spill] sm:$0xff] %v6396_v39  ;;  %v6404_v18 = vadd.f32 %v11708_v13, %v11707_v7  ;;  %v11711_v23 = vld [vmem:[#allocation29_spill] sm:$0xff]  ;;  %v6410_v0 = vld [vmem:[#allocation2 + $0x860] sm:$0xff]  ;;  %v6412_v44 = vld [vmem:[#allocation2 + $0x868] sm:$0xff]  ;;  %v1574_v39 = vadd.f32 %v1573_v56, %v6242_v30 }
 0x1eb   :  { %11706 = vst [vmem:[#allocation109_spill] sm:$0xff] %v6400_v24  ;;  %v6408_v21 = vadd.f32 %v11711_v23, %v11710_v34  ;;  %11713 = vst [vmem:[#allocation16_spill] sm:$0xff] %v6410_v0  ;;  %v6414_v32 = vld [vmem:[#allocation2 + $0x870] sm:$0xff]  ;;  %v6416_v11 = vld [vmem:[#allocation2 + $0x878] sm:$0xff]  ;;  %v6432_v23 = vmul.f32 %v6348_v10, %v6324_v19  ;;  %v1559_v24 = vadd.f32 %v1558_v40, %v6238_v43 }
 0x1ec   :  { %11709 = vst [vmem:[#allocation107_spill] sm:$0xff] %v6404_v18  ;;  %11714 = vst [vmem:[#allocation40_spill] sm:$0xff] %v6412_v44  ;;  %v6418_v36 = vld [vmem:[#allocation5 + $0x838] sm:$0xff]  ;;  %v6420_v25 = vld [vmem:[#allocation5 + $0x840] sm:$0xff]  ;;  %v1544_v18 = vadd.f32 %v1543_v20, %v6234_v5  ;;  %v1589_v10 = vadd.f32 %v1588_v1, %v6246_v45  ;;  %v6480_v1 = vmul.f32 %v6388_v29, %v6354_v33 }
 0x1ed   :  { %11712 = vst [vmem:[#allocation14_spill] sm:$0xff] %v6408_v21  ;;  %11715 = vst [vmem:[#allocation15_spill] sm:$0xff] %v6414_v32  ;;  %v6422_v26 = vld [vmem:[#allocation5 + $0x848] sm:$0xff]  ;;  %v6424_v7 = vld [vmem:[#allocation5 + $0x850] sm:$0xff]  ;;  %v6444_v21 = vmul.f32 %v6366_v50, %v6346_v55  ;;  %v6492_v28 = vmul.f32 %v6418_v36, %v6360_v35  ;;  %v6510_v3 = vmul.f32 %v6420_v25, %v6380_v57 }
 0x1ee   :  { %11716 = vst [vmem:[#allocation106_spill] sm:$0xff] %v6416_v11  ;;  %11717 = vst [vmem:[#allocation142_spill] sm:$0xff] %v6418_v36  ;;  %v6426_v13 = vld [vmem:[#allocation5 + $0x858] sm:$0xff]  ;;  %v6428_v34 = vld [vmem:[#allocation5 + $0x860] sm:$0xff]  ;;  %v6514_v36 = vmul.f32 %v6422_v26, %v6382_v51  ;;  %v6518_v35 = vmul.f32 %v6424_v7, %v6384_v4  ;;  %v1560_v4 = vadd.f32 %v1559_v24, %v6258_v38 }
 0x1ef   :  { %11718 = vst [vmem:[#allocation111_spill] sm:$0xff] %v6420_v25  ;;  %11719 = vst [vmem:[#allocation112_spill] sm:$0xff] %v6422_v26  ;;  %v6450_v19 = vld [vmem:[#allocation2 + $0x880] sm:$0xff]  ;;  %v6452_v60 = vld [vmem:[#allocation2 + $0x888] sm:$0xff]  ;;  %v6522_v31 = vmul.f32 %v6426_v13, %v6386_v41  ;;  %v6532_v25 = vmul.f32 %v6428_v34, %v6410_v0  ;;  %v1545_v41 = vadd.f32 %v1544_v18, %v6254_v53 }
 0x1f0   :  { %11720 = vst [vmem:[#allocation11_spill] sm:$0xff] %v6424_v7  ;;  %11721 = vst [vmem:[#allocation104_spill] sm:$0xff] %v6426_v13  ;;  %v6454_v49 = vld [vmem:[#allocation2 + $0x890] sm:$0xff]  ;;  %v6456_v52 = vld [vmem:[#allocation2 + $0x898] sm:$0xff]  ;;  %v1575_v51 = vadd.f32 %v1574_v39, %v6262_v42 }
 0x1f1   :  { %11722 = vst [vmem:[#allocation117_spill] sm:$0xff] %v6428_v34  ;;  %11723 = vst [vmem:[#allocation120_spill] sm:$0xff] %v6452_v60  ;;  %v6458_v15 = vld [vmem:[#allocation5 + $0x868] sm:$0xff]  ;;  %v6460_v50 = vld [vmem:[#allocation5 + $0x870] sm:$0xff]  ;;  %v1590_v34 = vadd.f32 %v1589_v10, %v6266_v22 }
 0x1f2   :  { %11724 = vst [vmem:[#allocation100_spill] sm:$0xff] %v6454_v49  ;;  %11725 = vst [vmem:[#allocation143_spill] sm:$0xff] %v6456_v52  ;;  %v6462_v55 = vld [vmem:[#allocation5 + $0x878] sm:$0xff]  ;;  %v6464_v5 = vld [vmem:[#allocation2 + $0x8a0] sm:$0xff]  ;;  %v6536_v26 = vmul.f32 %v6458_v15, %v6412_v44  ;;  %v6540_v7 = vmul.f32 %v6460_v50, %v6414_v32 }
 0x1f3   :  { %11726 = vst [vmem:[#allocation116_spill] sm:$0xff] %v6458_v15  ;;  %11727 = vst [vmem:[#allocation22_spill] sm:$0xff] %v6460_v50  ;;  %v6466_v43 = vld [vmem:[#allocation2 + $0x8a8] sm:$0xff]  ;;  %v6468_v30 = vld [vmem:[#allocation2 + $0x8b0] sm:$0xff]  ;;  %v6544_v13 = vmul.f32 %v6462_v55, %v6416_v11 }
 0x1f4   :  { %11728 = vst [vmem:[#allocation118_spill] sm:$0xff] %v6462_v55  ;;  %11729 = vst [vmem:[#allocation146_spill] sm:$0xff] %v6466_v43  ;;  %v6470_v45 = vld [vmem:[#allocation2 + $0x8b8] sm:$0xff]  ;;  %v6472_v20 = vld [vmem:[#allocation5 + $0x880] sm:$0xff] }
 0x1f5   :  { %11730 = vst [vmem:[#allocation113_spill] sm:$0xff] %v6468_v30  ;;  %11731 = vst [vmem:[#allocation127_spill] sm:$0xff] %v6470_v45  ;;  %v6474_v40 = vld [vmem:[#allocation5 + $0x888] sm:$0xff]  ;;  %v6476_v56 = vld [vmem:[#allocation5 + $0x890] sm:$0xff]  ;;  %v6578_v24 = vmul.f32 %v6472_v20, %v6450_v19 }
 0x1f6   :  { %11732 = vst [vmem:[#allocation115_spill] sm:$0xff] %v6472_v20  ;;  %11733 = vst [vmem:[#allocation85_spill] sm:$0xff] %v6474_v40  ;;  %v6494_v48 = vld [vmem:[#allocation2 + $0x8c0] sm:$0xff]  ;;  %v6496_v8 = vld [vmem:[#allocation2 + $0x8c8] sm:$0xff]  ;;  %v6582_v18 = vmul.f32 %v6474_v40, %v6452_v60  ;;  %v6586_v57 = vmul.f32 %v6476_v56, %v6454_v49 }
 0x1f7   :  { %11734 = vst [vmem:[#allocation20_spill] sm:$0xff] %v6476_v56  ;;  %11735 = vst [vmem:[#allocation19_spill] sm:$0xff] %v6494_v48  ;;  %v6498_v2 = vld [vmem:[#allocation2 + $0x8d0] sm:$0xff]  ;;  %v6500_v29 = vld [vmem:[#allocation2 + $0x8d8] sm:$0xff] }
 0x1f8   :  { %11736 = vst [vmem:[#allocation144_spill] sm:$0xff] %v6500_v29  ;;  %v6502_v33 = vld [vmem:[#allocation5 + $0x898] sm:$0xff]  ;;  %v6504_v62 = vld [vmem:[#allocation5 + $0x8a0] sm:$0xff]  ;;  %v6506_v37 = vld [vmem:[#allocation5 + $0x8a8] sm:$0xff] }
 0x1f9   :  { %11737 = vst [vmem:[#allocation125_spill] sm:$0xff] %v6502_v33  ;;  %11738 = vst [vmem:[#allocation121_spill] sm:$0xff] %v6504_v62  ;;  %v6524_v54 = vld [vmem:[#allocation5 + $0x8b0] sm:$0xff]  ;;  %v6526_v27 = vld [vmem:[#allocation5 + $0x8b8] sm:$0xff]  ;;  %v6600_v20 = vmul.f32 %v6504_v62, %v6464_v5  ;;  %v6604_v40 = vmul.f32 %v6506_v37, %v6466_v43  ;;  %v1576_v43 = vadd.f32 %v1575_v51, %v6282_v16 }
 0x1fa   :  { %11739 = vst [vmem:[#allocation128_spill] sm:$0xff] %v6506_v37  ;;  %11740 = vst [vmem:[#allocation145_spill] sm:$0xff] %v6524_v54  ;;  %v6528_v61 = vld [vmem:[#allocation5 + $0x8c0] sm:$0xff]  ;;  %v6552_v15 = vld [vmem:[#allocation2 + $0x8e8] sm:$0xff]  ;;  %v6608_v56 = vmul.f32 %v6524_v54, %v6468_v30  ;;  %v1561_v30 = vadd.f32 %v1560_v4, %v6278_v46 }
 0x1fb   :  { %11741 = vst [vmem:[#allocation136_spill] sm:$0xff] %v6526_v27  ;;  %11742 = vst [vmem:[#allocation50_spill] sm:$0xff] %v6528_v61  ;;  %v6550_v0 = vld [vmem:[#allocation2 + $0x8e0] sm:$0xff]  ;;  %v6554_v44 = vld [vmem:[#allocation2 + $0x8f0] sm:$0xff]  ;;  %v6622_v62 = vmul.f32 %v6528_v61, %v6494_v48  ;;  %v1591_v61 = vadd.f32 %v1590_v34, %v6286_v47 }
 0x1fc   :  { %11743 = vst [vmem:[#allocation72_spill] sm:$0xff] %v6532_v25  ;;  %11744 = vst [vmem:[#allocation66_spill] sm:$0xff] %v6536_v26  ;;  %v6556_v50 = vld [vmem:[#allocation2 + $0x8f8] sm:$0xff]  ;;  %v6558_v32 = vld [vmem:[#allocation5 + $0x8c8] sm:$0xff] }
 0x1fd   :  { %11745 = vst [vmem:[#allocation119_spill] sm:$0xff] %v6540_v7  ;;  %11746 = vst [vmem:[#allocation123_spill] sm:$0xff] %v6544_v13  ;;  %v6560_v55 = vld [vmem:[#allocation5 + $0x8d0] sm:$0xff]  ;;  %v6562_v11 = vld [vmem:[#allocation5 + $0x8d8] sm:$0xff]  ;;  %v6590_v13 = vmul.f32 %v6502_v33, %v6456_v52  ;;  %v6612_v33 = vmul.f32 %v6526_v27, %v6470_v45  ;;  %v6626_v37 = vmul.f32 %v6558_v32, %v6496_v8 }
 0x1fe   :  { %11747 = vst [vmem:[#allocation126_spill] sm:$0xff] %v6550_v0  ;;  %11748 = vst [vmem:[#allocation12_spill] sm:$0xff] %v6552_v15  ;;  %v6564_v53 = vld [vmem:[#allocation2 + $0x900] sm:$0xff]  ;;  %v6566_v38 = vld [vmem:[#allocation2 + $0x908] sm:$0xff]  ;;  %v6630_v54 = vmul.f32 %v6560_v55, %v6498_v2  ;;  %v6634_v27 = vmul.f32 %v6562_v11, %v6500_v29  ;;  %v1546_v45 = vadd.f32 %v1545_v41, %v6274_v14 }
 0x1ff   :  { %11749 = vst [vmem:[#allocation129_spill] sm:$0xff] %v6554_v44  ;;  %11750 = vst [vmem:[#allocation134_spill] sm:$0xff] %v6556_v50  ;;  %v6568_v42 = vld [vmem:[#allocation2 + $0x910] sm:$0xff]  ;;  %v6570_v22 = vld [vmem:[#allocation2 + $0x918] sm:$0xff] }
 0x200   :  { %11751 = vst [vmem:[#allocation137_spill] sm:$0xff] %v6558_v32  ;;  %11752 = vst [vmem:[#allocation54_spill] sm:$0xff] %v6560_v55  ;;  %v6572_v10 = vld [vmem:[#allocation5 + $0x8e0] sm:$0xff]  ;;  %v6574_v39 = vld [vmem:[#allocation5 + $0x8e8] sm:$0xff] }
 0x201   :  { %11753 = vst [vmem:[#allocation124_spill] sm:$0xff] %v6562_v11  ;;  %11754 = vst [vmem:[#allocation147_spill] sm:$0xff] %v6564_v53  ;;  %v6592_v7 = vld [vmem:[#allocation5 + $0x8f0] sm:$0xff]  ;;  %v6594_v26 = vld [vmem:[#allocation5 + $0x8f8] sm:$0xff]  ;;  %v6646_v55 = vmul.f32 %v6572_v10, %v6550_v0  ;;  %v6650_v11 = vmul.f32 %v6574_v39, %v6552_v15 }
 0x202   :  { %11755 = vst [vmem:[#allocation47_spill] sm:$0xff] %v6566_v38  ;;  %11756 = vst [vmem:[#allocation148_spill] sm:$0xff] %v6568_v42  ;;  %v6596_v25 = vld [vmem:[#allocation5 + $0x900] sm:$0xff]  ;;  %v6614_v52 = vld [vmem:[#allocation5 + $0x908] sm:$0xff]  ;;  %v6654_v14 = vmul.f32 %v6592_v7, %v6554_v44  ;;  %v6658_v46 = vmul.f32 %v6594_v26, %v6556_v50 }
 0x203   :  { %11757 = vst [vmem:[#allocation135_spill] sm:$0xff] %v6570_v22  ;;  %11758 = vst [vmem:[#allocation149_spill] sm:$0xff] %v6572_v10  ;;  %v6616_v49 = vld [vmem:[#allocation5 + $0x910] sm:$0xff]  ;;  %v6618_v60 = vld [vmem:[#allocation5 + $0x918] sm:$0xff]  ;;  %v6668_v4 = vmul.f32 %v6596_v25, %v6564_v53  ;;  %v6672_v41 = vmul.f32 %v6614_v52, %v6566_v38  ;;  %v1577_v38 = vadd.f32 %v1576_v43, %v6298_v6 }
 0x204   :  { %11759 = vst [vmem:[#allocation39_spill] sm:$0xff] %v6574_v39  ;;  %11760 = vst [vmem:[#allocation150_spill] sm:$0xff] %v6592_v7  ;;  %v6640_v48 = vld [vmem:[#allocation2 + $0x920] sm:$0xff]  ;;  %v6642_v32 = vld [vmem:[#allocation2 + $0x928] sm:$0xff]  ;;  %v6676_v34 = vmul.f32 %v6616_v49, %v6568_v42  ;;  %v1837_v42 = vadd.f32 %v6492_v28, %v6444_v21 }
 0x205   :  { %11761 = vst [vmem:[#allocation35_spill] sm:$0xff] %v6594_v26  ;;  %11762 = vst [vmem:[#allocation42_spill] sm:$0xff] %v6596_v25  ;;  %v6660_v16 = vld [vmem:[#allocation2 + $0x930] sm:$0xff]  ;;  %v6662_v47 = vld [vmem:[#allocation2 + $0x938] sm:$0xff]  ;;  %v6680_v26 = vmul.f32 %v6618_v60, %v6570_v22  ;;  %v1792_v25 = vadd.f32 %v6480_v1, %v6432_v23  ;;  %v1562_v22 = vadd.f32 %v1561_v30, %v6294_v59 }
 0x206   :  { %11763 = vst [vmem:[#allocation138_spill] sm:$0xff] %v6614_v52  ;;  %11764 = vst [vmem:[#allocation140_spill] sm:$0xff] %v6616_v49  ;;  %v6664_v51 = vld [vmem:[#allocation5 + $0x920] sm:$0xff]  ;;  %v6682_v50 = vld [vmem:[#allocation5 + $0x928] sm:$0xff]  ;;  %v1807_v52 = vadd.f32 %v6484_v9, %v6436_v58  ;;  %v1822_v49 = vadd.f32 %v6488_v12, %v6440_v17  ;;  %v1838_v28 = vadd.f32 %v1837_v42, %v6522_v31 }
 0x207   :  { %11765 = vst [vmem:[#allocation98_spill] sm:$0xff] %v6618_v60  ;;  %11766 = vst [vmem:[#allocation30_spill] sm:$0xff] %v6640_v48  ;;  %v6684_v7 = vld [vmem:[#allocation5 + $0x930] sm:$0xff]  ;;  %v6686_v44 = vld [vmem:[#allocation5 + $0x938] sm:$0xff]  ;;  %v1547_v60 = vadd.f32 %v1546_v45, %v6290_v63  ;;  %v1793_v9 = vadd.f32 %v1792_v25, %v6510_v3  ;;  %v6716_v6 = vmul.f32 %v6664_v51, %v6640_v48 }
 0x208   :  { %11767 = vst [vmem:[#allocation131_spill] sm:$0xff] %v6642_v32  ;;  %11768 = vst [vmem:[#allocation133_spill] sm:$0xff] %v6660_v16  ;;  %v11774_v53 = vld [vmem:[#allocation88_spill] sm:$0xff]  ;;  %v6700_v15 = vld [vmem:[#allocation2 + $0x940] sm:$0xff]  ;;  %v1808_v58 = vadd.f32 %v1807_v52, %v6514_v36  ;;  %v1823_v12 = vadd.f32 %v1822_v49, %v6518_v35  ;;  %v6724_v52 = vmul.f32 %v6684_v7, %v6660_v16 }
 0x209   :  { %11769 = vst [vmem:[#allocation13_spill] sm:$0xff] %v6662_v47  ;;  %11770 = vst [vmem:[#allocation32_spill] sm:$0xff] %v6664_v51  ;;  %v1592_v39 = vadd.f32 %v1591_v61, %v11774_v53  ;;  %v6702_v23 = vld [vmem:[#allocation2 + $0x948] sm:$0xff]  ;;  %v6708_v17 = vld [vmem:[#allocation2 + $0x950] sm:$0xff]  ;;  %v6720_v61 = vmul.f32 %v6682_v50, %v6642_v32  ;;  %v6728_v49 = vmul.f32 %v6686_v44, %v6662_v47 }
 0x20a   :  { %11771 = vst [vmem:[#allocation139_spill] sm:$0xff] %v6682_v50  ;;  %11772 = vst [vmem:[#allocation141_spill] sm:$0xff] %v6684_v7  ;;  %v6710_v63 = vld [vmem:[#allocation2 + $0x958] sm:$0xff]  ;;  %v6712_v59 = vld [vmem:[#allocation5 + $0x940] sm:$0xff] }
 0x20b   :  { %11773 = vst [vmem:[#allocation56_spill] sm:$0xff] %v6686_v44  ;;  %11775 = vst [vmem:[#allocation130_spill] sm:$0xff] %v6700_v15  ;;  %v6730_v31 = vld [vmem:[#allocation5 + $0x948] sm:$0xff]  ;;  %v6732_v35 = vld [vmem:[#allocation5 + $0x950] sm:$0xff] }
 0x20c   :  { %11776 = vst [vmem:[#allocation132_spill] sm:$0xff] %v6702_v23  ;;  %11777 = vst [vmem:[#allocation17_spill] sm:$0xff] %v6708_v17  ;;  %v6734_v3 = vld [vmem:[#allocation5 + $0x958] sm:$0xff]  ;;  %v11783_v21 = vld [vmem:[#allocation72_spill] sm:$0xff] }
 0x20d   :  { %11778 = vst [vmem:[#allocation18_spill] sm:$0xff] %v6710_v63  ;;  %11779 = vst [vmem:[#allocation23_spill] sm:$0xff] %v6712_v59  ;;  %v1794_v36 = vadd.f32 %v1793_v9, %v11783_v21  ;;  %v11784_v25 = vld [vmem:[#allocation66_spill] sm:$0xff]  ;;  %v11785_v30 = vld [vmem:[#allocation119_spill] sm:$0xff] }
 0x20e   :  { %11780 = vst [vmem:[#allocation59_spill] sm:$0xff] %v6730_v31  ;;  %11781 = vst [vmem:[#allocation26_spill] sm:$0xff] %v6732_v35  ;;  %v1809_v43 = vadd.f32 %v1808_v58, %v11784_v25  ;;  %v1824_v45 = vadd.f32 %v1823_v12, %v11785_v30  ;;  %v11786_v1 = vld [vmem:[#allocation123_spill] sm:$0xff]  ;;  %v11787_v42 = vld [vmem:[#allocation86_spill] sm:$0xff] }
 0x20f   :  { %11782 = vst [vmem:[#allocation61_spill] sm:$0xff] %v6734_v3  ;;  %v1839_v53 = vadd.f32 %v1838_v28, %v11786_v1  ;;  %v1548_v7 = vadd.f32 %v1547_v60, %v11787_v42  ;;  %v11788_v16 = vld [vmem:[#allocation67_spill] sm:$0xff]  ;;  %v11789_v44 = vld [vmem:[#allocation36_spill] sm:$0xff]  ;;  %v6748_v0 = vld [vmem:[#allocation2 + $0x970] sm:$0xff]  ;;  %v1795_v58 = vadd.f32 %v1794_v36, %v6578_v24  ;;  %v6770_v24 = vmul.f32 %v6712_v59, %v6700_v15 }
 0x210   :  { %v1563_v50 = vadd.f32 %v1562_v22, %v11788_v16  ;;  %v1578_v47 = vadd.f32 %v1577_v38, %v11789_v44  ;;  %v11790_v32 = vld [vmem:[#allocation71_spill] sm:$0xff]  ;;  %v6746_v10 = vld [vmem:[#allocation2 + $0x968] sm:$0xff]  ;;  %11793 = vst [vmem:[#allocation80_spill] sm:$0xff] %v6748_v0  ;;  %v6750_v9 = vld [vmem:[#allocation2 + $0x978] sm:$0xff]  ;;  %v1810_v12 = vadd.f32 %v1809_v43, %v6582_v18  ;;  %v1825_v60 = vadd.f32 %v1824_v45, %v6586_v57 }
 0x211   :  { %v1593_v51 = vadd.f32 %v1592_v39, %v11790_v32  ;;  %v6744_v48 = vld [vmem:[#allocation2 + $0x960] sm:$0xff]  ;;  %11792 = vst [vmem:[#allocation24_spill] sm:$0xff] %v6746_v10  ;;  %11794 = vst [vmem:[#allocation51_spill] sm:$0xff] %v6750_v9  ;;  %v1840_v22 = vadd.f32 %v1839_v53, %v6590_v13  ;;  %v6758_v44 = vld [vmem:[#allocation2 + $0x988] sm:$0xff]  ;;  %v6774_v57 = vmul.f32 %v6730_v31, %v6702_v23 }
 0x212   :  { %11791 = vst [vmem:[#allocation49_spill] sm:$0xff] %v6744_v48  ;;  %v6756_v16 = vld [vmem:[#allocation2 + $0x980] sm:$0xff]  ;;  %11796 = vst [vmem:[#allocation37_spill] sm:$0xff] %v6758_v44  ;;  %v6760_v32 = vld [vmem:[#allocation2 + $0x990] sm:$0xff]  ;;  %v6778_v13 = vmul.f32 %v6732_v35, %v6708_v17  ;;  %v6782_v18 = vmul.f32 %v6734_v3, %v6710_v63  ;;  %v1796_v43 = vadd.f32 %v1795_v58, %v6600_v20 }
 0x213   :  { %11795 = vst [vmem:[#allocation21_spill] sm:$0xff] %v6756_v16  ;;  %11797 = vst [vmem:[#allocation62_spill] sm:$0xff] %v6760_v32  ;;  %v6762_v38 = vld [vmem:[#allocation2 + $0x998] sm:$0xff]  ;;  %v6764_v39 = vld [vmem:[#allocation5 + $0x960] sm:$0xff]  ;;  %v1811_v30 = vadd.f32 %v1810_v12, %v6604_v40  ;;  %v1826_v45 = vadd.f32 %v1825_v60, %v6608_v56  ;;  %v1841_v1 = vadd.f32 %v1840_v22, %v6612_v33 }
 0x214   :  { %11798 = vst [vmem:[#allocation25_spill] sm:$0xff] %v6762_v38  ;;  %11799 = vst [vmem:[#allocation31_spill] sm:$0xff] %v6764_v39  ;;  %v6766_v28 = vld [vmem:[#allocation5 + $0x968] sm:$0xff]  ;;  %v6784_v21 = vld [vmem:[#allocation5 + $0x970] sm:$0xff] }
 0x215   :  { %11800 = vst [vmem:[#allocation84_spill] sm:$0xff] %v6766_v28  ;;  %11801 = vst [vmem:[#allocation63_spill] sm:$0xff] %v6784_v21  ;;  %v6786_v36 = vld [vmem:[#allocation5 + $0x978] sm:$0xff]  ;;  %v6788_v25 = vld [vmem:[#allocation5 + $0x980] sm:$0xff] }
 0x216   :  { %11802 = vst [vmem:[#allocation102_spill] sm:$0xff] %v6786_v36  ;;  %11803 = vst [vmem:[#allocation33_spill] sm:$0xff] %v6788_v25  ;;  %v11804_v53 = vld [vmem:[#allocation34_spill] sm:$0xff]  ;;  %v11805_v35 = vld [vmem:[#allocation57_spill] sm:$0xff] }
 0x217   :  { %v1549_v42 = vadd.f32 %v1548_v7, %v11804_v53  ;;  %v1564_v17 = vadd.f32 %v1563_v50, %v11805_v35  ;;  %v11806_v3 = vld [vmem:[#allocation38_spill] sm:$0xff]  ;;  %v11807_v31 = vld [vmem:[#allocation69_spill] sm:$0xff]  ;;  %v6798_v59 = vld [vmem:[#allocation5 + $0x988] sm:$0xff]  ;;  %v1797_v50 = vadd.f32 %v1796_v43, %v6622_v62  ;;  %v1812_v7 = vadd.f32 %v1811_v30, %v6626_v37 }
 0x218   :  { %v1579_v63 = vadd.f32 %v1578_v47, %v11806_v3  ;;  %v1594_v23 = vadd.f32 %v1593_v51, %v11807_v31  ;;  %11808 = vst [vmem:[#allocation94_spill] sm:$0xff] %v6798_v59  ;;  %v6800_v15 = vld [vmem:[#allocation5 + $0x990] sm:$0xff]  ;;  %v6802_v29 = vld [vmem:[#allocation5 + $0x998] sm:$0xff]  ;;  %v6804_v20 = vld [vmem:[#allocation2 + $0x9a0] sm:$0xff]  ;;  %v1827_v47 = vadd.f32 %v1826_v45, %v6630_v54  ;;  %v1842_v51 = vadd.f32 %v1841_v1, %v6634_v27 }
 0x219   :  { %11809 = vst [vmem:[#allocation53_spill] sm:$0xff] %v6800_v15  ;;  %11810 = vst [vmem:[#allocation44_spill] sm:$0xff] %v6802_v29  ;;  %v6806_v40 = vld [vmem:[#allocation2 + $0x9a8] sm:$0xff]  ;;  %v6808_v56 = vld [vmem:[#allocation2 + $0x9b0] sm:$0xff]  ;;  %v6830_v62 = vmul.f32 %v6764_v39, %v6744_v48  ;;  %v6834_v54 = vmul.f32 %v6766_v28, %v6746_v10  ;;  %v6838_v27 = vmul.f32 %v6784_v21, %v6748_v0 }
 0x21a   :  { %11811 = vst [vmem:[#allocation28_spill] sm:$0xff] %v6804_v20  ;;  %11812 = vst [vmem:[#allocation64_spill] sm:$0xff] %v6806_v40  ;;  %v6810_v33 = vld [vmem:[#allocation2 + $0x9b8] sm:$0xff]  ;;  %v6816_v31 = vld [vmem:[#allocation2 + $0x9c0] sm:$0xff]  ;;  %v6842_v37 = vmul.f32 %v6786_v36, %v6750_v9  ;;  %v6852_v45 = vmul.f32 %v6788_v25, %v6756_v16  ;;  %v6856_v1 = vmul.f32 %v6798_v59, %v6758_v44 }
 0x21b   :  { %11813 = vst [vmem:[#allocation83_spill] sm:$0xff] %v6808_v56  ;;  %11814 = vst [vmem:[#allocation79_spill] sm:$0xff] %v6810_v33  ;;  %v6818_v35 = vld [vmem:[#allocation2 + $0x9c8] sm:$0xff]  ;;  %v6820_v3 = vld [vmem:[#allocation2 + $0x9d0] sm:$0xff]  ;;  %v6860_v53 = vmul.f32 %v6800_v15, %v6760_v32  ;;  %v6864_v36 = vmul.f32 %v6802_v29, %v6762_v38  ;;  %v1798_v25 = vadd.f32 %v1797_v50, %v6646_v55 }
 0x21c   :  { %11815 = vst [vmem:[#allocation55_spill] sm:$0xff] %v6816_v31  ;;  %11816 = vst [vmem:[#allocation48_spill] sm:$0xff] %v6818_v35  ;;  %v6822_v58 = vld [vmem:[#allocation2 + $0x9d8] sm:$0xff]  ;;  %v6824_v12 = vld [vmem:[#allocation5 + $0x9a0] sm:$0xff]  ;;  %v1813_v16 = vadd.f32 %v1812_v7, %v6650_v11  ;;  %v1828_v59 = vadd.f32 %v1827_v47, %v6654_v14  ;;  %v1843_v44 = vadd.f32 %v1842_v51, %v6658_v46 }
 0x21d   :  { %11817 = vst [vmem:[#allocation58_spill] sm:$0xff] %v6820_v3  ;;  %11818 = vst [vmem:[#allocation114_spill] sm:$0xff] %v6822_v58  ;;  %v6826_v60 = vld [vmem:[#allocation5 + $0x9a8] sm:$0xff]  ;;  %v6844_v22 = vld [vmem:[#allocation5 + $0x9b0] sm:$0xff]  ;;  %v6892_v14 = vmul.f32 %v6824_v12, %v6804_v20  ;;  %v1799_v7 = vadd.f32 %v1798_v25, %v6668_v4 }
 0x21e   :  { %11819 = vst [vmem:[#allocation78_spill] sm:$0xff] %v6824_v12  ;;  %11820 = vst [vmem:[#allocation52_spill] sm:$0xff] %v6826_v60  ;;  %v6846_v43 = vld [vmem:[#allocation5 + $0x9b8] sm:$0xff]  ;;  %v6848_v30 = vld [vmem:[#allocation5 + $0x9c0] sm:$0xff]  ;;  %v1814_v47 = vadd.f32 %v1813_v16, %v6672_v41  ;;  %v1829_v51 = vadd.f32 %v1828_v59, %v6676_v34 }
 0x21f   :  { %11821 = vst [vmem:[#allocation81_spill] sm:$0xff] %v6844_v22  ;;  %11822 = vst [vmem:[#allocation90_spill] sm:$0xff] %v6846_v43  ;;  %v6866_v9 = vld [vmem:[#allocation5 + $0x9c8] sm:$0xff]  ;;  %v6868_v21 = vld [vmem:[#allocation5 + $0x9d0] sm:$0xff]  ;;  %v6904_v46 = vmul.f32 %v6846_v43, %v6810_v33 }
 0x220   :  { %11823 = vst [vmem:[#allocation77_spill] sm:$0xff] %v6848_v30  ;;  %11824 = vst [vmem:[#allocation27_spill] sm:$0xff] %v6856_v1  ;;  %v6870_v0 = vld [vmem:[#allocation5 + $0x9d8] sm:$0xff]  ;;  %v11830_v15 = vld [vmem:[#allocation97_spill] sm:$0xff] }
 0x221   :  { %11825 = vst [vmem:[#allocation29_spill] sm:$0xff] %v6860_v53  ;;  %11826 = vst [vmem:[#allocation88_spill] sm:$0xff] %v6864_v36  ;;  %v1550_v32 = vadd.f32 %v1549_v42, %v11830_v15  ;;  %v11831_v28 = vld [vmem:[#allocation109_spill] sm:$0xff]  ;;  %v11832_v29 = vld [vmem:[#allocation107_spill] sm:$0xff]  ;;  %v6896_v15 = vmul.f32 %v6826_v60, %v6806_v40  ;;  %v6922_v42 = vmul.f32 %v6868_v21, %v6820_v3 }
 0x222   :  { %11827 = vst [vmem:[#allocation72_spill] sm:$0xff] %v6866_v9  ;;  %11828 = vst [vmem:[#allocation66_spill] sm:$0xff] %v6868_v21  ;;  %v1565_v10 = vadd.f32 %v1564_v17, %v11831_v28  ;;  %v1580_v38 = vadd.f32 %v1579_v63, %v11832_v29  ;;  %v11833_v39 = vld [vmem:[#allocation14_spill] sm:$0xff]  ;;  %v6880_v36 = vld [vmem:[#allocation2 + $0x9e0] sm:$0xff]  ;;  %v6900_v29 = vmul.f32 %v6844_v22, %v6808_v56 }
 0x223   :  { %11829 = vst [vmem:[#allocation119_spill] sm:$0xff] %v6870_v0  ;;  %v1595_v48 = vadd.f32 %v1594_v23, %v11833_v39  ;;  %11834 = vst [vmem:[#allocation123_spill] sm:$0xff] %v6880_v36  ;;  %v6882_v53 = vld [vmem:[#allocation2 + $0x9e8] sm:$0xff]  ;;  %v6884_v1 = vld [vmem:[#allocation2 + $0x9f0] sm:$0xff]  ;;  %v6914_v39 = vmul.f32 %v6848_v30, %v6816_v31  ;;  %v6918_v28 = vmul.f32 %v6866_v9, %v6818_v35 }
 0x224   :  { %11835 = vst [vmem:[#allocation86_spill] sm:$0xff] %v6882_v53  ;;  %11836 = vst [vmem:[#allocation67_spill] sm:$0xff] %v6884_v1  ;;  %v6886_v55 = vld [vmem:[#allocation2 + $0x9f8] sm:$0xff]  ;;  %v6888_v11 = vld [vmem:[#allocation5 + $0x9e0] sm:$0xff]  ;;  %v6926_v50 = vmul.f32 %v6870_v0, %v6822_v58  ;;  %v1844_v30 = vadd.f32 %v1843_v44, %v6680_v26 }
 0x225   :  { %11837 = vst [vmem:[#allocation36_spill] sm:$0xff] %v6886_v55  ;;  %11838 = vst [vmem:[#allocation71_spill] sm:$0xff] %v6888_v11  ;;  %v6906_v23 = vld [vmem:[#allocation5 + $0x9e8] sm:$0xff]  ;;  %v6908_v17 = vld [vmem:[#allocation5 + $0x9f0] sm:$0xff]  ;;  %v6946_v4 = vmul.f32 %v6888_v11, %v6880_v36 }
 0x226   :  { %11839 = vst [vmem:[#allocation34_spill] sm:$0xff] %v6906_v23  ;;  %11840 = vst [vmem:[#allocation57_spill] sm:$0xff] %v6908_v17  ;;  %v6910_v63 = vld [vmem:[#allocation5 + $0x9f8] sm:$0xff]  ;;  %v11845_v9 = vld [vmem:[#allocation96_spill] sm:$0xff]  ;;  %v6950_v41 = vmul.f32 %v6906_v23, %v6882_v53  ;;  %v6954_v26 = vmul.f32 %v6908_v17, %v6884_v1 }
 0x227   :  { %11841 = vst [vmem:[#allocation38_spill] sm:$0xff] %v6910_v63  ;;  %11842 = vst [vmem:[#allocation69_spill] sm:$0xff] %v6926_v50  ;;  %v11843_v31 = vld [vmem:[#allocation122_spill] sm:$0xff]  ;;  %v6936_v35 = vadd.f32 %v1565_v10, %v11845_v9  ;;  %v11847_v21 = vld [vmem:[#allocation43_spill] sm:$0xff]  ;;  %v6958_v10 = vmul.f32 %v6910_v63, %v6886_v55 }
 0x228   :  { %v6933_v43 = vadd.f32 %v1550_v32, %v11843_v31  ;;  %v6939_v3 = vadd.f32 %v1580_v38, %v11847_v21  ;;  %v11849_v33 = vld [vmem:[#allocation74_spill] sm:$0xff]  ;;  %11851 = vst [vmem:[#allocation122_spill] sm:$0xff] %v6946_v4  ;;  %11852 = vst [vmem:[#allocation96_spill] sm:$0xff] %v6950_v41  ;;  %v11855_v34 = vld [vmem:[#allocation75_spill] sm:$0xff] }
 0x229   :  { %11846 = vst [vmem:[#allocation109_spill] sm:$0xff] %v6936_v35  ;;  %v6942_v0 = vadd.f32 %v1595_v48, %v11849_v33  ;;  %11853 = vst [vmem:[#allocation43_spill] sm:$0xff] %v6954_v26  ;;  %v11856_v59 = vld [vmem:[#allocation70_spill] sm:$0xff]  ;;  %v11857_v9 = vld [vmem:[#allocation68_spill] sm:$0xff]  ;;  %v1830_v35 = vadd.f32 %v1829_v51, %v6724_v52 }
 0x22a   :  { %11844 = vst [vmem:[#allocation97_spill] sm:$0xff] %v6933_v43  ;;  %11848 = vst [vmem:[#allocation107_spill] sm:$0xff] %v6939_v3  ;;  %v1856_v48 = vadd.f32 %v11856_v59, %v11855_v34  ;;  %v11858_v16 = vld [vmem:[#allocation73_spill] sm:$0xff]  ;;  %v11860_v38 = vld [vmem:[#allocation60_spill] sm:$0xff]  ;;  %v1815_v3 = vadd.f32 %v1814_v47, %v6720_v61  ;;  %v1845_v43 = vadd.f32 %v1844_v30, %v6728_v49 }
 0x22b   :  { %11850 = vst [vmem:[#allocation14_spill] sm:$0xff] %v6942_v0  ;;  %11854 = vst [vmem:[#allocation74_spill] sm:$0xff] %v6958_v10  ;;  %v1857_v44 = vadd.f32 %v11858_v16, %v11857_v9  ;;  %v11859_v32 = vld [vmem:[#allocation65_spill] sm:$0xff]  ;;  %v11861_v25 = vld [vmem:[#allocation82_spill] sm:$0xff]  ;;  %v1800_v0 = vadd.f32 %v1799_v7, %v6716_v6 }
 0x22c   :  { %v1858_v21 = vadd.f32 %v11860_v38, %v11859_v32  ;;  %v11862_v33 = vld [vmem:[#allocation103_spill] sm:$0xff]  ;;  %v11863_v63 = vld [vmem:[#allocation92_spill] sm:$0xff]  ;;  %v11865_v59 = vld [vmem:[#allocation45_spill] sm:$0xff] }
 0x22d   :  { %v1859_v31 = vadd.f32 %v11862_v33, %v11861_v25  ;;  %v11864_v55 = vld [vmem:[#allocation108_spill] sm:$0xff]  ;;  %v11866_v17 = vld [vmem:[#allocation101_spill] sm:$0xff]  ;;  %v11869_v38 = vld [vmem:[#allocation87_spill] sm:$0xff] }
 0x22e   :  { %v1860_v34 = vadd.f32 %v11864_v55, %v11863_v63  ;;  %v1861_v9 = vadd.f32 %v11866_v17, %v11865_v59  ;;  %v11867_v16 = vld [vmem:[#allocation93_spill] sm:$0xff]  ;;  %v11870_v23 = vld [vmem:[#allocation142_spill] sm:$0xff]  ;;  %v11872_v6 = vld [vmem:[#allocation111_spill] sm:$0xff] }
 0x22f   :  { %v11868_v1 = vld [vmem:[#allocation41_spill] sm:$0xff]  ;;  %v1863_v25 = vadd.f32 %v11870_v23, %v11869_v38  ;;  %v11873_v61 = vld [vmem:[#allocation110_spill] sm:$0xff]  ;;  %v11874_v47 = vld [vmem:[#allocation112_spill] sm:$0xff] }
 0x230   :  { %v1862_v32 = vadd.f32 %v11868_v1, %v11867_v16  ;;  %v11871_v33 = vld [vmem:[#allocation89_spill] sm:$0xff]  ;;  %v1865_v52 = vadd.f32 %v11874_v47, %v11873_v61  ;;  %v11875_v51 = vld [vmem:[#allocation91_spill] sm:$0xff]  ;;  %v11878_v55 = vld [vmem:[#allocation104_spill] sm:$0xff]  ;;  %v1801_v61 = vadd.f32 %v1800_v0, %v6770_v24  ;;  %v1816_v47 = vadd.f32 %v1815_v3, %v6774_v57 }
 0x231   :  { %v1864_v7 = vadd.f32 %v11872_v6, %v11871_v33  ;;  %v11876_v49 = vld [vmem:[#allocation11_spill] sm:$0xff]  ;;  %v11879_v11 = vld [vmem:[#allocation16_spill] sm:$0xff]  ;;  %v11880_v17 = vld [vmem:[#allocation117_spill] sm:$0xff] }
 0x232   :  { %v1866_v30 = vadd.f32 %v11876_v49, %v11875_v51  ;;  %v11877_v53 = vld [vmem:[#allocation95_spill] sm:$0xff]  ;;  %v1868_v59 = vadd.f32 %v11880_v17, %v11879_v11  ;;  %v11881_v36 = vld [vmem:[#allocation40_spill] sm:$0xff]  ;;  %v11884_v23 = vld [vmem:[#allocation22_spill] sm:$0xff]  ;;  %v1831_v51 = vadd.f32 %v1830_v35, %v6778_v13 }
 0x233   :  { %v1867_v63 = vadd.f32 %v11878_v55, %v11877_v53  ;;  %v11882_v1 = vld [vmem:[#allocation116_spill] sm:$0xff]  ;;  %v11883_v58 = vld [vmem:[#allocation15_spill] sm:$0xff]  ;;  %v11885_v22 = vld [vmem:[#allocation106_spill] sm:$0xff]  ;;  %v1846_v53 = vadd.f32 %v1845_v43, %v6782_v18 }
 0x234   :  { %v1869_v16 = vadd.f32 %v11882_v1, %v11881_v36  ;;  %v1870_v38 = vadd.f32 %v11884_v23, %v11883_v58  ;;  %v11886_v33 = vld [vmem:[#allocation118_spill] sm:$0xff]  ;;  %v11887_v49 = vld [vmem:[#allocation115_spill] sm:$0xff]  ;;  %v11888_v55 = vld [vmem:[#allocation120_spill] sm:$0xff] }
 0x235   :  { %v1871_v6 = vadd.f32 %v11886_v33, %v11885_v22  ;;  %v1872_v11 = vadd.f32 %v11887_v49, %v6450_v19  ;;  %v11889_v17 = vld [vmem:[#allocation85_spill] sm:$0xff]  ;;  %v11890_v1 = vld [vmem:[#allocation100_spill] sm:$0xff]  ;;  %v11892_v23 = vld [vmem:[#allocation143_spill] sm:$0xff] }
 0x236   :  { %v1873_v36 = vadd.f32 %v11889_v17, %v11888_v55  ;;  %v11891_v56 = vld [vmem:[#allocation20_spill] sm:$0xff]  ;;  %v11893_v60 = vld [vmem:[#allocation125_spill] sm:$0xff]  ;;  %v11895_v57 = vld [vmem:[#allocation146_spill] sm:$0xff] }
 0x237   :  { %v1874_v58 = vadd.f32 %v11891_v56, %v11890_v1  ;;  %v1875_v22 = vadd.f32 %v11893_v60, %v11892_v23  ;;  %v11894_v0 = vld [vmem:[#allocation121_spill] sm:$0xff]  ;;  %v11896_v3 = vld [vmem:[#allocation128_spill] sm:$0xff]  ;;  %v11899_v33 = vld [vmem:[#allocation127_spill] sm:$0xff] }
 0x238   :  { %v1876_v24 = vadd.f32 %v11894_v0, %v6464_v5  ;;  %v1877_v13 = vadd.f32 %v11896_v3, %v11895_v57  ;;  %v11897_v35 = vld [vmem:[#allocation113_spill] sm:$0xff]  ;;  %v11900_v19 = vld [vmem:[#allocation136_spill] sm:$0xff]  ;;  %v11901_v40 = vld [vmem:[#allocation19_spill] sm:$0xff]  ;;  %v1802_v57 = vadd.f32 %v1801_v61, %v6830_v62  ;;  %v1817_v3 = vadd.f32 %v1816_v47, %v6834_v54 }
 0x239   :  { %v11898_v18 = vld [vmem:[#allocation145_spill] sm:$0xff]  ;;  %v1879_v49 = vadd.f32 %v11900_v19, %v11899_v33  ;;  %v11902_v55 = vld [vmem:[#allocation50_spill] sm:$0xff]  ;;  %v11905_v12 = vld [vmem:[#allocation144_spill] sm:$0xff] }
 0x23a   :  { %v1878_v43 = vadd.f32 %v11898_v18, %v11897_v35  ;;  %v1880_v17 = vadd.f32 %v11902_v55, %v11901_v40  ;;  %v11903_v56 = vld [vmem:[#allocation137_spill] sm:$0xff]  ;;  %v11904_v60 = vld [vmem:[#allocation54_spill] sm:$0xff]  ;;  %v11906_v5 = vld [vmem:[#allocation124_spill] sm:$0xff]  ;;  %v1832_v35 = vadd.f32 %v1831_v51, %v6838_v27  ;;  %v1847_v18 = vadd.f32 %v1846_v53, %v6842_v37 }
 0x23b   :  { %v1881_v1 = vadd.f32 %v11903_v56, %v6496_v8  ;;  %v1882_v23 = vadd.f32 %v11904_v60, %v6498_v2  ;;  %v1883_v0 = vadd.f32 %v11906_v5, %v11905_v12  ;;  %v11907_v33 = vld [vmem:[#allocation126_spill] sm:$0xff]  ;;  %v11908_v19 = vld [vmem:[#allocation149_spill] sm:$0xff]  ;;  %v11909_v55 = vld [vmem:[#allocation12_spill] sm:$0xff] }
 0x23c   :  { %v1884_v40 = vadd.f32 %v11908_v19, %v11907_v33  ;;  %v11910_v20 = vld [vmem:[#allocation39_spill] sm:$0xff]  ;;  %v11911_v56 = vld [vmem:[#allocation129_spill] sm:$0xff]  ;;  %v11912_v10 = vld [vmem:[#allocation150_spill] sm:$0xff] }
 0x23d   :  { %v1885_v8 = vadd.f32 %v11910_v20, %v11909_v55  ;;  %v1886_v2 = vadd.f32 %v11912_v10, %v11911_v56  ;;  %v11913_v60 = vld [vmem:[#allocation134_spill] sm:$0xff]  ;;  %v11914_v26 = vld [vmem:[#allocation35_spill] sm:$0xff]  ;;  %v11921_v37 = vld [vmem:[#allocation148_spill] sm:$0xff]  ;;  %v1920_v10 = vadd.f32 %v1860_v34, %v1856_v48  ;;  %v1935_v55 = vadd.f32 %v1861_v9, %v1857_v44 }
 0x23e   :  { %v1887_v12 = vadd.f32 %v11914_v26, %v11913_v60  ;;  %v11915_v5 = vld [vmem:[#allocation147_spill] sm:$0xff]  ;;  %v11916_v62 = vld [vmem:[#allocation42_spill] sm:$0xff]  ;;  %v11922_v51 = vld [vmem:[#allocation140_spill] sm:$0xff]  ;;  %v1950_v56 = vadd.f32 %v1862_v32, %v1858_v21  ;;  %v1965_v26 = vadd.f32 %v1863_v25, %v1859_v31  ;;  %v1803_v60 = vadd.f32 %v1802_v57, %v6852_v45 }
 0x23f   :  { %v7038_v61 = vadd.f32 %v11916_v62, %v11915_v5  ;;  %v11918_v54 = vld [vmem:[#allocation47_spill] sm:$0xff]  ;;  %v11919_v27 = vld [vmem:[#allocation138_spill] sm:$0xff]  ;;  %v7046_v53 = vadd.f32 %v11922_v51, %v11921_v37  ;;  %v1936_v4 = vadd.f32 %v1935_v55, %v1865_v52  ;;  %v11930_v50 = vld [vmem:[#allocation32_spill] sm:$0xff] }
 0x240   :  { %v7042_v47 = vadd.f32 %v11919_v27, %v11918_v54  ;;  %v11924_v33 = vld [vmem:[#allocation135_spill] sm:$0xff]  ;;  %v11925_v20 = vld [vmem:[#allocation98_spill] sm:$0xff]  ;;  %v11928_v54 = vld [vmem:[#allocation88_spill] sm:$0xff]  ;;  %v1951_v37 = vadd.f32 %v1950_v56, %v1866_v30  ;;  %v1966_v51 = vadd.f32 %v1965_v26, %v1867_v63  ;;  %v1804_v57 = vadd.f32 %v1803_v60, %v6892_v14 }
 0x241   :  { %11917 = vst [vmem:[#allocation75_spill] sm:$0xff] %v7038_v61  ;;  %11923 = vst [vmem:[#allocation68_spill] sm:$0xff] %v7046_v53  ;;  %v7050_v19 = vadd.f32 %v11925_v20, %v11924_v33  ;;  %v11926_v5 = vld [vmem:[#allocation27_spill] sm:$0xff]  ;;  %v11927_v61 = vld [vmem:[#allocation29_spill] sm:$0xff]  ;;  %v1848_v27 = vadd.f32 %v1847_v18, %v11928_v54  ;;  %v1937_v52 = vadd.f32 %v1936_v4, %v1869_v16 }
 0x242   :  { %11920 = vst [vmem:[#allocation70_spill] sm:$0xff] %v7042_v47  ;;  %v1818_v62 = vadd.f32 %v1817_v3, %v11926_v5  ;;  %v1833_v41 = vadd.f32 %v1832_v35, %v11927_v61  ;;  %v1921_v47 = vadd.f32 %v1920_v10, %v1864_v7  ;;  %v11929_v53 = vld [vmem:[#allocation30_spill] sm:$0xff]  ;;  %v11931_v48 = vld [vmem:[#allocation131_spill] sm:$0xff]  ;;  %v11933_v31 = vld [vmem:[#allocation133_spill] sm:$0xff]  ;;  %v1952_v30 = vadd.f32 %v1951_v37, %v1870_v38 }
 0x243   :  { %v7058_v33 = vadd.f32 %v11930_v50, %v11929_v53  ;;  %v11932_v44 = vld [vmem:[#allocation139_spill] sm:$0xff]  ;;  %v11934_v45 = vld [vmem:[#allocation141_spill] sm:$0xff]  ;;  %v11936_v32 = vld [vmem:[#allocation56_spill] sm:$0xff]  ;;  %v1967_v63 = vadd.f32 %v1966_v51, %v1871_v6  ;;  %v1849_v35 = vadd.f32 %v1848_v27, %v6904_v46  ;;  %v1938_v61 = vadd.f32 %v1937_v52, %v1873_v36 }
 0x244   :  { %v7062_v21 = vadd.f32 %v11932_v44, %v11931_v48  ;;  %v7066_v34 = vadd.f32 %v11934_v45, %v11933_v31  ;;  %v11935_v9 = vld [vmem:[#allocation13_spill] sm:$0xff]  ;;  %v1922_v7 = vadd.f32 %v1921_v47, %v1868_v59  ;;  %v1819_v50 = vadd.f32 %v1818_v62, %v6896_v15  ;;  %v11937_v10 = vld [vmem:[#allocation130_spill] sm:$0xff]  ;;  %v11938_v55 = vld [vmem:[#allocation23_spill] sm:$0xff] }
 0x245   :  { %v7070_v25 = vadd.f32 %v11936_v32, %v11935_v9  ;;  %v1834_v3 = vadd.f32 %v1833_v41, %v6900_v29  ;;  %v1953_v53 = vadd.f32 %v1952_v30, %v1874_v58  ;;  %v1968_v20 = vadd.f32 %v1967_v63, %v1875_v22  ;;  %v11939_v59 = vld [vmem:[#allocation132_spill] sm:$0xff]  ;;  %v11940_v4 = vld [vmem:[#allocation59_spill] sm:$0xff]  ;;  %v11941_v38 = vld [vmem:[#allocation17_spill] sm:$0xff] }
 0x246   :  { %v1923_v18 = vadd.f32 %v1922_v7, %v1872_v11  ;;  %v7078_v56 = vadd.f32 %v11938_v55, %v11937_v10  ;;  %v7082_v16 = vadd.f32 %v11940_v4, %v11939_v59  ;;  %v11942_v14 = vld [vmem:[#allocation26_spill] sm:$0xff]  ;;  %v11944_v29 = vld [vmem:[#allocation61_spill] sm:$0xff]  ;;  %v1939_v11 = vadd.f32 %v1938_v61, %v1877_v13  ;;  %v11947_v48 = vld [vmem:[#allocation31_spill] sm:$0xff] }
 0x247   :  { %v7086_v6 = vadd.f32 %v11942_v14, %v11941_v38  ;;  %v11943_v15 = vld [vmem:[#allocation18_spill] sm:$0xff]  ;;  %v1954_v36 = vadd.f32 %v1953_v53, %v1878_v43  ;;  %v1969_v58 = vadd.f32 %v1968_v20, %v1879_v49  ;;  %v1805_v22 = vadd.f32 %v1804_v57, %v6914_v39  ;;  %v11945_v60 = vld [vmem:[#allocation69_spill] sm:$0xff]  ;;  %v11949_v13 = vld [vmem:[#allocation84_spill] sm:$0xff] }
 0x248   :  { %v7090_v41 = vadd.f32 %v11944_v29, %v11943_v15  ;;  %v1924_v46 = vadd.f32 %v1923_v18, %v1876_v24  ;;  %v1820_v47 = vadd.f32 %v1819_v50, %v6918_v28  ;;  %v1835_v26 = vadd.f32 %v1834_v3, %v6922_v42  ;;  %v11946_v51 = vld [vmem:[#allocation49_spill] sm:$0xff]  ;;  %v11948_v24 = vld [vmem:[#allocation24_spill] sm:$0xff]  ;;  %v11951_v39 = vld [vmem:[#allocation63_spill] sm:$0xff] }
 0x249   :  { %v1850_v5 = vadd.f32 %v1849_v35, %v11945_v60  ;;  %v1940_v54 = vadd.f32 %v1939_v11, %v1881_v1  ;;  %v1955_v27 = vadd.f32 %v1954_v36, %v1882_v23  ;;  %v1970_v37 = vadd.f32 %v1969_v58, %v1883_v0  ;;  %v11950_v49 = vld [vmem:[#allocation80_spill] sm:$0xff]  ;;  %v11952_v28 = vld [vmem:[#allocation51_spill] sm:$0xff]  ;;  %v11953_v42 = vld [vmem:[#allocation102_spill] sm:$0xff] }
 0x24a   :  { %v1925_v62 = vadd.f32 %v1924_v46, %v1880_v17  ;;  %v7098_v44 = vadd.f32 %v11947_v48, %v11946_v51  ;;  %v7102_v43 = vadd.f32 %v11949_v13, %v11948_v24  ;;  %v7106_v31 = vadd.f32 %v11951_v39, %v11950_v49  ;;  %v11954_v17 = vld [vmem:[#allocation21_spill] sm:$0xff]  ;;  %v11957_v9 = vld [vmem:[#allocation94_spill] sm:$0xff]  ;;  %v11961_v57 = vld [vmem:[#allocation44_spill] sm:$0xff] }
 0x24b   :  { %v7110_v45 = vadd.f32 %v11953_v42, %v11952_v28  ;;  %v11955_v1 = vld [vmem:[#allocation33_spill] sm:$0xff]  ;;  %v11958_v7 = vld [vmem:[#allocation62_spill] sm:$0xff]  ;;  %v1941_v35 = vadd.f32 %v1940_v54, %v1885_v8  ;;  %v1956_v18 = vadd.f32 %v1955_v27, %v1886_v2  ;;  %v1971_v61 = vadd.f32 %v1970_v37, %v1887_v12  ;;  %v11964_v10 = vld [vmem:[#allocation96_spill] sm:$0xff] }
 0x24c   :  { %v7114_v23 = vadd.f32 %v11955_v1, %v11954_v17  ;;  %v11956_v0 = vld [vmem:[#allocation37_spill] sm:$0xff]  ;;  %v1926_v3 = vadd.f32 %v1925_v62, %v1884_v40  ;;  %v11963_v53 = vld [vmem:[#allocation122_spill] sm:$0xff]  ;;  %v1821_v55 = vadd.f32 %v1820_v47, %v11964_v10  ;;  %v11965_v59 = vld [vmem:[#allocation43_spill] sm:$0xff] }
 0x24d   :  { %v7118_v32 = vadd.f32 %v11957_v9, %v11956_v0  ;;  %v11959_v52 = vld [vmem:[#allocation53_spill] sm:$0xff]  ;;  %v1806_v20 = vadd.f32 %v1805_v22, %v11963_v53  ;;  %v1836_v4 = vadd.f32 %v1835_v26, %v11965_v59  ;;  %v11966_v38 = vld [vmem:[#allocation74_spill] sm:$0xff]  ;;  %v11967_v15 = vld [vmem:[#allocation28_spill] sm:$0xff]  ;;  %v1972_v53 = vadd.f32 %v1971_v61, %v7050_v19 }
 0x24e   :  { %v7122_v30 = vadd.f32 %v11959_v52, %v11958_v7  ;;  %v11960_v63 = vld [vmem:[#allocation25_spill] sm:$0xff]  ;;  %v1851_v14 = vadd.f32 %v1850_v5, %v11966_v38  ;;  %v11968_v29 = vld [vmem:[#allocation78_spill] sm:$0xff]  ;;  %v11970_v11 = vld [vmem:[#allocation64_spill] sm:$0xff] }
 0x24f   :  { %v7126_v50 = vadd.f32 %v11961_v57, %v11960_v63  ;;  %v7134_v46 = vadd.f32 %v11968_v29, %v11967_v15  ;;  %v11971_v36 = vld [vmem:[#allocation52_spill] sm:$0xff]  ;;  %v11973_v40 = vld [vmem:[#allocation83_spill] sm:$0xff]  ;;  %v11974_v8 = vld [vmem:[#allocation81_spill] sm:$0xff] }
 0x250   :  { %v7138_v58 = vadd.f32 %v11971_v36, %v11970_v11  ;;  %v7142_v2 = vadd.f32 %v11974_v8, %v11973_v40  ;;  %v11976_v12 = vld [vmem:[#allocation79_spill] sm:$0xff]  ;;  %v11977_v22 = vld [vmem:[#allocation90_spill] sm:$0xff]  ;;  %v7150_v26 = vld [vmem:[#allocation2 + $0xa08] sm:$0xff] }
 0x251   :  { %11962 = vst [vmem:[#allocation73_spill] sm:$0xff] %v7126_v50  ;;  %11969 = vst [vmem:[#allocation65_spill] sm:$0xff] %v7134_v46  ;;  %v7146_v60 = vadd.f32 %v11977_v22, %v11976_v12  ;;  %v7148_v47 = vld [vmem:[#allocation2 + $0xa00] sm:$0xff]  ;;  %v11982_v62 = vld [vmem:[#allocation77_spill] sm:$0xff] }
 0x252   :  { %11972 = vst [vmem:[#allocation60_spill] sm:$0xff] %v7138_v58  ;;  %11975 = vst [vmem:[#allocation82_spill] sm:$0xff] %v7142_v2  ;;  %v11981_v5 = vld [vmem:[#allocation55_spill] sm:$0xff]  ;;  %v11984_v27 = vld [vmem:[#allocation48_spill] sm:$0xff] }
 0x253   :  { %11978 = vst [vmem:[#allocation103_spill] sm:$0xff] %v7146_v60  ;;  %11979 = vst [vmem:[#allocation92_spill] sm:$0xff] %v7148_v47  ;;  %v7154_v54 = vadd.f32 %v11982_v62, %v11981_v5  ;;  %v11985_v37 = vld [vmem:[#allocation72_spill] sm:$0xff]  ;;  %v11987_v48 = vld [vmem:[#allocation58_spill] sm:$0xff] }
 0x254   :  { %11980 = vst [vmem:[#allocation108_spill] sm:$0xff] %v7150_v26  ;;  %v7158_v51 = vadd.f32 %v11985_v37, %v11984_v27  ;;  %v11988_v24 = vld [vmem:[#allocation66_spill] sm:$0xff]  ;;  %v11991_v39 = vld [vmem:[#allocation119_spill] sm:$0xff]  ;;  %v7168_v42 = vld [vmem:[#allocation2 + $0xa10] sm:$0xff] }
 0x255   :  { %11983 = vst [vmem:[#allocation45_spill] sm:$0xff] %v7154_v54  ;;  %v7162_v13 = vadd.f32 %v11988_v24, %v11987_v48  ;;  %v11990_v49 = vld [vmem:[#allocation114_spill] sm:$0xff]  ;;  %11993 = vst [vmem:[#allocation87_spill] sm:$0xff] %v7168_v42  ;;  %v7172_v1 = vld [vmem:[#allocation5 + $0xa00] sm:$0xff] }
 0x256   :  { %11986 = vst [vmem:[#allocation101_spill] sm:$0xff] %v7158_v51  ;;  %v7166_v28 = vadd.f32 %v11991_v39, %v11990_v49  ;;  %v7170_v17 = vld [vmem:[#allocation2 + $0xa18] sm:$0xff]  ;;  %11995 = vst [vmem:[#allocation89_spill] sm:$0xff] %v7172_v1  ;;  %v11996_v0 = vld [vmem:[#allocation75_spill] sm:$0xff] }
 0x257   :  { %11989 = vst [vmem:[#allocation93_spill] sm:$0xff] %v7162_v13  ;;  %11994 = vst [vmem:[#allocation142_spill] sm:$0xff] %v7170_v17  ;;  %v1927_v9 = vadd.f32 %v1926_v3, %v11996_v0  ;;  %v11997_v7 = vld [vmem:[#allocation70_spill] sm:$0xff]  ;;  %v11998_v63 = vld [vmem:[#allocation68_spill] sm:$0xff] }
 0x258   :  { %11992 = vst [vmem:[#allocation41_spill] sm:$0xff] %v7166_v28  ;;  %v1942_v52 = vadd.f32 %v1941_v35, %v11997_v7  ;;  %v1957_v57 = vadd.f32 %v1956_v18, %v11998_v63  ;;  %v7178_v10 = vld [vmem:[#allocation2 + $0xa20] sm:$0xff]  ;;  %v7180_v59 = vld [vmem:[#allocation2 + $0xa28] sm:$0xff]  ;;  %v7182_v38 = vld [vmem:[#allocation2 + $0xa30] sm:$0xff] }
 0x259   :  { %11999 = vst [vmem:[#allocation111_spill] sm:$0xff] %v7178_v10  ;;  %12000 = vst [vmem:[#allocation110_spill] sm:$0xff] %v7180_v59  ;;  %v7184_v15 = vld [vmem:[#allocation2 + $0xa38] sm:$0xff]  ;;  %v7186_v29 = vld [vmem:[#allocation5 + $0xa08] sm:$0xff] }
 0x25a   :  { %12001 = vst [vmem:[#allocation112_spill] sm:$0xff] %v7182_v38  ;;  %12002 = vst [vmem:[#allocation91_spill] sm:$0xff] %v7184_v15  ;;  %v7188_v11 = vld [vmem:[#allocation5 + $0xa10] sm:$0xff]  ;;  %v7190_v36 = vld [vmem:[#allocation5 + $0xa18] sm:$0xff] }
 0x25b   :  { %12003 = vst [vmem:[#allocation11_spill] sm:$0xff] %v7186_v29  ;;  %12004 = vst [vmem:[#allocation95_spill] sm:$0xff] %v7188_v11  ;;  %v12006_v3 = vld [vmem:[#allocation76_spill] sm:$0xff]  ;;  %v12008_v18 = vld [vmem:[#allocation99_spill] sm:$0xff] }
 0x25c   :  { %12005 = vst [vmem:[#allocation104_spill] sm:$0xff] %v7190_v36  ;;  %v7193_v35 = vadd.f32 %v1806_v20, %v12006_v3  ;;  %v7196_v40 = vadd.f32 %v1821_v55, %v12008_v18  ;;  %v12010_v19 = vld [vmem:[#allocation46_spill] sm:$0xff]  ;;  %v12012_v8 = vld [vmem:[#allocation105_spill] sm:$0xff]  ;;  %v7204_v22 = vld [vmem:[#allocation2 + $0xa40] sm:$0xff] }
 0x25d   :  { %v7199_v61 = vadd.f32 %v1836_v4, %v12010_v19  ;;  %v7202_v12 = vadd.f32 %v1851_v14, %v12012_v8  ;;  %12014 = vst [vmem:[#allocation15_spill] sm:$0xff] %v7204_v22  ;;  %v7206_v5 = vld [vmem:[#allocation2 + $0xa48] sm:$0xff]  ;;  %v7208_v62 = vld [vmem:[#allocation2 + $0xa50] sm:$0xff]  ;;  %v7210_v27 = vld [vmem:[#allocation2 + $0xa58] sm:$0xff] }
 0x25e   :  { %12007 = vst [vmem:[#allocation16_spill] sm:$0xff] %v7193_v35  ;;  %12009 = vst [vmem:[#allocation117_spill] sm:$0xff] %v7196_v40  ;;  %v7212_v37 = vld [vmem:[#allocation5 + $0xa20] sm:$0xff]  ;;  %v7214_v20 = vld [vmem:[#allocation5 + $0xa28] sm:$0xff]  ;;  %v7260_v40 = vmul.f32 %v7186_v29, %v7150_v26  ;;  %v7264_v35 = vmul.f32 %v7188_v11, %v7168_v42 }
 0x25f   :  { %12011 = vst [vmem:[#allocation40_spill] sm:$0xff] %v7199_v61  ;;  %12013 = vst [vmem:[#allocation116_spill] sm:$0xff] %v7202_v12  ;;  %v7216_v55 = vld [vmem:[#allocation5 + $0xa30] sm:$0xff]  ;;  %v12021_v48 = vld [vmem:[#allocation123_spill] sm:$0xff]  ;;  %v7308_v28 = vmul.f32 %v7214_v20, %v7180_v59 }
 0x260   :  { %12015 = vst [vmem:[#allocation22_spill] sm:$0xff] %v7206_v5  ;;  %12016 = vst [vmem:[#allocation106_spill] sm:$0xff] %v7208_v62  ;;  %v12022_v4 = vld [vmem:[#allocation71_spill] sm:$0xff]  ;;  %v12024_v14 = vld [vmem:[#allocation86_spill] sm:$0xff]  ;;  %v7312_v13 = vmul.f32 %v7216_v55, %v7182_v38 }
 0x261   :  { %12017 = vst [vmem:[#allocation118_spill] sm:$0xff] %v7210_v27  ;;  %12018 = vst [vmem:[#allocation115_spill] sm:$0xff] %v7212_v37  ;;  %v7220_v24 = vadd.f32 %v12022_v4, %v12021_v48  ;;  %v12025_v49 = vld [vmem:[#allocation34_spill] sm:$0xff]  ;;  %v12027_v0 = vld [vmem:[#allocation67_spill] sm:$0xff] }
 0x262   :  { %12019 = vst [vmem:[#allocation120_spill] sm:$0xff] %v7214_v20  ;;  %12020 = vst [vmem:[#allocation85_spill] sm:$0xff] %v7216_v55  ;;  %v7224_v39 = vadd.f32 %v12025_v49, %v12024_v14  ;;  %v12028_v7 = vld [vmem:[#allocation57_spill] sm:$0xff]  ;;  %v12030_v3 = vld [vmem:[#allocation36_spill] sm:$0xff] }
 0x263   :  { %12023 = vst [vmem:[#allocation100_spill] sm:$0xff] %v7220_v24  ;;  %v7228_v63 = vadd.f32 %v12028_v7, %v12027_v0  ;;  %v12031_v18 = vld [vmem:[#allocation38_spill] sm:$0xff]  ;;  %v7234_v8 = vld [vmem:[#allocation2 + $0xa60] sm:$0xff]  ;;  %v7236_v12 = vld [vmem:[#allocation2 + $0xa68] sm:$0xff]  ;;  %v1958_v24 = vadd.f32 %v1957_v57, %v7066_v34 }
 0x264   :  { %12026 = vst [vmem:[#allocation20_spill] sm:$0xff] %v7224_v39  ;;  %v7232_v19 = vadd.f32 %v12031_v18, %v12030_v3  ;;  %12033 = vst [vmem:[#allocation121_spill] sm:$0xff] %v7234_v8  ;;  %v7238_v61 = vld [vmem:[#allocation2 + $0xa70] sm:$0xff]  ;;  %v7240_v48 = vld [vmem:[#allocation2 + $0xa78] sm:$0xff]  ;;  %v7256_v18 = vmul.f32 %v7172_v1, %v7148_v47  ;;  %v1943_v39 = vadd.f32 %v1942_v52, %v7062_v21 }
 0x265   :  { %12029 = vst [vmem:[#allocation143_spill] sm:$0xff] %v7228_v63  ;;  %12034 = vst [vmem:[#allocation146_spill] sm:$0xff] %v7236_v12  ;;  %v7242_v4 = vld [vmem:[#allocation5 + $0xa38] sm:$0xff]  ;;  %v7244_v14 = vld [vmem:[#allocation5 + $0xa40] sm:$0xff]  ;;  %v1928_v63 = vadd.f32 %v1927_v9, %v7058_v33  ;;  %v1973_v1 = vadd.f32 %v1972_v53, %v7070_v25  ;;  %v7304_v53 = vmul.f32 %v7212_v37, %v7178_v10 }
 0x266   :  { %12032 = vst [vmem:[#allocation125_spill] sm:$0xff] %v7232_v19  ;;  %12035 = vst [vmem:[#allocation128_spill] sm:$0xff] %v7238_v61  ;;  %v7246_v49 = vld [vmem:[#allocation5 + $0xa48] sm:$0xff]  ;;  %v7248_v0 = vld [vmem:[#allocation5 + $0xa50] sm:$0xff]  ;;  %v7268_v19 = vmul.f32 %v7190_v36, %v7170_v17  ;;  %v7316_v51 = vmul.f32 %v7242_v4, %v7184_v15  ;;  %v7334_v55 = vmul.f32 %v7244_v14, %v7204_v22 }
 0x267   :  { %12036 = vst [vmem:[#allocation113_spill] sm:$0xff] %v7240_v48  ;;  %12037 = vst [vmem:[#allocation145_spill] sm:$0xff] %v7242_v4  ;;  %v7250_v7 = vld [vmem:[#allocation5 + $0xa58] sm:$0xff]  ;;  %v7252_v3 = vld [vmem:[#allocation5 + $0xa60] sm:$0xff]  ;;  %v7338_v4 = vmul.f32 %v7246_v49, %v7206_v5  ;;  %v7342_v15 = vmul.f32 %v7248_v0, %v7208_v62  ;;  %v1944_v62 = vadd.f32 %v1943_v39, %v7082_v16 }
 0x268   :  { %12038 = vst [vmem:[#allocation127_spill] sm:$0xff] %v7244_v14  ;;  %12039 = vst [vmem:[#allocation136_spill] sm:$0xff] %v7246_v49  ;;  %v7274_v47 = vld [vmem:[#allocation2 + $0xa80] sm:$0xff]  ;;  %v7276_v29 = vld [vmem:[#allocation2 + $0xa88] sm:$0xff]  ;;  %v7346_v38 = vmul.f32 %v7250_v7, %v7210_v27  ;;  %v7356_v14 = vmul.f32 %v7252_v3, %v7234_v8  ;;  %v1929_v27 = vadd.f32 %v1928_v63, %v7078_v56 }
 0x269   :  { %12040 = vst [vmem:[#allocation19_spill] sm:$0xff] %v7248_v0  ;;  %12041 = vst [vmem:[#allocation50_spill] sm:$0xff] %v7250_v7  ;;  %v7278_v26 = vld [vmem:[#allocation2 + $0xa90] sm:$0xff]  ;;  %v7280_v11 = vld [vmem:[#allocation2 + $0xa98] sm:$0xff]  ;;  %v1959_v5 = vadd.f32 %v1958_v24, %v7086_v6 }
 0x26a   :  { %12042 = vst [vmem:[#allocation137_spill] sm:$0xff] %v7252_v3  ;;  %12043 = vst [vmem:[#allocation54_spill] sm:$0xff] %v7276_v29  ;;  %v7282_v42 = vld [vmem:[#allocation5 + $0xa68] sm:$0xff]  ;;  %v7284_v36 = vld [vmem:[#allocation5 + $0xa70] sm:$0xff]  ;;  %v1974_v3 = vadd.f32 %v1973_v1, %v7090_v41 }
 0x26b   :  { %12044 = vst [vmem:[#allocation144_spill] sm:$0xff] %v7278_v26  ;;  %12045 = vst [vmem:[#allocation124_spill] sm:$0xff] %v7280_v11  ;;  %v7286_v17 = vld [vmem:[#allocation5 + $0xa78] sm:$0xff]  ;;  %v7288_v33 = vld [vmem:[#allocation2 + $0xaa0] sm:$0xff]  ;;  %v7360_v49 = vmul.f32 %v7282_v42, %v7236_v12  ;;  %v7364_v0 = vmul.f32 %v7284_v36, %v7238_v61 }
 0x26c   :  { %12046 = vst [vmem:[#allocation126_spill] sm:$0xff] %v7282_v42  ;;  %12047 = vst [vmem:[#allocation149_spill] sm:$0xff] %v7284_v36  ;;  %v7290_v21 = vld [vmem:[#allocation2 + $0xaa8] sm:$0xff]  ;;  %v7292_v34 = vld [vmem:[#allocation2 + $0xab0] sm:$0xff]  ;;  %v7368_v7 = vmul.f32 %v7286_v17, %v7240_v48 }
 0x26d   :  { %12048 = vst [vmem:[#allocation12_spill] sm:$0xff] %v7286_v17  ;;  %12049 = vst [vmem:[#allocation39_spill] sm:$0xff] %v7290_v21  ;;  %v7294_v25 = vld [vmem:[#allocation2 + $0xab8] sm:$0xff]  ;;  %v7296_v9 = vld [vmem:[#allocation5 + $0xa80] sm:$0xff] }
 0x26e   :  { %12050 = vst [vmem:[#allocation129_spill] sm:$0xff] %v7292_v34  ;;  %12051 = vst [vmem:[#allocation150_spill] sm:$0xff] %v7294_v25  ;;  %v7298_v52 = vld [vmem:[#allocation5 + $0xa88] sm:$0xff]  ;;  %v7300_v57 = vld [vmem:[#allocation5 + $0xa90] sm:$0xff]  ;;  %v7402_v39 = vmul.f32 %v7296_v9, %v7274_v47 }
 0x26f   :  { %12052 = vst [vmem:[#allocation134_spill] sm:$0xff] %v7296_v9  ;;  %12053 = vst [vmem:[#allocation35_spill] sm:$0xff] %v7298_v52  ;;  %v7318_v54 = vld [vmem:[#allocation2 + $0xac0] sm:$0xff]  ;;  %v7320_v60 = vld [vmem:[#allocation2 + $0xac8] sm:$0xff]  ;;  %v7406_v63 = vmul.f32 %v7298_v52, %v7276_v29  ;;  %v7410_v22 = vmul.f32 %v7300_v57, %v7278_v26 }
 0x270   :  { %12054 = vst [vmem:[#allocation147_spill] sm:$0xff] %v7300_v57  ;;  %12055 = vst [vmem:[#allocation42_spill] sm:$0xff] %v7318_v54  ;;  %v7322_v2 = vld [vmem:[#allocation2 + $0xad0] sm:$0xff]  ;;  %v7324_v37 = vld [vmem:[#allocation2 + $0xad8] sm:$0xff] }
 0x271   :  { %12056 = vst [vmem:[#allocation47_spill] sm:$0xff] %v7324_v37  ;;  %v7326_v10 = vld [vmem:[#allocation5 + $0xa98] sm:$0xff]  ;;  %v7328_v20 = vld [vmem:[#allocation5 + $0xaa0] sm:$0xff]  ;;  %v7330_v59 = vld [vmem:[#allocation5 + $0xaa8] sm:$0xff] }
 0x272   :  { %12057 = vst [vmem:[#allocation138_spill] sm:$0xff] %v7326_v10  ;;  %12058 = vst [vmem:[#allocation148_spill] sm:$0xff] %v7328_v20  ;;  %v7348_v58 = vld [vmem:[#allocation5 + $0xab0] sm:$0xff]  ;;  %v7350_v46 = vld [vmem:[#allocation5 + $0xab8] sm:$0xff]  ;;  %v7424_v9 = vmul.f32 %v7328_v20, %v7288_v33  ;;  %v7428_v52 = vmul.f32 %v7330_v59, %v7290_v21  ;;  %v1960_v21 = vadd.f32 %v1959_v5, %v7106_v31 }
 0x273   :  { %12059 = vst [vmem:[#allocation140_spill] sm:$0xff] %v7330_v59  ;;  %12060 = vst [vmem:[#allocation135_spill] sm:$0xff] %v7348_v58  ;;  %v7352_v50 = vld [vmem:[#allocation5 + $0xac0] sm:$0xff]  ;;  %v7376_v42 = vld [vmem:[#allocation2 + $0xae8] sm:$0xff]  ;;  %v7432_v57 = vmul.f32 %v7348_v58, %v7292_v34  ;;  %v1945_v34 = vadd.f32 %v1944_v62, %v7102_v43 }
 0x274   :  { %12061 = vst [vmem:[#allocation98_spill] sm:$0xff] %v7350_v46  ;;  %12062 = vst [vmem:[#allocation27_spill] sm:$0xff] %v7352_v50  ;;  %v7374_v8 = vld [vmem:[#allocation2 + $0xae0] sm:$0xff]  ;;  %v7378_v12 = vld [vmem:[#allocation2 + $0xaf0] sm:$0xff]  ;;  %v7446_v20 = vmul.f32 %v7352_v50, %v7318_v54  ;;  %v1975_v50 = vadd.f32 %v1974_v3, %v7110_v45 }
 0x275   :  { %12063 = vst [vmem:[#allocation29_spill] sm:$0xff] %v7356_v14  ;;  %12064 = vst [vmem:[#allocation88_spill] sm:$0xff] %v7360_v49  ;;  %v7380_v36 = vld [vmem:[#allocation2 + $0xaf8] sm:$0xff]  ;;  %v7382_v61 = vld [vmem:[#allocation5 + $0xac8] sm:$0xff] }
 0x276   :  { %12065 = vst [vmem:[#allocation30_spill] sm:$0xff] %v7364_v0  ;;  %12066 = vst [vmem:[#allocation32_spill] sm:$0xff] %v7368_v7  ;;  %v7384_v17 = vld [vmem:[#allocation5 + $0xad0] sm:$0xff]  ;;  %v7386_v48 = vld [vmem:[#allocation5 + $0xad8] sm:$0xff]  ;;  %v7414_v7 = vmul.f32 %v7326_v10, %v7280_v11  ;;  %v7436_v10 = vmul.f32 %v7350_v46, %v7294_v25  ;;  %v7450_v59 = vmul.f32 %v7382_v61, %v7320_v60 }
 0x277   :  { %12067 = vst [vmem:[#allocation131_spill] sm:$0xff] %v7374_v8  ;;  %12068 = vst [vmem:[#allocation139_spill] sm:$0xff] %v7376_v42  ;;  %v7388_v56 = vld [vmem:[#allocation2 + $0xb00] sm:$0xff]  ;;  %v7390_v16 = vld [vmem:[#allocation2 + $0xb08] sm:$0xff]  ;;  %v7454_v58 = vmul.f32 %v7384_v17, %v7322_v2  ;;  %v7458_v46 = vmul.f32 %v7386_v48, %v7324_v37  ;;  %v1930_v25 = vadd.f32 %v1929_v27, %v7098_v44 }
 0x278   :  { %12069 = vst [vmem:[#allocation133_spill] sm:$0xff] %v7378_v12  ;;  %12070 = vst [vmem:[#allocation141_spill] sm:$0xff] %v7380_v36  ;;  %v7392_v6 = vld [vmem:[#allocation2 + $0xb10] sm:$0xff]  ;;  %v7394_v41 = vld [vmem:[#allocation2 + $0xb18] sm:$0xff] }
 0x279   :  { %12071 = vst [vmem:[#allocation13_spill] sm:$0xff] %v7382_v61  ;;  %12072 = vst [vmem:[#allocation56_spill] sm:$0xff] %v7384_v17  ;;  %v7396_v1 = vld [vmem:[#allocation5 + $0xae0] sm:$0xff]  ;;  %v7398_v24 = vld [vmem:[#allocation5 + $0xae8] sm:$0xff] }
 0x27a   :  { %12073 = vst [vmem:[#allocation130_spill] sm:$0xff] %v7386_v48  ;;  %12074 = vst [vmem:[#allocation23_spill] sm:$0xff] %v7388_v56  ;;  %v7416_v0 = vld [vmem:[#allocation5 + $0xaf0] sm:$0xff]  ;;  %v7418_v49 = vld [vmem:[#allocation5 + $0xaf8] sm:$0xff]  ;;  %v7470_v17 = vmul.f32 %v7396_v1, %v7374_v8  ;;  %v7474_v48 = vmul.f32 %v7398_v24, %v7376_v42 }
 0x27b   :  { %12075 = vst [vmem:[#allocation132_spill] sm:$0xff] %v7390_v16  ;;  %12076 = vst [vmem:[#allocation59_spill] sm:$0xff] %v7392_v6  ;;  %v7420_v14 = vld [vmem:[#allocation5 + $0xb00] sm:$0xff]  ;;  %v7438_v11 = vld [vmem:[#allocation5 + $0xb08] sm:$0xff]  ;;  %v7478_v44 = vmul.f32 %v7416_v0, %v7378_v12  ;;  %v7482_v43 = vmul.f32 %v7418_v49, %v7380_v36 }
 0x27c   :  { %12077 = vst [vmem:[#allocation17_spill] sm:$0xff] %v7394_v41  ;;  %12078 = vst [vmem:[#allocation26_spill] sm:$0xff] %v7396_v1  ;;  %v7440_v26 = vld [vmem:[#allocation5 + $0xb10] sm:$0xff]  ;;  %v7442_v29 = vld [vmem:[#allocation5 + $0xb18] sm:$0xff]  ;;  %v7492_v62 = vmul.f32 %v7420_v14, %v7388_v56  ;;  %v7496_v27 = vmul.f32 %v7438_v11, %v7390_v16  ;;  %v1961_v16 = vadd.f32 %v1960_v21, %v7122_v30 }
 0x27d   :  { %12079 = vst [vmem:[#allocation18_spill] sm:$0xff] %v7398_v24  ;;  %12080 = vst [vmem:[#allocation61_spill] sm:$0xff] %v7416_v0  ;;  %v7464_v54 = vld [vmem:[#allocation2 + $0xb20] sm:$0xff]  ;;  %v7466_v61 = vld [vmem:[#allocation2 + $0xb28] sm:$0xff]  ;;  %v7500_v3 = vmul.f32 %v7440_v26, %v7392_v6  ;;  %v2221_v6 = vadd.f32 %v7316_v51, %v7268_v19 }
 0x27e   :  { %12081 = vst [vmem:[#allocation69_spill] sm:$0xff] %v7418_v49  ;;  %12082 = vst [vmem:[#allocation49_spill] sm:$0xff] %v7420_v14  ;;  %v7484_v31 = vld [vmem:[#allocation2 + $0xb30] sm:$0xff]  ;;  %v7486_v45 = vld [vmem:[#allocation2 + $0xb38] sm:$0xff]  ;;  %v7504_v49 = vmul.f32 %v7442_v29, %v7394_v41  ;;  %v2176_v14 = vadd.f32 %v7304_v53, %v7256_v18  ;;  %v1946_v41 = vadd.f32 %v1945_v34, %v7118_v32 }
 0x27f   :  { %12083 = vst [vmem:[#allocation31_spill] sm:$0xff] %v7438_v11  ;;  %12084 = vst [vmem:[#allocation24_spill] sm:$0xff] %v7440_v26  ;;  %v7488_v5 = vld [vmem:[#allocation5 + $0xb20] sm:$0xff]  ;;  %v7506_v36 = vld [vmem:[#allocation5 + $0xb28] sm:$0xff]  ;;  %v2191_v11 = vadd.f32 %v7308_v28, %v7260_v40  ;;  %v2206_v26 = vadd.f32 %v7312_v13, %v7264_v35  ;;  %v2222_v51 = vadd.f32 %v2221_v6, %v7346_v38 }
 0x280   :  { %12085 = vst [vmem:[#allocation84_spill] sm:$0xff] %v7442_v29  ;;  %12086 = vst [vmem:[#allocation80_spill] sm:$0xff] %v7464_v54  ;;  %v7508_v0 = vld [vmem:[#allocation5 + $0xb30] sm:$0xff]  ;;  %v7510_v12 = vld [vmem:[#allocation5 + $0xb38] sm:$0xff]  ;;  %v1931_v29 = vadd.f32 %v1930_v25, %v7114_v23  ;;  %v2177_v28 = vadd.f32 %v2176_v14, %v7334_v55  ;;  %v7540_v30 = vmul.f32 %v7488_v5, %v7464_v54 }
 0x281   :  { %12087 = vst [vmem:[#allocation63_spill] sm:$0xff] %v7466_v61  ;;  %12088 = vst [vmem:[#allocation51_spill] sm:$0xff] %v7484_v31  ;;  %v12094_v56 = vld [vmem:[#allocation73_spill] sm:$0xff]  ;;  %v7524_v42 = vld [vmem:[#allocation2 + $0xb40] sm:$0xff]  ;;  %v2192_v40 = vadd.f32 %v2191_v11, %v7338_v4  ;;  %v2207_v13 = vadd.f32 %v2206_v26, %v7342_v15  ;;  %v7548_v11 = vmul.f32 %v7508_v0, %v7484_v31 }
 0x282   :  { %12089 = vst [vmem:[#allocation102_spill] sm:$0xff] %v7486_v45  ;;  %12090 = vst [vmem:[#allocation21_spill] sm:$0xff] %v7488_v5  ;;  %v1976_v24 = vadd.f32 %v1975_v50, %v12094_v56  ;;  %v7526_v18 = vld [vmem:[#allocation2 + $0xb48] sm:$0xff]  ;;  %v7532_v35 = vld [vmem:[#allocation2 + $0xb50] sm:$0xff]  ;;  %v7544_v50 = vmul.f32 %v7506_v36, %v7466_v61  ;;  %v7552_v26 = vmul.f32 %v7510_v12, %v7486_v45 }
 0x283   :  { %12091 = vst [vmem:[#allocation33_spill] sm:$0xff] %v7506_v36  ;;  %12092 = vst [vmem:[#allocation37_spill] sm:$0xff] %v7508_v0  ;;  %v7534_v23 = vld [vmem:[#allocation2 + $0xb58] sm:$0xff]  ;;  %v7536_v32 = vld [vmem:[#allocation5 + $0xb40] sm:$0xff] }
 0x284   :  { %12093 = vst [vmem:[#allocation94_spill] sm:$0xff] %v7510_v12  ;;  %12095 = vst [vmem:[#allocation62_spill] sm:$0xff] %v7524_v42  ;;  %v7554_v38 = vld [vmem:[#allocation5 + $0xb48] sm:$0xff]  ;;  %v7556_v15 = vld [vmem:[#allocation5 + $0xb50] sm:$0xff] }
 0x285   :  { %12096 = vst [vmem:[#allocation53_spill] sm:$0xff] %v7526_v18  ;;  %12097 = vst [vmem:[#allocation25_spill] sm:$0xff] %v7532_v35  ;;  %v7558_v55 = vld [vmem:[#allocation5 + $0xb58] sm:$0xff]  ;;  %v12103_v19 = vld [vmem:[#allocation29_spill] sm:$0xff] }
 0x286   :  { %12098 = vst [vmem:[#allocation44_spill] sm:$0xff] %v7534_v23  ;;  %12099 = vst [vmem:[#allocation122_spill] sm:$0xff] %v7536_v32  ;;  %v2178_v4 = vadd.f32 %v2177_v28, %v12103_v19  ;;  %v12104_v14 = vld [vmem:[#allocation88_spill] sm:$0xff]  ;;  %v12105_v34 = vld [vmem:[#allocation30_spill] sm:$0xff] }
 0x287   :  { %12100 = vst [vmem:[#allocation96_spill] sm:$0xff] %v7554_v38  ;;  %12101 = vst [vmem:[#allocation43_spill] sm:$0xff] %v7556_v15  ;;  %v2193_v21 = vadd.f32 %v2192_v40, %v12104_v14  ;;  %v2208_v25 = vadd.f32 %v2207_v13, %v12105_v34  ;;  %v12106_v53 = vld [vmem:[#allocation32_spill] sm:$0xff]  ;;  %v12107_v6 = vld [vmem:[#allocation65_spill] sm:$0xff] }
 0x288   :  { %12102 = vst [vmem:[#allocation74_spill] sm:$0xff] %v7558_v55  ;;  %v2223_v56 = vadd.f32 %v2222_v51, %v12106_v53  ;;  %v1932_v0 = vadd.f32 %v1931_v29, %v12107_v6  ;;  %v12108_v31 = vld [vmem:[#allocation60_spill] sm:$0xff]  ;;  %v12109_v12 = vld [vmem:[#allocation82_spill] sm:$0xff]  ;;  %v12110_v61 = vld [vmem:[#allocation103_spill] sm:$0xff]  ;;  %v2179_v40 = vadd.f32 %v2178_v4, %v7402_v39  ;;  %v7594_v39 = vmul.f32 %v7536_v32, %v7524_v42 }
 0x289   :  { %v1947_v36 = vadd.f32 %v1946_v41, %v12108_v31  ;;  %v1962_v45 = vadd.f32 %v1961_v16, %v12109_v12  ;;  %v1977_v5 = vadd.f32 %v1976_v24, %v12110_v61  ;;  %v7568_v54 = vld [vmem:[#allocation2 + $0xb60] sm:$0xff]  ;;  %v7570_v1 = vld [vmem:[#allocation2 + $0xb68] sm:$0xff]  ;;  %v7572_v8 = vld [vmem:[#allocation2 + $0xb70] sm:$0xff]  ;;  %v2194_v13 = vadd.f32 %v2193_v21, %v7406_v63 }
 0x28a   :  { %12111 = vst [vmem:[#allocation28_spill] sm:$0xff] %v7568_v54  ;;  %12112 = vst [vmem:[#allocation78_spill] sm:$0xff] %v7570_v1  ;;  %v7574_v28 = vld [vmem:[#allocation2 + $0xb78] sm:$0xff]  ;;  %v2209_v29 = vadd.f32 %v2208_v25, %v7410_v22  ;;  %v2224_v41 = vadd.f32 %v2223_v56, %v7414_v7  ;;  %v7580_v31 = vld [vmem:[#allocation2 + $0xb80] sm:$0xff]  ;;  %v7598_v22 = vmul.f32 %v7554_v38, %v7526_v18 }
 0x28b   :  { %12113 = vst [vmem:[#allocation64_spill] sm:$0xff] %v7572_v8  ;;  %12114 = vst [vmem:[#allocation52_spill] sm:$0xff] %v7574_v28  ;;  %v7582_v12 = vld [vmem:[#allocation2 + $0xb88] sm:$0xff]  ;;  %v7584_v61 = vld [vmem:[#allocation2 + $0xb90] sm:$0xff]  ;;  %v7602_v7 = vmul.f32 %v7556_v15, %v7532_v35  ;;  %v7606_v63 = vmul.f32 %v7558_v55, %v7534_v23  ;;  %v2180_v21 = vadd.f32 %v2179_v40, %v7424_v9 }
 0x28c   :  { %12115 = vst [vmem:[#allocation83_spill] sm:$0xff] %v7580_v31  ;;  %12116 = vst [vmem:[#allocation81_spill] sm:$0xff] %v7582_v12  ;;  %v7586_v16 = vld [vmem:[#allocation2 + $0xb98] sm:$0xff]  ;;  %v7588_v24 = vld [vmem:[#allocation5 + $0xb60] sm:$0xff]  ;;  %v2195_v34 = vadd.f32 %v2194_v13, %v7428_v52  ;;  %v2210_v25 = vadd.f32 %v2209_v29, %v7432_v57  ;;  %v2225_v53 = vadd.f32 %v2224_v41, %v7436_v10 }
 0x28d   :  { %12117 = vst [vmem:[#allocation79_spill] sm:$0xff] %v7584_v61  ;;  %12118 = vst [vmem:[#allocation90_spill] sm:$0xff] %v7586_v16  ;;  %v7590_v51 = vld [vmem:[#allocation5 + $0xb68] sm:$0xff]  ;;  %v7608_v19 = vld [vmem:[#allocation5 + $0xb70] sm:$0xff] }
 0x28e   :  { %12119 = vst [vmem:[#allocation55_spill] sm:$0xff] %v7588_v24  ;;  %12120 = vst [vmem:[#allocation77_spill] sm:$0xff] %v7590_v51  ;;  %v7610_v4 = vld [vmem:[#allocation5 + $0xb78] sm:$0xff]  ;;  %v7612_v14 = vld [vmem:[#allocation5 + $0xb80] sm:$0xff] }
 0x28f   :  { %12121 = vst [vmem:[#allocation48_spill] sm:$0xff] %v7608_v19  ;;  %12122 = vst [vmem:[#allocation72_spill] sm:$0xff] %v7610_v4  ;;  %v12124_v56 = vld [vmem:[#allocation45_spill] sm:$0xff]  ;;  %v7622_v32 = vld [vmem:[#allocation5 + $0xb88] sm:$0xff] }
 0x290   :  { %12123 = vst [vmem:[#allocation58_spill] sm:$0xff] %v7612_v14  ;;  %v1933_v6 = vadd.f32 %v1932_v0, %v12124_v56  ;;  %v12125_v15 = vld [vmem:[#allocation101_spill] sm:$0xff]  ;;  %12128 = vst [vmem:[#allocation66_spill] sm:$0xff] %v7622_v32  ;;  %v7626_v37 = vld [vmem:[#allocation5 + $0xb98] sm:$0xff]  ;;  %v2196_v0 = vadd.f32 %v2195_v34, %v7450_v59  ;;  %v7666_v59 = vmul.f32 %v7610_v4, %v7574_v28 }
 0x291   :  { %v1948_v35 = vadd.f32 %v1947_v36, %v12125_v15  ;;  %v12126_v55 = vld [vmem:[#allocation93_spill] sm:$0xff]  ;;  %12130 = vst [vmem:[#allocation119_spill] sm:$0xff] %v7626_v37  ;;  %v7628_v9 = vld [vmem:[#allocation2 + $0xba0] sm:$0xff]  ;;  %v7630_v52 = vld [vmem:[#allocation2 + $0xba8] sm:$0xff]  ;;  %v2181_v36 = vadd.f32 %v2180_v21, %v7446_v20  ;;  %v7654_v20 = vmul.f32 %v7588_v24, %v7568_v54  ;;  %v7688_v4 = vmul.f32 %v7626_v37, %v7586_v16 }
 0x292   :  { %v1963_v23 = vadd.f32 %v1962_v45, %v12126_v55  ;;  %v12127_v38 = vld [vmem:[#allocation41_spill] sm:$0xff]  ;;  %12131 = vst [vmem:[#allocation75_spill] sm:$0xff] %v7628_v9  ;;  %12132 = vst [vmem:[#allocation70_spill] sm:$0xff] %v7630_v52  ;;  %v7634_v10 = vld [vmem:[#allocation2 + $0xbb8] sm:$0xff]  ;;  %v2211_v45 = vadd.f32 %v2210_v25, %v7454_v58  ;;  %v7658_v58 = vmul.f32 %v7590_v51, %v7570_v1 }
 0x293   :  { %v1978_v18 = vadd.f32 %v1977_v5, %v12127_v38  ;;  %v7624_v42 = vld [vmem:[#allocation5 + $0xb90] sm:$0xff]  ;;  %12134 = vst [vmem:[#allocation76_spill] sm:$0xff] %v7634_v10  ;;  %v2226_v5 = vadd.f32 %v2225_v53, %v7458_v46  ;;  %v7640_v38 = vld [vmem:[#allocation2 + $0xbc0] sm:$0xff]  ;;  %v7642_v15 = vld [vmem:[#allocation2 + $0xbc8] sm:$0xff]  ;;  %v7662_v46 = vmul.f32 %v7608_v19, %v7572_v8  ;;  %v7676_v25 = vmul.f32 %v7612_v14, %v7580_v31 }
 0x294   :  { %12129 = vst [vmem:[#allocation114_spill] sm:$0xff] %v7624_v42  ;;  %v7632_v57 = vld [vmem:[#allocation2 + $0xbb0] sm:$0xff]  ;;  %12135 = vst [vmem:[#allocation99_spill] sm:$0xff] %v7640_v38  ;;  %v7646_v40 = vld [vmem:[#allocation2 + $0xbd8] sm:$0xff]  ;;  %v7680_v53 = vmul.f32 %v7622_v32, %v7582_v12  ;;  %v7684_v56 = vmul.f32 %v7624_v42, %v7584_v61  ;;  %v2182_v14 = vadd.f32 %v2181_v36, %v7470_v17 }
 0x295   :  { %12133 = vst [vmem:[#allocation68_spill] sm:$0xff] %v7632_v57  ;;  %12136 = vst [vmem:[#allocation46_spill] sm:$0xff] %v7642_v15  ;;  %v7644_v55 = vld [vmem:[#allocation2 + $0xbd0] sm:$0xff]  ;;  %v7648_v13 = vld [vmem:[#allocation5 + $0xba0] sm:$0xff]  ;;  %v2197_v31 = vadd.f32 %v2196_v0, %v7474_v48  ;;  %v2212_v32 = vadd.f32 %v2211_v45, %v7478_v44  ;;  %v2227_v12 = vadd.f32 %v2226_v5, %v7482_v43 }
 0x296   :  { %12137 = vst [vmem:[#allocation105_spill] sm:$0xff] %v7644_v55  ;;  %12138 = vst [vmem:[#allocation123_spill] sm:$0xff] %v7646_v40  ;;  %v7650_v29 = vld [vmem:[#allocation5 + $0xba8] sm:$0xff]  ;;  %v7668_v41 = vld [vmem:[#allocation5 + $0xbb0] sm:$0xff]  ;;  %v7716_v44 = vmul.f32 %v7648_v13, %v7628_v9  ;;  %v2183_v0 = vadd.f32 %v2182_v14, %v7492_v62 }
 0x297   :  { %12139 = vst [vmem:[#allocation71_spill] sm:$0xff] %v7648_v13  ;;  %12140 = vst [vmem:[#allocation86_spill] sm:$0xff] %v7650_v29  ;;  %v7670_v21 = vld [vmem:[#allocation5 + $0xbb8] sm:$0xff]  ;;  %v7672_v34 = vld [vmem:[#allocation5 + $0xbc0] sm:$0xff]  ;;  %v2198_v45 = vadd.f32 %v2197_v31, %v7496_v27  ;;  %v2213_v5 = vadd.f32 %v2212_v32, %v7500_v3 }
 0x298   :  { %12141 = vst [vmem:[#allocation34_spill] sm:$0xff] %v7668_v41  ;;  %12142 = vst [vmem:[#allocation67_spill] sm:$0xff] %v7670_v21  ;;  %v7690_v28 = vld [vmem:[#allocation5 + $0xbc8] sm:$0xff]  ;;  %v7692_v19 = vld [vmem:[#allocation5 + $0xbd0] sm:$0xff]  ;;  %v7728_v43 = vmul.f32 %v7670_v21, %v7634_v10 }
 0x299   :  { %12143 = vst [vmem:[#allocation57_spill] sm:$0xff] %v7672_v34  ;;  %12144 = vst [vmem:[#allocation36_spill] sm:$0xff] %v7680_v53  ;;  %v7694_v8 = vld [vmem:[#allocation5 + $0xbd8] sm:$0xff]  ;;  %v12150_v42 = vld [vmem:[#allocation100_spill] sm:$0xff] }
 0x29a   :  { %12145 = vst [vmem:[#allocation38_spill] sm:$0xff] %v7684_v56  ;;  %12146 = vst [vmem:[#allocation73_spill] sm:$0xff] %v7688_v4  ;;  %v1934_v61 = vadd.f32 %v1933_v6, %v12150_v42  ;;  %v12151_v51 = vld [vmem:[#allocation20_spill] sm:$0xff]  ;;  %v12152_v37 = vld [vmem:[#allocation143_spill] sm:$0xff]  ;;  %v7720_v42 = vmul.f32 %v7650_v29, %v7630_v52  ;;  %v7746_v6 = vmul.f32 %v7692_v19, %v7644_v55 }
 0x29b   :  { %12147 = vst [vmem:[#allocation29_spill] sm:$0xff] %v7690_v28  ;;  %12148 = vst [vmem:[#allocation88_spill] sm:$0xff] %v7692_v19  ;;  %v1949_v1 = vadd.f32 %v1948_v35, %v12151_v51  ;;  %v1964_v16 = vadd.f32 %v1963_v23, %v12152_v37  ;;  %v12153_v24 = vld [vmem:[#allocation125_spill] sm:$0xff]  ;;  %v7704_v4 = vld [vmem:[#allocation2 + $0xbe0] sm:$0xff]  ;;  %v7724_v37 = vmul.f32 %v7668_v41, %v7632_v57 }
 0x29c   :  { %12149 = vst [vmem:[#allocation30_spill] sm:$0xff] %v7694_v8  ;;  %v1979_v54 = vadd.f32 %v1978_v18, %v12153_v24  ;;  %12154 = vst [vmem:[#allocation32_spill] sm:$0xff] %v7704_v4  ;;  %v7706_v56 = vld [vmem:[#allocation2 + $0xbe8] sm:$0xff]  ;;  %v7708_v53 = vld [vmem:[#allocation2 + $0xbf0] sm:$0xff]  ;;  %v7738_v24 = vmul.f32 %v7672_v34, %v7640_v38  ;;  %v7742_v51 = vmul.f32 %v7690_v28, %v7642_v15 }
 0x29d   :  { %12155 = vst [vmem:[#allocation65_spill] sm:$0xff] %v7706_v56  ;;  %12156 = vst [vmem:[#allocation60_spill] sm:$0xff] %v7708_v53  ;;  %v7710_v17 = vld [vmem:[#allocation2 + $0xbf8] sm:$0xff]  ;;  %v7712_v48 = vld [vmem:[#allocation5 + $0xbe0] sm:$0xff]  ;;  %v7750_v36 = vmul.f32 %v7694_v8, %v7646_v40  ;;  %v2228_v34 = vadd.f32 %v2227_v12, %v7504_v49 }
 0x29e   :  { %12157 = vst [vmem:[#allocation82_spill] sm:$0xff] %v7710_v17  ;;  %12158 = vst [vmem:[#allocation103_spill] sm:$0xff] %v7712_v48  ;;  %v7730_v18 = vld [vmem:[#allocation5 + $0xbe8] sm:$0xff]  ;;  %v7732_v35 = vld [vmem:[#allocation5 + $0xbf0] sm:$0xff]  ;;  %v7770_v62 = vmul.f32 %v7712_v48, %v7704_v4 }
 0x29f   :  { %12159 = vst [vmem:[#allocation45_spill] sm:$0xff] %v7730_v18  ;;  %12160 = vst [vmem:[#allocation101_spill] sm:$0xff] %v7732_v35  ;;  %v7734_v23 = vld [vmem:[#allocation5 + $0xbf8] sm:$0xff]  ;;  %v12163_v38 = vld [vmem:[#allocation97_spill] sm:$0xff]  ;;  %v7774_v27 = vmul.f32 %v7730_v18, %v7706_v56  ;;  %v7778_v49 = vmul.f32 %v7732_v35, %v7708_v53 }
 0x2a0   :  { %12161 = vst [vmem:[#allocation93_spill] sm:$0xff] %v7734_v23  ;;  %12162 = vst [vmem:[#allocation41_spill] sm:$0xff] %v7750_v36  ;;  %v7757_v21 = vadd.f32 %v1934_v61, %v12163_v38  ;;  %v12165_v28 = vld [vmem:[#allocation109_spill] sm:$0xff]  ;;  %v12167_v19 = vld [vmem:[#allocation107_spill] sm:$0xff] }
 0x2a1   :  { %v7760_v15 = vadd.f32 %v1949_v1, %v12165_v28  ;;  %v7763_v55 = vadd.f32 %v1964_v16, %v12167_v19  ;;  %v12169_v10 = vld [vmem:[#allocation14_spill] sm:$0xff]  ;;  %12171 = vst [vmem:[#allocation97_spill] sm:$0xff] %v7770_v62  ;;  %12172 = vst [vmem:[#allocation109_spill] sm:$0xff] %v7774_v27  ;;  %v7782_v1 = vmul.f32 %v7734_v23, %v7710_v17  ;;  %v12175_v3 = vld [vmem:[#allocation92_spill] sm:$0xff] }
 0x2a2   :  { %12164 = vst [vmem:[#allocation100_spill] sm:$0xff] %v7757_v21  ;;  %v7766_v8 = vadd.f32 %v1979_v54, %v12169_v10  ;;  %12173 = vst [vmem:[#allocation107_spill] sm:$0xff] %v7778_v49  ;;  %v12176_v32 = vld [vmem:[#allocation89_spill] sm:$0xff]  ;;  %v12177_v28 = vld [vmem:[#allocation108_spill] sm:$0xff]  ;;  %v2229_v21 = vadd.f32 %v2228_v34, %v7552_v26 }
 0x2a3   :  { %12166 = vst [vmem:[#allocation20_spill] sm:$0xff] %v7760_v15  ;;  %12168 = vst [vmem:[#allocation143_spill] sm:$0xff] %v7763_v55  ;;  %v2240_v54 = vadd.f32 %v12176_v32, %v12175_v3  ;;  %v12178_v31 = vld [vmem:[#allocation11_spill] sm:$0xff]  ;;  %v12181_v14 = vld [vmem:[#allocation142_spill] sm:$0xff]  ;;  %v2199_v55 = vadd.f32 %v2198_v45, %v7544_v50  ;;  %v2214_v15 = vadd.f32 %v2213_v5, %v7548_v11 }
 0x2a4   :  { %12170 = vst [vmem:[#allocation125_spill] sm:$0xff] %v7766_v8  ;;  %12174 = vst [vmem:[#allocation14_spill] sm:$0xff] %v7782_v1  ;;  %v2241_v12 = vadd.f32 %v12178_v31, %v12177_v28  ;;  %v12179_v61 = vld [vmem:[#allocation87_spill] sm:$0xff]  ;;  %v12182_v10 = vld [vmem:[#allocation104_spill] sm:$0xff]  ;;  %v2184_v8 = vadd.f32 %v2183_v0, %v7540_v30 }
 0x2a5   :  { %v12180_v16 = vld [vmem:[#allocation95_spill] sm:$0xff]  ;;  %v2243_v38 = vadd.f32 %v12182_v10, %v12181_v14  ;;  %v12185_v32 = vld [vmem:[#allocation110_spill] sm:$0xff]  ;;  %v12186_v35 = vld [vmem:[#allocation120_spill] sm:$0xff] }
 0x2a6   :  { %v2242_v19 = vadd.f32 %v12180_v16, %v12179_v61  ;;  %v12183_v23 = vld [vmem:[#allocation111_spill] sm:$0xff]  ;;  %v2245_v28 = vadd.f32 %v12186_v35, %v12185_v32  ;;  %v12187_v31 = vld [vmem:[#allocation112_spill] sm:$0xff]  ;;  %v12188_v53 = vld [vmem:[#allocation85_spill] sm:$0xff] }
 0x2a7   :  { %v12184_v17 = vld [vmem:[#allocation115_spill] sm:$0xff]  ;;  %v2246_v61 = vadd.f32 %v12188_v53, %v12187_v31  ;;  %v12190_v18 = vld [vmem:[#allocation145_spill] sm:$0xff]  ;;  %v12193_v50 = vld [vmem:[#allocation22_spill] sm:$0xff] }
 0x2a8   :  { %v2244_v3 = vadd.f32 %v12184_v17, %v12183_v23  ;;  %v12189_v16 = vld [vmem:[#allocation91_spill] sm:$0xff]  ;;  %v12194_v45 = vld [vmem:[#allocation136_spill] sm:$0xff]  ;;  %v12195_v5 = vld [vmem:[#allocation106_spill] sm:$0xff] }
 0x2a9   :  { %v2247_v14 = vadd.f32 %v12190_v18, %v12189_v16  ;;  %v12191_v10 = vld [vmem:[#allocation15_spill] sm:$0xff]  ;;  %v2249_v11 = vadd.f32 %v12194_v45, %v12193_v50  ;;  %v12197_v56 = vld [vmem:[#allocation118_spill] sm:$0xff]  ;;  %v12199_v48 = vld [vmem:[#allocation121_spill] sm:$0xff]  ;;  %v2185_v50 = vadd.f32 %v2184_v8, %v7594_v39  ;;  %v2200_v45 = vadd.f32 %v2199_v55, %v7598_v22 }
 0x2aa   :  { %v12192_v30 = vld [vmem:[#allocation127_spill] sm:$0xff]  ;;  %v12198_v17 = vld [vmem:[#allocation50_spill] sm:$0xff]  ;;  %v12200_v35 = vld [vmem:[#allocation137_spill] sm:$0xff] }
 0x2ab   :  { %v2248_v0 = vadd.f32 %v12192_v30, %v12191_v10  ;;  %v12196_v26 = vld [vmem:[#allocation19_spill] sm:$0xff]  ;;  %v2251_v23 = vadd.f32 %v12198_v17, %v12197_v56  ;;  %v2252_v32 = vadd.f32 %v12200_v35, %v12199_v48  ;;  %v12201_v4 = vld [vmem:[#allocation146_spill] sm:$0xff]  ;;  %v12203_v40 = vld [vmem:[#allocation128_spill] sm:$0xff]  ;;  %v2230_v56 = vadd.f32 %v2229_v21, %v7606_v63 }
 0x2ac   :  { %v2250_v34 = vadd.f32 %v12196_v26, %v12195_v5  ;;  %v12202_v53 = vld [vmem:[#allocation126_spill] sm:$0xff]  ;;  %v12204_v18 = vld [vmem:[#allocation149_spill] sm:$0xff]  ;;  %v12206_v10 = vld [vmem:[#allocation12_spill] sm:$0xff]  ;;  %v2215_v5 = vadd.f32 %v2214_v15, %v7602_v7 }
 0x2ad   :  { %v2253_v31 = vadd.f32 %v12202_v53, %v12201_v4  ;;  %v2254_v16 = vadd.f32 %v12204_v18, %v12203_v40  ;;  %v12205_v41 = vld [vmem:[#allocation113_spill] sm:$0xff]  ;;  %v12207_v26 = vld [vmem:[#allocation134_spill] sm:$0xff]  ;;  %v12209_v35 = vld [vmem:[#allocation35_spill] sm:$0xff] }
 0x2ae   :  { %v2255_v30 = vadd.f32 %v12206_v10, %v12205_v41  ;;  %v2256_v48 = vadd.f32 %v12207_v26, %v7274_v47  ;;  %v12208_v17 = vld [vmem:[#allocation54_spill] sm:$0xff]  ;;  %v12210_v53 = vld [vmem:[#allocation144_spill] sm:$0xff]  ;;  %v12211_v57 = vld [vmem:[#allocation147_spill] sm:$0xff] }
 0x2af   :  { %v2257_v4 = vadd.f32 %v12209_v35, %v12208_v17  ;;  %v2258_v40 = vadd.f32 %v12211_v57, %v12210_v53  ;;  %v12212_v18 = vld [vmem:[#allocation124_spill] sm:$0xff]  ;;  %v12213_v29 = vld [vmem:[#allocation138_spill] sm:$0xff]  ;;  %v12215_v22 = vld [vmem:[#allocation39_spill] sm:$0xff] }
 0x2b0   :  { %v2259_v41 = vadd.f32 %v12213_v29, %v12212_v18  ;;  %v12214_v8 = vld [vmem:[#allocation148_spill] sm:$0xff]  ;;  %v12217_v15 = vld [vmem:[#allocation129_spill] sm:$0xff]  ;;  %v12218_v63 = vld [vmem:[#allocation135_spill] sm:$0xff] }
 0x2b1   :  { %v2260_v39 = vadd.f32 %v12214_v8, %v7288_v33  ;;  %v12216_v55 = vld [vmem:[#allocation140_spill] sm:$0xff]  ;;  %v2262_v21 = vadd.f32 %v12218_v63, %v12217_v15  ;;  %v12219_v10 = vld [vmem:[#allocation150_spill] sm:$0xff]  ;;  %v12222_v17 = vld [vmem:[#allocation27_spill] sm:$0xff]  ;;  %v2216_v15 = vadd.f32 %v2215_v5, %v7662_v46  ;;  %v2231_v63 = vadd.f32 %v2230_v56, %v7666_v59 }
 0x2b2   :  { %v2261_v7 = vadd.f32 %v12216_v55, %v12215_v22  ;;  %v12220_v47 = vld [vmem:[#allocation98_spill] sm:$0xff]  ;;  %v12223_v57 = vld [vmem:[#allocation13_spill] sm:$0xff]  ;;  %v12224_v29 = vld [vmem:[#allocation56_spill] sm:$0xff]  ;;  %v2186_v22 = vadd.f32 %v2185_v50, %v7654_v20  ;;  %v2201_v55 = vadd.f32 %v2200_v45, %v7658_v58 }
 0x2b3   :  { %v2263_v26 = vadd.f32 %v12220_v47, %v12219_v10  ;;  %v12221_v52 = vld [vmem:[#allocation42_spill] sm:$0xff]  ;;  %v2265_v53 = vadd.f32 %v12223_v57, %v7320_v60  ;;  %v2266_v18 = vadd.f32 %v12224_v29, %v7322_v2  ;;  %v12225_v13 = vld [vmem:[#allocation47_spill] sm:$0xff]  ;;  %v12231_v57 = vld [vmem:[#allocation133_spill] sm:$0xff] }
 0x2b4   :  { %v2264_v35 = vadd.f32 %v12222_v17, %v12221_v52  ;;  %v12226_v33 = vld [vmem:[#allocation130_spill] sm:$0xff]  ;;  %v12227_v10 = vld [vmem:[#allocation131_spill] sm:$0xff]  ;;  %v12232_v1 = vld [vmem:[#allocation61_spill] sm:$0xff] }
 0x2b5   :  { %v2267_v8 = vadd.f32 %v12226_v33, %v12225_v13  ;;  %v12228_v47 = vld [vmem:[#allocation26_spill] sm:$0xff]  ;;  %v12229_v17 = vld [vmem:[#allocation139_spill] sm:$0xff]  ;;  %v2270_v2 = vadd.f32 %v12232_v1, %v12231_v57  ;;  %v12233_v29 = vld [vmem:[#allocation141_spill] sm:$0xff]  ;;  %v2304_v1 = vadd.f32 %v2244_v3, %v2240_v54  ;;  %v2334_v57 = vadd.f32 %v2246_v61, %v2242_v19 }
 0x2b6   :  { %v2268_v52 = vadd.f32 %v12228_v47, %v12227_v10  ;;  %v12230_v9 = vld [vmem:[#allocation18_spill] sm:$0xff]  ;;  %v12234_v49 = vld [vmem:[#allocation69_spill] sm:$0xff]  ;;  %v12235_v33 = vld [vmem:[#allocation23_spill] sm:$0xff] }
 0x2b7   :  { %v2269_v60 = vadd.f32 %v12230_v9, %v12229_v17  ;;  %v2271_v13 = vadd.f32 %v12234_v49, %v12233_v29  ;;  %v12236_v20 = vld [vmem:[#allocation49_spill] sm:$0xff]  ;;  %v12238_v58 = vld [vmem:[#allocation132_spill] sm:$0xff]  ;;  %v12239_v46 = vld [vmem:[#allocation31_spill] sm:$0xff]  ;;  %v2319_v17 = vadd.f32 %v2245_v28, %v2241_v12  ;;  %v2349_v49 = vadd.f32 %v2247_v14, %v2243_v38 }
 0x2b8   :  { %v7862_v50 = vadd.f32 %v12236_v20, %v12235_v33  ;;  %v7866_v45 = vadd.f32 %v12239_v46, %v12238_v58  ;;  %v12241_v59 = vld [vmem:[#allocation59_spill] sm:$0xff]  ;;  %v12242_v5 = vld [vmem:[#allocation24_spill] sm:$0xff]  ;;  %v12244_v10 = vld [vmem:[#allocation17_spill] sm:$0xff]  ;;  %v2187_v29 = vadd.f32 %v2186_v22, %v7676_v25 }
 0x2b9   :  { %v7870_v56 = vadd.f32 %v12242_v5, %v12241_v59  ;;  %v12245_v9 = vld [vmem:[#allocation84_spill] sm:$0xff]  ;;  %v12248_v58 = vld [vmem:[#allocation73_spill] sm:$0xff]  ;;  %v2320_v62 = vadd.f32 %v2319_v17, %v2249_v11  ;;  %v2335_v59 = vadd.f32 %v2334_v57, %v2250_v34  ;;  %v2350_v5 = vadd.f32 %v2349_v49, %v2251_v23  ;;  %v12251_v54 = vld [vmem:[#allocation63_spill] sm:$0xff] }
 0x2ba   :  { %12237 = vst [vmem:[#allocation92_spill] sm:$0xff] %v7862_v50  ;;  %12240 = vst [vmem:[#allocation89_spill] sm:$0xff] %v7866_v45  ;;  %v7874_v47 = vadd.f32 %v12245_v9, %v12244_v10  ;;  %v12246_v33 = vld [vmem:[#allocation36_spill] sm:$0xff]  ;;  %v12247_v50 = vld [vmem:[#allocation38_spill] sm:$0xff]  ;;  %v2232_v46 = vadd.f32 %v2231_v63, %v12248_v58  ;;  %v2305_v45 = vadd.f32 %v2304_v1, %v2248_v0 }
 0x2bb   :  { %12243 = vst [vmem:[#allocation108_spill] sm:$0xff] %v7870_v56  ;;  %v2202_v20 = vadd.f32 %v2201_v55, %v12246_v33  ;;  %v2217_v27 = vadd.f32 %v2216_v15, %v12247_v50  ;;  %v12249_v56 = vld [vmem:[#allocation80_spill] sm:$0xff]  ;;  %v12250_v36 = vld [vmem:[#allocation21_spill] sm:$0xff]  ;;  %v12253_v38 = vld [vmem:[#allocation51_spill] sm:$0xff]  ;;  %v2321_v11 = vadd.f32 %v2320_v62, %v2253_v31  ;;  %v2336_v34 = vadd.f32 %v2335_v59, %v2254_v16 }
 0x2bc   :  { %v7882_v10 = vadd.f32 %v12250_v36, %v12249_v56  ;;  %v12252_v12 = vld [vmem:[#allocation33_spill] sm:$0xff]  ;;  %v12255_v28 = vld [vmem:[#allocation102_spill] sm:$0xff]  ;;  %v2306_v0 = vadd.f32 %v2305_v45, %v2252_v32  ;;  %v2351_v23 = vadd.f32 %v2350_v5, %v2255_v30  ;;  %v2188_v22 = vadd.f32 %v2187_v29, %v7716_v44  ;;  %v12260_v62 = vld [vmem:[#allocation96_spill] sm:$0xff] }
 0x2bd   :  { %v7886_v19 = vadd.f32 %v12252_v12, %v12251_v54  ;;  %v12254_v25 = vld [vmem:[#allocation37_spill] sm:$0xff]  ;;  %v12256_v61 = vld [vmem:[#allocation94_spill] sm:$0xff]  ;;  %v2203_v36 = vadd.f32 %v2202_v20, %v7720_v42  ;;  %v2218_v55 = vadd.f32 %v2217_v27, %v7724_v37  ;;  %v2233_v15 = vadd.f32 %v2232_v46, %v7728_v43  ;;  %v12262_v44 = vld [vmem:[#allocation43_spill] sm:$0xff] }
 0x2be   :  { %v7890_v3 = vadd.f32 %v12254_v25, %v12253_v38  ;;  %v7894_v14 = vadd.f32 %v12256_v61, %v12255_v28  ;;  %v2307_v63 = vadd.f32 %v2306_v0, %v2256_v48  ;;  %v2322_v50 = vadd.f32 %v2321_v11, %v2257_v4  ;;  %v12257_v1 = vld [vmem:[#allocation62_spill] sm:$0xff]  ;;  %v12259_v32 = vld [vmem:[#allocation53_spill] sm:$0xff]  ;;  %v12263_v42 = vld [vmem:[#allocation44_spill] sm:$0xff] }
 0x2bf   :  { %v2337_v56 = vadd.f32 %v2336_v34, %v2258_v40  ;;  %v2352_v9 = vadd.f32 %v2351_v23, %v2259_v41  ;;  %v12258_v17 = vld [vmem:[#allocation122_spill] sm:$0xff]  ;;  %v7906_v31 = vadd.f32 %v12260_v62, %v12259_v32  ;;  %v12261_v16 = vld [vmem:[#allocation25_spill] sm:$0xff]  ;;  %v2189_v41 = vadd.f32 %v2188_v22, %v7738_v24  ;;  %v12266_v5 = vld [vmem:[#allocation28_spill] sm:$0xff] }
 0x2c0   :  { %v7902_v57 = vadd.f32 %v12258_v17, %v12257_v1  ;;  %v7910_v30 = vadd.f32 %v12262_v44, %v12261_v16  ;;  %v12264_v37 = vld [vmem:[#allocation74_spill] sm:$0xff]  ;;  %v2308_v43 = vadd.f32 %v2307_v63, %v2260_v39  ;;  %v2323_v48 = vadd.f32 %v2322_v50, %v2261_v7  ;;  %v12265_v29 = vld [vmem:[#allocation41_spill] sm:$0xff]  ;;  %v12267_v54 = vld [vmem:[#allocation55_spill] sm:$0xff] }
 0x2c1   :  { %v7914_v27 = vadd.f32 %v12264_v37, %v12263_v42  ;;  %v2338_v4 = vadd.f32 %v2337_v56, %v2262_v21  ;;  %v2353_v40 = vadd.f32 %v2352_v9, %v2263_v26  ;;  %v2204_v45 = vadd.f32 %v2203_v36, %v7742_v51  ;;  %v12268_v39 = vld [vmem:[#allocation78_spill] sm:$0xff]  ;;  %v12269_v7 = vld [vmem:[#allocation77_spill] sm:$0xff]  ;;  %v12270_v26 = vld [vmem:[#allocation64_spill] sm:$0xff] }
 0x2c2   :  { %v2219_v49 = vadd.f32 %v2218_v55, %v7746_v6  ;;  %v2234_v33 = vadd.f32 %v2233_v15, %v12265_v29  ;;  %v2309_v20 = vadd.f32 %v2308_v43, %v2264_v35  ;;  %v2324_v58 = vadd.f32 %v2323_v48, %v2265_v53  ;;  %v12271_v24 = vld [vmem:[#allocation48_spill] sm:$0xff]  ;;  %v12274_v35 = vld [vmem:[#allocation83_spill] sm:$0xff]  ;;  %v12275_v53 = vld [vmem:[#allocation58_spill] sm:$0xff] }
 0x2c3   :  { %v2339_v46 = vadd.f32 %v2338_v4, %v2266_v18  ;;  %v2354_v59 = vadd.f32 %v2353_v40, %v2267_v8  ;;  %v7922_v12 = vadd.f32 %v12267_v54, %v12266_v5  ;;  %v7926_v21 = vadd.f32 %v12269_v7, %v12268_v39  ;;  %v12272_v51 = vld [vmem:[#allocation52_spill] sm:$0xff]  ;;  %v12276_v8 = vld [vmem:[#allocation81_spill] sm:$0xff]  ;;  %v12277_v28 = vld [vmem:[#allocation66_spill] sm:$0xff] }
 0x2c4   :  { %v7930_v38 = vadd.f32 %v12271_v24, %v12270_v26  ;;  %v12273_v6 = vld [vmem:[#allocation72_spill] sm:$0xff]  ;;  %v7938_v18 = vadd.f32 %v12275_v53, %v12274_v35  ;;  %v7942_v61 = vadd.f32 %v12277_v28, %v12276_v8  ;;  %v12278_v0 = vld [vmem:[#allocation79_spill] sm:$0xff]  ;;  %v12279_v11 = vld [vmem:[#allocation114_spill] sm:$0xff]  ;;  %v2310_v55 = vadd.f32 %v2309_v20, %v2268_v52 }
 0x2c5   :  { %v7934_v25 = vadd.f32 %v12273_v6, %v12272_v51  ;;  %v7946_v34 = vadd.f32 %v12279_v11, %v12278_v0  ;;  %v12280_v23 = vld [vmem:[#allocation90_spill] sm:$0xff]  ;;  %v12281_v22 = vld [vmem:[#allocation119_spill] sm:$0xff]  ;;  %v2325_v15 = vadd.f32 %v2324_v58, %v2269_v60  ;;  %v2340_v63 = vadd.f32 %v2339_v46, %v2270_v2  ;;  %v12283_v56 = vld [vmem:[#allocation97_spill] sm:$0xff] }
 0x2c6   :  { %v7950_v36 = vadd.f32 %v12281_v22, %v12280_v23  ;;  %v2355_v50 = vadd.f32 %v2354_v59, %v2271_v13  ;;  %v2190_v9 = vadd.f32 %v2189_v41, %v12283_v56  ;;  %v12284_v1 = vld [vmem:[#allocation109_spill] sm:$0xff]  ;;  %v12285_v32 = vld [vmem:[#allocation107_spill] sm:$0xff]  ;;  %v12286_v16 = vld [vmem:[#allocation14_spill] sm:$0xff] }
 0x2c7   :  { %v2205_v17 = vadd.f32 %v2204_v45, %v12284_v1  ;;  %v2220_v62 = vadd.f32 %v2219_v49, %v12285_v32  ;;  %v2235_v44 = vadd.f32 %v2234_v33, %v12286_v16  ;;  %v12287_v42 = vld [vmem:[#allocation75_spill] sm:$0xff]  ;;  %v12290_v48 = vld [vmem:[#allocation70_spill] sm:$0xff]  ;;  %v12293_v52 = vld [vmem:[#allocation68_spill] sm:$0xff] }
 0x2c8   :  { %12282 = vst [vmem:[#allocation11_spill] sm:$0xff] %v7950_v36  ;;  %v12288_v37 = vld [vmem:[#allocation71_spill] sm:$0xff]  ;;  %v12291_v4 = vld [vmem:[#allocation86_spill] sm:$0xff]  ;;  %v12296_v13 = vld [vmem:[#allocation76_spill] sm:$0xff]  ;;  %v2356_v56 = vadd.f32 %v2355_v50, %v7874_v47 }
 0x2c9   :  { %v7958_v43 = vadd.f32 %v12288_v37, %v12287_v42  ;;  %v7962_v40 = vadd.f32 %v12291_v4, %v12290_v48  ;;  %v12294_v60 = vld [vmem:[#allocation34_spill] sm:$0xff]  ;;  %v12297_v41 = vld [vmem:[#allocation67_spill] sm:$0xff]  ;;  %v7974_v49 = vld [vmem:[#allocation2 + $0xc08] sm:$0xff] }
 0x2ca   :  { %v7966_v2 = vadd.f32 %v12294_v60, %v12293_v52  ;;  %v7970_v29 = vadd.f32 %v12297_v41, %v12296_v13  ;;  %v7972_v45 = vld [vmem:[#allocation2 + $0xc00] sm:$0xff]  ;;  %12300 = vst [vmem:[#allocation115_spill] sm:$0xff] %v7974_v49  ;;  %v12302_v20 = vld [vmem:[#allocation57_spill] sm:$0xff]  ;;  %v12304_v46 = vld [vmem:[#allocation46_spill] sm:$0xff] }
 0x2cb   :  { %12289 = vst [vmem:[#allocation87_spill] sm:$0xff] %v7958_v43  ;;  %12292 = vst [vmem:[#allocation95_spill] sm:$0xff] %v7962_v40  ;;  %v12301_v33 = vld [vmem:[#allocation99_spill] sm:$0xff]  ;;  %v12305_v59 = vld [vmem:[#allocation29_spill] sm:$0xff] }
 0x2cc   :  { %12295 = vst [vmem:[#allocation142_spill] sm:$0xff] %v7966_v2  ;;  %12298 = vst [vmem:[#allocation104_spill] sm:$0xff] %v7970_v29  ;;  %v7978_v58 = vadd.f32 %v12302_v20, %v12301_v33  ;;  %v7982_v5 = vadd.f32 %v12305_v59, %v12304_v46  ;;  %v12307_v54 = vld [vmem:[#allocation105_spill] sm:$0xff]  ;;  %v12308_v39 = vld [vmem:[#allocation88_spill] sm:$0xff] }
 0x2cd   :  { %12299 = vst [vmem:[#allocation111_spill] sm:$0xff] %v7972_v45  ;;  %v7986_v7 = vadd.f32 %v12308_v39, %v12307_v54  ;;  %v12310_v26 = vld [vmem:[#allocation123_spill] sm:$0xff]  ;;  %v12311_v24 = vld [vmem:[#allocation30_spill] sm:$0xff]  ;;  %v7992_v6 = vld [vmem:[#allocation2 + $0xc10] sm:$0xff] }
 0x2ce   :  { %12303 = vst [vmem:[#allocation110_spill] sm:$0xff] %v7978_v58  ;;  %12306 = vst [vmem:[#allocation120_spill] sm:$0xff] %v7982_v5  ;;  %v7990_v51 = vadd.f32 %v12311_v24, %v12310_v26  ;;  %v7994_v35 = vld [vmem:[#allocation2 + $0xc18] sm:$0xff]  ;;  %v7996_v53 = vld [vmem:[#allocation5 + $0xc00] sm:$0xff] }
 0x2cf   :  { %12309 = vst [vmem:[#allocation112_spill] sm:$0xff] %v7986_v7  ;;  %12313 = vst [vmem:[#allocation91_spill] sm:$0xff] %v7992_v6  ;;  %v12316_v8 = vld [vmem:[#allocation92_spill] sm:$0xff]  ;;  %v12317_v0 = vld [vmem:[#allocation89_spill] sm:$0xff] }
 0x2d0   :  { %12312 = vst [vmem:[#allocation85_spill] sm:$0xff] %v7990_v51  ;;  %12314 = vst [vmem:[#allocation145_spill] sm:$0xff] %v7994_v35  ;;  %v2311_v28 = vadd.f32 %v2310_v55, %v12316_v8  ;;  %v2326_v11 = vadd.f32 %v2325_v15, %v12317_v0  ;;  %v12318_v23 = vld [vmem:[#allocation108_spill] sm:$0xff]  ;;  %v8002_v1 = vld [vmem:[#allocation2 + $0xc20] sm:$0xff] }
 0x2d1   :  { %12315 = vst [vmem:[#allocation15_spill] sm:$0xff] %v7996_v53  ;;  %v2341_v22 = vadd.f32 %v2340_v63, %v12318_v23  ;;  %12319 = vst [vmem:[#allocation127_spill] sm:$0xff] %v8002_v1  ;;  %v8004_v32 = vld [vmem:[#allocation2 + $0xc28] sm:$0xff]  ;;  %v8006_v16 = vld [vmem:[#allocation2 + $0xc30] sm:$0xff] }
 0x2d2   :  { %12320 = vst [vmem:[#allocation22_spill] sm:$0xff] %v8004_v32  ;;  %12321 = vst [vmem:[#allocation136_spill] sm:$0xff] %v8006_v16  ;;  %v8008_v42 = vld [vmem:[#allocation2 + $0xc38] sm:$0xff]  ;;  %v8010_v37 = vld [vmem:[#allocation5 + $0xc08] sm:$0xff] }
 0x2d3   :  { %12322 = vst [vmem:[#allocation106_spill] sm:$0xff] %v8008_v42  ;;  %12323 = vst [vmem:[#allocation19_spill] sm:$0xff] %v8010_v37  ;;  %v8012_v48 = vld [vmem:[#allocation5 + $0xc10] sm:$0xff]  ;;  %v8014_v4 = vld [vmem:[#allocation5 + $0xc18] sm:$0xff] }
 0x2d4   :  { %12324 = vst [vmem:[#allocation118_spill] sm:$0xff] %v8012_v48  ;;  %12325 = vst [vmem:[#allocation50_spill] sm:$0xff] %v8014_v4  ;;  %v12326_v55 = vld [vmem:[#allocation16_spill] sm:$0xff]  ;;  %v12328_v63 = vld [vmem:[#allocation117_spill] sm:$0xff] }
 0x2d5   :  { %v8017_v15 = vadd.f32 %v2190_v9, %v12326_v55  ;;  %v8020_v52 = vadd.f32 %v2205_v17, %v12328_v63  ;;  %v12330_v47 = vld [vmem:[#allocation40_spill] sm:$0xff]  ;;  %v8028_v41 = vld [vmem:[#allocation2 + $0xc40] sm:$0xff]  ;;  %v8032_v20 = vld [vmem:[#allocation2 + $0xc50] sm:$0xff] }
 0x2d6   :  { %v8023_v50 = vadd.f32 %v2220_v62, %v12330_v47  ;;  %v12332_v60 = vld [vmem:[#allocation116_spill] sm:$0xff]  ;;  %12334 = vst [vmem:[#allocation128_spill] sm:$0xff] %v8028_v41  ;;  %12336 = vst [vmem:[#allocation113_spill] sm:$0xff] %v8032_v20  ;;  %v8034_v46 = vld [vmem:[#allocation2 + $0xc58] sm:$0xff] }
 0x2d7   :  { %12327 = vst [vmem:[#allocation121_spill] sm:$0xff] %v8017_v15  ;;  %12329 = vst [vmem:[#allocation137_spill] sm:$0xff] %v8020_v52  ;;  %v8026_v13 = vadd.f32 %v2235_v44, %v12332_v60  ;;  %v8030_v33 = vld [vmem:[#allocation2 + $0xc48] sm:$0xff]  ;;  %v8036_v59 = vld [vmem:[#allocation5 + $0xc20] sm:$0xff]  ;;  %v8084_v52 = vmul.f32 %v8010_v37, %v7974_v49  ;;  %v8088_v15 = vmul.f32 %v8012_v48, %v7992_v6 }
 0x2d8   :  { %12331 = vst [vmem:[#allocation146_spill] sm:$0xff] %v8023_v50  ;;  %12335 = vst [vmem:[#allocation149_spill] sm:$0xff] %v8030_v33  ;;  %v8038_v9 = vld [vmem:[#allocation5 + $0xc28] sm:$0xff]  ;;  %v8040_v17 = vld [vmem:[#allocation5 + $0xc30] sm:$0xff] }
 0x2d9   :  { %12333 = vst [vmem:[#allocation126_spill] sm:$0xff] %v8026_v13  ;;  %12337 = vst [vmem:[#allocation12_spill] sm:$0xff] %v8034_v46  ;;  %v12341_v54 = vld [vmem:[#allocation32_spill] sm:$0xff]  ;;  %v12342_v62 = vld [vmem:[#allocation103_spill] sm:$0xff]  ;;  %v8132_v51 = vmul.f32 %v8038_v9, %v8004_v32  ;;  %v8136_v7 = vmul.f32 %v8040_v17, %v8006_v16 }
 0x2da   :  { %12338 = vst [vmem:[#allocation134_spill] sm:$0xff] %v8036_v59  ;;  %12339 = vst [vmem:[#allocation54_spill] sm:$0xff] %v8038_v9  ;;  %v8044_v39 = vadd.f32 %v12342_v62, %v12341_v54  ;;  %v12344_v44 = vld [vmem:[#allocation65_spill] sm:$0xff]  ;;  %v12347_v8 = vld [vmem:[#allocation60_spill] sm:$0xff] }
 0x2db   :  { %12340 = vst [vmem:[#allocation35_spill] sm:$0xff] %v8040_v17  ;;  %v12345_v26 = vld [vmem:[#allocation45_spill] sm:$0xff]  ;;  %v12350_v55 = vld [vmem:[#allocation82_spill] sm:$0xff]  ;;  %v8058_v60 = vld [vmem:[#allocation2 + $0xc60] sm:$0xff] }
 0x2dc   :  { %12343 = vst [vmem:[#allocation144_spill] sm:$0xff] %v8044_v39  ;;  %v8048_v24 = vadd.f32 %v12345_v26, %v12344_v44  ;;  %v12348_v0 = vld [vmem:[#allocation101_spill] sm:$0xff]  ;;  %12353 = vst [vmem:[#allocation148_spill] sm:$0xff] %v8058_v60  ;;  %v8060_v13 = vld [vmem:[#allocation2 + $0xc68] sm:$0xff]  ;;  %v2342_v39 = vadd.f32 %v2341_v22, %v7890_v3 }
 0x2dd   :  { %v8052_v23 = vadd.f32 %v12348_v0, %v12347_v8  ;;  %v12351_v63 = vld [vmem:[#allocation93_spill] sm:$0xff]  ;;  %12354 = vst [vmem:[#allocation39_spill] sm:$0xff] %v8060_v13  ;;  %v8064_v54 = vld [vmem:[#allocation2 + $0xc78] sm:$0xff]  ;;  %v8068_v44 = vld [vmem:[#allocation5 + $0xc40] sm:$0xff] }
 0x2de   :  { %12346 = vst [vmem:[#allocation147_spill] sm:$0xff] %v8048_v24  ;;  %v8056_v47 = vadd.f32 %v12351_v63, %v12350_v55  ;;  %v8062_v50 = vld [vmem:[#allocation2 + $0xc70] sm:$0xff]  ;;  %12356 = vst [vmem:[#allocation129_spill] sm:$0xff] %v8064_v54  ;;  %v8066_v62 = vld [vmem:[#allocation5 + $0xc38] sm:$0xff]  ;;  %v8080_v63 = vmul.f32 %v7996_v53, %v7972_v45  ;;  %v2327_v24 = vadd.f32 %v2326_v11, %v7886_v19 }
 0x2df   :  { %12349 = vst [vmem:[#allocation124_spill] sm:$0xff] %v8052_v23  ;;  %12355 = vst [vmem:[#allocation140_spill] sm:$0xff] %v8062_v50  ;;  %v8070_v26 = vld [vmem:[#allocation5 + $0xc48] sm:$0xff]  ;;  %v8072_v8 = vld [vmem:[#allocation5 + $0xc50] sm:$0xff]  ;;  %v2312_v23 = vadd.f32 %v2311_v28, %v7882_v10  ;;  %v2357_v53 = vadd.f32 %v2356_v56, %v7894_v14  ;;  %v8128_v56 = vmul.f32 %v8036_v59, %v8002_v1 }
 0x2e0   :  { %12352 = vst [vmem:[#allocation138_spill] sm:$0xff] %v8056_v47  ;;  %12357 = vst [vmem:[#allocation135_spill] sm:$0xff] %v8066_v62  ;;  %v8074_v0 = vld [vmem:[#allocation5 + $0xc58] sm:$0xff]  ;;  %v8076_v55 = vld [vmem:[#allocation5 + $0xc60] sm:$0xff]  ;;  %v8092_v47 = vmul.f32 %v8014_v4, %v7994_v35  ;;  %v8140_v5 = vmul.f32 %v8066_v62, %v8008_v42  ;;  %v8158_v17 = vmul.f32 %v8068_v44, %v8028_v41 }
 0x2e1   :  { %12358 = vst [vmem:[#allocation150_spill] sm:$0xff] %v8068_v44  ;;  %12359 = vst [vmem:[#allocation98_spill] sm:$0xff] %v8070_v26  ;;  %v8098_v45 = vld [vmem:[#allocation2 + $0xc80] sm:$0xff]  ;;  %v8100_v37 = vld [vmem:[#allocation2 + $0xc88] sm:$0xff]  ;;  %v8162_v62 = vmul.f32 %v8070_v26, %v8030_v33  ;;  %v8166_v42 = vmul.f32 %v8072_v8, %v8032_v20  ;;  %v8170_v16 = vmul.f32 %v8074_v0, %v8034_v46 }
 0x2e2   :  { %12360 = vst [vmem:[#allocation42_spill] sm:$0xff] %v8072_v8  ;;  %12361 = vst [vmem:[#allocation27_spill] sm:$0xff] %v8074_v0  ;;  %v8102_v49 = vld [vmem:[#allocation2 + $0xc90] sm:$0xff]  ;;  %v8104_v48 = vld [vmem:[#allocation2 + $0xc98] sm:$0xff]  ;;  %v8180_v44 = vmul.f32 %v8076_v55, %v8058_v60  ;;  %v2313_v46 = vadd.f32 %v2312_v23, %v7902_v57  ;;  %v2328_v20 = vadd.f32 %v2327_v24, %v7906_v31 }
 0x2e3   :  { %12362 = vst [vmem:[#allocation13_spill] sm:$0xff] %v8076_v55  ;;  %12363 = vst [vmem:[#allocation56_spill] sm:$0xff] %v8100_v37  ;;  %v8106_v6 = vld [vmem:[#allocation5 + $0xc68] sm:$0xff]  ;;  %v8108_v4 = vld [vmem:[#allocation5 + $0xc70] sm:$0xff]  ;;  %v2343_v33 = vadd.f32 %v2342_v39, %v7910_v30  ;;  %v2358_v55 = vadd.f32 %v2357_v53, %v7914_v27 }
 0x2e4   :  { %12364 = vst [vmem:[#allocation47_spill] sm:$0xff] %v8102_v49  ;;  %12365 = vst [vmem:[#allocation130_spill] sm:$0xff] %v8104_v48  ;;  %v8110_v35 = vld [vmem:[#allocation5 + $0xc78] sm:$0xff]  ;;  %v8112_v10 = vld [vmem:[#allocation2 + $0xca0] sm:$0xff]  ;;  %v8184_v26 = vmul.f32 %v8106_v6, %v8060_v13  ;;  %v8188_v8 = vmul.f32 %v8108_v4, %v8062_v50 }
 0x2e5   :  { %12366 = vst [vmem:[#allocation131_spill] sm:$0xff] %v8106_v6  ;;  %12367 = vst [vmem:[#allocation26_spill] sm:$0xff] %v8108_v4  ;;  %v8114_v19 = vld [vmem:[#allocation2 + $0xca8] sm:$0xff]  ;;  %v8116_v3 = vld [vmem:[#allocation2 + $0xcb0] sm:$0xff]  ;;  %v8192_v0 = vmul.f32 %v8110_v35, %v8064_v54 }
 0x2e6   :  { %12368 = vst [vmem:[#allocation139_spill] sm:$0xff] %v8110_v35  ;;  %12369 = vst [vmem:[#allocation18_spill] sm:$0xff] %v8114_v19  ;;  %v8118_v14 = vld [vmem:[#allocation2 + $0xcb8] sm:$0xff]  ;;  %v8120_v28 = vld [vmem:[#allocation5 + $0xc80] sm:$0xff] }
 0x2e7   :  { %12370 = vst [vmem:[#allocation133_spill] sm:$0xff] %v8116_v3  ;;  %12371 = vst [vmem:[#allocation61_spill] sm:$0xff] %v8118_v14  ;;  %v8122_v11 = vld [vmem:[#allocation5 + $0xc88] sm:$0xff]  ;;  %v8124_v22 = vld [vmem:[#allocation5 + $0xc90] sm:$0xff]  ;;  %v8226_v24 = vmul.f32 %v8120_v28, %v8098_v45 }
 0x2e8   :  { %12372 = vst [vmem:[#allocation141_spill] sm:$0xff] %v8120_v28  ;;  %12373 = vst [vmem:[#allocation69_spill] sm:$0xff] %v8122_v11  ;;  %v8142_v58 = vld [vmem:[#allocation2 + $0xcc0] sm:$0xff]  ;;  %v8144_v29 = vld [vmem:[#allocation2 + $0xcc8] sm:$0xff]  ;;  %v8230_v23 = vmul.f32 %v8122_v11, %v8100_v37  ;;  %v8234_v41 = vmul.f32 %v8124_v22, %v8102_v49 }
 0x2e9   :  { %12374 = vst [vmem:[#allocation23_spill] sm:$0xff] %v8124_v22  ;;  %12375 = vst [vmem:[#allocation49_spill] sm:$0xff] %v8142_v58  ;;  %v8146_v2 = vld [vmem:[#allocation2 + $0xcd0] sm:$0xff]  ;;  %v8148_v59 = vld [vmem:[#allocation2 + $0xcd8] sm:$0xff] }
 0x2ea   :  { %v8150_v1 = vld [vmem:[#allocation5 + $0xc98] sm:$0xff]  ;;  %v8152_v9 = vld [vmem:[#allocation5 + $0xca0] sm:$0xff]  ;;  %v8154_v32 = vld [vmem:[#allocation5 + $0xca8] sm:$0xff]  ;;  %12382 = vst [vmem:[#allocation36_spill] sm:$0xff] %v8180_v44 }
 0x2eb   :  { %12376 = vst [vmem:[#allocation132_spill] sm:$0xff] %v8150_v1  ;;  %12377 = vst [vmem:[#allocation31_spill] sm:$0xff] %v8152_v9  ;;  %v8172_v40 = vld [vmem:[#allocation5 + $0xcb0] sm:$0xff]  ;;  %v8174_v43 = vld [vmem:[#allocation5 + $0xcb8] sm:$0xff]  ;;  %v8248_v28 = vmul.f32 %v8152_v9, %v8112_v10  ;;  %v8252_v11 = vmul.f32 %v8154_v32, %v8114_v19  ;;  %v2344_v19 = vadd.f32 %v2343_v33, %v7930_v38 }
 0x2ec   :  { %12378 = vst [vmem:[#allocation59_spill] sm:$0xff] %v8154_v32  ;;  %12379 = vst [vmem:[#allocation24_spill] sm:$0xff] %v8172_v40  ;;  %v8176_v36 = vld [vmem:[#allocation5 + $0xcc0] sm:$0xff]  ;;  %v8200_v6 = vld [vmem:[#allocation2 + $0xce8] sm:$0xff]  ;;  %v8256_v22 = vmul.f32 %v8172_v40, %v8116_v3  ;;  %v2329_v3 = vadd.f32 %v2328_v20, %v7926_v21 }
 0x2ed   :  { %12380 = vst [vmem:[#allocation17_spill] sm:$0xff] %v8174_v43  ;;  %12381 = vst [vmem:[#allocation84_spill] sm:$0xff] %v8176_v36  ;;  %v8198_v60 = vld [vmem:[#allocation2 + $0xce0] sm:$0xff]  ;;  %v8202_v13 = vld [vmem:[#allocation2 + $0xcf0] sm:$0xff]  ;;  %v8270_v9 = vmul.f32 %v8176_v36, %v8142_v58  ;;  %v2359_v36 = vadd.f32 %v2358_v55, %v7934_v25 }
 0x2ee   :  { %12383 = vst [vmem:[#allocation38_spill] sm:$0xff] %v8184_v26  ;;  %12384 = vst [vmem:[#allocation73_spill] sm:$0xff] %v8188_v8  ;;  %v8204_v4 = vld [vmem:[#allocation2 + $0xcf8] sm:$0xff]  ;;  %v8206_v50 = vld [vmem:[#allocation5 + $0xcc8] sm:$0xff] }
 0x2ef   :  { %12385 = vst [vmem:[#allocation80_spill] sm:$0xff] %v8192_v0  ;;  %12386 = vst [vmem:[#allocation21_spill] sm:$0xff] %v8200_v6  ;;  %v8208_v35 = vld [vmem:[#allocation5 + $0xcd0] sm:$0xff]  ;;  %v8210_v54 = vld [vmem:[#allocation5 + $0xcd8] sm:$0xff]  ;;  %v8238_v0 = vmul.f32 %v8150_v1, %v8104_v48  ;;  %v8260_v1 = vmul.f32 %v8174_v43, %v8118_v14  ;;  %v8274_v32 = vmul.f32 %v8206_v50, %v8144_v29 }
 0x2f0   :  { %12387 = vst [vmem:[#allocation63_spill] sm:$0xff] %v8202_v13  ;;  %12388 = vst [vmem:[#allocation33_spill] sm:$0xff] %v8204_v4  ;;  %v8212_v57 = vld [vmem:[#allocation2 + $0xd00] sm:$0xff]  ;;  %v8214_v31 = vld [vmem:[#allocation2 + $0xd08] sm:$0xff]  ;;  %v8278_v40 = vmul.f32 %v8208_v35, %v8146_v2  ;;  %v8282_v43 = vmul.f32 %v8210_v54, %v8148_v59  ;;  %v2314_v14 = vadd.f32 %v2313_v46, %v7922_v12 }
 0x2f1   :  { %12389 = vst [vmem:[#allocation51_spill] sm:$0xff] %v8206_v50  ;;  %12390 = vst [vmem:[#allocation37_spill] sm:$0xff] %v8208_v35  ;;  %v8216_v30 = vld [vmem:[#allocation2 + $0xd10] sm:$0xff]  ;;  %v8218_v27 = vld [vmem:[#allocation2 + $0xd18] sm:$0xff] }
 0x2f2   :  { %12391 = vst [vmem:[#allocation102_spill] sm:$0xff] %v8210_v54  ;;  %12392 = vst [vmem:[#allocation94_spill] sm:$0xff] %v8212_v57  ;;  %v8220_v53 = vld [vmem:[#allocation5 + $0xce0] sm:$0xff]  ;;  %v8222_v39 = vld [vmem:[#allocation5 + $0xce8] sm:$0xff] }
 0x2f3   :  { %12393 = vst [vmem:[#allocation62_spill] sm:$0xff] %v8214_v31  ;;  %12394 = vst [vmem:[#allocation122_spill] sm:$0xff] %v8216_v30  ;;  %v8240_v8 = vld [vmem:[#allocation5 + $0xcf0] sm:$0xff]  ;;  %v8242_v26 = vld [vmem:[#allocation5 + $0xcf8] sm:$0xff]  ;;  %v8294_v35 = vmul.f32 %v8220_v53, %v8198_v60  ;;  %v8298_v54 = vmul.f32 %v8222_v39, %v8200_v6 }
 0x2f4   :  { %12395 = vst [vmem:[#allocation53_spill] sm:$0xff] %v8218_v27  ;;  %12396 = vst [vmem:[#allocation96_spill] sm:$0xff] %v8220_v53  ;;  %v8244_v44 = vld [vmem:[#allocation5 + $0xd00] sm:$0xff]  ;;  %v8262_v48 = vld [vmem:[#allocation5 + $0xd08] sm:$0xff]  ;;  %v8302_v12 = vmul.f32 %v8240_v8, %v8202_v13  ;;  %v8306_v21 = vmul.f32 %v8242_v26, %v8204_v4 }
 0x2f5   :  { %12397 = vst [vmem:[#allocation25_spill] sm:$0xff] %v8222_v39  ;;  %12398 = vst [vmem:[#allocation43_spill] sm:$0xff] %v8240_v8  ;;  %v8264_v49 = vld [vmem:[#allocation5 + $0xd10] sm:$0xff]  ;;  %v8266_v37 = vld [vmem:[#allocation5 + $0xd18] sm:$0xff]  ;;  %v8316_v20 = vmul.f32 %v8244_v44, %v8212_v57  ;;  %v8320_v46 = vmul.f32 %v8262_v48, %v8214_v31  ;;  %v2345_v31 = vadd.f32 %v2344_v19, %v7946_v34 }
 0x2f6   :  { %12399 = vst [vmem:[#allocation44_spill] sm:$0xff] %v8242_v26  ;;  %12400 = vst [vmem:[#allocation74_spill] sm:$0xff] %v8244_v44  ;;  %v8288_v58 = vld [vmem:[#allocation2 + $0xd20] sm:$0xff]  ;;  %v8290_v50 = vld [vmem:[#allocation2 + $0xd28] sm:$0xff]  ;;  %v8324_v55 = vmul.f32 %v8264_v49, %v8216_v30  ;;  %v8328_v26 = vmul.f32 %v8266_v37, %v8218_v27  ;;  %v2560_v44 = vadd.f32 %v8128_v56, %v8080_v63 }
 0x2f7   :  { %12401 = vst [vmem:[#allocation41_spill] sm:$0xff] %v8262_v48  ;;  %12402 = vst [vmem:[#allocation28_spill] sm:$0xff] %v8264_v49  ;;  %v8308_v38 = vld [vmem:[#allocation2 + $0xd30] sm:$0xff]  ;;  %v8310_v25 = vld [vmem:[#allocation2 + $0xd38] sm:$0xff]  ;;  %v2575_v48 = vadd.f32 %v8132_v51, %v8084_v52  ;;  %v2590_v49 = vadd.f32 %v8136_v7, %v8088_v15  ;;  %v2605_v30 = vadd.f32 %v8140_v5, %v8092_v47 }
 0x2f8   :  { %12403 = vst [vmem:[#allocation55_spill] sm:$0xff] %v8266_v37  ;;  %12404 = vst [vmem:[#allocation78_spill] sm:$0xff] %v8288_v58  ;;  %v8312_v33 = vld [vmem:[#allocation5 + $0xd20] sm:$0xff]  ;;  %v8330_v4 = vld [vmem:[#allocation5 + $0xd28] sm:$0xff]  ;;  %v2315_v37 = vadd.f32 %v2314_v14, %v7938_v18  ;;  %v2330_v27 = vadd.f32 %v2329_v3, %v7942_v61  ;;  %v2561_v51 = vadd.f32 %v2560_v44, %v8158_v17 }
 0x2f9   :  { %12405 = vst [vmem:[#allocation77_spill] sm:$0xff] %v8290_v50  ;;  %12406 = vst [vmem:[#allocation64_spill] sm:$0xff] %v8308_v38  ;;  %v8332_v8 = vld [vmem:[#allocation5 + $0xd30] sm:$0xff]  ;;  %v8334_v13 = vld [vmem:[#allocation5 + $0xd38] sm:$0xff]  ;;  %v2576_v52 = vadd.f32 %v2575_v48, %v8162_v62  ;;  %v2591_v7 = vadd.f32 %v2590_v49, %v8166_v42  ;;  %v2606_v5 = vadd.f32 %v2605_v30, %v8170_v16 }
 0x2fa   :  { %12407 = vst [vmem:[#allocation48_spill] sm:$0xff] %v8310_v25  ;;  %12408 = vst [vmem:[#allocation52_spill] sm:$0xff] %v8312_v33  ;;  %v12412_v57 = vld [vmem:[#allocation11_spill] sm:$0xff]  ;;  %v8350_v63 = vld [vmem:[#allocation2 + $0xd48] sm:$0xff]  ;;  %v8364_v34 = vmul.f32 %v8312_v33, %v8288_v58  ;;  %v8372_v48 = vmul.f32 %v8332_v8, %v8308_v38  ;;  %v8376_v49 = vmul.f32 %v8334_v13, %v8310_v25 }
 0x2fb   :  { %12409 = vst [vmem:[#allocation72_spill] sm:$0xff] %v8330_v4  ;;  %12410 = vst [vmem:[#allocation83_spill] sm:$0xff] %v8332_v8  ;;  %v2360_v39 = vadd.f32 %v2359_v36, %v12412_v57  ;;  %v8348_v6 = vld [vmem:[#allocation2 + $0xd40] sm:$0xff]  ;;  %v8356_v15 = vld [vmem:[#allocation2 + $0xd50] sm:$0xff]  ;;  %v8368_v36 = vmul.f32 %v8330_v4, %v8290_v50 }
 0x2fc   :  { %12411 = vst [vmem:[#allocation58_spill] sm:$0xff] %v8334_v13  ;;  %12413 = vst [vmem:[#allocation81_spill] sm:$0xff] %v8350_v63  ;;  %v8358_v18 = vld [vmem:[#allocation2 + $0xd58] sm:$0xff]  ;;  %v8360_v61 = vld [vmem:[#allocation5 + $0xd40] sm:$0xff] }
 0x2fd   :  { %12414 = vst [vmem:[#allocation66_spill] sm:$0xff] %v8356_v15  ;;  %12415 = vst [vmem:[#allocation79_spill] sm:$0xff] %v8358_v18  ;;  %v8378_v16 = vld [vmem:[#allocation5 + $0xd48] sm:$0xff]  ;;  %v8380_v42 = vld [vmem:[#allocation5 + $0xd50] sm:$0xff] }
 0x2fe   :  { %12416 = vst [vmem:[#allocation114_spill] sm:$0xff] %v8360_v61  ;;  %12417 = vst [vmem:[#allocation90_spill] sm:$0xff] %v8378_v16  ;;  %v8382_v17 = vld [vmem:[#allocation5 + $0xd58] sm:$0xff]  ;;  %v12420_v47 = vld [vmem:[#allocation36_spill] sm:$0xff] }
 0x2ff   :  { %12418 = vst [vmem:[#allocation119_spill] sm:$0xff] %v8380_v42  ;;  %12419 = vst [vmem:[#allocation97_spill] sm:$0xff] %v8382_v17  ;;  %v2562_v62 = vadd.f32 %v2561_v51, %v12420_v47  ;;  %v12421_v44 = vld [vmem:[#allocation38_spill] sm:$0xff]  ;;  %v12422_v3 = vld [vmem:[#allocation73_spill] sm:$0xff] }
 0x300   :  { %v2577_v19 = vadd.f32 %v2576_v52, %v12421_v44  ;;  %v2592_v14 = vadd.f32 %v2591_v7, %v12422_v3  ;;  %v12423_v56 = vld [vmem:[#allocation80_spill] sm:$0xff]  ;;  %v12424_v30 = vld [vmem:[#allocation87_spill] sm:$0xff]  ;;  %v12426_v13 = vld [vmem:[#allocation142_spill] sm:$0xff] }
 0x301   :  { %v2607_v57 = vadd.f32 %v2606_v5, %v12423_v56  ;;  %v2316_v8 = vadd.f32 %v2315_v37, %v12424_v30  ;;  %v12425_v38 = vld [vmem:[#allocation95_spill] sm:$0xff]  ;;  %v2346_v25 = vadd.f32 %v2345_v31, %v12426_v13  ;;  %v12427_v50 = vld [vmem:[#allocation104_spill] sm:$0xff]  ;;  %v2563_v51 = vadd.f32 %v2562_v62, %v8226_v24  ;;  %v8400_v47 = vld [vmem:[#allocation2 + $0xd70] sm:$0xff] }
 0x302   :  { %v2331_v4 = vadd.f32 %v2330_v27, %v12425_v38  ;;  %v2361_v33 = vadd.f32 %v2360_v39, %v12427_v50  ;;  %v8392_v58 = vld [vmem:[#allocation2 + $0xd60] sm:$0xff]  ;;  %v8394_v53 = vld [vmem:[#allocation2 + $0xd68] sm:$0xff]  ;;  %v2578_v52 = vadd.f32 %v2577_v19, %v8230_v23  ;;  %v2593_v7 = vadd.f32 %v2592_v14, %v8234_v41  ;;  %12429 = vst [vmem:[#allocation107_spill] sm:$0xff] %v8400_v47  ;;  %v8402_v37 = vld [vmem:[#allocation2 + $0xd78] sm:$0xff] }
 0x303   :  { %12428 = vst [vmem:[#allocation109_spill] sm:$0xff] %v8394_v53  ;;  %v2608_v5 = vadd.f32 %v2607_v57, %v8238_v0  ;;  %12430 = vst [vmem:[#allocation14_spill] sm:$0xff] %v8402_v37  ;;  %v8404_v27 = vld [vmem:[#allocation5 + $0xd60] sm:$0xff]  ;;  %v8408_v50 = vmul.f32 %v8360_v61, %v8348_v6  ;;  %v8412_v13 = vmul.f32 %v8378_v16, %v8350_v63  ;;  %v8424_v39 = vld [vmem:[#allocation2 + $0xd88] sm:$0xff] }
 0x304   :  { %12431 = vst [vmem:[#allocation75_spill] sm:$0xff] %v8404_v27  ;;  %v8416_v31 = vmul.f32 %v8380_v42, %v8356_v15  ;;  %v8420_v41 = vmul.f32 %v8382_v17, %v8358_v18  ;;  %v8422_v0 = vld [vmem:[#allocation2 + $0xd80] sm:$0xff]  ;;  %12433 = vst [vmem:[#allocation70_spill] sm:$0xff] %v8424_v39  ;;  %v8426_v24 = vld [vmem:[#allocation5 + $0xd68] sm:$0xff]  ;;  %v2564_v62 = vadd.f32 %v2563_v51, %v8248_v28 }
 0x305   :  { %12432 = vst [vmem:[#allocation71_spill] sm:$0xff] %v8422_v0  ;;  %12434 = vst [vmem:[#allocation86_spill] sm:$0xff] %v8426_v24  ;;  %v8428_v23 = vld [vmem:[#allocation5 + $0xd70] sm:$0xff]  ;;  %v8430_v38 = vld [vmem:[#allocation5 + $0xd78] sm:$0xff]  ;;  %v2579_v44 = vadd.f32 %v2578_v52, %v8252_v11  ;;  %v2594_v19 = vadd.f32 %v2593_v7, %v8256_v22  ;;  %v2609_v3 = vadd.f32 %v2608_v5, %v8260_v1 }
 0x306   :  { %12435 = vst [vmem:[#allocation68_spill] sm:$0xff] %v8428_v23  ;;  %12436 = vst [vmem:[#allocation34_spill] sm:$0xff] %v8430_v38  ;;  %v12437_v14 = vld [vmem:[#allocation110_spill] sm:$0xff]  ;;  %v12438_v57 = vld [vmem:[#allocation120_spill] sm:$0xff]  ;;  %v2565_v1 = vadd.f32 %v2564_v62, %v8270_v9  ;;  %v8466_v52 = vmul.f32 %v8404_v27, %v8392_v58  ;;  %v8470_v9 = vmul.f32 %v8426_v24, %v8394_v53 }
 0x307   :  { %v2317_v56 = vadd.f32 %v2316_v8, %v12437_v14  ;;  %v2332_v30 = vadd.f32 %v2331_v4, %v12438_v57  ;;  %v12439_v17 = vld [vmem:[#allocation112_spill] sm:$0xff]  ;;  %v12440_v42 = vld [vmem:[#allocation85_spill] sm:$0xff]  ;;  %v8442_v63 = vld [vmem:[#allocation2 + $0xd98] sm:$0xff]  ;;  %v2580_v4 = vadd.f32 %v2579_v44, %v8274_v32  ;;  %v2595_v8 = vadd.f32 %v2594_v19, %v8278_v40 }
 0x308   :  { %v2347_v18 = vadd.f32 %v2346_v25, %v12439_v17  ;;  %v2362_v15 = vadd.f32 %v2361_v33, %v12440_v42  ;;  %v8440_v16 = vld [vmem:[#allocation2 + $0xd90] sm:$0xff]  ;;  %v8444_v61 = vld [vmem:[#allocation5 + $0xd80] sm:$0xff]  ;;  %v8446_v28 = vld [vmem:[#allocation5 + $0xd88] sm:$0xff]  ;;  %v2610_v25 = vadd.f32 %v2609_v3, %v8282_v43  ;;  %v8474_v40 = vmul.f32 %v8428_v23, %v8400_v47 }
 0x309   :  { %12441 = vst [vmem:[#allocation76_spill] sm:$0xff] %v8440_v16  ;;  %12442 = vst [vmem:[#allocation67_spill] sm:$0xff] %v8444_v61  ;;  %v8448_v11 = vld [vmem:[#allocation5 + $0xd90] sm:$0xff]  ;;  %v8450_v22 = vld [vmem:[#allocation5 + $0xd98] sm:$0xff]  ;;  %v8478_v43 = vmul.f32 %v8430_v38, %v8402_v37  ;;  %v2566_v3 = vadd.f32 %v2565_v1, %v8294_v35  ;;  %v2581_v14 = vadd.f32 %v2580_v4, %v8298_v54 }
 0x30a   :  { %12443 = vst [vmem:[#allocation99_spill] sm:$0xff] %v8446_v28  ;;  %12444 = vst [vmem:[#allocation57_spill] sm:$0xff] %v8448_v11  ;;  %v8456_v33 = vld [vmem:[#allocation2 + $0xda0] sm:$0xff]  ;;  %v8458_v42 = vld [vmem:[#allocation2 + $0xda8] sm:$0xff]  ;;  %v2596_v57 = vadd.f32 %v2595_v8, %v8302_v12  ;;  %v2611_v38 = vadd.f32 %v2610_v25, %v8306_v21  ;;  %v8504_v24 = vmul.f32 %v8444_v61, %v8422_v0 }
 0x30b   :  { %12445 = vst [vmem:[#allocation46_spill] sm:$0xff] %v8450_v22  ;;  %12446 = vst [vmem:[#allocation29_spill] sm:$0xff] %v8456_v33  ;;  %v8460_v17 = vld [vmem:[#allocation2 + $0xdb0] sm:$0xff]  ;;  %v8462_v51 = vld [vmem:[#allocation2 + $0xdb8] sm:$0xff]  ;;  %v8508_v53 = vmul.f32 %v8446_v28, %v8424_v39  ;;  %v8512_v35 = vmul.f32 %v8448_v11, %v8440_v16  ;;  %v8516_v54 = vmul.f32 %v8450_v22, %v8442_v63 }
 0x30c   :  { %12447 = vst [vmem:[#allocation105_spill] sm:$0xff] %v8458_v42  ;;  %12448 = vst [vmem:[#allocation88_spill] sm:$0xff] %v8460_v17  ;;  %v8480_v32 = vld [vmem:[#allocation2 + $0xdc0] sm:$0xff]  ;;  %v8482_v7 = vld [vmem:[#allocation2 + $0xdc8] sm:$0xff]  ;;  %v2567_v22 = vadd.f32 %v2566_v3, %v8316_v20 }
 0x30d   :  { %12449 = vst [vmem:[#allocation123_spill] sm:$0xff] %v8462_v51  ;;  %12450 = vst [vmem:[#allocation30_spill] sm:$0xff] %v8480_v32  ;;  %v8484_v5 = vld [vmem:[#allocation2 + $0xdd0] sm:$0xff]  ;;  %v8486_v62 = vld [vmem:[#allocation2 + $0xdd8] sm:$0xff] }
 0x30e   :  { %12451 = vst [vmem:[#allocation92_spill] sm:$0xff] %v8482_v7  ;;  %12452 = vst [vmem:[#allocation89_spill] sm:$0xff] %v8484_v5  ;;  %v8488_v44 = vld [vmem:[#allocation5 + $0xda0] sm:$0xff]  ;;  %v8490_v19 = vld [vmem:[#allocation5 + $0xda8] sm:$0xff] }
 0x30f   :  { %12453 = vst [vmem:[#allocation108_spill] sm:$0xff] %v8486_v62  ;;  %12454 = vst [vmem:[#allocation16_spill] sm:$0xff] %v8488_v44  ;;  %v8496_v37 = vld [vmem:[#allocation5 + $0xdb0] sm:$0xff]  ;;  %v8498_v23 = vld [vmem:[#allocation5 + $0xdb8] sm:$0xff] }
 0x310   :  { %12455 = vst [vmem:[#allocation117_spill] sm:$0xff] %v8490_v19  ;;  %12456 = vst [vmem:[#allocation40_spill] sm:$0xff] %v8496_v37  ;;  %v8500_v47 = vld [vmem:[#allocation5 + $0xdc0] sm:$0xff]  ;;  %v12459_v12 = vld [vmem:[#allocation144_spill] sm:$0xff]  ;;  %v8552_v20 = vmul.f32 %v8496_v37, %v8460_v17 }
 0x311   :  { %12457 = vst [vmem:[#allocation116_spill] sm:$0xff] %v8498_v23  ;;  %12458 = vst [vmem:[#allocation32_spill] sm:$0xff] %v8500_v47  ;;  %v2318_v21 = vadd.f32 %v2317_v56, %v12459_v12  ;;  %v12460_v1 = vld [vmem:[#allocation147_spill] sm:$0xff]  ;;  %v12461_v8 = vld [vmem:[#allocation124_spill] sm:$0xff]  ;;  %v2582_v56 = vadd.f32 %v2581_v14, %v8320_v46  ;;  %v8566_v3 = vmul.f32 %v8500_v47, %v8480_v32 }
 0x312   :  { %v2333_v4 = vadd.f32 %v2332_v30, %v12460_v1  ;;  %v2348_v25 = vadd.f32 %v2347_v18, %v12461_v8  ;;  %v12462_v61 = vld [vmem:[#allocation138_spill] sm:$0xff]  ;;  %v8522_v27 = vld [vmem:[#allocation5 + $0xdc8] sm:$0xff]  ;;  %v8524_v28 = vld [vmem:[#allocation5 + $0xdd0] sm:$0xff]  ;;  %v2597_v30 = vadd.f32 %v2596_v57, %v8324_v55  ;;  %v2612_v18 = vadd.f32 %v2611_v38, %v8328_v26 }
 0x313   :  { %v2363_v0 = vadd.f32 %v2362_v15, %v12462_v61  ;;  %12463 = vst [vmem:[#allocation103_spill] sm:$0xff] %v8522_v27  ;;  %12464 = vst [vmem:[#allocation65_spill] sm:$0xff] %v8524_v28  ;;  %v8526_v39 = vld [vmem:[#allocation5 + $0xdd8] sm:$0xff]  ;;  %v8528_v11 = vld [vmem:[#allocation2 + $0xde0] sm:$0xff]  ;;  %v8544_v1 = vmul.f32 %v8488_v44, %v8456_v33  ;;  %v8548_v8 = vmul.f32 %v8490_v19, %v8458_v42 }
 0x314   :  { %12465 = vst [vmem:[#allocation45_spill] sm:$0xff] %v8526_v39  ;;  %12466 = vst [vmem:[#allocation60_spill] sm:$0xff] %v8528_v11  ;;  %v8530_v16 = vld [vmem:[#allocation2 + $0xde8] sm:$0xff]  ;;  %v8536_v12 = vld [vmem:[#allocation2 + $0xdf0] sm:$0xff]  ;;  %v8556_v26 = vmul.f32 %v8498_v23, %v8462_v51  ;;  %v8570_v14 = vmul.f32 %v8522_v27, %v8482_v7  ;;  %v8574_v57 = vmul.f32 %v8524_v28, %v8484_v5 }
 0x315   :  { %12467 = vst [vmem:[#allocation101_spill] sm:$0xff] %v8530_v16  ;;  %12468 = vst [vmem:[#allocation82_spill] sm:$0xff] %v8536_v12  ;;  %v8538_v15 = vld [vmem:[#allocation2 + $0xdf8] sm:$0xff]  ;;  %v8540_v61 = vld [vmem:[#allocation5 + $0xde0] sm:$0xff]  ;;  %v8578_v23 = vmul.f32 %v8526_v39, %v8486_v62  ;;  %v2568_v7 = vadd.f32 %v2567_v22, %v8364_v34  ;;  %v2583_v28 = vadd.f32 %v2582_v56, %v8368_v36 }
 0x316   :  { %12469 = vst [vmem:[#allocation93_spill] sm:$0xff] %v8538_v15  ;;  %12470 = vst [vmem:[#allocation11_spill] sm:$0xff] %v8540_v61  ;;  %v8558_v46 = vld [vmem:[#allocation5 + $0xde8] sm:$0xff]  ;;  %v8560_v55 = vld [vmem:[#allocation5 + $0xdf0] sm:$0xff]  ;;  %v2598_v5 = vadd.f32 %v2597_v30, %v8372_v48  ;;  %v2613_v39 = vadd.f32 %v2612_v18, %v8376_v49 }
 0x317   :  { %12471 = vst [vmem:[#allocation36_spill] sm:$0xff] %v8558_v46  ;;  %12472 = vst [vmem:[#allocation38_spill] sm:$0xff] %v8560_v55  ;;  %v8562_v38 = vld [vmem:[#allocation5 + $0xdf8] sm:$0xff]  ;;  %v12474_v51 = vld [vmem:[#allocation100_spill] sm:$0xff] }
 0x318   :  { %12473 = vst [vmem:[#allocation73_spill] sm:$0xff] %v8562_v38  ;;  %v8581_v37 = vadd.f32 %v2318_v21, %v12474_v51  ;;  %v12476_v17 = vld [vmem:[#allocation20_spill] sm:$0xff]  ;;  %v12478_v47 = vld [vmem:[#allocation143_spill] sm:$0xff]  ;;  %v12480_v42 = vld [vmem:[#allocation125_spill] sm:$0xff]  ;;  %v8598_v51 = vmul.f32 %v8540_v61, %v8528_v11  ;;  %v8610_v34 = vmul.f32 %v8562_v38, %v8538_v15 }
 0x319   :  { %v8584_v19 = vadd.f32 %v2333_v4, %v12476_v17  ;;  %v8587_v32 = vadd.f32 %v2348_v25, %v12478_v47  ;;  %v8590_v27 = vadd.f32 %v2363_v0, %v12480_v42  ;;  %v8602_v17 = vmul.f32 %v8558_v46, %v8530_v16  ;;  %v12486_v36 = vld [vmem:[#allocation111_spill] sm:$0xff]  ;;  %v12491_v4 = vld [vmem:[#allocation118_spill] sm:$0xff]  ;;  %v12492_v56 = vld [vmem:[#allocation145_spill] sm:$0xff] }
 0x31a   :  { %12475 = vst [vmem:[#allocation80_spill] sm:$0xff] %v8581_v37  ;;  %12482 = vst [vmem:[#allocation104_spill] sm:$0xff] %v8598_v51  ;;  %v8606_v47 = vmul.f32 %v8560_v55, %v8536_v12  ;;  %v12487_v48 = vld [vmem:[#allocation15_spill] sm:$0xff]  ;;  %v12493_v30 = vld [vmem:[#allocation50_spill] sm:$0xff] }
 0x31b   :  { %12477 = vst [vmem:[#allocation87_spill] sm:$0xff] %v8584_v19  ;;  %12479 = vst [vmem:[#allocation95_spill] sm:$0xff] %v8587_v32  ;;  %v2624_v0 = vadd.f32 %v12487_v48, %v12486_v36  ;;  %v12488_v49 = vld [vmem:[#allocation115_spill] sm:$0xff]  ;;  %v2627_v18 = vadd.f32 %v12493_v30, %v12492_v56  ;;  %v12495_v32 = vld [vmem:[#allocation134_spill] sm:$0xff] }
 0x31c   :  { %12481 = vst [vmem:[#allocation142_spill] sm:$0xff] %v8590_v27  ;;  %12483 = vst [vmem:[#allocation110_spill] sm:$0xff] %v8602_v17  ;;  %v12489_v22 = vld [vmem:[#allocation19_spill] sm:$0xff]  ;;  %v12496_v37 = vld [vmem:[#allocation22_spill] sm:$0xff] }
 0x31d   :  { %12484 = vst [vmem:[#allocation120_spill] sm:$0xff] %v8606_v47  ;;  %12485 = vst [vmem:[#allocation112_spill] sm:$0xff] %v8610_v34  ;;  %v2625_v42 = vadd.f32 %v12489_v22, %v12488_v49  ;;  %v12490_v21 = vld [vmem:[#allocation91_spill] sm:$0xff]  ;;  %v12497_v55 = vld [vmem:[#allocation54_spill] sm:$0xff]  ;;  %v2569_v49 = vadd.f32 %v2568_v7, %v8408_v50  ;;  %v2584_v22 = vadd.f32 %v2583_v28, %v8412_v13 }
 0x31e   :  { %v2626_v25 = vadd.f32 %v12491_v4, %v12490_v21  ;;  %v12494_v27 = vld [vmem:[#allocation127_spill] sm:$0xff]  ;;  %v2629_v12 = vadd.f32 %v12497_v55, %v12496_v37  ;;  %v12498_v38 = vld [vmem:[#allocation136_spill] sm:$0xff]  ;;  %v12500_v16 = vld [vmem:[#allocation106_spill] sm:$0xff]  ;;  %v2599_v21 = vadd.f32 %v2598_v5, %v8416_v31  ;;  %v2614_v4 = vadd.f32 %v2613_v39, %v8420_v41 }
 0x31f   :  { %v2628_v19 = vadd.f32 %v12495_v32, %v12494_v27  ;;  %v12499_v15 = vld [vmem:[#allocation35_spill] sm:$0xff]  ;;  %v12502_v56 = vld [vmem:[#allocation128_spill] sm:$0xff]  ;;  %v12503_v30 = vld [vmem:[#allocation150_spill] sm:$0xff] }
 0x320   :  { %v2630_v46 = vadd.f32 %v12499_v15, %v12498_v38  ;;  %v12501_v36 = vld [vmem:[#allocation135_spill] sm:$0xff]  ;;  %v2632_v27 = vadd.f32 %v12503_v30, %v12502_v56  ;;  %v12504_v32 = vld [vmem:[#allocation149_spill] sm:$0xff]  ;;  %v12505_v61 = vld [vmem:[#allocation98_spill] sm:$0xff] }
 0x321   :  { %v2631_v48 = vadd.f32 %v12501_v36, %v12500_v16  ;;  %v2633_v37 = vadd.f32 %v12505_v61, %v12504_v32  ;;  %v12506_v55 = vld [vmem:[#allocation113_spill] sm:$0xff]  ;;  %v12507_v11 = vld [vmem:[#allocation42_spill] sm:$0xff]  ;;  %v12508_v38 = vld [vmem:[#allocation12_spill] sm:$0xff] }
 0x322   :  { %v2634_v15 = vadd.f32 %v12507_v11, %v12506_v55  ;;  %v12509_v62 = vld [vmem:[#allocation27_spill] sm:$0xff]  ;;  %v12510_v36 = vld [vmem:[#allocation148_spill] sm:$0xff]  ;;  %v12511_v50 = vld [vmem:[#allocation13_spill] sm:$0xff] }
 0x323   :  { %v2635_v16 = vadd.f32 %v12509_v62, %v12508_v38  ;;  %v2636_v7 = vadd.f32 %v12511_v50, %v12510_v36  ;;  %v12512_v13 = vld [vmem:[#allocation39_spill] sm:$0xff]  ;;  %v12514_v5 = vld [vmem:[#allocation140_spill] sm:$0xff]  ;;  %v12515_v41 = vld [vmem:[#allocation26_spill] sm:$0xff] }
 0x324   :  { %v12513_v28 = vld [vmem:[#allocation131_spill] sm:$0xff]  ;;  %v2638_v39 = vadd.f32 %v12515_v41, %v12514_v5  ;;  %v12516_v44 = vld [vmem:[#allocation129_spill] sm:$0xff]  ;;  %v12519_v33 = vld [vmem:[#allocation56_spill] sm:$0xff]  ;;  %v2600_v5 = vadd.f32 %v2599_v21, %v8474_v40 }
 0x325   :  { %v2637_v31 = vadd.f32 %v12513_v28, %v12512_v13  ;;  %v12517_v56 = vld [vmem:[#allocation139_spill] sm:$0xff]  ;;  %v12518_v61 = vld [vmem:[#allocation141_spill] sm:$0xff]  ;;  %v12523_v47 = vld [vmem:[#allocation130_spill] sm:$0xff]  ;;  %v2570_v13 = vadd.f32 %v2569_v49, %v8466_v52  ;;  %v2585_v28 = vadd.f32 %v2584_v22, %v8470_v9 }
 0x326   :  { %v2639_v30 = vadd.f32 %v12517_v56, %v12516_v44  ;;  %v2640_v32 = vadd.f32 %v12518_v61, %v8098_v45  ;;  %v12520_v11 = vld [vmem:[#allocation69_spill] sm:$0xff]  ;;  %v12521_v34 = vld [vmem:[#allocation47_spill] sm:$0xff]  ;;  %v12524_v36 = vld [vmem:[#allocation132_spill] sm:$0xff]  ;;  %v2615_v44 = vadd.f32 %v2614_v4, %v8478_v43 }
 0x327   :  { %v2641_v55 = vadd.f32 %v12520_v11, %v12519_v33  ;;  %v12522_v62 = vld [vmem:[#allocation23_spill] sm:$0xff]  ;;  %v2643_v50 = vadd.f32 %v12524_v36, %v12523_v47  ;;  %v12526_v56 = vld [vmem:[#allocation18_spill] sm:$0xff]  ;;  %v12528_v11 = vld [vmem:[#allocation133_spill] sm:$0xff] }
 0x328   :  { %v2642_v38 = vadd.f32 %v12522_v62, %v12521_v34  ;;  %v12525_v41 = vld [vmem:[#allocation31_spill] sm:$0xff]  ;;  %v12529_v17 = vld [vmem:[#allocation24_spill] sm:$0xff]  ;;  %v12530_v62 = vld [vmem:[#allocation61_spill] sm:$0xff] }
 0x329   :  { %v2644_v45 = vadd.f32 %v12525_v41, %v8112_v10  ;;  %v12527_v61 = vld [vmem:[#allocation59_spill] sm:$0xff]  ;;  %v2646_v34 = vadd.f32 %v12529_v17, %v12528_v11  ;;  %v12531_v51 = vld [vmem:[#allocation17_spill] sm:$0xff]  ;;  %v12533_v52 = vld [vmem:[#allocation84_spill] sm:$0xff] }
 0x32a   :  { %v2645_v33 = vadd.f32 %v12527_v61, %v12526_v56  ;;  %v2647_v47 = vadd.f32 %v12531_v51, %v12530_v62  ;;  %v12532_v36 = vld [vmem:[#allocation49_spill] sm:$0xff]  ;;  %v12534_v9 = vld [vmem:[#allocation51_spill] sm:$0xff]  ;;  %v12536_v22 = vld [vmem:[#allocation102_spill] sm:$0xff] }
 0x32b   :  { %v8670_v49 = vadd.f32 %v12533_v52, %v12532_v36  ;;  %v8674_v40 = vadd.f32 %v12534_v9, %v8144_v29  ;;  %v12535_v43 = vld [vmem:[#allocation37_spill] sm:$0xff]  ;;  %v8682_v21 = vadd.f32 %v12536_v22, %v8148_v59  ;;  %v12537_v17 = vld [vmem:[#allocation96_spill] sm:$0xff]  ;;  %v12541_v61 = vld [vmem:[#allocation63_spill] sm:$0xff]  ;;  %v2571_v52 = vadd.f32 %v2570_v13, %v8504_v24 }
 0x32c   :  { %v8678_v10 = vadd.f32 %v12535_v43, %v8146_v2  ;;  %v8686_v4 = vadd.f32 %v12537_v17, %v8198_v60  ;;  %v12538_v51 = vld [vmem:[#allocation21_spill] sm:$0xff]  ;;  %v12542_v11 = vld [vmem:[#allocation43_spill] sm:$0xff]  ;;  %v12545_v36 = vld [vmem:[#allocation44_spill] sm:$0xff]  ;;  %v2586_v59 = vadd.f32 %v2585_v28, %v8508_v53  ;;  %v2601_v9 = vadd.f32 %v2600_v5, %v8512_v35 }
 0x32d   :  { %v12539_v41 = vld [vmem:[#allocation25_spill] sm:$0xff]  ;;  %v8694_v29 = vadd.f32 %v12542_v11, %v12541_v61  ;;  %v2616_v60 = vadd.f32 %v2615_v44, %v8516_v54  ;;  %v2688_v43 = vadd.f32 %v2628_v19, %v2624_v0  ;;  %v2703_v22 = vadd.f32 %v2629_v12, %v2625_v42  ;;  %v12548_v11 = vld [vmem:[#allocation62_spill] sm:$0xff]  ;;  %v12551_v24 = vld [vmem:[#allocation28_spill] sm:$0xff] }
 0x32e   :  { %v8690_v56 = vadd.f32 %v12539_v41, %v12538_v51  ;;  %v12544_v62 = vld [vmem:[#allocation33_spill] sm:$0xff]  ;;  %v2718_v17 = vadd.f32 %v2630_v46, %v2626_v25  ;;  %v2733_v51 = vadd.f32 %v2631_v48, %v2627_v18  ;;  %v12546_v41 = vld [vmem:[#allocation94_spill] sm:$0xff]  ;;  %v12553_v35 = vld [vmem:[#allocation55_spill] sm:$0xff]  ;;  %v2572_v0 = vadd.f32 %v2571_v52, %v8544_v1 }
 0x32f   :  { %12543 = vst [vmem:[#allocation144_spill] sm:$0xff] %v8694_v29  ;;  %v8698_v2 = vadd.f32 %v12545_v36, %v12544_v62  ;;  %v12549_v29 = vld [vmem:[#allocation41_spill] sm:$0xff]  ;;  %v12550_v36 = vld [vmem:[#allocation122_spill] sm:$0xff]  ;;  %v2689_v19 = vadd.f32 %v2688_v43, %v2632_v27  ;;  %v2704_v54 = vadd.f32 %v2703_v22, %v2633_v37  ;;  %v2587_v42 = vadd.f32 %v2586_v59, %v8548_v8  ;;  %v12557_v37 = vld [vmem:[#allocation72_spill] sm:$0xff] }
 0x330   :  { %12540 = vst [vmem:[#allocation85_spill] sm:$0xff] %v8690_v56  ;;  %v12547_v56 = vld [vmem:[#allocation74_spill] sm:$0xff]  ;;  %v8710_v62 = vadd.f32 %v12549_v29, %v12548_v11  ;;  %v8714_v13 = vadd.f32 %v12551_v24, %v12550_v36  ;;  %v12552_v53 = vld [vmem:[#allocation53_spill] sm:$0xff]  ;;  %v2719_v12 = vadd.f32 %v2718_v17, %v2634_v15  ;;  %v2734_v46 = vadd.f32 %v2733_v51, %v2635_v16  ;;  %v12558_v16 = vld [vmem:[#allocation64_spill] sm:$0xff] }
 0x331   :  { %v8706_v61 = vadd.f32 %v12547_v56, %v12546_v41  ;;  %v8718_v28 = vadd.f32 %v12553_v35, %v12552_v53  ;;  %v2602_v25 = vadd.f32 %v2601_v9, %v8552_v20  ;;  %v2617_v18 = vadd.f32 %v2616_v60, %v8556_v26  ;;  %v12554_v29 = vld [vmem:[#allocation78_spill] sm:$0xff]  ;;  %v12555_v41 = vld [vmem:[#allocation52_spill] sm:$0xff]  ;;  %v12556_v27 = vld [vmem:[#allocation77_spill] sm:$0xff] }
 0x332   :  { %v2690_v48 = vadd.f32 %v2689_v19, %v2636_v7  ;;  %v2705_v5 = vadd.f32 %v2704_v54, %v2637_v31  ;;  %v2720_v44 = vadd.f32 %v2719_v12, %v2638_v39  ;;  %v2735_v56 = vadd.f32 %v2734_v46, %v2639_v30  ;;  %v12559_v1 = vld [vmem:[#allocation83_spill] sm:$0xff]  ;;  %v12560_v8 = vld [vmem:[#allocation48_spill] sm:$0xff]  ;;  %v12561_v20 = vld [vmem:[#allocation58_spill] sm:$0xff] }
 0x333   :  { %v8726_v11 = vadd.f32 %v12555_v41, %v12554_v29  ;;  %v8730_v15 = vadd.f32 %v12557_v37, %v12556_v27  ;;  %v8734_v52 = vadd.f32 %v12559_v1, %v12558_v16  ;;  %v8738_v59 = vadd.f32 %v12561_v20, %v12560_v8  ;;  %v12562_v30 = vld [vmem:[#allocation114_spill] sm:$0xff]  ;;  %v12563_v60 = vld [vmem:[#allocation81_spill] sm:$0xff]  ;;  %v12566_v51 = vld [vmem:[#allocation119_spill] sm:$0xff] }
 0x334   :  { %v2691_v26 = vadd.f32 %v2690_v48, %v2640_v32  ;;  %v2706_v7 = vadd.f32 %v2705_v5, %v2641_v55  ;;  %v2721_v31 = vadd.f32 %v2720_v44, %v2642_v38  ;;  %v2736_v39 = vadd.f32 %v2735_v56, %v2643_v50  ;;  %v12564_v43 = vld [vmem:[#allocation90_spill] sm:$0xff]  ;;  %v12567_v24 = vld [vmem:[#allocation79_spill] sm:$0xff]  ;;  %v12568_v53 = vld [vmem:[#allocation97_spill] sm:$0xff] }
 0x335   :  { %v8742_v9 = vadd.f32 %v12562_v30, %v8348_v6  ;;  %v8746_v22 = vadd.f32 %v12564_v43, %v12563_v60  ;;  %v12565_v17 = vld [vmem:[#allocation66_spill] sm:$0xff]  ;;  %v8754_v35 = vadd.f32 %v12568_v53, %v12567_v24  ;;  %v2573_v32 = vadd.f32 %v2572_v0, %v8566_v3  ;;  %v12569_v46 = vld [vmem:[#allocation75_spill] sm:$0xff]  ;;  %v12570_v5 = vld [vmem:[#allocation109_spill] sm:$0xff] }
 0x336   :  { %v8750_v36 = vadd.f32 %v12566_v51, %v12565_v17  ;;  %v2588_v55 = vadd.f32 %v2587_v42, %v8570_v14  ;;  %v2603_v38 = vadd.f32 %v2602_v25, %v8574_v57  ;;  %v2618_v6 = vadd.f32 %v2617_v18, %v8578_v23  ;;  %v12571_v44 = vld [vmem:[#allocation86_spill] sm:$0xff]  ;;  %v12572_v29 = vld [vmem:[#allocation107_spill] sm:$0xff]  ;;  %v12573_v3 = vld [vmem:[#allocation68_spill] sm:$0xff] }
 0x337   :  { %v2692_v50 = vadd.f32 %v2691_v26, %v2644_v45  ;;  %v2707_v19 = vadd.f32 %v2706_v7, %v2645_v33  ;;  %v2722_v54 = vadd.f32 %v2721_v31, %v2646_v34  ;;  %v2737_v12 = vadd.f32 %v2736_v39, %v2647_v47  ;;  %v12575_v14 = vld [vmem:[#allocation14_spill] sm:$0xff]  ;;  %v12578_v23 = vld [vmem:[#allocation71_spill] sm:$0xff]  ;;  %v12584_v25 = vld [vmem:[#allocation76_spill] sm:$0xff] }
 0x338   :  { %v8762_v48 = vadd.f32 %v12569_v46, %v8392_v58  ;;  %v8766_v56 = vadd.f32 %v12571_v44, %v12570_v5  ;;  %v8770_v0 = vadd.f32 %v12573_v3, %v12572_v29  ;;  %v12576_v57 = vld [vmem:[#allocation34_spill] sm:$0xff]  ;;  %v12579_v45 = vld [vmem:[#allocation67_spill] sm:$0xff]  ;;  %v12585_v18 = vld [vmem:[#allocation57_spill] sm:$0xff] }
 0x339   :  { %v8774_v42 = vadd.f32 %v12576_v57, %v12575_v14  ;;  %v8778_v33 = vadd.f32 %v12579_v45, %v12578_v23  ;;  %v12581_v34 = vld [vmem:[#allocation70_spill] sm:$0xff]  ;;  %v12582_v47 = vld [vmem:[#allocation99_spill] sm:$0xff]  ;;  %v8786_v41 = vadd.f32 %v12585_v18, %v12584_v25  ;;  %v12589_v16 = vld [vmem:[#allocation104_spill] sm:$0xff]  ;;  %v2693_v30 = vadd.f32 %v2692_v50, %v8670_v49 }
 0x33a   :  { %12574 = vst [vmem:[#allocation147_spill] sm:$0xff] %v8770_v0  ;;  %v8782_v58 = vadd.f32 %v12582_v47, %v12581_v34  ;;  %v12587_v27 = vld [vmem:[#allocation46_spill] sm:$0xff]  ;;  %v2574_v1 = vadd.f32 %v2573_v32, %v12589_v16  ;;  %v12591_v26 = vld [vmem:[#allocation120_spill] sm:$0xff]  ;;  %v2708_v60 = vadd.f32 %v2707_v19, %v8674_v40  ;;  %v2723_v43 = vadd.f32 %v2722_v54, %v8678_v10  ;;  %v12593_v51 = vld [vmem:[#allocation29_spill] sm:$0xff] }
 0x33b   :  { %12577 = vst [vmem:[#allocation124_spill] sm:$0xff] %v8774_v42  ;;  %12580 = vst [vmem:[#allocation138_spill] sm:$0xff] %v8778_v33  ;;  %v8790_v37 = vadd.f32 %v12587_v27, %v8442_v63  ;;  %v12590_v8 = vld [vmem:[#allocation110_spill] sm:$0xff]  ;;  %v2604_v7 = vadd.f32 %v2603_v38, %v12591_v26  ;;  %v12592_v31 = vld [vmem:[#allocation112_spill] sm:$0xff]  ;;  %v2738_v17 = vadd.f32 %v2737_v12, %v8682_v21 }
 0x33c   :  { %12583 = vst [vmem:[#allocation100_spill] sm:$0xff] %v8782_v58  ;;  %12586 = vst [vmem:[#allocation20_spill] sm:$0xff] %v8786_v41  ;;  %v2589_v20 = vadd.f32 %v2588_v55, %v12590_v8  ;;  %v2619_v39 = vadd.f32 %v2618_v6, %v12592_v31  ;;  %v12594_v24 = vld [vmem:[#allocation16_spill] sm:$0xff]  ;;  %v12596_v53 = vld [vmem:[#allocation105_spill] sm:$0xff] }
 0x33d   :  { %12588 = vst [vmem:[#allocation143_spill] sm:$0xff] %v8790_v37  ;;  %v8802_v63 = vadd.f32 %v12594_v24, %v12593_v51  ;;  %v12597_v32 = vld [vmem:[#allocation117_spill] sm:$0xff]  ;;  %v12599_v55 = vld [vmem:[#allocation88_spill] sm:$0xff]  ;;  %v12602_v6 = vld [vmem:[#allocation123_spill] sm:$0xff] }
 0x33e   :  { %v8806_v46 = vadd.f32 %v12597_v32, %v12596_v53  ;;  %v12600_v38 = vld [vmem:[#allocation40_spill] sm:$0xff]  ;;  %v8816_v40 = vld [vmem:[#allocation2 + $0xe00] sm:$0xff]  ;;  %v8820_v21 = vld [vmem:[#allocation2 + $0xe10] sm:$0xff] }
 0x33f   :  { %12595 = vst [vmem:[#allocation125_spill] sm:$0xff] %v8802_v63  ;;  %v8810_v5 = vadd.f32 %v12600_v38, %v12599_v55  ;;  %v12603_v49 = vld [vmem:[#allocation116_spill] sm:$0xff]  ;;  %12605 = vst [vmem:[#allocation19_spill] sm:$0xff] %v8816_v40  ;;  %v8822_v19 = vld [vmem:[#allocation2 + $0xe18] sm:$0xff] }
 0x340   :  { %12598 = vst [vmem:[#allocation111_spill] sm:$0xff] %v8806_v46  ;;  %v8814_v50 = vadd.f32 %v12603_v49, %v12602_v6  ;;  %v8818_v10 = vld [vmem:[#allocation2 + $0xe08] sm:$0xff]  ;;  %12607 = vst [vmem:[#allocation118_spill] sm:$0xff] %v8820_v21  ;;  %v12609_v54 = vld [vmem:[#allocation30_spill] sm:$0xff] }
 0x341   :  { %12601 = vst [vmem:[#allocation15_spill] sm:$0xff] %v8810_v5  ;;  %12606 = vst [vmem:[#allocation91_spill] sm:$0xff] %v8818_v10  ;;  %v12610_v12 = vld [vmem:[#allocation32_spill] sm:$0xff]  ;;  %v12613_v3 = vld [vmem:[#allocation103_spill] sm:$0xff] }
 0x342   :  { %12604 = vst [vmem:[#allocation115_spill] sm:$0xff] %v8814_v50  ;;  %12608 = vst [vmem:[#allocation145_spill] sm:$0xff] %v8822_v19  ;;  %v8826_v44 = vadd.f32 %v12610_v12, %v12609_v54  ;;  %v12612_v29 = vld [vmem:[#allocation92_spill] sm:$0xff]  ;;  %v12615_v57 = vld [vmem:[#allocation89_spill] sm:$0xff] }
 0x343   :  { %v8830_v14 = vadd.f32 %v12613_v3, %v12612_v29  ;;  %v12616_v23 = vld [vmem:[#allocation65_spill] sm:$0xff]  ;;  %v12618_v34 = vld [vmem:[#allocation108_spill] sm:$0xff]  ;;  %v8840_v18 = vld [vmem:[#allocation2 + $0xe20] sm:$0xff]  ;;  %v2694_v3 = vadd.f32 %v2693_v30, %v8686_v4 }
 0x344   :  { %12611 = vst [vmem:[#allocation50_spill] sm:$0xff] %v8826_v44  ;;  %v8834_v45 = vadd.f32 %v12616_v23, %v12615_v57  ;;  %v12619_v47 = vld [vmem:[#allocation45_spill] sm:$0xff]  ;;  %12621 = vst [vmem:[#allocation54_spill] sm:$0xff] %v8840_v18  ;;  %v8842_v27 = vld [vmem:[#allocation2 + $0xe28] sm:$0xff] }
 0x345   :  { %12614 = vst [vmem:[#allocation127_spill] sm:$0xff] %v8830_v14  ;;  %v8838_v25 = vadd.f32 %v12619_v47, %v12618_v34  ;;  %12622 = vst [vmem:[#allocation136_spill] sm:$0xff] %v8842_v27  ;;  %v8844_v16 = vld [vmem:[#allocation2 + $0xe30] sm:$0xff]  ;;  %v8846_v8 = vld [vmem:[#allocation2 + $0xe38] sm:$0xff] }
 0x346   :  { %12617 = vst [vmem:[#allocation134_spill] sm:$0xff] %v8834_v45  ;;  %12623 = vst [vmem:[#allocation35_spill] sm:$0xff] %v8844_v16  ;;  %v8848_v26 = vld [vmem:[#allocation5 + $0xe00] sm:$0xff]  ;;  %v8850_v31 = vld [vmem:[#allocation5 + $0xe08] sm:$0xff] }
 0x347   :  { %12620 = vst [vmem:[#allocation22_spill] sm:$0xff] %v8838_v25  ;;  %12624 = vst [vmem:[#allocation106_spill] sm:$0xff] %v8846_v8  ;;  %v12627_v51 = vld [vmem:[#allocation121_spill] sm:$0xff]  ;;  %v12631_v55 = vld [vmem:[#allocation146_spill] sm:$0xff]  ;;  %v8938_v44 = vmul.f32 %v8850_v31, %v8818_v10 }
 0x348   :  { %12625 = vst [vmem:[#allocation135_spill] sm:$0xff] %v8848_v26  ;;  %12626 = vst [vmem:[#allocation128_spill] sm:$0xff] %v8850_v31  ;;  %v8853_v24 = vadd.f32 %v2574_v1, %v12627_v51  ;;  %v12629_v53 = vld [vmem:[#allocation137_spill] sm:$0xff]  ;;  %v8859_v38 = vadd.f32 %v2604_v7, %v12631_v55  ;;  %v12633_v6 = vld [vmem:[#allocation126_spill] sm:$0xff] }
 0x349   :  { %v8856_v32 = vadd.f32 %v2589_v20, %v12629_v53  ;;  %v8862_v49 = vadd.f32 %v2619_v39, %v12633_v6  ;;  %v8864_v54 = vld [vmem:[#allocation5 + $0xe10] sm:$0xff]  ;;  %v8866_v12 = vld [vmem:[#allocation5 + $0xe18] sm:$0xff]  ;;  %v8868_v29 = vld [vmem:[#allocation5 + $0xe20] sm:$0xff]  ;;  %v2739_v20 = vadd.f32 %v2738_v17, %v8698_v2 }
 0x34a   :  { %12628 = vst [vmem:[#allocation150_spill] sm:$0xff] %v8853_v24  ;;  %12632 = vst [vmem:[#allocation98_spill] sm:$0xff] %v8859_v38  ;;  %v12638_v57 = vld [vmem:[#allocation85_spill] sm:$0xff]  ;;  %v12639_v23 = vld [vmem:[#allocation144_spill] sm:$0xff]  ;;  %v8942_v50 = vmul.f32 %v8864_v54, %v8820_v21  ;;  %v8946_v5 = vmul.f32 %v8866_v12, %v8822_v19  ;;  %v2695_v19 = vadd.f32 %v2694_v3, %v8706_v61 }
 0x34b   :  { %12630 = vst [vmem:[#allocation149_spill] sm:$0xff] %v8856_v32  ;;  %12634 = vst [vmem:[#allocation113_spill] sm:$0xff] %v8862_v49  ;;  %v2709_v1 = vadd.f32 %v2708_v60, %v12638_v57  ;;  %v2724_v34 = vadd.f32 %v2723_v43, %v12639_v23  ;;  %v8874_v47 = vld [vmem:[#allocation2 + $0xe40] sm:$0xff]  ;;  %v8876_v7 = vld [vmem:[#allocation2 + $0xe48] sm:$0xff] }
 0x34c   :  { %12635 = vst [vmem:[#allocation42_spill] sm:$0xff] %v8864_v54  ;;  %12636 = vst [vmem:[#allocation12_spill] sm:$0xff] %v8866_v12  ;;  %v8878_v39 = vld [vmem:[#allocation2 + $0xe50] sm:$0xff]  ;;  %v8880_v51 = vld [vmem:[#allocation2 + $0xe58] sm:$0xff] }
 0x34d   :  { %12637 = vst [vmem:[#allocation27_spill] sm:$0xff] %v8868_v29  ;;  %12640 = vst [vmem:[#allocation148_spill] sm:$0xff] %v8874_v47  ;;  %v8882_v53 = vld [vmem:[#allocation5 + $0xe28] sm:$0xff]  ;;  %v8884_v55 = vld [vmem:[#allocation5 + $0xe30] sm:$0xff]  ;;  %v2710_v21 = vadd.f32 %v2709_v1, %v8710_v62  ;;  %v2725_v10 = vadd.f32 %v2724_v34, %v8714_v13 }
 0x34e   :  { %12641 = vst [vmem:[#allocation13_spill] sm:$0xff] %v8876_v7  ;;  %12642 = vst [vmem:[#allocation39_spill] sm:$0xff] %v8878_v39  ;;  %v8886_v6 = vld [vmem:[#allocation5 + $0xe38] sm:$0xff]  ;;  %v12647_v4 = vld [vmem:[#allocation60_spill] sm:$0xff]  ;;  %v8960_v31 = vmul.f32 %v8882_v53, %v8842_v27  ;;  %v8964_v54 = vmul.f32 %v8884_v55, %v8844_v16 }
 0x34f   :  { %12643 = vst [vmem:[#allocation131_spill] sm:$0xff] %v8880_v51  ;;  %12644 = vst [vmem:[#allocation140_spill] sm:$0xff] %v8882_v53  ;;  %v12648_v30 = vld [vmem:[#allocation11_spill] sm:$0xff]  ;;  %v12650_v43 = vld [vmem:[#allocation101_spill] sm:$0xff]  ;;  %v8968_v12 = vmul.f32 %v8886_v6, %v8846_v8 }
 0x350   :  { %12645 = vst [vmem:[#allocation26_spill] sm:$0xff] %v8884_v55  ;;  %12646 = vst [vmem:[#allocation129_spill] sm:$0xff] %v8886_v6  ;;  %v8890_v60 = vadd.f32 %v12648_v30, %v12647_v4  ;;  %v12651_v2 = vld [vmem:[#allocation36_spill] sm:$0xff]  ;;  %v12653_v57 = vld [vmem:[#allocation82_spill] sm:$0xff] }
 0x351   :  { %v8894_v17 = vadd.f32 %v12651_v2, %v12650_v43  ;;  %v12654_v23 = vld [vmem:[#allocation38_spill] sm:$0xff]  ;;  %v12656_v38 = vld [vmem:[#allocation93_spill] sm:$0xff]  ;;  %v8904_v25 = vld [vmem:[#allocation2 + $0xe60] sm:$0xff] }
 0x352   :  { %12649 = vst [vmem:[#allocation139_spill] sm:$0xff] %v8890_v60  ;;  %v8898_v49 = vadd.f32 %v12654_v23, %v12653_v57  ;;  %v12657_v32 = vld [vmem:[#allocation73_spill] sm:$0xff]  ;;  %12659 = vst [vmem:[#allocation47_spill] sm:$0xff] %v8904_v25  ;;  %v8906_v45 = vld [vmem:[#allocation2 + $0xe68] sm:$0xff]  ;;  %v8934_v60 = vmul.f32 %v8848_v26, %v8816_v40  ;;  %v8956_v26 = vmul.f32 %v8868_v29, %v8840_v18 }
 0x353   :  { %12652 = vst [vmem:[#allocation141_spill] sm:$0xff] %v8894_v17  ;;  %v8902_v24 = vadd.f32 %v12657_v32, %v12656_v38  ;;  %12660 = vst [vmem:[#allocation23_spill] sm:$0xff] %v8906_v45  ;;  %v8908_v14 = vld [vmem:[#allocation2 + $0xe70] sm:$0xff]  ;;  %v8910_v4 = vld [vmem:[#allocation2 + $0xe78] sm:$0xff]  ;;  %v2740_v29 = vadd.f32 %v2739_v20, %v8718_v28 }
 0x354   :  { %12655 = vst [vmem:[#allocation56_spill] sm:$0xff] %v8898_v49  ;;  %12661 = vst [vmem:[#allocation130_spill] sm:$0xff] %v8908_v14  ;;  %v8912_v30 = vld [vmem:[#allocation5 + $0xe40] sm:$0xff]  ;;  %v8914_v43 = vld [vmem:[#allocation5 + $0xe48] sm:$0xff] }
 0x355   :  { %12658 = vst [vmem:[#allocation69_spill] sm:$0xff] %v8902_v24  ;;  %12662 = vst [vmem:[#allocation132_spill] sm:$0xff] %v8910_v4  ;;  %v8916_v2 = vld [vmem:[#allocation5 + $0xe50] sm:$0xff]  ;;  %v8918_v57 = vld [vmem:[#allocation2 + $0xe80] sm:$0xff]  ;;  %v9004_v20 = vmul.f32 %v8912_v30, %v8874_v47  ;;  %v9008_v40 = vmul.f32 %v8914_v43, %v8876_v7 }
 0x356   :  { %12663 = vst [vmem:[#allocation31_spill] sm:$0xff] %v8912_v30  ;;  %12664 = vst [vmem:[#allocation18_spill] sm:$0xff] %v8914_v43  ;;  %v8920_v23 = vld [vmem:[#allocation2 + $0xe88] sm:$0xff]  ;;  %v8922_v32 = vld [vmem:[#allocation2 + $0xe90] sm:$0xff]  ;;  %v9012_v41 = vmul.f32 %v8916_v2, %v8878_v39 }
 0x357   :  { %12665 = vst [vmem:[#allocation59_spill] sm:$0xff] %v8916_v2  ;;  %12666 = vst [vmem:[#allocation133_spill] sm:$0xff] %v8918_v57  ;;  %v8924_v38 = vld [vmem:[#allocation2 + $0xe98] sm:$0xff]  ;;  %v8928_v49 = vld [vmem:[#allocation5 + $0xe60] sm:$0xff] }
 0x358   :  { %12667 = vst [vmem:[#allocation24_spill] sm:$0xff] %v8920_v23  ;;  %12668 = vst [vmem:[#allocation61_spill] sm:$0xff] %v8922_v32  ;;  %v8926_v24 = vld [vmem:[#allocation5 + $0xe58] sm:$0xff]  ;;  %v8930_v17 = vld [vmem:[#allocation5 + $0xe68] sm:$0xff]  ;;  %v9034_v2 = vmul.f32 %v8928_v49, %v8904_v25 }
 0x359   :  { %12669 = vst [vmem:[#allocation17_spill] sm:$0xff] %v8924_v38  ;;  %12670 = vst [vmem:[#allocation49_spill] sm:$0xff] %v8926_v24  ;;  %v8948_v46 = vld [vmem:[#allocation5 + $0xe70] sm:$0xff]  ;;  %v8950_v63 = vld [vmem:[#allocation5 + $0xe78] sm:$0xff]  ;;  %v9016_v58 = vmul.f32 %v8926_v24, %v8880_v51  ;;  %v9038_v24 = vmul.f32 %v8930_v17, %v8906_v45  ;;  %v2726_v45 = vadd.f32 %v2725_v10, %v8734_v52 }
 0x35a   :  { %12671 = vst [vmem:[#allocation84_spill] sm:$0xff] %v8928_v49  ;;  %12672 = vst [vmem:[#allocation51_spill] sm:$0xff] %v8930_v17  ;;  %v8952_v37 = vld [vmem:[#allocation5 + $0xe80] sm:$0xff]  ;;  %v8976_v53 = vld [vmem:[#allocation2 + $0xea8] sm:$0xff]  ;;  %v9042_v51 = vmul.f32 %v8948_v46, %v8908_v14  ;;  %v9046_v39 = vmul.f32 %v8950_v63, %v8910_v4  ;;  %v2696_v4 = vadd.f32 %v2695_v19, %v8726_v11 }
 0x35b   :  { %12673 = vst [vmem:[#allocation37_spill] sm:$0xff] %v8948_v46  ;;  %12674 = vst [vmem:[#allocation102_spill] sm:$0xff] %v8950_v63  ;;  %v8974_v18 = vld [vmem:[#allocation2 + $0xea0] sm:$0xff]  ;;  %v8978_v27 = vld [vmem:[#allocation2 + $0xeb0] sm:$0xff]  ;;  %v9056_v49 = vmul.f32 %v8952_v37, %v8918_v57  ;;  %v2711_v14 = vadd.f32 %v2710_v21, %v8730_v15 }
 0x35c   :  { %12675 = vst [vmem:[#allocation96_spill] sm:$0xff] %v8952_v37  ;;  %12676 = vst [vmem:[#allocation21_spill] sm:$0xff] %v8976_v53  ;;  %v8980_v55 = vld [vmem:[#allocation2 + $0xeb8] sm:$0xff]  ;;  %v8982_v16 = vld [vmem:[#allocation5 + $0xe88] sm:$0xff]  ;;  %v2741_v37 = vadd.f32 %v2740_v29, %v8738_v59 }
 0x35d   :  { %12677 = vst [vmem:[#allocation25_spill] sm:$0xff] %v8978_v27  ;;  %12678 = vst [vmem:[#allocation63_spill] sm:$0xff] %v8980_v55  ;;  %v8984_v6 = vld [vmem:[#allocation5 + $0xe90] sm:$0xff]  ;;  %v8986_v8 = vld [vmem:[#allocation5 + $0xe98] sm:$0xff]  ;;  %v9060_v17 = vmul.f32 %v8982_v16, %v8920_v23 }
 0x35e   :  { %12679 = vst [vmem:[#allocation43_spill] sm:$0xff] %v8982_v16  ;;  %12680 = vst [vmem:[#allocation33_spill] sm:$0xff] %v8984_v6  ;;  %v8988_v61 = vld [vmem:[#allocation2 + $0xec0] sm:$0xff]  ;;  %v8990_v62 = vld [vmem:[#allocation2 + $0xec8] sm:$0xff]  ;;  %v9064_v46 = vmul.f32 %v8984_v6, %v8922_v32  ;;  %v9068_v63 = vmul.f32 %v8986_v8, %v8924_v38 }
 0x35f   :  { %12681 = vst [vmem:[#allocation44_spill] sm:$0xff] %v8986_v8  ;;  %12682 = vst [vmem:[#allocation94_spill] sm:$0xff] %v8990_v62  ;;  %v8992_v13 = vld [vmem:[#allocation2 + $0xed0] sm:$0xff]  ;;  %v8994_v28 = vld [vmem:[#allocation2 + $0xed8] sm:$0xff] }
 0x360   :  { %12683 = vst [vmem:[#allocation74_spill] sm:$0xff] %v8992_v13  ;;  %12684 = vst [vmem:[#allocation62_spill] sm:$0xff] %v8994_v28  ;;  %v8996_v3 = vld [vmem:[#allocation5 + $0xea0] sm:$0xff]  ;;  %v8998_v1 = vld [vmem:[#allocation5 + $0xea8] sm:$0xff] }
 0x361   :  { %12685 = vst [vmem:[#allocation41_spill] sm:$0xff] %v8996_v3  ;;  %12686 = vst [vmem:[#allocation122_spill] sm:$0xff] %v8998_v1  ;;  %v9000_v34 = vld [vmem:[#allocation5 + $0xeb0] sm:$0xff]  ;;  %v9018_v33 = vld [vmem:[#allocation2 + $0xee0] sm:$0xff]  ;;  %v9102_v19 = vmul.f32 %v8996_v3, %v8974_v18  ;;  %v9106_v29 = vmul.f32 %v8998_v1, %v8976_v53 }
 0x362   :  { %12687 = vst [vmem:[#allocation28_spill] sm:$0xff] %v9000_v34  ;;  %12688 = vst [vmem:[#allocation53_spill] sm:$0xff] %v9008_v40  ;;  %v9020_v42 = vld [vmem:[#allocation2 + $0xee8] sm:$0xff]  ;;  %v9022_v0 = vld [vmem:[#allocation2 + $0xef0] sm:$0xff]  ;;  %v9110_v25 = vmul.f32 %v9000_v34, %v8978_v27 }
 0x363   :  { %12689 = vst [vmem:[#allocation55_spill] sm:$0xff] %v9012_v41  ;;  %12690 = vst [vmem:[#allocation78_spill] sm:$0xff] %v9016_v58  ;;  %v9024_v30 = vld [vmem:[#allocation2 + $0xef8] sm:$0xff]  ;;  %v9028_v43 = vld [vmem:[#allocation5 + $0xec0] sm:$0xff] }
 0x364   :  { %12691 = vst [vmem:[#allocation52_spill] sm:$0xff] %v9018_v33  ;;  %v9026_v47 = vld [vmem:[#allocation5 + $0xeb8] sm:$0xff]  ;;  %12693 = vst [vmem:[#allocation72_spill] sm:$0xff] %v9028_v43  ;;  %v9030_v7 = vld [vmem:[#allocation5 + $0xec8] sm:$0xff]  ;;  %v9124_v3 = vmul.f32 %v9028_v43, %v8988_v61 }
 0x365   :  { %12692 = vst [vmem:[#allocation77_spill] sm:$0xff] %v9026_v47  ;;  %12694 = vst [vmem:[#allocation64_spill] sm:$0xff] %v9030_v7  ;;  %v9048_v58 = vld [vmem:[#allocation5 + $0xed0] sm:$0xff]  ;;  %v9050_v41 = vld [vmem:[#allocation5 + $0xed8] sm:$0xff]  ;;  %v9128_v1 = vmul.f32 %v9030_v7, %v8990_v62  ;;  %v2727_v62 = vadd.f32 %v2726_v45, %v8750_v36 }
 0x366   :  { %12695 = vst [vmem:[#allocation83_spill] sm:$0xff] %v9048_v58  ;;  %12696 = vst [vmem:[#allocation48_spill] sm:$0xff] %v9050_v41  ;;  %v9052_v40 = vld [vmem:[#allocation5 + $0xee0] sm:$0xff]  ;;  %v9076_v16 = vld [vmem:[#allocation2 + $0xf08] sm:$0xff]  ;;  %v9132_v34 = vmul.f32 %v9048_v58, %v8992_v13  ;;  %v2712_v13 = vadd.f32 %v2711_v14, %v8746_v22 }
 0x367   :  { %12697 = vst [vmem:[#allocation58_spill] sm:$0xff] %v9052_v40  ;;  %12698 = vst [vmem:[#allocation114_spill] sm:$0xff] %v9056_v49  ;;  %v9074_v57 = vld [vmem:[#allocation2 + $0xf00] sm:$0xff]  ;;  %v9078_v23 = vld [vmem:[#allocation2 + $0xf10] sm:$0xff]  ;;  %v9146_v43 = vmul.f32 %v9052_v40, %v9018_v33  ;;  %v2742_v40 = vadd.f32 %v2741_v37, %v8754_v35 }
 0x368   :  { %12699 = vst [vmem:[#allocation81_spill] sm:$0xff] %v9060_v17  ;;  %12700 = vst [vmem:[#allocation90_spill] sm:$0xff] %v9064_v46  ;;  %v9080_v6 = vld [vmem:[#allocation2 + $0xf18] sm:$0xff]  ;;  %v9082_v32 = vld [vmem:[#allocation5 + $0xee8] sm:$0xff] }
 0x369   :  { %12701 = vst [vmem:[#allocation66_spill] sm:$0xff] %v9068_v63  ;;  %12702 = vst [vmem:[#allocation119_spill] sm:$0xff] %v9074_v57  ;;  %v9084_v8 = vld [vmem:[#allocation5 + $0xef0] sm:$0xff]  ;;  %v9086_v38 = vld [vmem:[#allocation5 + $0xef8] sm:$0xff]  ;;  %v9114_v63 = vmul.f32 %v9026_v47, %v8980_v55  ;;  %v9136_v47 = vmul.f32 %v9050_v41, %v8994_v28  ;;  %v9150_v7 = vmul.f32 %v9082_v32, %v9020_v42 }
 0x36a   :  { %12703 = vst [vmem:[#allocation79_spill] sm:$0xff] %v9076_v16  ;;  %12704 = vst [vmem:[#allocation97_spill] sm:$0xff] %v9078_v23  ;;  %v9088_v11 = vld [vmem:[#allocation2 + $0xf20] sm:$0xff]  ;;  %v9090_v15 = vld [vmem:[#allocation2 + $0xf28] sm:$0xff]  ;;  %v9154_v58 = vmul.f32 %v9084_v8, %v9022_v0  ;;  %v9158_v41 = vmul.f32 %v9086_v38, %v9024_v30  ;;  %v2697_v28 = vadd.f32 %v2696_v4, %v8742_v9 }
 0x36b   :  { %12705 = vst [vmem:[#allocation75_spill] sm:$0xff] %v9080_v6  ;;  %12706 = vst [vmem:[#allocation109_spill] sm:$0xff] %v9082_v32  ;;  %v9092_v52 = vld [vmem:[#allocation2 + $0xf30] sm:$0xff]  ;;  %v9094_v59 = vld [vmem:[#allocation2 + $0xf38] sm:$0xff] }
 0x36c   :  { %12707 = vst [vmem:[#allocation86_spill] sm:$0xff] %v9084_v8  ;;  %12708 = vst [vmem:[#allocation107_spill] sm:$0xff] %v9086_v38  ;;  %v9096_v10 = vld [vmem:[#allocation5 + $0xf00] sm:$0xff]  ;;  %v9098_v21 = vld [vmem:[#allocation5 + $0xf08] sm:$0xff] }
 0x36d   :  { %12709 = vst [vmem:[#allocation68_spill] sm:$0xff] %v9088_v11  ;;  %12710 = vst [vmem:[#allocation14_spill] sm:$0xff] %v9090_v15  ;;  %v9116_v46 = vld [vmem:[#allocation5 + $0xf10] sm:$0xff]  ;;  %v9118_v17 = vld [vmem:[#allocation5 + $0xf18] sm:$0xff]  ;;  %v9170_v8 = vmul.f32 %v9096_v10, %v9074_v57  ;;  %v9174_v38 = vmul.f32 %v9098_v21, %v9076_v16 }
 0x36e   :  { %12711 = vst [vmem:[#allocation34_spill] sm:$0xff] %v9092_v52  ;;  %12712 = vst [vmem:[#allocation71_spill] sm:$0xff] %v9094_v59  ;;  %v9120_v49 = vld [vmem:[#allocation5 + $0xf20] sm:$0xff]  ;;  %v9138_v55 = vld [vmem:[#allocation5 + $0xf28] sm:$0xff]  ;;  %v9178_v9 = vmul.f32 %v9116_v46, %v9078_v23  ;;  %v9182_v22 = vmul.f32 %v9118_v17, %v9080_v6 }
 0x36f   :  { %12713 = vst [vmem:[#allocation67_spill] sm:$0xff] %v9096_v10  ;;  %12714 = vst [vmem:[#allocation70_spill] sm:$0xff] %v9098_v21  ;;  %v9140_v27 = vld [vmem:[#allocation5 + $0xf30] sm:$0xff]  ;;  %v9142_v53 = vld [vmem:[#allocation5 + $0xf38] sm:$0xff]  ;;  %v9192_v14 = vmul.f32 %v9120_v49, %v9088_v11  ;;  %v9196_v45 = vmul.f32 %v9138_v55, %v9090_v15 }
 0x370   :  { %12715 = vst [vmem:[#allocation99_spill] sm:$0xff] %v9116_v46  ;;  %12716 = vst [vmem:[#allocation76_spill] sm:$0xff] %v9118_v17  ;;  %v9164_v33 = vld [vmem:[#allocation2 + $0xf40] sm:$0xff]  ;;  %v9166_v32 = vld [vmem:[#allocation2 + $0xf48] sm:$0xff]  ;;  %v9200_v4 = vmul.f32 %v9140_v27, %v9092_v52  ;;  %v9204_v17 = vmul.f32 %v9142_v53, %v9094_v59  ;;  %v2989_v52 = vadd.f32 %v8968_v12, %v8946_v5 }
 0x371   :  { %12717 = vst [vmem:[#allocation57_spill] sm:$0xff] %v9120_v49  ;;  %12718 = vst [vmem:[#allocation46_spill] sm:$0xff] %v9138_v55  ;;  %v9184_v36 = vld [vmem:[#allocation2 + $0xf50] sm:$0xff]  ;;  %v9186_v35 = vld [vmem:[#allocation2 + $0xf58] sm:$0xff]  ;;  %v2944_v49 = vadd.f32 %v8956_v26, %v8934_v60  ;;  %v2959_v55 = vadd.f32 %v8960_v31, %v8938_v44  ;;  %v2713_v59 = vadd.f32 %v2712_v13, %v8766_v56 }
 0x372   :  { %12719 = vst [vmem:[#allocation104_spill] sm:$0xff] %v9140_v27  ;;  %12720 = vst [vmem:[#allocation110_spill] sm:$0xff] %v9142_v53  ;;  %v9188_v37 = vld [vmem:[#allocation5 + $0xf40] sm:$0xff]  ;;  %v9206_v6 = vld [vmem:[#allocation5 + $0xf48] sm:$0xff]  ;;  %v2974_v27 = vadd.f32 %v8964_v54, %v8942_v50  ;;  %v2698_v53 = vadd.f32 %v2697_v28, %v8762_v48 }
 0x373   :  { %12721 = vst [vmem:[#allocation120_spill] sm:$0xff] %v9164_v33  ;;  %12722 = vst [vmem:[#allocation112_spill] sm:$0xff] %v9166_v32  ;;  %v9208_v46 = vld [vmem:[#allocation5 + $0xf50] sm:$0xff]  ;;  %v9210_v23 = vld [vmem:[#allocation5 + $0xf58] sm:$0xff]  ;;  %v2945_v44 = vadd.f32 %v2944_v49, %v9004_v20 }
 0x374   :  { %12723 = vst [vmem:[#allocation29_spill] sm:$0xff] %v9184_v36  ;;  %12724 = vst [vmem:[#allocation16_spill] sm:$0xff] %v9186_v35  ;;  %v12729_v15 = vld [vmem:[#allocation147_spill] sm:$0xff]  ;;  %v12730_v21 = vld [vmem:[#allocation124_spill] sm:$0xff]  ;;  %v9248_v49 = vmul.f32 %v9208_v46, %v9184_v36 }
 0x375   :  { %12725 = vst [vmem:[#allocation105_spill] sm:$0xff] %v9188_v37  ;;  %12726 = vst [vmem:[#allocation117_spill] sm:$0xff] %v9206_v6  ;;  %v2728_v11 = vadd.f32 %v2727_v62, %v12729_v15  ;;  %v2743_v16 = vadd.f32 %v2742_v40, %v12730_v21  ;;  %v9224_v10 = vld [vmem:[#allocation2 + $0xf60] sm:$0xff]  ;;  %v9226_v26 = vld [vmem:[#allocation2 + $0xf68] sm:$0xff]  ;;  %v9240_v40 = vmul.f32 %v9188_v37, %v9164_v33 }
 0x376   :  { %12727 = vst [vmem:[#allocation88_spill] sm:$0xff] %v9208_v46  ;;  %12728 = vst [vmem:[#allocation40_spill] sm:$0xff] %v9210_v23  ;;  %v12732_v31 = vld [vmem:[#allocation53_spill] sm:$0xff]  ;;  %v12733_v50 = vld [vmem:[#allocation55_spill] sm:$0xff]  ;;  %v9244_v62 = vmul.f32 %v9206_v6, %v9166_v32  ;;  %v2946_v28 = vadd.f32 %v2945_v44, %v9034_v2 }
 0x377   :  { %12731 = vst [vmem:[#allocation123_spill] sm:$0xff] %v9226_v26  ;;  %v2960_v60 = vadd.f32 %v2959_v55, %v12732_v31  ;;  %v2975_v54 = vadd.f32 %v2974_v27, %v12733_v50  ;;  %v12734_v57 = vld [vmem:[#allocation78_spill] sm:$0xff]  ;;  %v9232_v12 = vld [vmem:[#allocation2 + $0xf70] sm:$0xff]  ;;  %v9236_v56 = vld [vmem:[#allocation5 + $0xf60] sm:$0xff]  ;;  %v9252_v27 = vmul.f32 %v9210_v23, %v9186_v35 }
 0x378   :  { %v2990_v5 = vadd.f32 %v2989_v52, %v12734_v57  ;;  %12735 = vst [vmem:[#allocation116_spill] sm:$0xff] %v9232_v12  ;;  %v9234_v48 = vld [vmem:[#allocation2 + $0xf78] sm:$0xff]  ;;  %12737 = vst [vmem:[#allocation32_spill] sm:$0xff] %v9236_v56  ;;  %v9254_v55 = vld [vmem:[#allocation5 + $0xf68] sm:$0xff] }
 0x379   :  { %12736 = vst [vmem:[#allocation30_spill] sm:$0xff] %v9234_v48  ;;  %12738 = vst [vmem:[#allocation92_spill] sm:$0xff] %v9254_v55  ;;  %v9256_v57 = vld [vmem:[#allocation5 + $0xf70] sm:$0xff]  ;;  %v9258_v13 = vld [vmem:[#allocation5 + $0xf78] sm:$0xff]  ;;  %v2961_v20 = vadd.f32 %v2960_v60, %v9038_v24  ;;  %v2976_v15 = vadd.f32 %v2975_v54, %v9042_v51 }
 0x37a   :  { %12739 = vst [vmem:[#allocation103_spill] sm:$0xff] %v9256_v57  ;;  %12740 = vst [vmem:[#allocation89_spill] sm:$0xff] %v9258_v13  ;;  %v2991_v52 = vadd.f32 %v2990_v5, %v9046_v39  ;;  %v12741_v21 = vld [vmem:[#allocation138_spill] sm:$0xff]  ;;  %v12742_v50 = vld [vmem:[#allocation100_spill] sm:$0xff] }
 0x37b   :  { %v2699_v31 = vadd.f32 %v2698_v53, %v12741_v21  ;;  %v2714_v46 = vadd.f32 %v2713_v59, %v12742_v50  ;;  %v12743_v23 = vld [vmem:[#allocation20_spill] sm:$0xff]  ;;  %v12744_v36 = vld [vmem:[#allocation143_spill] sm:$0xff]  ;;  %v12745_v33 = vld [vmem:[#allocation114_spill] sm:$0xff] }
 0x37c   :  { %v2729_v35 = vadd.f32 %v2728_v11, %v12743_v23  ;;  %v2744_v6 = vadd.f32 %v2743_v16, %v12744_v36  ;;  %v9268_v32 = vld [vmem:[#allocation2 + $0xf80] sm:$0xff]  ;;  %v9270_v37 = vld [vmem:[#allocation2 + $0xf88] sm:$0xff]  ;;  %v2947_v2 = vadd.f32 %v2946_v28, %v12745_v33  ;;  %v12746_v44 = vld [vmem:[#allocation81_spill] sm:$0xff]  ;;  %v9284_v16 = vmul.f32 %v9236_v56, %v9224_v10 }
 0x37d   :  { %v2962_v24 = vadd.f32 %v2961_v20, %v12746_v44  ;;  %v12747_v60 = vld [vmem:[#allocation90_spill] sm:$0xff]  ;;  %v9276_v5 = vld [vmem:[#allocation2 + $0xf90] sm:$0xff]  ;;  %v9280_v59 = vld [vmem:[#allocation5 + $0xf80] sm:$0xff]  ;;  %v9288_v23 = vmul.f32 %v9254_v55, %v9226_v26  ;;  %v9292_v33 = vmul.f32 %v9256_v57, %v9232_v12  ;;  %v9296_v11 = vmul.f32 %v9258_v13, %v9234_v48 }
 0x37e   :  { %v2977_v51 = vadd.f32 %v2976_v15, %v12747_v60  ;;  %v12748_v54 = vld [vmem:[#allocation66_spill] sm:$0xff]  ;;  %12749 = vst [vmem:[#allocation65_spill] sm:$0xff] %v9276_v5  ;;  %v9298_v36 = vld [vmem:[#allocation5 + $0xf88] sm:$0xff]  ;;  %v9300_v28 = vld [vmem:[#allocation5 + $0xf90] sm:$0xff]  ;;  %v2948_v15 = vadd.f32 %v2947_v2, %v9102_v19 }
 0x37f   :  { %v2992_v39 = vadd.f32 %v2991_v52, %v12748_v54  ;;  %v9278_v53 = vld [vmem:[#allocation2 + $0xf98] sm:$0xff]  ;;  %12751 = vst [vmem:[#allocation45_spill] sm:$0xff] %v9300_v28  ;;  %v2963_v52 = vadd.f32 %v2962_v24, %v9106_v29  ;;  %v12753_v44 = vld [vmem:[#allocation125_spill] sm:$0xff]  ;;  %v12754_v54 = vld [vmem:[#allocation111_spill] sm:$0xff] }
 0x380   :  { %12750 = vst [vmem:[#allocation108_spill] sm:$0xff] %v9278_v53  ;;  %v9302_v20 = vld [vmem:[#allocation5 + $0xf98] sm:$0xff]  ;;  %v2978_v21 = vadd.f32 %v2977_v51, %v9110_v25  ;;  %v2700_v60 = vadd.f32 %v2699_v31, %v12753_v44  ;;  %v2715_v57 = vadd.f32 %v2714_v46, %v12754_v54  ;;  %v12755_v13 = vld [vmem:[#allocation15_spill] sm:$0xff]  ;;  %v9314_v56 = vld [vmem:[#allocation2 + $0xfa8] sm:$0xff]  ;;  %v2949_v19 = vadd.f32 %v2948_v15, %v9124_v3 }
 0x381   :  { %12752 = vst [vmem:[#allocation121_spill] sm:$0xff] %v9302_v20  ;;  %v2993_v50 = vadd.f32 %v2992_v39, %v9114_v63  ;;  %v2730_v48 = vadd.f32 %v2729_v35, %v12755_v13  ;;  %v12756_v12 = vld [vmem:[#allocation115_spill] sm:$0xff]  ;;  %v2964_v29 = vadd.f32 %v2963_v52, %v9128_v1  ;;  %v9320_v2 = vld [vmem:[#allocation2 + $0xfb0] sm:$0xff]  ;;  %v9322_v31 = vld [vmem:[#allocation2 + $0xfb8] sm:$0xff]  ;;  %v9332_v35 = vmul.f32 %v9298_v36, %v9270_v37 }
 0x382   :  { %v2745_v55 = vadd.f32 %v2744_v6, %v12756_v12  ;;  %v9312_v26 = vld [vmem:[#allocation2 + $0xfa0] sm:$0xff]  ;;  %v2979_v25 = vadd.f32 %v2978_v21, %v9132_v34  ;;  %12757 = vst [vmem:[#allocation137_spill] sm:$0xff] %v9320_v2  ;;  %12758 = vst [vmem:[#allocation146_spill] sm:$0xff] %v9322_v31  ;;  %v9328_v6 = vmul.f32 %v9280_v59, %v9268_v32  ;;  %v9342_v1 = vld [vmem:[#allocation5 + $0xfa8] sm:$0xff] }
 0x383   :  { %v2994_v63 = vadd.f32 %v2993_v50, %v9136_v47  ;;  %v9324_v46 = vld [vmem:[#allocation5 + $0xfa0] sm:$0xff]  ;;  %v9336_v3 = vmul.f32 %v9300_v28, %v9276_v5  ;;  %v9340_v47 = vmul.f32 %v9302_v20, %v9278_v53  ;;  %12759 = vst [vmem:[#allocation126_spill] sm:$0xff] %v9342_v1  ;;  %v9344_v34 = vld [vmem:[#allocation5 + $0xfb0] sm:$0xff]  ;;  %v9346_v12 = vld [vmem:[#allocation5 + $0xfb8] sm:$0xff]  ;;  %v2950_v13 = vadd.f32 %v2949_v19, %v9146_v43 }
 0x384   :  { %12760 = vst [vmem:[#allocation85_spill] sm:$0xff] %v9344_v34  ;;  %12761 = vst [vmem:[#allocation144_spill] sm:$0xff] %v9346_v12  ;;  %v2965_v24 = vadd.f32 %v2964_v29, %v9150_v7  ;;  %v2980_v51 = vadd.f32 %v2979_v25, %v9154_v58  ;;  %v12762_v15 = vld [vmem:[#allocation50_spill] sm:$0xff]  ;;  %v12763_v21 = vld [vmem:[#allocation127_spill] sm:$0xff] }
 0x385   :  { %v2995_v39 = vadd.f32 %v2994_v63, %v9158_v41  ;;  %v2701_v52 = vadd.f32 %v2700_v60, %v12762_v15  ;;  %v2716_v50 = vadd.f32 %v2715_v57, %v12763_v21  ;;  %v12764_v44 = vld [vmem:[#allocation134_spill] sm:$0xff]  ;;  %v9356_v28 = vld [vmem:[#allocation2 + $0xfc0] sm:$0xff]  ;;  %v9358_v5 = vld [vmem:[#allocation2 + $0xfc8] sm:$0xff]  ;;  %v2951_v43 = vadd.f32 %v2950_v13, %v9170_v8 }
 0x386   :  { %v2731_v54 = vadd.f32 %v2730_v48, %v12764_v44  ;;  %v12765_v20 = vld [vmem:[#allocation22_spill] sm:$0xff]  ;;  %v2966_v7 = vadd.f32 %v2965_v24, %v9174_v38  ;;  %v2981_v58 = vadd.f32 %v2980_v51, %v9178_v9  ;;  %v9364_v19 = vld [vmem:[#allocation2 + $0xfd0] sm:$0xff]  ;;  %v9368_v57 = vld [vmem:[#allocation5 + $0xfc0] sm:$0xff]  ;;  %v2932_v48 = vmul.f32 %v9324_v46, %v9312_v26 }
 0x387   :  { %v2746_v53 = vadd.f32 %v2745_v55, %v12765_v20  ;;  %v2996_v41 = vadd.f32 %v2995_v39, %v9182_v22  ;;  %v9366_v60 = vld [vmem:[#allocation2 + $0xfd8] sm:$0xff]  ;;  %v2933_v55 = vmul.f32 %v9342_v1, %v9314_v56  ;;  %v2934_v8 = vmul.f32 %v9344_v34, %v9320_v2  ;;  %v9378_v9 = vld [vmem:[#allocation2 + $0xfe0] sm:$0xff]  ;;  %v9380_v22 = vld [vmem:[#allocation2 + $0xfe8] sm:$0xff] }
 0x388   :  { %v2935_v38 = vmul.f32 %v9346_v12, %v9322_v31  ;;  %12766 = vst [vmem:[#allocation60_spill] sm:$0xff] %v9378_v9  ;;  %12767 = vst [vmem:[#allocation11_spill] sm:$0xff] %v9380_v22  ;;  %v9382_v20 = vld [vmem:[#allocation5 + $0xfc8] sm:$0xff]  ;;  %v9384_v29 = vld [vmem:[#allocation5 + $0xfd0] sm:$0xff]  ;;  %v2952_v63 = vadd.f32 %v2951_v43, %v9192_v14  ;;  %v2967_v13 = vadd.f32 %v2966_v7, %v9196_v45 }
 0x389   :  { %v9386_v25 = vld [vmem:[#allocation5 + $0xfd8] sm:$0xff]  ;;  %v2982_v24 = vadd.f32 %v2981_v58, %v9200_v4  ;;  %v2997_v51 = vadd.f32 %v2996_v41, %v9204_v17  ;;  %v12769_v39 = vld [vmem:[#allocation139_spill] sm:$0xff]  ;;  %v12771_v21 = vld [vmem:[#allocation141_spill] sm:$0xff]  ;;  %v2937_v43 = vmul.f32 %v9382_v20, %v9358_v5  ;;  %v2938_v7 = vmul.f32 %v9384_v29, %v9364_v19 }
 0x38a   :  { %12768 = vst [vmem:[#allocation101_spill] sm:$0xff] %v9386_v25  ;;  %v9393_v15 = vadd.f32 %v2701_v52, %v12769_v39  ;;  %v9396_v44 = vadd.f32 %v2716_v50, %v12771_v21  ;;  %v12773_v12 = vld [vmem:[#allocation56_spill] sm:$0xff]  ;;  %v12775_v34 = vld [vmem:[#allocation69_spill] sm:$0xff]  ;;  %v9406_v14 = vld [vmem:[#allocation2 + $0xff8] sm:$0xff]  ;;  %v2953_v50 = vadd.f32 %v2952_v63, %v9240_v40  ;;  %v2939_v58 = vmul.f32 %v9386_v25, %v9366_v60 }
 0x38b   :  { %v9399_v31 = vadd.f32 %v2731_v54, %v12773_v12  ;;  %v9402_v2 = vadd.f32 %v2746_v53, %v12775_v34  ;;  %v9404_v1 = vld [vmem:[#allocation2 + $0xff0] sm:$0xff]  ;;  %12778 = vst [vmem:[#allocation147_spill] sm:$0xff] %v9406_v14  ;;  %v9408_v45 = vld [vmem:[#allocation5 + $0xfe0] sm:$0xff]  ;;  %v9410_v4 = vld [vmem:[#allocation5 + $0xfe8] sm:$0xff]  ;;  %v2968_v12 = vadd.f32 %v2967_v13, %v9244_v62  ;;  %v2983_v54 = vadd.f32 %v2982_v24, %v9248_v49 }
 0x38c   :  { %12770 = vst [vmem:[#allocation36_spill] sm:$0xff] %v9393_v15  ;;  %12772 = vst [vmem:[#allocation82_spill] sm:$0xff] %v9396_v44  ;;  %v9412_v17 = vld [vmem:[#allocation5 + $0xff0] sm:$0xff]  ;;  %v9414_v52 = vld [vmem:[#allocation5 + $0xff8] sm:$0xff]  ;;  %v2998_v53 = vadd.f32 %v2997_v51, %v9252_v27  ;;  %v2936_v34 = vmul.f32 %v9368_v57, %v9356_v28  ;;  %v2954_v40 = vadd.f32 %v2953_v50, %v9284_v16 }
 0x38d   :  { %12774 = vst [vmem:[#allocation38_spill] sm:$0xff] %v9399_v31  ;;  %12776 = vst [vmem:[#allocation93_spill] sm:$0xff] %v9402_v2  ;;  %v2969_v62 = vadd.f32 %v2968_v12, %v9288_v23  ;;  %v2984_v49 = vadd.f32 %v2983_v54, %v9292_v33  ;;  %v2940_v41 = vmul.f32 %v9408_v45, %v9378_v9  ;;  %v12783_v51 = vld [vmem:[#allocation19_spill] sm:$0xff]  ;;  %v12786_v12 = vld [vmem:[#allocation128_spill] sm:$0xff] }
 0x38e   :  { %12777 = vst [vmem:[#allocation73_spill] sm:$0xff] %v9404_v1  ;;  %12779 = vst [vmem:[#allocation124_spill] sm:$0xff] %v9408_v45  ;;  %v2999_v27 = vadd.f32 %v2998_v53, %v9296_v11  ;;  %v2941_v63 = vmul.f32 %v9410_v4, %v9380_v22  ;;  %v2942_v13 = vmul.f32 %v9412_v17, %v9404_v1  ;;  %v12784_v39 = vld [vmem:[#allocation135_spill] sm:$0xff]  ;;  %v12787_v53 = vld [vmem:[#allocation118_spill] sm:$0xff] }
 0x38f   :  { %12780 = vst [vmem:[#allocation53_spill] sm:$0xff] %v9410_v4  ;;  %12781 = vst [vmem:[#allocation55_spill] sm:$0xff] %v9412_v17  ;;  %v2943_v24 = vmul.f32 %v9414_v52, %v9406_v14  ;;  %v2955_v16 = vadd.f32 %v2954_v40, %v9328_v6  ;;  %v2970_v23 = vadd.f32 %v2969_v62, %v9332_v35  ;;  %v12785_v50 = vld [vmem:[#allocation91_spill] sm:$0xff]  ;;  %v12788_v2 = vld [vmem:[#allocation42_spill] sm:$0xff] }
 0x390   :  { %12782 = vst [vmem:[#allocation78_spill] sm:$0xff] %v9414_v52  ;;  %v2985_v33 = vadd.f32 %v2984_v49, %v9336_v3  ;;  %v3000_v11 = vadd.f32 %v2999_v27, %v9340_v47  ;;  %v3008_v21 = vadd.f32 %v12784_v39, %v12783_v51  ;;  %v3009_v54 = vadd.f32 %v12786_v12, %v12785_v50  ;;  %v12789_v44 = vld [vmem:[#allocation145_spill] sm:$0xff]  ;;  %v12790_v15 = vld [vmem:[#allocation12_spill] sm:$0xff]  ;;  %v12791_v62 = vld [vmem:[#allocation54_spill] sm:$0xff] }
 0x391   :  { %v3010_v31 = vadd.f32 %v12788_v2, %v12787_v53  ;;  %v3011_v52 = vadd.f32 %v12790_v15, %v12789_v44  ;;  %v2956_v14 = vadd.f32 %v2955_v16, %v2932_v48  ;;  %v2971_v6 = vadd.f32 %v2970_v23, %v2933_v55  ;;  %v12792_v3 = vld [vmem:[#allocation27_spill] sm:$0xff]  ;;  %v12793_v47 = vld [vmem:[#allocation136_spill] sm:$0xff]  ;;  %v12796_v39 = vld [vmem:[#allocation26_spill] sm:$0xff] }
 0x392   :  { %v2986_v40 = vadd.f32 %v2985_v33, %v2934_v8  ;;  %v3001_v35 = vadd.f32 %v3000_v11, %v2935_v38  ;;  %v3012_v49 = vadd.f32 %v12792_v3, %v12791_v62  ;;  %v12794_v27 = vld [vmem:[#allocation140_spill] sm:$0xff]  ;;  %v12795_v51 = vld [vmem:[#allocation35_spill] sm:$0xff]  ;;  %v12797_v50 = vld [vmem:[#allocation106_spill] sm:$0xff] }
 0x393   :  { %v3013_v17 = vadd.f32 %v12794_v27, %v12793_v47  ;;  %v3014_v1 = vadd.f32 %v12796_v39, %v12795_v51  ;;  %v12798_v12 = vld [vmem:[#allocation129_spill] sm:$0xff]  ;;  %v2957_v2 = vadd.f32 %v2956_v14, %v2936_v34  ;;  %v2972_v53 = vadd.f32 %v2971_v6, %v2937_v43  ;;  %v12799_v48 = vld [vmem:[#allocation148_spill] sm:$0xff]  ;;  %v12800_v55 = vld [vmem:[#allocation31_spill] sm:$0xff] }
 0x394   :  { %v3015_v4 = vadd.f32 %v12798_v12, %v12797_v50  ;;  %v2987_v22 = vadd.f32 %v2986_v40, %v2938_v7  ;;  %v3002_v15 = vadd.f32 %v3001_v35, %v2939_v58  ;;  %v3016_v8 = vadd.f32 %v12800_v55, %v12799_v48  ;;  %v12801_v38 = vld [vmem:[#allocation13_spill] sm:$0xff]  ;;  %v12802_v44 = vld [vmem:[#allocation18_spill] sm:$0xff]  ;;  %v12803_v23 = vld [vmem:[#allocation39_spill] sm:$0xff] }
 0x395   :  { %v3017_v16 = vadd.f32 %v12802_v44, %v12801_v38  ;;  %v12804_v33 = vld [vmem:[#allocation59_spill] sm:$0xff]  ;;  %v12806_v3 = vld [vmem:[#allocation49_spill] sm:$0xff]  ;;  %v2958_v27 = vadd.f32 %v2957_v2, %v2940_v41  ;;  %v2973_v51 = vadd.f32 %v2972_v53, %v2941_v63  ;;  %v12808_v34 = vld [vmem:[#allocation84_spill] sm:$0xff] }
 0x396   :  { %v3018_v11 = vadd.f32 %v12804_v33, %v12803_v23  ;;  %v12805_v62 = vld [vmem:[#allocation131_spill] sm:$0xff]  ;;  %v2988_v39 = vadd.f32 %v2987_v22, %v2942_v13  ;;  %v3003_v50 = vadd.f32 %v3002_v15, %v2943_v24  ;;  %v12811_v40 = vld [vmem:[#allocation130_spill] sm:$0xff]  ;;  %v12812_v35 = vld [vmem:[#allocation37_spill] sm:$0xff] }
 0x397   :  { %v3019_v47 = vadd.f32 %v12806_v3, %v12805_v62  ;;  %v12807_v14 = vld [vmem:[#allocation47_spill] sm:$0xff]  ;;  %v3022_v12 = vadd.f32 %v12812_v35, %v12811_v40  ;;  %v12813_v48 = vld [vmem:[#allocation132_spill] sm:$0xff]  ;;  %v12814_v55 = vld [vmem:[#allocation102_spill] sm:$0xff] }
 0x398   :  { %v3020_v43 = vadd.f32 %v12808_v34, %v12807_v14  ;;  %v12809_v7 = vld [vmem:[#allocation23_spill] sm:$0xff]  ;;  %v3023_v38 = vadd.f32 %v12814_v55, %v12813_v48  ;;  %v12815_v44 = vld [vmem:[#allocation150_spill] sm:$0xff]  ;;  %v12816_v33 = vld [vmem:[#allocation149_spill] sm:$0xff]  ;;  %v3072_v55 = vadd.f32 %v3012_v49, %v3008_v21 }
 0x399   :  { %v12810_v58 = vld [vmem:[#allocation51_spill] sm:$0xff]  ;;  %v3004_v23 = vadd.f32 %v2958_v27, %v12815_v44  ;;  %v3005_v62 = vadd.f32 %v2973_v51, %v12816_v33  ;;  %v12817_v41 = vld [vmem:[#allocation98_spill] sm:$0xff]  ;;  %v12818_v22 = vld [vmem:[#allocation113_spill] sm:$0xff]  ;;  %v3087_v27 = vadd.f32 %v3013_v17, %v3009_v54  ;;  %v3102_v44 = vadd.f32 %v3014_v1, %v3010_v31 }
 0x39a   :  { %v3021_v6 = vadd.f32 %v12810_v58, %v12809_v7  ;;  %v3006_v63 = vadd.f32 %v2988_v39, %v12817_v41  ;;  %v3007_v13 = vadd.f32 %v3003_v50, %v12818_v22  ;;  %v12819_v24 = vld [vmem:[#allocation133_spill] sm:$0xff]  ;;  %v12820_v2 = vld [vmem:[#allocation96_spill] sm:$0xff]  ;;  %v12822_v3 = vld [vmem:[#allocation43_spill] sm:$0xff]  ;;  %v3117_v51 = vadd.f32 %v3015_v4, %v3011_v52 }
 0x39b   :  { %v3024_v53 = vadd.f32 %v12820_v2, %v12819_v24  ;;  %v12821_v15 = vld [vmem:[#allocation24_spill] sm:$0xff]  ;;  %v12823_v34 = vld [vmem:[#allocation61_spill] sm:$0xff]  ;;  %v3073_v33 = vadd.f32 %v3072_v55, %v3016_v8  ;;  %v3088_v39 = vadd.f32 %v3087_v27, %v3017_v16  ;;  %v3103_v41 = vadd.f32 %v3102_v44, %v3018_v11  ;;  %v12829_v45 = vld [vmem:[#allocation122_spill] sm:$0xff]  ;;  %3144 = vst [vmem:[#allocation7] sm:$0xff] %v3004_v23 }
 0x39c   :  { %v3025_v14 = vadd.f32 %v12822_v3, %v12821_v15  ;;  %v12824_v7 = vld [vmem:[#allocation33_spill] sm:$0xff]  ;;  %v12826_v35 = vld [vmem:[#allocation44_spill] sm:$0xff]  ;;  %v3118_v50 = vadd.f32 %v3117_v51, %v3019_v47  ;;  %3145 = vst [vmem:[#allocation7 + $0x8] sm:$0xff] %v3005_v62  ;;  %3146 = vst [vmem:[#allocation7 + $0x10] sm:$0xff] %v3006_v63 }
 0x39d   :  { %v3026_v58 = vadd.f32 %v12824_v7, %v12823_v34  ;;  %v12825_v40 = vld [vmem:[#allocation17_spill] sm:$0xff]  ;;  %v12831_v9 = vld [vmem:[#allocation28_spill] sm:$0xff]  ;;  %v12832_v7 = vld [vmem:[#allocation63_spill] sm:$0xff]  ;;  %3147 = vst [vmem:[#allocation7 + $0x18] sm:$0xff] %v3007_v13  ;;  %v3074_v31 = vadd.f32 %v3073_v33, %v3020_v43  ;;  %v3089_v1 = vadd.f32 %v3088_v39, %v3021_v6  ;;  %v3104_v4 = vadd.f32 %v3103_v41, %v3022_v12 }
 0x39e   :  { %v3027_v48 = vadd.f32 %v12826_v35, %v12825_v40  ;;  %v12827_v22 = vld [vmem:[#allocation41_spill] sm:$0xff]  ;;  %v3119_v17 = vadd.f32 %v3118_v50, %v3023_v38  ;;  %v12834_v52 = vld [vmem:[#allocation72_spill] sm:$0xff]  ;;  %v12835_v21 = vld [vmem:[#allocation94_spill] sm:$0xff] }
 0x39f   :  { %v3028_v24 = vadd.f32 %v12827_v22, %v8974_v18  ;;  %v12828_v2 = vld [vmem:[#allocation21_spill] sm:$0xff]  ;;  %v3032_v18 = vadd.f32 %v12834_v52, %v8988_v61  ;;  %v12836_v54 = vld [vmem:[#allocation64_spill] sm:$0xff]  ;;  %v12837_v49 = vld [vmem:[#allocation74_spill] sm:$0xff]  ;;  %v3075_v47 = vadd.f32 %v3074_v31, %v3024_v53  ;;  %v3090_v23 = vadd.f32 %v3089_v1, %v3025_v14 }
 0x3a0   :  { %v3029_v15 = vadd.f32 %v12829_v45, %v12828_v2  ;;  %v12830_v3 = vld [vmem:[#allocation25_spill] sm:$0xff]  ;;  %v3033_v45 = vadd.f32 %v12836_v54, %v12835_v21  ;;  %v12838_v8 = vld [vmem:[#allocation83_spill] sm:$0xff]  ;;  %v12839_v16 = vld [vmem:[#allocation62_spill] sm:$0xff]  ;;  %v3105_v62 = vadd.f32 %v3104_v4, %v3026_v58  ;;  %v3120_v63 = vadd.f32 %v3119_v17, %v3027_v48 }
 0x3a1   :  { %v3030_v34 = vadd.f32 %v12831_v9, %v12830_v3  ;;  %v12833_v25 = vld [vmem:[#allocation77_spill] sm:$0xff]  ;;  %v3034_v9 = vadd.f32 %v12838_v8, %v12837_v49  ;;  %v12840_v11 = vld [vmem:[#allocation48_spill] sm:$0xff]  ;;  %v12842_v6 = vld [vmem:[#allocation58_spill] sm:$0xff]  ;;  %v3076_v44 = vadd.f32 %v3075_v47, %v3028_v24 }
 0x3a2   :  { %v3031_v40 = vadd.f32 %v12833_v25, %v12832_v7  ;;  %v3035_v25 = vadd.f32 %v12840_v11, %v12839_v16  ;;  %v12841_v43 = vld [vmem:[#allocation52_spill] sm:$0xff]  ;;  %v12843_v38 = vld [vmem:[#allocation109_spill] sm:$0xff]  ;;  %v12844_v61 = vld [vmem:[#allocation86_spill] sm:$0xff]  ;;  %v3091_v51 = vadd.f32 %v3090_v23, %v3029_v15 }
 0x3a3   :  { %v3036_v12 = vadd.f32 %v12842_v6, %v12841_v43  ;;  %v3037_v13 = vadd.f32 %v12843_v38, %v9020_v42  ;;  %v3038_v35 = vadd.f32 %v12844_v61, %v9022_v0  ;;  %v12845_v55 = vld [vmem:[#allocation107_spill] sm:$0xff]  ;;  %v3106_v33 = vadd.f32 %v3105_v62, %v3030_v34  ;;  %v12849_v41 = vld [vmem:[#allocation70_spill] sm:$0xff]  ;;  %v12850_v22 = vld [vmem:[#allocation97_spill] sm:$0xff] }
 0x3a4   :  { %v3039_v27 = vadd.f32 %v12845_v55, %v9024_v30  ;;  %v3121_v39 = vadd.f32 %v3120_v63, %v3031_v40  ;;  %v12846_v53 = vld [vmem:[#allocation119_spill] sm:$0xff]  ;;  %v12853_v7 = vld [vmem:[#allocation76_spill] sm:$0xff]  ;;  %v3077_v0 = vadd.f32 %v3076_v44, %v3032_v18  ;;  %v3092_v1 = vadd.f32 %v3091_v51, %v3033_v45  ;;  %v12855_v15 = vld [vmem:[#allocation57_spill] sm:$0xff] }
 0x3a5   :  { %v12847_v14 = vld [vmem:[#allocation67_spill] sm:$0xff]  ;;  %v3107_v4 = vadd.f32 %v3106_v33, %v3034_v9  ;;  %v12854_v24 = vld [vmem:[#allocation68_spill] sm:$0xff]  ;;  %v12856_v40 = vld [vmem:[#allocation14_spill] sm:$0xff] }
 0x3a6   :  { %v3040_v58 = vadd.f32 %v12847_v14, %v12846_v53  ;;  %v12848_v48 = vld [vmem:[#allocation79_spill] sm:$0xff]  ;;  %v3122_v30 = vadd.f32 %v3121_v39, %v3035_v25  ;;  %v3044_v34 = vadd.f32 %v12855_v15, %v12854_v24  ;;  %v12857_v17 = vld [vmem:[#allocation46_spill] sm:$0xff]  ;;  %v12859_v54 = vld [vmem:[#allocation104_spill] sm:$0xff]  ;;  %v3078_v47 = vadd.f32 %v3077_v0, %v3036_v12 }
 0x3a7   :  { %v3041_v50 = vadd.f32 %v12849_v41, %v12848_v48  ;;  %v12851_v2 = vld [vmem:[#allocation99_spill] sm:$0xff]  ;;  %v3045_v52 = vadd.f32 %v12857_v17, %v12856_v40  ;;  %v12858_v21 = vld [vmem:[#allocation34_spill] sm:$0xff]  ;;  %v3093_v23 = vadd.f32 %v3092_v1, %v3037_v13  ;;  %v3108_v62 = vadd.f32 %v3107_v4, %v3038_v35  ;;  %v12862_v18 = vld [vmem:[#allocation120_spill] sm:$0xff] }
 0x3a8   :  { %v3042_v3 = vadd.f32 %v12851_v2, %v12850_v22  ;;  %v12852_v42 = vld [vmem:[#allocation75_spill] sm:$0xff]  ;;  %v3046_v49 = vadd.f32 %v12859_v54, %v12858_v21  ;;  %v12861_v16 = vld [vmem:[#allocation110_spill] sm:$0xff]  ;;  %v3123_v63 = vadd.f32 %v3122_v30, %v3039_v27  ;;  %v12863_v45 = vld [vmem:[#allocation105_spill] sm:$0xff]  ;;  %v3079_v39 = vadd.f32 %v3078_v47, %v3040_v58 }
 0x3a9   :  { %v3043_v31 = vadd.f32 %v12853_v7, %v12852_v42  ;;  %v12860_v8 = vld [vmem:[#allocation71_spill] sm:$0xff]  ;;  %v3048_v9 = vadd.f32 %v12863_v45, %v12862_v18  ;;  %v12864_v25 = vld [vmem:[#allocation112_spill] sm:$0xff]  ;;  %v12865_v43 = vld [vmem:[#allocation117_spill] sm:$0xff]  ;;  %v3094_v53 = vadd.f32 %v3093_v23, %v3041_v50  ;;  %v3056_v58 = vadd.f32 %v9280_v59, %v9268_v32 }
 0x3aa   :  { %v3047_v11 = vadd.f32 %v12861_v16, %v12860_v8  ;;  %v3049_v6 = vadd.f32 %v12865_v43, %v12864_v25  ;;  %v12866_v38 = vld [vmem:[#allocation29_spill] sm:$0xff]  ;;  %v12867_v61 = vld [vmem:[#allocation88_spill] sm:$0xff]  ;;  %v3109_v14 = vadd.f32 %v3108_v62, %v3042_v3  ;;  %v12871_v35 = vld [vmem:[#allocation123_spill] sm:$0xff]  ;;  %v3080_v4 = vadd.f32 %v3079_v39, %v3044_v34 }
 0x3ab   :  { %v3050_v55 = vadd.f32 %v12867_v61, %v12866_v38  ;;  %v12868_v44 = vld [vmem:[#allocation16_spill] sm:$0xff]  ;;  %v3124_v48 = vadd.f32 %v3123_v63, %v3043_v31  ;;  %v12874_v2 = vld [vmem:[#allocation103_spill] sm:$0xff]  ;;  %v12875_v7 = vld [vmem:[#allocation30_spill] sm:$0xff]  ;;  %v3095_v30 = vadd.f32 %v3094_v53, %v3045_v52  ;;  %v3057_v50 = vadd.f32 %v9298_v36, %v9270_v37 }
 0x3ac   :  { %v12869_v51 = vld [vmem:[#allocation40_spill] sm:$0xff]  ;;  %v12876_v0 = vld [vmem:[#allocation89_spill] sm:$0xff]  ;;  %v3110_v24 = vadd.f32 %v3109_v14, %v3046_v49  ;;  %v3081_v54 = vadd.f32 %v3080_v4, %v3048_v9  ;;  %v3060_v34 = vadd.f32 %v9324_v46, %v9312_v26  ;;  %v12881_v52 = vld [vmem:[#allocation126_spill] sm:$0xff]  ;;  %v3064_v9 = vadd.f32 %v9368_v57, %v9356_v28 }
 0x3ad   :  { %v3051_v33 = vadd.f32 %v12869_v51, %v12868_v44  ;;  %v12870_v12 = vld [vmem:[#allocation32_spill] sm:$0xff]  ;;  %v3055_v1 = vadd.f32 %v12876_v0, %v12875_v7  ;;  %v3125_v15 = vadd.f32 %v3124_v48, %v3047_v11  ;;  %v12878_v3 = vld [vmem:[#allocation45_spill] sm:$0xff]  ;;  %v3096_v8 = vadd.f32 %v3095_v30, %v3049_v6  ;;  %v12884_v37 = vld [vmem:[#allocation146_spill] sm:$0xff] }
 0x3ae   :  { %v3052_v13 = vadd.f32 %v12870_v12, %v9224_v10  ;;  %v12872_v27 = vld [vmem:[#allocation92_spill] sm:$0xff]  ;;  %v12877_v10 = vld [vmem:[#allocation65_spill] sm:$0xff]  ;;  %v3111_v16 = vadd.f32 %v3110_v24, %v3050_v55  ;;  %v3061_v49 = vadd.f32 %v12881_v52, %v9314_v56  ;;  %v3065_v25 = vadd.f32 %v9382_v20, %v9358_v5  ;;  %v12892_v57 = vld [vmem:[#allocation55_spill] sm:$0xff] }
 0x3af   :  { %v3053_v41 = vadd.f32 %v12872_v27, %v12871_v35  ;;  %v12873_v22 = vld [vmem:[#allocation116_spill] sm:$0xff]  ;;  %v3058_v31 = vadd.f32 %v12878_v3, %v12877_v10  ;;  %v12880_v17 = vld [vmem:[#allocation121_spill] sm:$0xff]  ;;  %v3126_v47 = vadd.f32 %v3125_v15, %v3051_v33  ;;  %v3066_v26 = vadd.f32 %v9384_v29, %v9364_v19  ;;  %v12889_v33 = vld [vmem:[#allocation11_spill] sm:$0xff] }
 0x3b0   :  { %v3054_v42 = vadd.f32 %v12874_v2, %v12873_v22  ;;  %v12879_v40 = vld [vmem:[#allocation108_spill] sm:$0xff]  ;;  %v12882_v32 = vld [vmem:[#allocation137_spill] sm:$0xff]  ;;  %v3082_v62 = vadd.f32 %v3081_v54, %v3052_v13  ;;  %v12893_v5 = vld [vmem:[#allocation147_spill] sm:$0xff] }
 0x3b1   :  { %v3059_v21 = vadd.f32 %v12880_v17, %v12879_v40  ;;  %v12883_v59 = vld [vmem:[#allocation85_spill] sm:$0xff]  ;;  %v12885_v36 = vld [vmem:[#allocation144_spill] sm:$0xff]  ;;  %v3097_v63 = vadd.f32 %v3096_v8, %v3053_v41  ;;  %v3127_v45 = vadd.f32 %v3126_v47, %v3055_v1  ;;  %v12894_v20 = vld [vmem:[#allocation78_spill] sm:$0xff] }
 0x3b2   :  { %v3062_v11 = vadd.f32 %v12883_v59, %v12882_v32  ;;  %v3063_v23 = vadd.f32 %v12885_v36, %v12884_v37  ;;  %v3112_v18 = vadd.f32 %v3111_v16, %v3054_v42  ;;  %v12886_v56 = vld [vmem:[#allocation101_spill] sm:$0xff]  ;;  %v3083_v43 = vadd.f32 %v3082_v62, %v3056_v58  ;;  %v12887_v55 = vld [vmem:[#allocation60_spill] sm:$0xff]  ;;  %v12897_v41 = vld [vmem:[#allocation87_spill] sm:$0xff] }
 0x3b3   :  { %v3067_v46 = vadd.f32 %v12886_v56, %v9366_v60  ;;  %v3098_v6 = vadd.f32 %v3097_v63, %v3057_v50  ;;  %v3128_v61 = vadd.f32 %v3127_v45, %v3059_v21  ;;  %v12888_v44 = vld [vmem:[#allocation124_spill] sm:$0xff]  ;;  %v12890_v39 = vld [vmem:[#allocation53_spill] sm:$0xff]  ;;  %v3071_v48 = vadd.f32 %v12894_v20, %v12893_v5  ;;  %v12898_v22 = vld [vmem:[#allocation82_spill] sm:$0xff] }
 0x3b4   :  { %v3113_v38 = vadd.f32 %v3112_v18, %v3058_v31  ;;  %v3068_v51 = vadd.f32 %v12888_v44, %v12887_v55  ;;  %v3069_v53 = vadd.f32 %v12890_v39, %v12889_v33  ;;  %v12891_v28 = vld [vmem:[#allocation73_spill] sm:$0xff]  ;;  %v3084_v19 = vadd.f32 %v3083_v43, %v3060_v34  ;;  %v12895_v13 = vld [vmem:[#allocation80_spill] sm:$0xff]  ;;  %v12899_v42 = vld [vmem:[#allocation95_spill] sm:$0xff] }
 0x3b5   :  { %v3070_v14 = vadd.f32 %v12892_v57, %v12891_v28  ;;  %v3099_v29 = vadd.f32 %v3098_v6, %v3061_v49  ;;  %v3129_v60 = vadd.f32 %v3128_v61, %v3063_v23  ;;  %v12896_v35 = vld [vmem:[#allocation36_spill] sm:$0xff]  ;;  %v2749_v2 = vadd.f32 %v12898_v22, %v12897_v41  ;;  %v12900_v7 = vld [vmem:[#allocation38_spill] sm:$0xff]  ;;  %v12902_v4 = vld [vmem:[#allocation93_spill] sm:$0xff] }
 0x3b6   :  { %v3114_v12 = vadd.f32 %v3113_v38, %v3062_v11  ;;  %v2748_v27 = vadd.f32 %v12896_v35, %v12895_v13  ;;  %v2750_v0 = vadd.f32 %v12900_v7, %v12899_v42  ;;  %v12901_v1 = vld [vmem:[#allocation142_spill] sm:$0xff]  ;;  %v3085_v24 = vadd.f32 %v3084_v19, %v3064_v9 }
 0x3b7   :  { %v2751_v30 = vadd.f32 %v12902_v4, %v12901_v1  ;;  %v3100_v15 = vadd.f32 %v3099_v29, %v3065_v25  ;;  %v3130_v50 = vadd.f32 %v3129_v60, %v3067_v46 }
 0x3b8   :  { %v3115_v58 = vadd.f32 %v3114_v12, %v3066_v26  ;;  %v3086_v10 = vadd.f32 %v3085_v24, %v3068_v51 }
 0x3b9   :  { %v3101_v3 = vadd.f32 %v3100_v15, %v3069_v53  ;;  %v3131_v40 = vadd.f32 %v3130_v50, %v3071_v48 }
 0x3ba   :  { %v3116_v31 = vadd.f32 %v3115_v58, %v3070_v14  ;;  %v3132_v17 = vadd.f32 %v3086_v10, %v2748_v27 }
 0x3bb   :  { %v3133_v21 = vadd.f32 %v3101_v3, %v2749_v2  ;;  %v3135_v8 = vadd.f32 %v3131_v40, %v2751_v30 }
 0x3bc   :  { %v3134_v54 = vadd.f32 %v3116_v31, %v2750_v0  ;;  %3157 = vst [vmem:[#allocation7 + $0x20] sm:$0xff] %v3132_v17 }
 0x3bd   :  { %3158 = vst [vmem:[#allocation7 + $0x28] sm:$0xff] %v3133_v21  ;;  %3160 = vst [vmem:[#allocation7 + $0x38] sm:$0xff] %v3135_v8 }
 0x3be   :  { %3159 = vst [vmem:[#allocation7 + $0x30] sm:$0xff] %v3134_v54 }
 0x3bf   :  { %3236 = shalt.err (!%p3233_p0)
}
 0x3c0   :  { %3172 = dma.vmem_to_hbm [thread:$0]  %s3167_s1, 1024, %s9592_s2, [#allocation4], %s3252_s12, %s3252_s12, %s3253_s13  }
 0x3c1   :  { %3249 = dma.done.wait [#allocation4], 1024  }
 0x3c2   :  { %3250 = vsyncadd [#allocation4], 4294966272 }
 0x3c3   :  { %3176 = vsyncpa [#allocation3], 1 }
 0x3c4   :  { %3177 = vsyncpa [#allocation6], 1 }
 0x3c5   :  { %3178 = vsyncpa [#allocation4], 1 }

</bundles_post_ra>
